<compile_context>
chip_gen: v5e
topology: v5e:2x2
jax: 0.10.0
libtpu: 0.0.40
codegen_flags: <defaults>
</compile_context>

<pallas_src>
import jax
import jax.numpy as jnp
from jax import lax
from jax.experimental import pallas as pl
from jax.experimental.pallas import tpu as pltpu

# ----------------------------- model hyperparams (small, TPU-friendly) ------
VOCAB_SIZE = 743
VOCAB_PAD = 768            # 6 * 128 -> lane-dense fc output
EMBED_DIM = 128
HIDDEN_DIM = 128
NUM_LAYERS = 2
BATCH = 8
SEQ = 8


# ----------------------------- fused forward kernel -------------------------
def fused_forward_kernel(emb_ref, h0_ref, c0_ref,
                         w_ih0_ref, w_hh0_ref, b0_ref,
                         w_cat1_ref, b1_ref,
                         w_fc_ref, b_fc_ref,
                         logits_ref, hN_ref, cN_ref,
                         xproj_sc, seq_sc):
    TB = emb_ref.shape[0]
    _, B, H = h0_ref.shape
    T = TB // B

    w_hh0 = w_hh0_ref[...]        # [H, 4H]  bf16
    w_cat1 = w_cat1_ref[...]      # [2H, 4H] bf16  ([W_hh1 ; W_ih1])
    b1 = b1_ref[...]              # [1, 4H]  f32

    # ---- layer 0: batched input projection for all time steps (one matmul) --
    xproj_sc[...] = (jnp.dot(emb_ref[...], w_ih0_ref[...],
                             preferred_element_type=jnp.float32)
                     + b0_ref[...])                       # [T*B, 4H] f32

    def _row_start(t):
        start = t * B
        if not isinstance(start, int):                    # traced loop index
            start = pl.multiple_of(start, B)
        return start

    def cell(gates, c_prev):
        # gate order (i, f, o, g): one wide sigmoid + one tanh per step
        sig = jax.nn.sigmoid(gates[:, :3 * H])
        i_g = sig[:, 0 * H:1 * H]
        f_g = sig[:, 1 * H:2 * H]
        o_g = sig[:, 2 * H:3 * H]
        g_g = jnp.tanh(gates[:, 3 * H:])
        c_new = f_g * c_prev + i_g * g_g
        h_new = o_g * jnp.tanh(c_new)
        return h_new, c_new

    def l0_step(t, h0, c0):
        start = _row_start(t)
        gates = (jnp.dot(h0.astype(jnp.bfloat16), w_hh0,
                         preferred_element_type=jnp.float32)
                 + xproj_sc[pl.ds(start, B), :])          # [B, 4H] f32
        return cell(gates, c0)

    def l1_step(t, h1, c1, h0_t):
        # fused K=256 matmul: [h1_{t-1} ; h0_t] @ [W_hh1 ; W_ih1]
        cat = jnp.concatenate([h1, h0_t], axis=-1).astype(jnp.bfloat16)
        gates = (jnp.dot(cat, w_cat1, preferred_element_type=jnp.float32)
                 + b1)                                    # [B, 4H] f32
        h_new, c_new = cell(gates, c1)
        seq_sc[pl.ds(_row_start(t), B), :] = h_new        # f32 -> unmasked vst
        return h_new, c_new

    # ---- prologue: layer-0, time 0 ------------------------------------------
    h0, c0 = l0_step(0, h0_ref[0], c0_ref[0])
    h1, c1 = h0_ref[1], c0_ref[1]

    # ---- wavefront: step s = layer-0 @ t=s  +  layer-1 @ t=s-1 ---------------
    def step(s, carry):
        h0_c, c0_c, h1_c, c1_c = carry
        h0_n, c0_n = l0_step(s, h0_c, c0_c)               # independent of ...
        h1_n, c1_n = l1_step(s - 1, h1_c, c1_c, h0_c)     # ... this -> MXU overlap
        return h0_n, c0_n, h1_n, c1_n

    h0, c0, h1, c1 = lax.fori_loop(1, T, step, (h0, c0, h1, c1), unroll=True)

    # ---- epilogue: layer-1, time T-1 -----------------------------------------
    h1, c1 = l1_step(T - 1, h1, c1, h0)

    # ---- final fc over all (t, b) rows at once (lane-dense padded vocab) ----
    logits_ref[...] = (jnp.dot(seq_sc[...].astype(jnp.bfloat16), w_fc_ref[...],
                               preferred_element_type=jnp.float32)
                       + b_fc_ref[...])                   # [T*B, VOCAB_PAD] f32

    # ---- final hidden/cell states, written once ------------------------------
    hN_ref[0] = h0
    hN_ref[1] = h1
    cN_ref[0] = c0
    cN_ref[1] = c1


# ----------------------------- parameters ------------------------------------
def _permute_gate_cols(w, H):
    """Reorder gate columns from torch (i, f, g, o) to kernel order (i, f, o, g)."""
    i = w[..., 0 * H:1 * H]
    f = w[..., 1 * H:2 * H]
    g = w[..., 2 * H:3 * H]
    o = w[..., 3 * H:4 * H]
    return jnp.concatenate([i, f, o, g], axis=-1)


def init_params(key):
    ks = jax.random.split(key, 9)
    H = HIDDEN_DIM
    k_hid = 1.0 / jnp.sqrt(H)

    params = {
        # torch.nn.Embedding default: N(0, 1); stored bf16 (MXU operand).
        "embedding": jax.random.normal(
            ks[0], (VOCAB_SIZE, EMBED_DIM), jnp.float32).astype(jnp.bfloat16),
    }

    # torch.nn.Linear(hidden, vocab): stored pre-transposed [H, V], padded to a
    # lane-dense [H, VOCAB_PAD] bf16; bias padded with zeros (f32).
    w_fc = jax.random.uniform(ks[1], (H, VOCAB_SIZE), jnp.float32, -k_hid, k_hid)
    b_fc = jax.random.uniform(ks[2], (1, VOCAB_SIZE), jnp.float32, -k_hid, k_hid)
    params["w_fc_t"] = jnp.pad(
        w_fc, ((0, 0), (0, VOCAB_PAD - VOCAB_SIZE))).astype(jnp.bfloat16)
    params["b_fc"] = jnp.pad(b_fc, ((0, 0), (0, VOCAB_PAD - VOCAB_SIZE)))

    def lstm_layer(kw_ih, kw_hh, kb, in_dim):
        # torch LSTM weights are [4H, in]; stored transposed ([in, 4H]).
        w_ih = jax.random.uniform(kw_ih, (in_dim, 4 * H), jnp.float32, -k_hid, k_hid)
        w_hh = jax.random.uniform(kw_hh, (H, 4 * H), jnp.float32, -k_hid, k_hid)
        # b_ih + b_hh pre-summed, kept 2D f32.
        b = jnp.sum(jax.random.uniform(kb, (2, 4 * H), jnp.float32, -k_hid, k_hid),
                    axis=0, keepdims=True)
        return (_permute_gate_cols(w_ih, H).astype(jnp.bfloat16),
                _permute_gate_cols(w_hh, H).astype(jnp.bfloat16),
                _permute_gate_cols(b, H))

    w_ih0, w_hh0, b0 = lstm_layer(ks[3], ks[4], ks[5], EMBED_DIM)
    w_ih1, w_hh1, b1 = lstm_layer(ks[6], ks[7], ks[8], HIDDEN_DIM)

    params["w_ih_0"] = w_ih0
    params["w_hh_0"] = w_hh0
    params["b_0"] = b0
    # Layer 1: stack [W_hh1 ; W_ih1] -> (2H, 4H) so the per-step projection is a
    # single K=256 matmul against concat([h1_{t-1}, h0_t]).
    params["w_cat_1"] = jnp.concatenate([w_hh1, w_ih1], axis=0)
    params["b_1"] = b1
    return params


# ----------------------------- forward pass ----------------------------------
@jax.jit
def lstm_model_forward(params, x_tokens, hidden):
    """x_tokens: [B, T] int32; hidden = (h0, c0) each [NUM_LAYERS, B, H]."""
    h0_all, c0_all = hidden
    B, T = x_tokens.shape

    # Time-major embedding gather: transpose the tiny int index array instead of
    # the [T*B, E] activation; table is bf16 so no extra cast op.
    tok_tm = jnp.transpose(x_tokens).reshape(-1)                  # [T*B] int32
    emb_tb = jnp.take(params["embedding"], tok_tm, axis=0)        # [T*B, E] bf16

    logits2d, h_n, c_n = pl.pallas_call(
        fused_forward_kernel,
        out_shape=(
            jax.ShapeDtypeStruct((T * B, VOCAB_PAD), jnp.float32),
            jax.ShapeDtypeStruct((NUM_LAYERS, B, HIDDEN_DIM), jnp.float32),
            jax.ShapeDtypeStruct((NUM_LAYERS, B, HIDDEN_DIM), jnp.float32),
        ),
        in_specs=[pl.BlockSpec(memory_space=pltpu.MemorySpace.VMEM)] * 10,
        out_specs=(pl.BlockSpec(memory_space=pltpu.MemorySpace.VMEM),) * 3,
        scratch_shapes=[
            pltpu.VMEM((T * B, 4 * HIDDEN_DIM), jnp.float32),   # layer-0 xproj
            pltpu.VMEM((T * B, HIDDEN_DIM), jnp.float32),       # layer-1 outputs
        ],
    )(emb_tb, h0_all, c0_all,
      params["w_ih_0"], params["w_hh_0"], params["b_0"],
      params["w_cat_1"], params["b_1"],
      params["w_fc_t"], params["b_fc"])

    # [T*B, Vpad] -> [B, T, V]  (strip lane padding back to the real vocab).
    logits = jnp.transpose(logits2d.reshape(T, B, VOCAB_PAD),
                           (1, 0, 2))[:, :, :VOCAB_SIZE]
    return logits, (h_n, c_n)


def init_hidden(batch_size):
    return (jnp.zeros((NUM_LAYERS, batch_size, HIDDEN_DIM), jnp.float32),
            jnp.zeros((NUM_LAYERS, batch_size, HIDDEN_DIM), jnp.float32))


# ----------------------------- main -------------------------------------------
if __name__ == "__main__":
    key = jax.random.PRNGKey(0)
    k_param, k_tok = jax.random.split(key)

    params = init_params(k_param)
    x = jax.random.randint(k_tok, (BATCH, SEQ), 0, VOCAB_SIZE, jnp.int32)
    hidden = init_hidden(BATCH)

    logits, (h_n, c_n) = lstm_model_forward(params, x, hidden)
    jax.block_until_ready((logits, h_n, c_n))

    assert logits.shape == (BATCH, SEQ, VOCAB_SIZE)
    assert h_n.shape == (NUM_LAYERS, BATCH, HIDDEN_DIM)
    assert c_n.shape == (NUM_LAYERS, BATCH, HIDDEN_DIM)
    assert bool(jnp.all(jnp.isfinite(logits)))
    print("KERNEL_OK")
</pallas_src>

<mosaic_0001>
module attributes {stable_mosaic.version = 11 : i64} {
  func.func @fused_forward_kernel(%arg0: memref<64x128xbf16, #tpu.memory_space<vmem>>, %arg1: memref<2x8x128xf32, #tpu.memory_space<vmem>>, %arg2: memref<2x8x128xf32, #tpu.memory_space<vmem>>, %arg3: memref<128x512xbf16, #tpu.memory_space<vmem>>, %arg4: memref<128x512xbf16, #tpu.memory_space<vmem>>, %arg5: memref<1x512xf32, #tpu.memory_space<vmem>>, %arg6: memref<256x512xbf16, #tpu.memory_space<vmem>>, %arg7: memref<1x512xf32, #tpu.memory_space<vmem>>, %arg8: memref<128x768xbf16, #tpu.memory_space<vmem>>, %arg9: memref<1x768xf32, #tpu.memory_space<vmem>>, %arg10: memref<64x768xf32, #tpu.memory_space<vmem>>, %arg11: memref<2x8x128xf32, #tpu.memory_space<vmem>>, %arg12: memref<2x8x128xf32, #tpu.memory_space<vmem>>, %arg13: memref<64x512xf32, #tpu.memory_space<vmem>>, %arg14: memref<64x128xf32, #tpu.memory_space<vmem>>) attributes {dimension_semantics = [], scalar_prefetch = 0 : i64, scratch_operands = 2 : i64, tpu.core_type = #tpu.core_type<tc>} {
    %c0 = arith.constant 0 : index
    %c0_0 = arith.constant 0 : index
    %0 = vector.load %arg4[%c0, %c0_0] : memref<128x512xbf16, #tpu.memory_space<vmem>>, vector<128x512xbf16>
    %c0_1 = arith.constant 0 : index
    %c0_2 = arith.constant 0 : index
    %1 = vector.load %arg6[%c0_1, %c0_2] : memref<256x512xbf16, #tpu.memory_space<vmem>>, vector<256x512xbf16>
    %c0_3 = arith.constant 0 : index
    %c0_4 = arith.constant 0 : index
    %2 = vector.load %arg7[%c0_3, %c0_4] : memref<1x512xf32, #tpu.memory_space<vmem>>, vector<1x512xf32>
    %c0_5 = arith.constant 0 : index
    %c0_6 = arith.constant 0 : index
    %3 = vector.load %arg0[%c0_5, %c0_6] : memref<64x128xbf16, #tpu.memory_space<vmem>>, vector<64x128xbf16>
    %c0_7 = arith.constant 0 : index
    %c0_8 = arith.constant 0 : index
    %4 = vector.load %arg3[%c0_7, %c0_8] : memref<128x512xbf16, #tpu.memory_space<vmem>>, vector<128x512xbf16>
    %cst = arith.constant dense<0.000000e+00> : vector<64x512xf32>
    %5 = tpu.matmul %3, %4, %cst {dimension_numbers = #tpu.dot_dimension_numbers<[1], [0], [0], [1], [0, 0, 1, 1], [], []>} : vector<64x128xbf16>, vector<128x512xbf16>, vector<64x512xf32> -> vector<64x512xf32>
    %c0_9 = arith.constant 0 : index
    %c0_10 = arith.constant 0 : index
    %6 = vector.load %arg5[%c0_9, %c0_10] : memref<1x512xf32, #tpu.memory_space<vmem>>, vector<1x512xf32>
    %7 = vector.broadcast %6 : vector<1x512xf32> to vector<64x512xf32>
    %8 = arith.addf %5, %7 : vector<64x512xf32>
    %c0_11 = arith.constant 0 : index
    %c0_12 = arith.constant 0 : index
    %9 = vector.load %arg13[%c0_11, %c0_12] : memref<64x512xf32, #tpu.memory_space<vmem>>, vector<64x512xf32>
    tpu.vector_store %arg13[%c0_11, %c0_12], %8 {strides = array<i32>} : memref<64x512xf32, #tpu.memory_space<vmem>>, vector<64x512xf32>,
    %c0_13 = arith.constant 0 : index
    %c0_14 = arith.constant 0 : index
    %c0_15 = arith.constant 0 : index
    %10 = vector.load %arg1[%c0_13, %c0_14, %c0_15] : memref<2x8x128xf32, #tpu.memory_space<vmem>>, vector<1x8x128xf32>
    %11 = vector.shape_cast %10 : vector<1x8x128xf32> to vector<8x128xf32>
    %c0_16 = arith.constant 0 : index
    %c0_17 = arith.constant 0 : index
    %c0_18 = arith.constant 0 : index
    %12 = vector.load %arg2[%c0_16, %c0_17, %c0_18] : memref<2x8x128xf32, #tpu.memory_space<vmem>>, vector<1x8x128xf32>
    %13 = vector.shape_cast %12 : vector<1x8x128xf32> to vector<8x128xf32>
    %14 = arith.truncf %11 : vector<8x128xf32> to vector<8x128xbf16>
    %cst_19 = arith.constant dense<0.000000e+00> : vector<8x512xf32>
    %15 = tpu.matmul %14, %0, %cst_19 {dimension_numbers = #tpu.dot_dimension_numbers<[1], [0], [0], [1], [0, 0, 1, 1], [], []>} : vector<8x128xbf16>, vector<128x512xbf16>, vector<8x512xf32> -> vector<8x512xf32>
    %c0_20 = arith.constant 0 : index
    %c0_21 = arith.constant 0 : index
    %16 = vector.load %arg13[%c0_20, %c0_21] : memref<64x512xf32, #tpu.memory_space<vmem>>, vector<8x512xf32>
    %17 = arith.addf %15, %16 : vector<8x512xf32>
    %18 = vector.extract_strided_slice %17 {offsets = [0, 0], sizes = [8, 384], strides = [1, 1]} : vector<8x512xf32> to vector<8x384xf32>
    %19 = arith.negf %18 : vector<8x384xf32>
    %20 = math.exp %19 : vector<8x384xf32>
    %cst_22 = arith.constant 1.000000e+00 : f32
    %21 = vector.broadcast %cst_22 : f32 to vector<8x384xf32>
    %22 = arith.addf %21, %20 : vector<8x384xf32>
    %23 = arith.divf %21, %22 : vector<8x384xf32>
    %24 = vector.extract_strided_slice %23 {offsets = [0, 0], sizes = [8, 128], strides = [1, 1]} : vector<8x384xf32> to vector<8x128xf32>
    %25 = vector.extract_strided_slice %23 {offsets = [0, 128], sizes = [8, 128], strides = [1, 1]} : vector<8x384xf32> to vector<8x128xf32>
    %26 = vector.extract_strided_slice %23 {offsets = [0, 256], sizes = [8, 128], strides = [1, 1]} : vector<8x384xf32> to vector<8x128xf32>
    %27 = vector.extract_strided_slice %17 {offsets = [0, 384], sizes = [8, 128], strides = [1, 1]} : vector<8x512xf32> to vector<8x128xf32>
    %28 = math.tanh %27 : vector<8x128xf32>
    %29 = arith.mulf %25, %13 : vector<8x128xf32>
    %30 = arith.mulf %24, %28 : vector<8x128xf32>
    %31 = arith.addf %29, %30 : vector<8x128xf32>
    %32 = math.tanh %31 : vector<8x128xf32>
    %33 = arith.mulf %26, %32 : vector<8x128xf32>
    %c1 = arith.constant 1 : index
    %c0_23 = arith.constant 0 : index
    %c0_24 = arith.constant 0 : index
    %34 = vector.load %arg1[%c1, %c0_23, %c0_24] : memref<2x8x128xf32, #tpu.memory_space<vmem>>, vector<1x8x128xf32>
    %35 = vector.shape_cast %34 : vector<1x8x128xf32> to vector<8x128xf32>
    %c1_25 = arith.constant 1 : index
    %c0_26 = arith.constant 0 : index
    %c0_27 = arith.constant 0 : index
    %36 = vector.load %arg2[%c1_25, %c0_26, %c0_27] : memref<2x8x128xf32, #tpu.memory_space<vmem>>, vector<1x8x128xf32>
    %37 = vector.shape_cast %36 : vector<1x8x128xf32> to vector<8x128xf32>
    %c1_i32 = arith.constant 1 : i32
    %c8_i32 = arith.constant 8 : i32
    %38 = arith.muli %c1_i32, %c8_i32 : i32
    %39 = tpu.assume_multiple %38, 8 : i32
    %40 = arith.truncf %33 : vector<8x128xf32> to vector<8x128xbf16>
    %cst_28 = arith.constant dense<0.000000e+00> : vector<8x512xf32>
    %41 = tpu.matmul %40, %0, %cst_28 {dimension_numbers = #tpu.dot_dimension_numbers<[1], [0], [0], [1], [0, 0, 1, 1], [], []>} : vector<8x128xbf16>, vector<128x512xbf16>, vector<8x512xf32> -> vector<8x512xf32>
    %42 = arith.index_cast %39 : i32 to index
    %c0_29 = arith.constant 0 : index
    %43 = vector.load %arg13[%42, %c0_29] : memref<64x512xf32, #tpu.memory_space<vmem>>, vector<8x512xf32>
    %44 = arith.addf %41, %43 : vector<8x512xf32>
    %45 = vector.extract_strided_slice %44 {offsets = [0, 0], sizes = [8, 384], strides = [1, 1]} : vector<8x512xf32> to vector<8x384xf32>
    %46 = arith.negf %45 : vector<8x384xf32>
    %47 = math.exp %46 : vector<8x384xf32>
    %cst_30 = arith.constant 1.000000e+00 : f32
    %48 = vector.broadcast %cst_30 : f32 to vector<8x384xf32>
    %49 = arith.addf %48, %47 : vector<8x384xf32>
    %50 = arith.divf %48, %49 : vector<8x384xf32>
    %51 = vector.extract_strided_slice %50 {offsets = [0, 0], sizes = [8, 128], strides = [1, 1]} : vector<8x384xf32> to vector<8x128xf32>
    %52 = vector.extract_strided_slice %50 {offsets = [0, 128], sizes = [8, 128], strides = [1, 1]} : vector<8x384xf32> to vector<8x128xf32>
    %53 = vector.extract_strided_slice %50 {offsets = [0, 256], sizes = [8, 128], strides = [1, 1]} : vector<8x384xf32> to vector<8x128xf32>
    %54 = vector.extract_strided_slice %44 {offsets = [0, 384], sizes = [8, 128], strides = [1, 1]} : vector<8x512xf32> to vector<8x128xf32>
    %55 = math.tanh %54 : vector<8x128xf32>
    %56 = arith.mulf %52, %31 : vector<8x128xf32>
    %57 = arith.mulf %51, %55 : vector<8x128xf32>
    %58 = arith.addf %56, %57 : vector<8x128xf32>
    %59 = math.tanh %58 : vector<8x128xf32>
    %60 = arith.mulf %53, %59 : vector<8x128xf32>
    %c1_i32_31 = arith.constant 1 : i32
    %61 = arith.subi %c1_i32, %c1_i32_31 : i32
    %62 = tpu.concatenate %35, %33 in 1 : vector<8x128xf32>, vector<8x128xf32> -> vector<8x256xf32>
    %63 = arith.truncf %62 : vector<8x256xf32> to vector<8x256xbf16>
    %cst_32 = arith.constant dense<0.000000e+00> : vector<8x512xf32>
    %64 = tpu.matmul %63, %1, %cst_32 {dimension_numbers = #tpu.dot_dimension_numbers<[1], [0], [0], [1], [0, 0, 1, 1], [], []>} : vector<8x256xbf16>, vector<256x512xbf16>, vector<8x512xf32> -> vector<8x512xf32>
    %65 = vector.broadcast %2 : vector<1x512xf32> to vector<8x512xf32>
    %66 = arith.addf %64, %65 : vector<8x512xf32>
    %67 = vector.extract_strided_slice %66 {offsets = [0, 0], sizes = [8, 384], strides = [1, 1]} : vector<8x512xf32> to vector<8x384xf32>
    %68 = arith.negf %67 : vector<8x384xf32>
    %69 = math.exp %68 : vector<8x384xf32>
    %cst_33 = arith.constant 1.000000e+00 : f32
    %70 = vector.broadcast %cst_33 : f32 to vector<8x384xf32>
    %71 = arith.addf %70, %69 : vector<8x384xf32>
    %72 = arith.divf %70, %71 : vector<8x384xf32>
    %73 = vector.extract_strided_slice %72 {offsets = [0, 0], sizes = [8, 128], strides = [1, 1]} : vector<8x384xf32> to vector<8x128xf32>
    %74 = vector.extract_strided_slice %72 {offsets = [0, 128], sizes = [8, 128], strides = [1, 1]} : vector<8x384xf32> to vector<8x128xf32>
    %75 = vector.extract_strided_slice %72 {offsets = [0, 256], sizes = [8, 128], strides = [1, 1]} : vector<8x384xf32> to vector<8x128xf32>
    %76 = vector.extract_strided_slice %66 {offsets = [0, 384], sizes = [8, 128], strides = [1, 1]} : vector<8x512xf32> to vector<8x128xf32>
    %77 = math.tanh %76 : vector<8x128xf32>
    %78 = arith.mulf %74, %37 : vector<8x128xf32>
    %79 = arith.mulf %73, %77 : vector<8x128xf32>
    %80 = arith.addf %78, %79 : vector<8x128xf32>
    %81 = math.tanh %80 : vector<8x128xf32>
    %82 = arith.mulf %75, %81 : vector<8x128xf32>
    %c8_i32_34 = arith.constant 8 : i32
    %83 = arith.muli %61, %c8_i32_34 : i32
    %84 = tpu.assume_multiple %83, 8 : i32
    %85 = arith.index_cast %84 : i32 to index
    %c0_35 = arith.constant 0 : index
    %86 = vector.load %arg14[%85, %c0_35] : memref<64x128xf32, #tpu.memory_space<vmem>>, vector<8x128xf32>
    tpu.vector_store %arg14[%85, %c0_35], %82 {strides = array<i32>} : memref<64x128xf32, #tpu.memory_space<vmem>>, vector<8x128xf32>,
    %c2_i32 = arith.constant 2 : i32
    %c8_i32_36 = arith.constant 8 : i32
    %87 = arith.muli %c2_i32, %c8_i32_36 : i32
    %88 = tpu.assume_multiple %87, 8 : i32
    %89 = arith.truncf %60 : vector<8x128xf32> to vector<8x128xbf16>
    %cst_37 = arith.constant dense<0.000000e+00> : vector<8x512xf32>
    %90 = tpu.matmul %89, %0, %cst_37 {dimension_numbers = #tpu.dot_dimension_numbers<[1], [0], [0], [1], [0, 0, 1, 1], [], []>} : vector<8x128xbf16>, vector<128x512xbf16>, vector<8x512xf32> -> vector<8x512xf32>
    %91 = arith.index_cast %88 : i32 to index
    %c0_38 = arith.constant 0 : index
    %92 = vector.load %arg13[%91, %c0_38] : memref<64x512xf32, #tpu.memory_space<vmem>>, vector<8x512xf32>
    %93 = arith.addf %90, %92 : vector<8x512xf32>
    %94 = vector.extract_strided_slice %93 {offsets = [0, 0], sizes = [8, 384], strides = [1, 1]} : vector<8x512xf32> to vector<8x384xf32>
    %95 = arith.negf %94 : vector<8x384xf32>
    %96 = math.exp %95 : vector<8x384xf32>
    %cst_39 = arith.constant 1.000000e+00 : f32
    %97 = vector.broadcast %cst_39 : f32 to vector<8x384xf32>
    %98 = arith.addf %97, %96 : vector<8x384xf32>
    %99 = arith.divf %97, %98 : vector<8x384xf32>
    %100 = vector.extract_strided_slice %99 {offsets = [0, 0], sizes = [8, 128], strides = [1, 1]} : vector<8x384xf32> to vector<8x128xf32>
    %101 = vector.extract_strided_slice %99 {offsets = [0, 128], sizes = [8, 128], strides = [1, 1]} : vector<8x384xf32> to vector<8x128xf32>
    %102 = vector.extract_strided_slice %99 {offsets = [0, 256], sizes = [8, 128], strides = [1, 1]} : vector<8x384xf32> to vector<8x128xf32>
    %103 = vector.extract_strided_slice %93 {offsets = [0, 384], sizes = [8, 128], strides = [1, 1]} : vector<8x512xf32> to vector<8x128xf32>
    %104 = math.tanh %103 : vector<8x128xf32>
    %105 = arith.mulf %101, %58 : vector<8x128xf32>
    %106 = arith.mulf %100, %104 : vector<8x128xf32>
    %107 = arith.addf %105, %106 : vector<8x128xf32>
    %108 = math.tanh %107 : vector<8x128xf32>
    %109 = arith.mulf %102, %108 : vector<8x128xf32>
    %c1_i32_40 = arith.constant 1 : i32
    %110 = arith.subi %c2_i32, %c1_i32_40 : i32
    %111 = tpu.concatenate %82, %60 in 1 : vector<8x128xf32>, vector<8x128xf32> -> vector<8x256xf32>
    %112 = arith.truncf %111 : vector<8x256xf32> to vector<8x256xbf16>
    %cst_41 = arith.constant dense<0.000000e+00> : vector<8x512xf32>
    %113 = tpu.matmul %112, %1, %cst_41 {dimension_numbers = #tpu.dot_dimension_numbers<[1], [0], [0], [1], [0, 0, 1, 1], [], []>} : vector<8x256xbf16>, vector<256x512xbf16>, vector<8x512xf32> -> vector<8x512xf32>
    %114 = vector.broadcast %2 : vector<1x512xf32> to vector<8x512xf32>
    %115 = arith.addf %113, %114 : vector<8x512xf32>
    %116 = vector.extract_strided_slice %115 {offsets = [0, 0], sizes = [8, 384], strides = [1, 1]} : vector<8x512xf32> to vector<8x384xf32>
    %117 = arith.negf %116 : vector<8x384xf32>
    %118 = math.exp %117 : vector<8x384xf32>
    %cst_42 = arith.constant 1.000000e+00 : f32
    %119 = vector.broadcast %cst_42 : f32 to vector<8x384xf32>
    %120 = arith.addf %119, %118 : vector<8x384xf32>
    %121 = arith.divf %119, %120 : vector<8x384xf32>
    %122 = vector.extract_strided_slice %121 {offsets = [0, 0], sizes = [8, 128], strides = [1, 1]} : vector<8x384xf32> to vector<8x128xf32>
    %123 = vector.extract_strided_slice %121 {offsets = [0, 128], sizes = [8, 128], strides = [1, 1]} : vector<8x384xf32> to vector<8x128xf32>
    %124 = vector.extract_strided_slice %121 {offsets = [0, 256], sizes = [8, 128], strides = [1, 1]} : vector<8x384xf32> to vector<8x128xf32>
    %125 = vector.extract_strided_slice %115 {offsets = [0, 384], sizes = [8, 128], strides = [1, 1]} : vector<8x512xf32> to vector<8x128xf32>
    %126 = math.tanh %125 : vector<8x128xf32>
    %127 = arith.mulf %123, %80 : vector<8x128xf32>
    %128 = arith.mulf %122, %126 : vector<8x128xf32>
    %129 = arith.addf %127, %128 : vector<8x128xf32>
    %130 = math.tanh %129 : vector<8x128xf32>
    %131 = arith.mulf %124, %130 : vector<8x128xf32>
    %c8_i32_43 = arith.constant 8 : i32
    %132 = arith.muli %110, %c8_i32_43 : i32
    %133 = tpu.assume_multiple %132, 8 : i32
    %134 = arith.index_cast %133 : i32 to index
    %c0_44 = arith.constant 0 : index
    %135 = vector.load %arg14[%134, %c0_44] : memref<64x128xf32, #tpu.memory_space<vmem>>, vector<8x128xf32>
    tpu.vector_store %arg14[%134, %c0_44], %131 {strides = array<i32>} : memref<64x128xf32, #tpu.memory_space<vmem>>, vector<8x128xf32>,
    %c3_i32 = arith.constant 3 : i32
    %c8_i32_45 = arith.constant 8 : i32
    %136 = arith.muli %c3_i32, %c8_i32_45 : i32
    %137 = tpu.assume_multiple %136, 8 : i32
    %138 = arith.truncf %109 : vector<8x128xf32> to vector<8x128xbf16>
    %cst_46 = arith.constant dense<0.000000e+00> : vector<8x512xf32>
    %139 = tpu.matmul %138, %0, %cst_46 {dimension_numbers = #tpu.dot_dimension_numbers<[1], [0], [0], [1], [0, 0, 1, 1], [], []>} : vector<8x128xbf16>, vector<128x512xbf16>, vector<8x512xf32> -> vector<8x512xf32>
    %140 = arith.index_cast %137 : i32 to index
    %c0_47 = arith.constant 0 : index
    %141 = vector.load %arg13[%140, %c0_47] : memref<64x512xf32, #tpu.memory_space<vmem>>, vector<8x512xf32>
    %142 = arith.addf %139, %141 : vector<8x512xf32>
    %143 = vector.extract_strided_slice %142 {offsets = [0, 0], sizes = [8, 384], strides = [1, 1]} : vector<8x512xf32> to vector<8x384xf32>
    %144 = arith.negf %143 : vector<8x384xf32>
    %145 = math.exp %144 : vector<8x384xf32>
    %cst_48 = arith.constant 1.000000e+00 : f32
    %146 = vector.broadcast %cst_48 : f32 to vector<8x384xf32>
    %147 = arith.addf %146, %145 : vector<8x384xf32>
    %148 = arith.divf %146, %147 : vector<8x384xf32>
    %149 = vector.extract_strided_slice %148 {offsets = [0, 0], sizes = [8, 128], strides = [1, 1]} : vector<8x384xf32> to vector<8x128xf32>
    %150 = vector.extract_strided_slice %148 {offsets = [0, 128], sizes = [8, 128], strides = [1, 1]} : vector<8x384xf32> to vector<8x128xf32>
    %151 = vector.extract_strided_slice %148 {offsets = [0, 256], sizes = [8, 128], strides = [1, 1]} : vector<8x384xf32> to vector<8x128xf32>
    %152 = vector.extract_strided_slice %142 {offsets = [0, 384], sizes = [8, 128], strides = [1, 1]} : vector<8x512xf32> to vector<8x128xf32>
    %153 = math.tanh %152 : vector<8x128xf32>
    %154 = arith.mulf %150, %107 : vector<8x128xf32>
    %155 = arith.mulf %149, %153 : vector<8x128xf32>
    %156 = arith.addf %154, %155 : vector<8x128xf32>
    %157 = math.tanh %156 : vector<8x128xf32>
    %158 = arith.mulf %151, %157 : vector<8x128xf32>
    %c1_i32_49 = arith.constant 1 : i32
    %159 = arith.subi %c3_i32, %c1_i32_49 : i32
    %160 = tpu.concatenate %131, %109 in 1 : vector<8x128xf32>, vector<8x128xf32> -> vector<8x256xf32>
    %161 = arith.truncf %160 : vector<8x256xf32> to vector<8x256xbf16>
    %cst_50 = arith.constant dense<0.000000e+00> : vector<8x512xf32>
    %162 = tpu.matmul %161, %1, %cst_50 {dimension_numbers = #tpu.dot_dimension_numbers<[1], [0], [0], [1], [0, 0, 1, 1], [], []>} : vector<8x256xbf16>, vector<256x512xbf16>, vector<8x512xf32> -> vector<8x512xf32>
    %163 = vector.broadcast %2 : vector<1x512xf32> to vector<8x512xf32>
    %164 = arith.addf %162, %163 : vector<8x512xf32>
    %165 = vector.extract_strided_slice %164 {offsets = [0, 0], sizes = [8, 384], strides = [1, 1]} : vector<8x512xf32> to vector<8x384xf32>
    %166 = arith.negf %165 : vector<8x384xf32>
    %167 = math.exp %166 : vector<8x384xf32>
    %cst_51 = arith.constant 1.000000e+00 : f32
    %168 = vector.broadcast %cst_51 : f32 to vector<8x384xf32>
    %169 = arith.addf %168, %167 : vector<8x384xf32>
    %170 = arith.divf %168, %169 : vector<8x384xf32>
    %171 = vector.extract_strided_slice %170 {offsets = [0, 0], sizes = [8, 128], strides = [1, 1]} : vector<8x384xf32> to vector<8x128xf32>
    %172 = vector.extract_strided_slice %170 {offsets = [0, 128], sizes = [8, 128], strides = [1, 1]} : vector<8x384xf32> to vector<8x128xf32>
    %173 = vector.extract_strided_slice %170 {offsets = [0, 256], sizes = [8, 128], strides = [1, 1]} : vector<8x384xf32> to vector<8x128xf32>
    %174 = vector.extract_strided_slice %164 {offsets = [0, 384], sizes = [8, 128], strides = [1, 1]} : vector<8x512xf32> to vector<8x128xf32>
    %175 = math.tanh %174 : vector<8x128xf32>
    %176 = arith.mulf %172, %129 : vector<8x128xf32>
    %177 = arith.mulf %171, %175 : vector<8x128xf32>
    %178 = arith.addf %176, %177 : vector<8x128xf32>
    %179 = math.tanh %178 : vector<8x128xf32>
    %180 = arith.mulf %173, %179 : vector<8x128xf32>
    %c8_i32_52 = arith.constant 8 : i32
    %181 = arith.muli %159, %c8_i32_52 : i32
    %182 = tpu.assume_multiple %181, 8 : i32
    %183 = arith.index_cast %182 : i32 to index
    %c0_53 = arith.constant 0 : index
    %184 = vector.load %arg14[%183, %c0_53] : memref<64x128xf32, #tpu.memory_space<vmem>>, vector<8x128xf32>
    tpu.vector_store %arg14[%183, %c0_53], %180 {strides = array<i32>} : memref<64x128xf32, #tpu.memory_space<vmem>>, vector<8x128xf32>,
    %c4_i32 = arith.constant 4 : i32
    %c8_i32_54 = arith.constant 8 : i32
    %185 = arith.muli %c4_i32, %c8_i32_54 : i32
    %186 = tpu.assume_multiple %185, 8 : i32
    %187 = arith.truncf %158 : vector<8x128xf32> to vector<8x128xbf16>
    %cst_55 = arith.constant dense<0.000000e+00> : vector<8x512xf32>
    %188 = tpu.matmul %187, %0, %cst_55 {dimension_numbers = #tpu.dot_dimension_numbers<[1], [0], [0], [1], [0, 0, 1, 1], [], []>} : vector<8x128xbf16>, vector<128x512xbf16>, vector<8x512xf32> -> vector<8x512xf32>
    %189 = arith.index_cast %186 : i32 to index
    %c0_56 = arith.constant 0 : index
    %190 = vector.load %arg13[%189, %c0_56] : memref<64x512xf32, #tpu.memory_space<vmem>>, vector<8x512xf32>
    %191 = arith.addf %188, %190 : vector<8x512xf32>
    %192 = vector.extract_strided_slice %191 {offsets = [0, 0], sizes = [8, 384], strides = [1, 1]} : vector<8x512xf32> to vector<8x384xf32>
    %193 = arith.negf %192 : vector<8x384xf32>
    %194 = math.exp %193 : vector<8x384xf32>
    %cst_57 = arith.constant 1.000000e+00 : f32
    %195 = vector.broadcast %cst_57 : f32 to vector<8x384xf32>
    %196 = arith.addf %195, %194 : vector<8x384xf32>
    %197 = arith.divf %195, %196 : vector<8x384xf32>
    %198 = vector.extract_strided_slice %197 {offsets = [0, 0], sizes = [8, 128], strides = [1, 1]} : vector<8x384xf32> to vector<8x128xf32>
    %199 = vector.extract_strided_slice %197 {offsets = [0, 128], sizes = [8, 128], strides = [1, 1]} : vector<8x384xf32> to vector<8x128xf32>
    %200 = vector.extract_strided_slice %197 {offsets = [0, 256], sizes = [8, 128], strides = [1, 1]} : vector<8x384xf32> to vector<8x128xf32>
    %201 = vector.extract_strided_slice %191 {offsets = [0, 384], sizes = [8, 128], strides = [1, 1]} : vector<8x512xf32> to vector<8x128xf32>
    %202 = math.tanh %201 : vector<8x128xf32>
    %203 = arith.mulf %199, %156 : vector<8x128xf32>
    %204 = arith.mulf %198, %202 : vector<8x128xf32>
    %205 = arith.addf %203, %204 : vector<8x128xf32>
    %206 = math.tanh %205 : vector<8x128xf32>
    %207 = arith.mulf %200, %206 : vector<8x128xf32>
    %c1_i32_58 = arith.constant 1 : i32
    %208 = arith.subi %c4_i32, %c1_i32_58 : i32
    %209 = tpu.concatenate %180, %158 in 1 : vector<8x128xf32>, vector<8x128xf32> -> vector<8x256xf32>
    %210 = arith.truncf %209 : vector<8x256xf32> to vector<8x256xbf16>
    %cst_59 = arith.constant dense<0.000000e+00> : vector<8x512xf32>
    %211 = tpu.matmul %210, %1, %cst_59 {dimension_numbers = #tpu.dot_dimension_numbers<[1], [0], [0], [1], [0, 0, 1, 1], [], []>} : vector<8x256xbf16>, vector<256x512xbf16>, vector<8x512xf32> -> vector<8x512xf32>
    %212 = vector.broadcast %2 : vector<1x512xf32> to vector<8x512xf32>
    %213 = arith.addf %211, %212 : vector<8x512xf32>
    %214 = vector.extract_strided_slice %213 {offsets = [0, 0], sizes = [8, 384], strides = [1, 1]} : vector<8x512xf32> to vector<8x384xf32>
    %215 = arith.negf %214 : vector<8x384xf32>
    %216 = math.exp %215 : vector<8x384xf32>
    %cst_60 = arith.constant 1.000000e+00 : f32
    %217 = vector.broadcast %cst_60 : f32 to vector<8x384xf32>
    %218 = arith.addf %217, %216 : vector<8x384xf32>
    %219 = arith.divf %217, %218 : vector<8x384xf32>
    %220 = vector.extract_strided_slice %219 {offsets = [0, 0], sizes = [8, 128], strides = [1, 1]} : vector<8x384xf32> to vector<8x128xf32>
    %221 = vector.extract_strided_slice %219 {offsets = [0, 128], sizes = [8, 128], strides = [1, 1]} : vector<8x384xf32> to vector<8x128xf32>
    %222 = vector.extract_strided_slice %219 {offsets = [0, 256], sizes = [8, 128], strides = [1, 1]} : vector<8x384xf32> to vector<8x128xf32>
    %223 = vector.extract_strided_slice %213 {offsets = [0, 384], sizes = [8, 128], strides = [1, 1]} : vector<8x512xf32> to vector<8x128xf32>
    %224 = math.tanh %223 : vector<8x128xf32>
    %225 = arith.mulf %221, %178 : vector<8x128xf32>
    %226 = arith.mulf %220, %224 : vector<8x128xf32>
    %227 = arith.addf %225, %226 : vector<8x128xf32>
    %228 = math.tanh %227 : vector<8x128xf32>
    %229 = arith.mulf %222, %228 : vector<8x128xf32>
    %c8_i32_61 = arith.constant 8 : i32
    %230 = arith.muli %208, %c8_i32_61 : i32
    %231 = tpu.assume_multiple %230, 8 : i32
    %232 = arith.index_cast %231 : i32 to index
    %c0_62 = arith.constant 0 : index
    %233 = vector.load %arg14[%232, %c0_62] : memref<64x128xf32, #tpu.memory_space<vmem>>, vector<8x128xf32>
    tpu.vector_store %arg14[%232, %c0_62], %229 {strides = array<i32>} : memref<64x128xf32, #tpu.memory_space<vmem>>, vector<8x128xf32>,
    %c5_i32 = arith.constant 5 : i32
    %c8_i32_63 = arith.constant 8 : i32
    %234 = arith.muli %c5_i32, %c8_i32_63 : i32
    %235 = tpu.assume_multiple %234, 8 : i32
    %236 = arith.truncf %207 : vector<8x128xf32> to vector<8x128xbf16>
    %cst_64 = arith.constant dense<0.000000e+00> : vector<8x512xf32>
    %237 = tpu.matmul %236, %0, %cst_64 {dimension_numbers = #tpu.dot_dimension_numbers<[1], [0], [0], [1], [0, 0, 1, 1], [], []>} : vector<8x128xbf16>, vector<128x512xbf16>, vector<8x512xf32> -> vector<8x512xf32>
    %238 = arith.index_cast %235 : i32 to index
    %c0_65 = arith.constant 0 : index
    %239 = vector.load %arg13[%238, %c0_65] : memref<64x512xf32, #tpu.memory_space<vmem>>, vector<8x512xf32>
    %240 = arith.addf %237, %239 : vector<8x512xf32>
    %241 = vector.extract_strided_slice %240 {offsets = [0, 0], sizes = [8, 384], strides = [1, 1]} : vector<8x512xf32> to vector<8x384xf32>
    %242 = arith.negf %241 : vector<8x384xf32>
    %243 = math.exp %242 : vector<8x384xf32>
    %cst_66 = arith.constant 1.000000e+00 : f32
    %244 = vector.broadcast %cst_66 : f32 to vector<8x384xf32>
    %245 = arith.addf %244, %243 : vector<8x384xf32>
    %246 = arith.divf %244, %245 : vector<8x384xf32>
    %247 = vector.extract_strided_slice %246 {offsets = [0, 0], sizes = [8, 128], strides = [1, 1]} : vector<8x384xf32> to vector<8x128xf32>
    %248 = vector.extract_strided_slice %246 {offsets = [0, 128], sizes = [8, 128], strides = [1, 1]} : vector<8x384xf32> to vector<8x128xf32>
    %249 = vector.extract_strided_slice %246 {offsets = [0, 256], sizes = [8, 128], strides = [1, 1]} : vector<8x384xf32> to vector<8x128xf32>
    %250 = vector.extract_strided_slice %240 {offsets = [0, 384], sizes = [8, 128], strides = [1, 1]} : vector<8x512xf32> to vector<8x128xf32>
    %251 = math.tanh %250 : vector<8x128xf32>
    %252 = arith.mulf %248, %205 : vector<8x128xf32>
    %253 = arith.mulf %247, %251 : vector<8x128xf32>
    %254 = arith.addf %252, %253 : vector<8x128xf32>
    %255 = math.tanh %254 : vector<8x128xf32>
    %256 = arith.mulf %249, %255 : vector<8x128xf32>
    %c1_i32_67 = arith.constant 1 : i32
    %257 = arith.subi %c5_i32, %c1_i32_67 : i32
    %258 = tpu.concatenate %229, %207 in 1 : vector<8x128xf32>, vector<8x128xf32> -> vector<8x256xf32>
    %259 = arith.truncf %258 : vector<8x256xf32> to vector<8x256xbf16>
    %cst_68 = arith.constant dense<0.000000e+00> : vector<8x512xf32>
    %260 = tpu.matmul %259, %1, %cst_68 {dimension_numbers = #tpu.dot_dimension_numbers<[1], [0], [0], [1], [0, 0, 1, 1], [], []>} : vector<8x256xbf16>, vector<256x512xbf16>, vector<8x512xf32> -> vector<8x512xf32>
    %261 = vector.broadcast %2 : vector<1x512xf32> to vector<8x512xf32>
    %262 = arith.addf %260, %261 : vector<8x512xf32>
    %263 = vector.extract_strided_slice %262 {offsets = [0, 0], sizes = [8, 384], strides = [1, 1]} : vector<8x512xf32> to vector<8x384xf32>
    %264 = arith.negf %263 : vector<8x384xf32>
    %265 = math.exp %264 : vector<8x384xf32>
    %cst_69 = arith.constant 1.000000e+00 : f32
    %266 = vector.broadcast %cst_69 : f32 to vector<8x384xf32>
    %267 = arith.addf %266, %265 : vector<8x384xf32>
    %268 = arith.divf %266, %267 : vector<8x384xf32>
    %269 = vector.extract_strided_slice %268 {offsets = [0, 0], sizes = [8, 128], strides = [1, 1]} : vector<8x384xf32> to vector<8x128xf32>
    %270 = vector.extract_strided_slice %268 {offsets = [0, 128], sizes = [8, 128], strides = [1, 1]} : vector<8x384xf32> to vector<8x128xf32>
    %271 = vector.extract_strided_slice %268 {offsets = [0, 256], sizes = [8, 128], strides = [1, 1]} : vector<8x384xf32> to vector<8x128xf32>
    %272 = vector.extract_strided_slice %262 {offsets = [0, 384], sizes = [8, 128], strides = [1, 1]} : vector<8x512xf32> to vector<8x128xf32>
    %273 = math.tanh %272 : vector<8x128xf32>
    %274 = arith.mulf %270, %227 : vector<8x128xf32>
    %275 = arith.mulf %269, %273 : vector<8x128xf32>
    %276 = arith.addf %274, %275 : vector<8x128xf32>
    %277 = math.tanh %276 : vector<8x128xf32>
    %278 = arith.mulf %271, %277 : vector<8x128xf32>
    %c8_i32_70 = arith.constant 8 : i32
    %279 = arith.muli %257, %c8_i32_70 : i32
    %280 = tpu.assume_multiple %279, 8 : i32
    %281 = arith.index_cast %280 : i32 to index
    %c0_71 = arith.constant 0 : index
    %282 = vector.load %arg14[%281, %c0_71] : memref<64x128xf32, #tpu.memory_space<vmem>>, vector<8x128xf32>
    tpu.vector_store %arg14[%281, %c0_71], %278 {strides = array<i32>} : memref<64x128xf32, #tpu.memory_space<vmem>>, vector<8x128xf32>,
    %c6_i32 = arith.constant 6 : i32
    %c8_i32_72 = arith.constant 8 : i32
    %283 = arith.muli %c6_i32, %c8_i32_72 : i32
    %284 = tpu.assume_multiple %283, 8 : i32
    %285 = arith.truncf %256 : vector<8x128xf32> to vector<8x128xbf16>
    %cst_73 = arith.constant dense<0.000000e+00> : vector<8x512xf32>
    %286 = tpu.matmul %285, %0, %cst_73 {dimension_numbers = #tpu.dot_dimension_numbers<[1], [0], [0], [1], [0, 0, 1, 1], [], []>} : vector<8x128xbf16>, vector<128x512xbf16>, vector<8x512xf32> -> vector<8x512xf32>
    %287 = arith.index_cast %284 : i32 to index
    %c0_74 = arith.constant 0 : index
    %288 = vector.load %arg13[%287, %c0_74] : memref<64x512xf32, #tpu.memory_space<vmem>>, vector<8x512xf32>
    %289 = arith.addf %286, %288 : vector<8x512xf32>
    %290 = vector.extract_strided_slice %289 {offsets = [0, 0], sizes = [8, 384], strides = [1, 1]} : vector<8x512xf32> to vector<8x384xf32>
    %291 = arith.negf %290 : vector<8x384xf32>
    %292 = math.exp %291 : vector<8x384xf32>
    %cst_75 = arith.constant 1.000000e+00 : f32
    %293 = vector.broadcast %cst_75 : f32 to vector<8x384xf32>
    %294 = arith.addf %293, %292 : vector<8x384xf32>
    %295 = arith.divf %293, %294 : vector<8x384xf32>
    %296 = vector.extract_strided_slice %295 {offsets = [0, 0], sizes = [8, 128], strides = [1, 1]} : vector<8x384xf32> to vector<8x128xf32>
    %297 = vector.extract_strided_slice %295 {offsets = [0, 128], sizes = [8, 128], strides = [1, 1]} : vector<8x384xf32> to vector<8x128xf32>
    %298 = vector.extract_strided_slice %295 {offsets = [0, 256], sizes = [8, 128], strides = [1, 1]} : vector<8x384xf32> to vector<8x128xf32>
    %299 = vector.extract_strided_slice %289 {offsets = [0, 384], sizes = [8, 128], strides = [1, 1]} : vector<8x512xf32> to vector<8x128xf32>
    %300 = math.tanh %299 : vector<8x128xf32>
    %301 = arith.mulf %297, %254 : vector<8x128xf32>
    %302 = arith.mulf %296, %300 : vector<8x128xf32>
    %303 = arith.addf %301, %302 : vector<8x128xf32>
    %304 = math.tanh %303 : vector<8x128xf32>
    %305 = arith.mulf %298, %304 : vector<8x128xf32>
    %c1_i32_76 = arith.constant 1 : i32
    %306 = arith.subi %c6_i32, %c1_i32_76 : i32
    %307 = tpu.concatenate %278, %256 in 1 : vector<8x128xf32>, vector<8x128xf32> -> vector<8x256xf32>
    %308 = arith.truncf %307 : vector<8x256xf32> to vector<8x256xbf16>
    %cst_77 = arith.constant dense<0.000000e+00> : vector<8x512xf32>
    %309 = tpu.matmul %308, %1, %cst_77 {dimension_numbers = #tpu.dot_dimension_numbers<[1], [0], [0], [1], [0, 0, 1, 1], [], []>} : vector<8x256xbf16>, vector<256x512xbf16>, vector<8x512xf32> -> vector<8x512xf32>
    %310 = vector.broadcast %2 : vector<1x512xf32> to vector<8x512xf32>
    %311 = arith.addf %309, %310 : vector<8x512xf32>
    %312 = vector.extract_strided_slice %311 {offsets = [0, 0], sizes = [8, 384], strides = [1, 1]} : vector<8x512xf32> to vector<8x384xf32>
    %313 = arith.negf %312 : vector<8x384xf32>
    %314 = math.exp %313 : vector<8x384xf32>
    %cst_78 = arith.constant 1.000000e+00 : f32
    %315 = vector.broadcast %cst_78 : f32 to vector<8x384xf32>
    %316 = arith.addf %315, %314 : vector<8x384xf32>
    %317 = arith.divf %315, %316 : vector<8x384xf32>
    %318 = vector.extract_strided_slice %317 {offsets = [0, 0], sizes = [8, 128], strides = [1, 1]} : vector<8x384xf32> to vector<8x128xf32>
    %319 = vector.extract_strided_slice %317 {offsets = [0, 128], sizes = [8, 128], strides = [1, 1]} : vector<8x384xf32> to vector<8x128xf32>
    %320 = vector.extract_strided_slice %317 {offsets = [0, 256], sizes = [8, 128], strides = [1, 1]} : vector<8x384xf32> to vector<8x128xf32>
    %321 = vector.extract_strided_slice %311 {offsets = [0, 384], sizes = [8, 128], strides = [1, 1]} : vector<8x512xf32> to vector<8x128xf32>
    %322 = math.tanh %321 : vector<8x128xf32>
    %323 = arith.mulf %319, %276 : vector<8x128xf32>
    %324 = arith.mulf %318, %322 : vector<8x128xf32>
    %325 = arith.addf %323, %324 : vector<8x128xf32>
    %326 = math.tanh %325 : vector<8x128xf32>
    %327 = arith.mulf %320, %326 : vector<8x128xf32>
    %c8_i32_79 = arith.constant 8 : i32
    %328 = arith.muli %306, %c8_i32_79 : i32
    %329 = tpu.assume_multiple %328, 8 : i32
    %330 = arith.index_cast %329 : i32 to index
    %c0_80 = arith.constant 0 : index
    %331 = vector.load %arg14[%330, %c0_80] : memref<64x128xf32, #tpu.memory_space<vmem>>, vector<8x128xf32>
    tpu.vector_store %arg14[%330, %c0_80], %327 {strides = array<i32>} : memref<64x128xf32, #tpu.memory_space<vmem>>, vector<8x128xf32>,
    %c7_i32 = arith.constant 7 : i32
    %c8_i32_81 = arith.constant 8 : i32
    %332 = arith.muli %c7_i32, %c8_i32_81 : i32
    %333 = tpu.assume_multiple %332, 8 : i32
    %334 = arith.truncf %305 : vector<8x128xf32> to vector<8x128xbf16>
    %cst_82 = arith.constant dense<0.000000e+00> : vector<8x512xf32>
    %335 = tpu.matmul %334, %0, %cst_82 {dimension_numbers = #tpu.dot_dimension_numbers<[1], [0], [0], [1], [0, 0, 1, 1], [], []>} : vector<8x128xbf16>, vector<128x512xbf16>, vector<8x512xf32> -> vector<8x512xf32>
    %336 = arith.index_cast %333 : i32 to index
    %c0_83 = arith.constant 0 : index
    %337 = vector.load %arg13[%336, %c0_83] : memref<64x512xf32, #tpu.memory_space<vmem>>, vector<8x512xf32>
    %338 = arith.addf %335, %337 : vector<8x512xf32>
    %339 = vector.extract_strided_slice %338 {offsets = [0, 0], sizes = [8, 384], strides = [1, 1]} : vector<8x512xf32> to vector<8x384xf32>
    %340 = arith.negf %339 : vector<8x384xf32>
    %341 = math.exp %340 : vector<8x384xf32>
    %cst_84 = arith.constant 1.000000e+00 : f32
    %342 = vector.broadcast %cst_84 : f32 to vector<8x384xf32>
    %343 = arith.addf %342, %341 : vector<8x384xf32>
    %344 = arith.divf %342, %343 : vector<8x384xf32>
    %345 = vector.extract_strided_slice %344 {offsets = [0, 0], sizes = [8, 128], strides = [1, 1]} : vector<8x384xf32> to vector<8x128xf32>
    %346 = vector.extract_strided_slice %344 {offsets = [0, 128], sizes = [8, 128], strides = [1, 1]} : vector<8x384xf32> to vector<8x128xf32>
    %347 = vector.extract_strided_slice %344 {offsets = [0, 256], sizes = [8, 128], strides = [1, 1]} : vector<8x384xf32> to vector<8x128xf32>
    %348 = vector.extract_strided_slice %338 {offsets = [0, 384], sizes = [8, 128], strides = [1, 1]} : vector<8x512xf32> to vector<8x128xf32>
    %349 = math.tanh %348 : vector<8x128xf32>
    %350 = arith.mulf %346, %303 : vector<8x128xf32>
    %351 = arith.mulf %345, %349 : vector<8x128xf32>
    %352 = arith.addf %350, %351 : vector<8x128xf32>
    %353 = math.tanh %352 : vector<8x128xf32>
    %354 = arith.mulf %347, %353 : vector<8x128xf32>
    %c1_i32_85 = arith.constant 1 : i32
    %355 = arith.subi %c7_i32, %c1_i32_85 : i32
    %356 = tpu.concatenate %327, %305 in 1 : vector<8x128xf32>, vector<8x128xf32> -> vector<8x256xf32>
    %357 = arith.truncf %356 : vector<8x256xf32> to vector<8x256xbf16>
    %cst_86 = arith.constant dense<0.000000e+00> : vector<8x512xf32>
    %358 = tpu.matmul %357, %1, %cst_86 {dimension_numbers = #tpu.dot_dimension_numbers<[1], [0], [0], [1], [0, 0, 1, 1], [], []>} : vector<8x256xbf16>, vector<256x512xbf16>, vector<8x512xf32> -> vector<8x512xf32>
    %359 = vector.broadcast %2 : vector<1x512xf32> to vector<8x512xf32>
    %360 = arith.addf %358, %359 : vector<8x512xf32>
    %361 = vector.extract_strided_slice %360 {offsets = [0, 0], sizes = [8, 384], strides = [1, 1]} : vector<8x512xf32> to vector<8x384xf32>
    %362 = arith.negf %361 : vector<8x384xf32>
    %363 = math.exp %362 : vector<8x384xf32>
    %cst_87 = arith.constant 1.000000e+00 : f32
    %364 = vector.broadcast %cst_87 : f32 to vector<8x384xf32>
    %365 = arith.addf %364, %363 : vector<8x384xf32>
    %366 = arith.divf %364, %365 : vector<8x384xf32>
    %367 = vector.extract_strided_slice %366 {offsets = [0, 0], sizes = [8, 128], strides = [1, 1]} : vector<8x384xf32> to vector<8x128xf32>
    %368 = vector.extract_strided_slice %366 {offsets = [0, 128], sizes = [8, 128], strides = [1, 1]} : vector<8x384xf32> to vector<8x128xf32>
    %369 = vector.extract_strided_slice %366 {offsets = [0, 256], sizes = [8, 128], strides = [1, 1]} : vector<8x384xf32> to vector<8x128xf32>
    %370 = vector.extract_strided_slice %360 {offsets = [0, 384], sizes = [8, 128], strides = [1, 1]} : vector<8x512xf32> to vector<8x128xf32>
    %371 = math.tanh %370 : vector<8x128xf32>
    %372 = arith.mulf %368, %325 : vector<8x128xf32>
    %373 = arith.mulf %367, %371 : vector<8x128xf32>
    %374 = arith.addf %372, %373 : vector<8x128xf32>
    %375 = math.tanh %374 : vector<8x128xf32>
    %376 = arith.mulf %369, %375 : vector<8x128xf32>
    %c8_i32_88 = arith.constant 8 : i32
    %377 = arith.muli %355, %c8_i32_88 : i32
    %378 = tpu.assume_multiple %377, 8 : i32
    %379 = arith.index_cast %378 : i32 to index
    %c0_89 = arith.constant 0 : index
    %380 = vector.load %arg14[%379, %c0_89] : memref<64x128xf32, #tpu.memory_space<vmem>>, vector<8x128xf32>
    tpu.vector_store %arg14[%379, %c0_89], %376 {strides = array<i32>} : memref<64x128xf32, #tpu.memory_space<vmem>>, vector<8x128xf32>,
    %c7_i32_90 = arith.constant 7 : i32
    %381 = tpu.concatenate %376, %354 in 1 : vector<8x128xf32>, vector<8x128xf32> -> vector<8x256xf32>
    %382 = arith.truncf %381 : vector<8x256xf32> to vector<8x256xbf16>
    %cst_91 = arith.constant dense<0.000000e+00> : vector<8x512xf32>
    %383 = tpu.matmul %382, %1, %cst_91 {dimension_numbers = #tpu.dot_dimension_numbers<[1], [0], [0], [1], [0, 0, 1, 1], [], []>} : vector<8x256xbf16>, vector<256x512xbf16>, vector<8x512xf32> -> vector<8x512xf32>
    %384 = vector.broadcast %2 : vector<1x512xf32> to vector<8x512xf32>
    %385 = arith.addf %383, %384 : vector<8x512xf32>
    %386 = vector.extract_strided_slice %385 {offsets = [0, 0], sizes = [8, 384], strides = [1, 1]} : vector<8x512xf32> to vector<8x384xf32>
    %387 = arith.negf %386 : vector<8x384xf32>
    %388 = math.exp %387 : vector<8x384xf32>
    %cst_92 = arith.constant 1.000000e+00 : f32
    %389 = vector.broadcast %cst_92 : f32 to vector<8x384xf32>
    %390 = arith.addf %389, %388 : vector<8x384xf32>
    %391 = arith.divf %389, %390 : vector<8x384xf32>
    %392 = vector.extract_strided_slice %391 {offsets = [0, 0], sizes = [8, 128], strides = [1, 1]} : vector<8x384xf32> to vector<8x128xf32>
    %393 = vector.extract_strided_slice %391 {offsets = [0, 128], sizes = [8, 128], strides = [1, 1]} : vector<8x384xf32> to vector<8x128xf32>
    %394 = vector.extract_strided_slice %391 {offsets = [0, 256], sizes = [8, 128], strides = [1, 1]} : vector<8x384xf32> to vector<8x128xf32>
    %395 = vector.extract_strided_slice %385 {offsets = [0, 384], sizes = [8, 128], strides = [1, 1]} : vector<8x512xf32> to vector<8x128xf32>
    %396 = math.tanh %395 : vector<8x128xf32>
    %397 = arith.mulf %393, %374 : vector<8x128xf32>
    %398 = arith.mulf %392, %396 : vector<8x128xf32>
    %399 = arith.addf %397, %398 : vector<8x128xf32>
    %400 = math.tanh %399 : vector<8x128xf32>
    %401 = arith.mulf %394, %400 : vector<8x128xf32>
    %c56 = arith.constant 56 : index
    %c0_93 = arith.constant 0 : index
    %402 = vector.load %arg14[%c56, %c0_93] : memref<64x128xf32, #tpu.memory_space<vmem>>, vector<8x128xf32>
    tpu.vector_store %arg14[%c56, %c0_93], %401 {strides = array<i32>} : memref<64x128xf32, #tpu.memory_space<vmem>>, vector<8x128xf32>,
    %c0_94 = arith.constant 0 : index
    %c0_95 = arith.constant 0 : index
    %403 = vector.load %arg14[%c0_94, %c0_95] : memref<64x128xf32, #tpu.memory_space<vmem>>, vector<64x128xf32>
    %404 = arith.truncf %403 : vector<64x128xf32> to vector<64x128xbf16>
    %c0_96 = arith.constant 0 : index
    %c0_97 = arith.constant 0 : index
    %405 = vector.load %arg8[%c0_96, %c0_97] : memref<128x768xbf16, #tpu.memory_space<vmem>>, vector<128x768xbf16>
    %cst_98 = arith.constant dense<0.000000e+00> : vector<64x768xf32>
    %406 = tpu.matmul %404, %405, %cst_98 {dimension_numbers = #tpu.dot_dimension_numbers<[1], [0], [0], [1], [0, 0, 1, 1], [], []>} : vector<64x128xbf16>, vector<128x768xbf16>, vector<64x768xf32> -> vector<64x768xf32>
    %c0_99 = arith.constant 0 : index
    %c0_100 = arith.constant 0 : index
    %407 = vector.load %arg9[%c0_99, %c0_100] : memref<1x768xf32, #tpu.memory_space<vmem>>, vector<1x768xf32>
    %408 = vector.broadcast %407 : vector<1x768xf32> to vector<64x768xf32>
    %409 = arith.addf %406, %408 : vector<64x768xf32>
    %c0_101 = arith.constant 0 : index
    %c0_102 = arith.constant 0 : index
    %410 = vector.load %arg10[%c0_101, %c0_102] : memref<64x768xf32, #tpu.memory_space<vmem>>, vector<64x768xf32>
    tpu.vector_store %arg10[%c0_101, %c0_102], %409 {strides = array<i32>} : memref<64x768xf32, #tpu.memory_space<vmem>>, vector<64x768xf32>,
    %c0_103 = arith.constant 0 : index
    %c0_104 = arith.constant 0 : index
    %c0_105 = arith.constant 0 : index
    %411 = vector.load %arg11[%c0_103, %c0_104, %c0_105] : memref<2x8x128xf32, #tpu.memory_space<vmem>>, vector<1x8x128xf32>
    %412 = vector.shape_cast %411 : vector<1x8x128xf32> to vector<8x128xf32>
    %413 = vector.shape_cast %354 : vector<8x128xf32> to vector<1x8x128xf32>
    tpu.vector_store %arg11[%c0_103, %c0_104, %c0_105], %413 {strides = array<i32>} : memref<2x8x128xf32, #tpu.memory_space<vmem>>, vector<1x8x128xf32>,
    %c1_106 = arith.constant 1 : index
    %c0_107 = arith.constant 0 : index
    %c0_108 = arith.constant 0 : index
    %414 = vector.load %arg11[%c1_106, %c0_107, %c0_108] : memref<2x8x128xf32, #tpu.memory_space<vmem>>, vector<1x8x128xf32>
    %415 = vector.shape_cast %414 : vector<1x8x128xf32> to vector<8x128xf32>
    %416 = vector.shape_cast %401 : vector<8x128xf32> to vector<1x8x128xf32>
    tpu.vector_store %arg11[%c1_106, %c0_107, %c0_108], %416 {strides = array<i32>} : memref<2x8x128xf32, #tpu.memory_space<vmem>>, vector<1x8x128xf32>,
    %c0_109 = arith.constant 0 : index
    %c0_110 = arith.constant 0 : index
    %c0_111 = arith.constant 0 : index
    %417 = vector.load %arg12[%c0_109, %c0_110, %c0_111] : memref<2x8x128xf32, #tpu.memory_space<vmem>>, vector<1x8x128xf32>
    %418 = vector.shape_cast %417 : vector<1x8x128xf32> to vector<8x128xf32>
    %419 = vector.shape_cast %352 : vector<8x128xf32> to vector<1x8x128xf32>
    tpu.vector_store %arg12[%c0_109, %c0_110, %c0_111], %419 {strides = array<i32>} : memref<2x8x128xf32, #tpu.memory_space<vmem>>, vector<1x8x128xf32>,
    %c1_112 = arith.constant 1 : index
    %c0_113 = arith.constant 0 : index
    %c0_114 = arith.constant 0 : index
    %420 = vector.load %arg12[%c1_112, %c0_113, %c0_114] : memref<2x8x128xf32, #tpu.memory_space<vmem>>, vector<1x8x128xf32>
    %421 = vector.shape_cast %420 : vector<1x8x128xf32> to vector<8x128xf32>
    %422 = vector.shape_cast %399 : vector<8x128xf32> to vector<1x8x128xf32>
    tpu.vector_store %arg12[%c1_112, %c0_113, %c0_114], %422 {strides = array<i32>} : memref<2x8x128xf32, #tpu.memory_space<vmem>>, vector<1x8x128xf32>,
    return
  }
}

</mosaic_0001>

<bundles_post_ra>
// kernel: lstm_model_forward.1
= control target key start
LH: loop header
LB: loop body
LE: loop exit
PB: predicated region body
PF: predicated region fallthrough
CT: control target
= control target key end

     0   :  { %18 = vsyncpa [#allocation5], 0  ;;  %s7714_s0 = inlined_call_operand.vmem [shape: bf16[64,128], index: 0, kind: input, shape index: {}]   ;;  %s7715_s1 = inlined_call_operand.vmem [shape: f32[2,8,128], index: 1, kind: input, shape index: {}]   ;;  %s7716_s2 = inlined_call_operand.hbm [shape: f32[2,8,128], index: 2, kind: input, shape index: {}]   ;;  %s7717_s3 = inlined_call_operand.hbm [shape: bf16[128,512], index: 3, kind: input, shape index: {}]   ;;  %s7718_s4 = inlined_call_operand.hbm [shape: bf16[128,512], index: 4, kind: input, shape index: {}]   ;;  %s7719_s5 = inlined_call_operand.hbm [shape: f32[1,512], index: 5, kind: input, shape index: {}]   ;;  %s7720_s6 = inlined_call_operand.hbm [shape: bf16[256,512], index: 6, kind: input, shape index: {}]   ;;  %s7721_s7 = inlined_call_operand.hbm [shape: f32[1,512], index: 7, kind: input, shape index: {}]   ;;  %s7722_s8 = inlined_call_operand.vmem [shape: bf16[128,768], index: 8, kind: input, shape index: {}]   ;;  %s7723_s9 = inlined_call_operand.hbm [shape: f32[1,768], index: 9, kind: input, shape index: {}]   ;;  %s7724_s10 = inlined_call_operand.vmem [shape: f32[64,768], index: 10, kind: output, shape index: {0}]   ;;  %s7725_s11 = inlined_call_operand.hbm [shape: f32[2,8,128], index: 11, kind: output, shape index: {1}]   ;;  %s7726_s12 = inlined_call_operand.hbm [shape: f32[2,8,128], index: 12, kind: output, shape index: {2}]  }
   0x1   :  { %19 = vsyncpa [#allocation8], 0 }
   0x2   :  { %20 = vsyncpa [#allocation11], 0 }
   0x3   :  { %21 = vsyncpa [#allocation14], 0 }
   0x4   :  { %22 = vsyncpa [#allocation6], 0  ;;  %s45_s23 = sshll.u32 %s7717_s3, 4  ;;  %s46_s23 = int_to_ptr.hbm [resolvable:$true] %s45_s23 }
   0x5   :  { %23 = vsyncpa [#allocation18], 0  ;;  %s5512_s24 = smov [#allocation7]   ;;  %s72_s28 = sshll.u32 %s7719_s5, 4  ;;  %s73_s28 = int_to_ptr.hbm [resolvable:$true] %s72_s28 }
   0x6   :  { %s47_s25 = sshll.u32 %s5512_s24, 4  ;;  %s5513_s29 = smov 256   ;;  %s48_s25 = int_to_ptr.vmem [resolvable:$true] %s47_s25 }
   0x7   :  { %s5514_s30 = smov 16   ;;  %s5515_s13 = smov [#allocation10]  }
   0x8   :  { %53 = dma.hbm_to_vmem [thread:$0]  %s46_s23, 4096, %s48_s25, [#allocation8], %s5513_s29, %s5513_s29, %s5514_s30  }
   0x9   :  { %s74_s14 = sshll.u32 %s5515_s13, 4  ;;  %s96_s16 = sshll.u32 %s7721_s7, 4  ;;  %s75_s14 = int_to_ptr.vmem [resolvable:$true] %s74_s14  ;;  %s97_s16 = int_to_ptr.hbm [resolvable:$true] %s96_s16 }
   0xa   :  { %77 = dma.hbm_to_vmem [thread:$0]  %s73_s28, 64, %s75_s14, [#allocation11]  }
   0xb   :  { %s32_s5 = sshll.u32 %s7716_s2, 4  ;;  %s5516_s19 = smov [#allocation13]   ;;  %s33_s5 = int_to_ptr.hbm [resolvable:$true] %s32_s5 }
   0xc   :  { %s98_s20 = sshll.u32 %s5516_s19, 4  ;;  %s5517_s21 = smov [#allocation4]   ;;  %s99_s20 = int_to_ptr.vmem [resolvable:$true] %s98_s20 }
   0xd   :  { %101 = dma.hbm_to_vmem [thread:$0]  %s97_s16, 64, %s99_s20, [#allocation14]  }
   0xe   :  { %s34_s22 = sshll.u32 %s5517_s21, 4  ;;  %s5518_s23 = smov 128   ;;  %s35_s22 = int_to_ptr.vmem [resolvable:$true] %s34_s22 }
   0xf   :  { %s5519_s24 = smov 8   ;;  %s58_s26 = sshll.u32 %s7718_s4, 4  ;;  %s59_s26 = int_to_ptr.hbm [resolvable:$true] %s58_s26 }
  0x10   :  { %40 = dma.hbm_to_vmem [thread:$0]  %s33_s5, 256, %s35_s22, [#allocation5], %s5518_s23, %s5518_s23, %s5519_s24  }
  0x11   :  { %s5520_s2 = smov [#allocation9]   ;;  %s82_s14 = sshll.u32 %s7720_s6, 4  ;;  %s83_s14 = int_to_ptr.hbm [resolvable:$true] %s82_s14 }
  0x12   :  { %s60_s27 = sshll.u32 %s5520_s2, 4  ;;  %s5521_s15 = smov [#allocation12]   ;;  %s61_s27 = int_to_ptr.vmem [resolvable:$true] %s60_s27 }
  0x13   :  { %66 = dma.hbm_to_vmem [thread:$0]  %s59_s26, 4096, %s61_s27, [#allocation8], %s5513_s29, %s5513_s29, %s5514_s30  }
  0x14   :  { %s84_s3 = sshll.u32 %s5521_s15, 4  ;;  %s109_s18 = sshll.u32 %s7723_s9, 4  ;;  %s85_s3 = int_to_ptr.vmem [resolvable:$true] %s84_s3  ;;  %s110_s18 = int_to_ptr.hbm [resolvable:$true] %s109_s18 }
  0x15   :  { %90 = dma.hbm_to_vmem [thread:$0]  %s83_s14, 8192, %s85_s3, [#allocation11], %s5513_s29, %s5513_s29, %s5514_s30  }
  0x16   :  { %s5522_s4 = smov [#allocation15]  }
  0x17   :  { %s111_s5 = sshll.u32 %s5522_s4, 4  ;;  %s112_s5 = int_to_ptr.vmem [resolvable:$true] %s111_s5 }
  0x18   :  { %114 = dma.hbm_to_vmem [thread:$0]  %s110_s18, 96, %s112_s5, [#allocation14]  }
  0x19   :  { %5500 = dma.done.wait [#allocation5], 256  }
  0x1a   :  { %5501 = vsyncadd [#allocation5], 4294967040 }
  0x1b   :  { %5502 = dma.done.wait [#allocation8], 8192  }
  0x1c   :  { %5503 = vsyncadd [#allocation8], 4294959104 }
  0x1d   :  { %5504 = dma.done.wait [#allocation11], 8256  }
  0x1e   :  { %5505 = vsyncadd [#allocation11], 4294959040 }
  0x1f   :  { %5506 = dma.done.wait [#allocation14], 160  }
  0x20   :  { %5507 = vsyncadd [#allocation14], 4294967136  ;;  %v4180_v0 = vld [vmem:[#allocation7 + $0xe0] sm:$0xf]  ;;  %v4949_v1 = vld [vmem:[#allocation7 + $0xec] sm:$0xf0] }
  0x21   :  { %v4947_v2 = vld [vmem:[#allocation7 + $0xe4] sm:$0xf]  ;;  %v4181_v3 = vor.u32 %v4949_v1, %v4180_v0  ;;  %v4182_v4 = vld [vmem:[#allocation7 + $0xf0] sm:$0xf0]  ;;  %v4164_v5 = vld [vmem:[#allocation7 + $0xc0] sm:$0xf] }
  0x22   :  { %v4945_v6 = vld [vmem:[#allocation7 + $0xcc] sm:$0xf0]  ;;  %v4185_v7 = vor.u32 %v4947_v2, %v4182_v4  ;;  %v4943_v8 = vld [vmem:[#allocation7 + $0xc4] sm:$0xf]  ;;  %v4166_v9 = vld [vmem:[#allocation7 + $0xd0] sm:$0xf0] }
  0x23   :  { %4999 = vmatpush.bf16.msra.mxu2 %v4181_v3  ;;  %v4165_v10 = vor.u32 %v4945_v6, %v4164_v5  ;;  %474 = vmatpush.bf16.msra.mxu0 %v4181_v3  ;;  %v4169_v11 = vor.u32 %v4943_v8, %v4166_v9  ;;  %v4148_v12 = vld [vmem:[#allocation7 + $0xa0] sm:$0xf]  ;;  %v4941_v13 = vld [vmem:[#allocation7 + $0xac] sm:$0xf0]  ;;  %v4939_v14 = vld [vmem:[#allocation7 + $0xa4] sm:$0xf] }
  0x24   :  { %5007 = vmatpush.bf16.msra.mxu3 %v4185_v7  ;;  %503 = vmatpush.bf16.msra.mxu1 %v4185_v7  ;;  %v4150_v15 = vld [vmem:[#allocation7 + $0xb0] sm:$0xf0]  ;;  %v4149_v16 = vor.u32 %v4941_v13, %v4148_v12  ;;  %v4132_v18 = vld [vmem:[#allocation7 + $0x80] sm:$0xf]  ;;  %v4937_v19 = vld [vmem:[#allocation7 + $0x8c] sm:$0xf0] }
  0x25   :  { %v4153_v17 = vor.u32 %v4939_v14, %v4150_v15  ;;  %v4935_v20 = vld [vmem:[#allocation7 + $0x84] sm:$0xf]  ;;  %v4134_v21 = vld [vmem:[#allocation7 + $0x90] sm:$0xf0]  ;;  %v4133_v22 = vor.u32 %v4937_v19, %v4132_v18  ;;  %v4116_v24 = vld [vmem:[#allocation7 + $0x60] sm:$0xf] }
  0x26   :  { %v4137_v23 = vor.u32 %v4935_v20, %v4134_v21  ;;  %v4933_v25 = vld [vmem:[#allocation7 + $0x6c] sm:$0xf0]  ;;  %v4931_v26 = vld [vmem:[#allocation7 + $0x64] sm:$0xf]  ;;  %v4118_v27 = vld [vmem:[#allocation7 + $0x70] sm:$0xf0] }
  0x27   :  { %5000 = vmatpush.bf16.msra.mxu2 %v4165_v10  ;;  %475 = vmatpush.bf16.msra.mxu0 %v4165_v10  ;;  %v4117_v28 = vor.u32 %v4933_v25, %v4116_v24  ;;  %v4121_v29 = vor.u32 %v4931_v26, %v4118_v27  ;;  %v4100_v30 = vld [vmem:[#allocation7 + $0x40] sm:$0xf]  ;;  %v4929_v31 = vld [vmem:[#allocation7 + $0x4c] sm:$0xf0]  ;;  %v4927_v32 = vld [vmem:[#allocation7 + $0x44] sm:$0xf] }
  0x28   :  { %5008 = vmatpush.bf16.msra.mxu3 %v4169_v11  ;;  %504 = vmatpush.bf16.msra.mxu1 %v4169_v11  ;;  %v4102_v33 = vld [vmem:[#allocation7 + $0x50] sm:$0xf0]  ;;  %v4101_v34 = vor.u32 %v4929_v31, %v4100_v30  ;;  %v4084_v36 = vld [vmem:[#allocation7 + $0x20] sm:$0xf]  ;;  %v4925_v37 = vld [vmem:[#allocation7 + $0x2c] sm:$0xf0] }
  0x29   :  { %v4105_v35 = vor.u32 %v4927_v32, %v4102_v33  ;;  %v4923_v38 = vld [vmem:[#allocation7 + $0x24] sm:$0xf]  ;;  %v4086_v39 = vld [vmem:[#allocation7 + $0x30] sm:$0xf0]  ;;  %v4085_v40 = vor.u32 %v4925_v37, %v4084_v36  ;;  %v4068_v42 = vld [vmem:[#allocation7] sm:$0xf] }
  0x2a   :  { %v4089_v41 = vor.u32 %v4923_v38, %v4086_v39  ;;  %v4921_v43 = vld [vmem:[#allocation7 + $0xc] sm:$0xf0]  ;;  %v4919_v44 = vld [vmem:[#allocation7 + $0x4] sm:$0xf]  ;;  %v4070_v45 = vld [vmem:[#allocation7 + $0x10] sm:$0xf0] }
  0x2b   :  { %5001 = vmatpush.bf16.msra.mxu2 %v4149_v16  ;;  %476 = vmatpush.bf16.msra.mxu0 %v4149_v16  ;;  %v4188_v46 = vld [vmem:[#allocation7 + $0xe8] sm:$0xf]  ;;  %v4950_v47 = vld [vmem:[#allocation7 + $0xf4] sm:$0xf0]  ;;  %v4948_v48 = vld [vmem:[#allocation7 + $0xec] sm:$0xf]  ;;  %v4069_v50 = vor.u32 %v4921_v43, %v4068_v42  ;;  %v4073_v51 = vor.u32 %v4919_v44, %v4070_v45 }
  0x2c   :  { %5009 = vmatpush.bf16.msra.mxu3 %v4153_v17  ;;  %505 = vmatpush.bf16.msra.mxu1 %v4153_v17  ;;  %v4190_v49 = vld [vmem:[#allocation7 + $0xf8] sm:$0xf0]  ;;  %v5626_v52 = vld [vmem:[%s7714_s0 + $0x10] sm:$0xff]  ;;  %v4189_v53 = vor.u32 %v4950_v47, %v4188_v46  ;;  %v4172_v54 = vld [vmem:[#allocation7 + $0xc8] sm:$0xf]  ;;  %s4007_s30 = sshll.u32 %s7725_s11, 4  ;;  %s4008_s30 = int_to_ptr.hbm [resolvable:$true] %s4007_s30 }
  0x2d   :  { %v4308_v55 = vld [vmem:[#allocation9 + $0xe0] sm:$0xf]  ;;  %v4849_v56 = vld [vmem:[#allocation9 + $0xec] sm:$0xf0]  ;;  %v4193_v57 = vor.u32 %v4948_v48, %v4190_v49  ;;  %v4946_v58 = vld [vmem:[#allocation7 + $0xd4] sm:$0xf0] }
  0x2e   :  { %v4944_v59 = vld [vmem:[#allocation7 + $0xcc] sm:$0xf]  ;;  %v4174_v60 = vld [vmem:[#allocation7 + $0xd8] sm:$0xf0]  ;;  %v5631_v61 = vld [vmem:[%s7714_s0] sm:$0xff]  ;;  %v5633_v0 = vor.u32 %v4849_v56, %v4308_v55  ;;  %v4173_v1 = vor.u32 %v4946_v58, %v4172_v54  ;;  %s5523_s19 = smov [#allocation16]  }
  0x2f   :  { %5002 = vmatpush.bf16.msra.mxu2 %v4133_v22  ;;  %477 = vmatpush.bf16.msra.mxu0 %v4133_v22  ;;  %v4847_v62 = vld [vmem:[#allocation9 + $0xe4] sm:$0xf]  ;;  %v4310_v63 = vld [vmem:[#allocation9 + $0xf0] sm:$0xf0]  ;;  %v4292_v2 = vld [vmem:[#allocation9 + $0xc0] sm:$0xf]  ;;  %v4177_v4 = vor.u32 %v4944_v59, %v4174_v60 }
  0x30   :  { %5010 = vmatpush.bf16.msra.mxu3 %v4137_v23  ;;  %506 = vmatpush.bf16.msra.mxu1 %v4137_v23  ;;  %7924 = vst [vmem:[#allocation25_spill] sm:$0xff] %v5633_v0  ;;  %v4845_v3 = vld [vmem:[#allocation9 + $0xcc] sm:$0xf0]  ;;  %v4156_v5 = vld [vmem:[#allocation7 + $0xa8] sm:$0xf]  ;;  %v5635_v8 = vor.u32 %v4847_v62, %v4310_v63  ;;  %v5667_v47 = vld [vmem:[%s7714_s0 + $0x8] sm:$0xff] }
  0x31   :  { %v4942_v6 = vld [vmem:[#allocation7 + $0xb4] sm:$0xf0]  ;;  %v4940_v7 = vld [vmem:[#allocation7 + $0xac] sm:$0xf]  ;;  %v4158_v9 = vld [vmem:[#allocation7 + $0xb8] sm:$0xf0]  ;;  %v5641_v12 = vor.u32 %v4845_v3, %v4292_v2 }
  0x32   :  { %7925 = vst [vmem:[#allocation26_spill] sm:$0xff] %v5635_v8  ;;  %v4843_v10 = vld [vmem:[#allocation9 + $0xc4] sm:$0xf]  ;;  %v4294_v11 = vld [vmem:[#allocation9 + $0xd0] sm:$0xf0]  ;;  %v4157_v13 = vor.u32 %v4942_v6, %v4156_v5  ;;  %v4161_v16 = vor.u32 %v4940_v7, %v4158_v9  ;;  %v5659_v37 = vld [vmem:[%s7714_s0 + $0x18] sm:$0xff] }
  0x33   :  { %5003 = vmatpush.bf16.msra.mxu2 %v4117_v28  ;;  %478 = vmatpush.bf16.msra.mxu0 %v4117_v28  ;;  %7926 = vst [vmem:[#allocation27_spill] sm:$0xff] %v5641_v12  ;;  %v4276_v14 = vld [vmem:[#allocation9 + $0xa0] sm:$0xf]  ;;  %v4841_v15 = vld [vmem:[#allocation9 + $0xac] sm:$0xf0]  ;;  %v5645_v20 = vor.u32 %v4843_v10, %v4294_v11  ;;  %s5524_s20 = smov [#allocation17]  }
  0x34   :  { %5011 = vmatpush.bf16.msra.mxu3 %v4121_v29  ;;  %507 = vmatpush.bf16.msra.mxu1 %v4121_v29  ;;  %v4140_v17 = vld [vmem:[#allocation7 + $0x88] sm:$0xf]  ;;  %v4938_v18 = vld [vmem:[#allocation7 + $0x94] sm:$0xf0]  ;;  %v4936_v19 = vld [vmem:[#allocation7 + $0x8c] sm:$0xf]  ;;  %v5648_v24 = vor.u32 %v4841_v15, %v4276_v14 }
  0x35   :  { %7927 = vst [vmem:[#allocation28_spill] sm:$0xff] %v5645_v20  ;;  %v4142_v21 = vld [vmem:[#allocation7 + $0x98] sm:$0xf0]  ;;  %v4839_v22 = vld [vmem:[#allocation9 + $0xa4] sm:$0xf]  ;;  %v4141_v25 = vor.u32 %v4938_v18, %v4140_v17  ;;  %s4018_s21 = sshll.u32 %s5524_s20, 4  ;;  %s4019_s21 = int_to_ptr.vmem [resolvable:$true] %s4018_s21 }
  0x36   :  { %v4278_v23 = vld [vmem:[#allocation9 + $0xb0] sm:$0xf0]  ;;  %7928 = vst [vmem:[#allocation29_spill] sm:$0xff] %v5648_v24  ;;  %v4260_v26 = vld [vmem:[#allocation9 + $0x80] sm:$0xf]  ;;  %v4145_v28 = vor.u32 %v4936_v19, %v4142_v21  ;;  %s4020_s7 = sshll.u32 %s7726_s12, 4  ;;  %s4021_s7 = int_to_ptr.hbm [resolvable:$true] %s4020_s7 }
  0x37   :  { %5004 = vmatpush.bf16.msra.mxu2 %v4101_v34  ;;  %479 = vmatpush.bf16.msra.mxu0 %v4101_v34  ;;  %v4837_v27 = vld [vmem:[#allocation9 + $0x8c] sm:$0xf0]  ;;  %v4124_v29 = vld [vmem:[#allocation7 + $0x68] sm:$0xf]  ;;  %v4934_v30 = vld [vmem:[#allocation7 + $0x74] sm:$0xf0]  ;;  %v5651_v32 = vor.u32 %v4839_v22, %v4278_v23 }
  0x38   :  { %5012 = vmatpush.bf16.msra.mxu3 %v4105_v35  ;;  %508 = vmatpush.bf16.msra.mxu1 %v4105_v35  ;;  %v4932_v31 = vld [vmem:[#allocation7 + $0x6c] sm:$0xf]  ;;  %v4126_v33 = vld [vmem:[#allocation7 + $0x78] sm:$0xf0]  ;;  %v4835_v34 = vld [vmem:[#allocation9 + $0x84] sm:$0xf]  ;;  %v5654_v36 = vor.u32 %v4837_v27, %v4260_v26  ;;  %v4125_v38 = vor.u32 %v4934_v30, %v4124_v29 }
  0x39   :  { %7929 = vst [vmem:[#allocation30_spill] sm:$0xff] %v5651_v32  ;;  %v4262_v35 = vld [vmem:[#allocation9 + $0x90] sm:$0xf0]  ;;  %v4108_v39 = vld [vmem:[#allocation7 + $0x48] sm:$0xf]  ;;  %v4129_v42 = vor.u32 %v4932_v31, %v4126_v33 }
  0x3a   :  { %7930 = vst [vmem:[#allocation31_spill] sm:$0xff] %v5654_v36  ;;  %v4930_v43 = vld [vmem:[#allocation7 + $0x54] sm:$0xf0]  ;;  %v4928_v44 = vld [vmem:[#allocation7 + $0x4c] sm:$0xf]  ;;  %v5662_v46 = vor.u32 %v4835_v34, %v4262_v35  ;;  %v622_v35 = vld [vmem:[%s7715_s1] sm:$0xff] }
  0x3b   :  { %5005 = vmatpush.bf16.msra.mxu2 %v4085_v40  ;;  %480 = vmatpush.bf16.msra.mxu0 %v4085_v40  ;;  %v4244_v40 = vld [vmem:[#allocation9 + $0x60] sm:$0xf]  ;;  %v4110_v45 = vld [vmem:[#allocation7 + $0x58] sm:$0xf0]  ;;  %v4831_v48 = vld [vmem:[#allocation9 + $0x64] sm:$0xf] }
  0x3c   :  { %5013 = vmatpush.bf16.msra.mxu3 %v4089_v41  ;;  %509 = vmatpush.bf16.msra.mxu1 %v4089_v41  ;;  %v4833_v41 = vld [vmem:[#allocation9 + $0x6c] sm:$0xf0]  ;;  %7931 = vst [vmem:[#allocation32_spill] sm:$0xff] %v5662_v46  ;;  %v4246_v49 = vld [vmem:[#allocation9 + $0x70] sm:$0xf0]  ;;  %v4113_v55 = vor.u32 %v4928_v44, %v4110_v45  ;;  %v5709_v44 = vpack.c.bf16 %v622_v35, %v622_v35 }
  0x3d   :  { %v4829_v54 = vld [vmem:[#allocation9 + $0x4c] sm:$0xf0]  ;;  %v4092_v56 = vld [vmem:[#allocation7 + $0x28] sm:$0xf]  ;;  %v4924_v58 = vld [vmem:[#allocation7 + $0x2c] sm:$0xf]  ;;  %v5673_v59 = vor.u32 %v4831_v48, %v4246_v49 }
  0x3e   :  { %v4094_v60 = vld [vmem:[#allocation7 + $0x38] sm:$0xf0]  ;;  %v4827_v62 = vld [vmem:[#allocation9 + $0x44] sm:$0xf]  ;;  %v4230_v63 = vld [vmem:[#allocation9 + $0x50] sm:$0xf0] }
  0x3f   :  { %5006 = vmatpush.bf16.msra.mxu2 %v4069_v50  ;;  %481 = vmatpush.bf16.msra.mxu0 %v4069_v50  ;;  %v5670_v50 = vor.u32 %v4833_v41, %v4244_v40  ;;  %7933 = vst [vmem:[#allocation34_spill] sm:$0xff] %v5673_v59  ;;  %v4076_v3 = vld [vmem:[#allocation7 + $0x8] sm:$0xf]  ;;  %v4825_v5 = vld [vmem:[#allocation9 + $0x2c] sm:$0xf0]  ;;  %v4097_v6 = vor.u32 %v4924_v58, %v4094_v60 }
  0x40   :  { %5014 = vmatpush.bf16.msra.mxu3 %v4073_v51  ;;  %510 = vmatpush.bf16.msra.mxu1 %v4073_v51  ;;  %v4109_v51 = vor.u32 %v4930_v43, %v4108_v39  ;;  %v4922_v7 = vld [vmem:[#allocation7 + $0x14] sm:$0xf0]  ;;  %v4920_v9 = vld [vmem:[#allocation7 + $0xc] sm:$0xf]  ;;  %v4078_v10 = vld [vmem:[#allocation7 + $0x18] sm:$0xf0]  ;;  %v5683_v11 = vor.u32 %v4827_v62, %v4230_v63 }
  0x41   :  { %7932 = vst [vmem:[#allocation33_spill] sm:$0xff] %v5670_v50  ;;  %v4850_v14 = vld [vmem:[#allocation9 + $0xf4] sm:$0xf0]  ;;  %v4823_v15 = vld [vmem:[#allocation9 + $0x24] sm:$0xf]  ;;  %v4077_v21 = vor.u32 %v4922_v7, %v4076_v3 }
  0x42   :  { %492 = vmatmul.bf16.vlgmr.msra.gmra.mxu2 %v5626_v52  ;;  %482 = vmatmul.bf16.vlgmr.msra.gmra.mxu0 %v5631_v61  ;;  %7935 = vst [vmem:[#allocation36_spill] sm:$0xff] %v5683_v11  ;;  %v4214_v17 = vld [vmem:[#allocation9 + $0x30] sm:$0xf0]  ;;  %v4848_v18 = vld [vmem:[#allocation9 + $0xec] sm:$0xf] }
  0x43   :  { %532 = vmatpush.bf16.msrb.mxu2 %v4189_v53  ;;  %521 = vmatmul.bf16.vlgmr.msra.gmra.mxu3 %v5626_v52  ;;  %v4228_v53 = vld [vmem:[#allocation9 + $0x40] sm:$0xf]  ;;  %v4318_v19 = vld [vmem:[#allocation9 + $0xf8] sm:$0xf0]  ;;  %v4821_v23 = vld [vmem:[#allocation9 + $0xc] sm:$0xf0]  ;;  %v5691_v29 = vor.u32 %v4823_v15, %v4214_v17 }
  0x44   :  { %561 = vmatpush.bf16.msrb.mxu3 %v4193_v57  ;;  %789 = vmatpush.bf16.msrb.mxu0 %v5633_v0  ;;  %v4926_v57 = vld [vmem:[#allocation7 + $0x34] sm:$0xf0]  ;;  %v4196_v22 = vld [vmem:[#allocation9] sm:$0xf]  ;;  %v4300_v27 = vld [vmem:[#allocation9 + $0xc8] sm:$0xf]  ;;  %v5693_v30 = vor.u32 %v4848_v18, %v4318_v19 }
  0x45   :  { %511 = vmatmul.bf16.vlgmr.msra.gmra.mxu1 %v5631_v61  ;;  %v4093_v2 = vor.u32 %v4926_v57, %v4092_v56  ;;  %7938 = vst [vmem:[#allocation39_spill] sm:$0xff] %v5691_v29  ;;  %v5696_v31 = vor.u32 %v4821_v23, %v4196_v22  ;;  %v4819_v33 = vld [vmem:[#allocation9 + $0x4] sm:$0xf]  ;;  %v4198_v34 = vld [vmem:[#allocation9 + $0x10] sm:$0xf0] }
  0x46   :  { %802 = vmatpush.bf16.msrb.mxu1 %v5635_v8  ;;  %7939 = vst [vmem:[#allocation40_spill] sm:$0xff] %v5693_v30  ;;  %v4844_v39 = vld [vmem:[#allocation9 + $0xcc] sm:$0xf]  ;;  %v4302_v40 = vld [vmem:[#allocation9 + $0xd8] sm:$0xf0]  ;;  %v5706_v41 = vor.u32 %v4819_v33, %v4198_v34 }
  0x47   :  { %533 = vmatpush.bf16.msrb.mxu2 %v4173_v1  ;;  %v5679_v1 = vor.u32 %v4829_v54, %v4228_v53  ;;  %7940 = vst [vmem:[#allocation41_spill] sm:$0xff] %v5696_v31  ;;  %v4842_v43 = vld [vmem:[#allocation9 + $0xb4] sm:$0xf0]  ;;  %v5711_v45 = vor.u32 %v4844_v39, %v4302_v40  ;;  %v4840_v49 = vld [vmem:[#allocation9 + $0xac] sm:$0xf] }
  0x48   :  { %562 = vmatpush.bf16.msrb.mxu3 %v4177_v4  ;;  %790 = vmatpush.bf16.msrb.mxu0 %v5641_v12  ;;  %v4212_v4 = vld [vmem:[#allocation9 + $0x20] sm:$0xf]  ;;  %7942 = vst [vmem:[#allocation43_spill] sm:$0xff] %v5706_v41  ;;  %v4268_v53 = vld [vmem:[#allocation9 + $0x88] sm:$0xf] }
  0x49   :  { %7934 = vst [vmem:[#allocation35_spill] sm:$0xff] %v5679_v1  ;;  %v4838_v54 = vld [vmem:[#allocation9 + $0x94] sm:$0xf0]  ;;  %v4836_v57 = vld [vmem:[#allocation9 + $0x8c] sm:$0xf] }
  0x4a   :  { %803 = vmatpush.bf16.msrb.mxu1 %v5645_v20  ;;  %7943 = vst [vmem:[#allocation44_spill] sm:$0xff] %v5711_v45  ;;  %v5727_v56 = vor.u32 %v4838_v54, %v4268_v53  ;;  %v4270_v58 = vld [vmem:[#allocation9 + $0x98] sm:$0xf0]  ;;  %v4252_v60 = vld [vmem:[#allocation9 + $0x68] sm:$0xf] }
  0x4b   :  { %534 = vmatpush.bf16.msrb.mxu2 %v4157_v13  ;;  %v4316_v13 = vld [vmem:[#allocation9 + $0xe8] sm:$0xf]  ;;  %v4834_v62 = vld [vmem:[#allocation9 + $0x74] sm:$0xf0]  ;;  %v4254_v3 = vld [vmem:[#allocation9 + $0x78] sm:$0xf0] }
  0x4c   :  { %563 = vmatpush.bf16.msrb.mxu3 %v4161_v16  ;;  %791 = vmatpush.bf16.msrb.mxu0 %v5648_v24  ;;  %v5686_v16 = vor.u32 %v4825_v5, %v4212_v4  ;;  %v5688_v26 = vor.u32 %v4850_v14, %v4316_v13  ;;  %7946 = vst [vmem:[#allocation47_spill] sm:$0xff] %v5727_v56  ;;  %v4236_v4 = vld [vmem:[#allocation9 + $0x48] sm:$0xf]  ;;  %v4830_v5 = vld [vmem:[#allocation9 + $0x54] sm:$0xf0] }
  0x4d   :  { %v5735_v63 = vor.u32 %v4834_v62, %v4252_v60  ;;  %v5743_v7 = vor.u32 %v4830_v5, %v4236_v4  ;;  %v4828_v13 = vld [vmem:[#allocation9 + $0x4c] sm:$0xf]  ;;  %v4238_v15 = vld [vmem:[#allocation9 + $0x58] sm:$0xf0]  ;;  %v4204_v17 = vld [vmem:[#allocation9 + $0x8] sm:$0xf] }
  0x4e   :  { %804 = vmatpush.bf16.msrb.mxu1 %v5651_v32  ;;  %7936 = vst [vmem:[#allocation37_spill] sm:$0xff] %v5686_v16  ;;  %v4822_v18 = vld [vmem:[#allocation9 + $0x14] sm:$0xf0]  ;;  %v5755_v19 = vor.u32 %v4828_v13, %v4238_v15  ;;  %v4222_v22 = vld [vmem:[#allocation9 + $0x38] sm:$0xf0] }
  0x4f   :  { %535 = vmatpush.bf16.msrb.mxu2 %v4141_v25  ;;  %v4081_v25 = vor.u32 %v4920_v9, %v4078_v10  ;;  %7937 = vst [vmem:[#allocation38_spill] sm:$0xff] %v5688_v26  ;;  %v4220_v9 = vld [vmem:[#allocation9 + $0x28] sm:$0xf]  ;;  %v4826_v10 = vld [vmem:[#allocation9 + $0x34] sm:$0xf0]  ;;  %v5758_v23 = vor.u32 %v4822_v18, %v4204_v17 }
  0x50   :  { %564 = vmatpush.bf16.msrb.mxu3 %v4145_v28  ;;  %792 = vmatpush.bf16.msrb.mxu0 %v5654_v36  ;;  %v4846_v28 = vld [vmem:[#allocation9 + $0xd4] sm:$0xf0]  ;;  %7948 = vst [vmem:[#allocation49_spill] sm:$0xff] %v5735_v63  ;;  %v5752_v14 = vor.u32 %v4826_v10, %v4220_v9 }
  0x51   :  { %7950 = vst [vmem:[#allocation51_spill] sm:$0xff] %v5743_v7 }
  0x52   :  { %805 = vmatpush.bf16.msrb.mxu1 %v5662_v46  ;;  %497 = vmatmul.bf16.gmra.mxu2 %v5659_v37  ;;  %7951 = vst [vmem:[#allocation52_spill] sm:$0xff] %v5752_v14 }
  0x53   :  { %536 = vmatpush.bf16.msrb.mxu2 %v4125_v38  ;;  %487 = vmatmul.bf16.gmra.mxu0 %v5667_v47  ;;  %v5702_v38 = vor.u32 %v4846_v28, %v4300_v27  ;;  %7952 = vst [vmem:[#allocation53_spill] sm:$0xff] %v5755_v19  ;;  %v4206_v27 = vld [vmem:[#allocation9 + $0x18] sm:$0xf0] }
  0x54   :  { %565 = vmatpush.bf16.msrb.mxu3 %v4129_v42  ;;  %793 = vmatpush.bf16.msrb.mxu0 %v5670_v50  ;;  %v4284_v42 = vld [vmem:[#allocation9 + $0xa8] sm:$0xf]  ;;  %7953 = vst [vmem:[#allocation54_spill] sm:$0xff] %v5758_v23 }
  0x55   :  { %526 = vmatmul.bf16.gmra.mxu3 %v5659_v37  ;;  %516 = vmatmul.bf16.gmra.mxu1 %v5667_v47  ;;  %7941 = vst [vmem:[#allocation42_spill] sm:$0xff] %v5702_v38  ;;  %v5715_v48 = vor.u32 %v4842_v43, %v4284_v42 }
  0x56   :  { %806 = vmatpush.bf16.msrb.mxu1 %v5673_v59 }
  0x57   :  { %537 = vmatpush.bf16.msrb.mxu2 %v4109_v51  ;;  %7944 = vst [vmem:[#allocation45_spill] sm:$0xff] %v5715_v48  ;;  %v4286_v51 = vld [vmem:[#allocation9 + $0xb8] sm:$0xf0] }
  0x58   :  { %566 = vmatpush.bf16.msrb.mxu3 %v4113_v55  ;;  %794 = vmatpush.bf16.msrb.mxu0 %v5679_v1  ;;  %v5722_v55 = vor.u32 %v4840_v49, %v4286_v51 }
  0x5a   :  { %807 = vmatpush.bf16.msrb.mxu1 %v5683_v11  ;;  %7945 = vst [vmem:[#allocation46_spill] sm:$0xff] %v5722_v55 }
  0x5b   :  { %538 = vmatpush.bf16.msrb.mxu2 %v4093_v2  ;;  %v4832_v2 = vld [vmem:[#allocation9 + $0x6c] sm:$0xf] }
  0x5c   :  { %567 = vmatpush.bf16.msrb.mxu3 %v4097_v6  ;;  %795 = vmatpush.bf16.msrb.mxu0 %v5686_v16  ;;  %v5739_v6 = vor.u32 %v4832_v2, %v4254_v3 }
  0x5e   :  { %808 = vmatpush.bf16.msrb.mxu1 %v5691_v29  ;;  %7949 = vst [vmem:[#allocation50_spill] sm:$0xff] %v5739_v6 }
  0x5f   :  { %539 = vmatpush.bf16.msrb.mxu2 %v4077_v21  ;;  %v4824_v21 = vld [vmem:[#allocation9 + $0x2c] sm:$0xf] }
  0x60   :  { %568 = vmatpush.bf16.msrb.mxu3 %v4081_v25  ;;  %796 = vmatpush.bf16.msrb.mxu0 %v5696_v31  ;;  %v4820_v25 = vld [vmem:[#allocation9 + $0xc] sm:$0xf] }
  0x61   :  { %v5768_v28 = vor.u32 %v4820_v25, %v4206_v27 }
  0x62   :  { %540 = vmatmul.bf16.vlgmr.msrb.gmra.mxu2 %v5631_v61  ;;  %809 = vmatpush.bf16.msrb.mxu1 %v5706_v41 }
  0x63   :  { %815 = vmatpush.bf16.msra.mxu2 %v5688_v26  ;;  %797 = vmatmul.bf16.vlgmr.msrb.gmra.mxu0 %v5709_v44  ;;  %7955 = vst [vmem:[#allocation56_spill] sm:$0xff] %v5768_v28 }
  0x64   :  { %828 = vmatpush.bf16.msra.mxu3 %v5693_v30  ;;  %916 = vmatpush.bf16.msra.mxu0 %v5633_v0 }
  0x65   :  { %569 = vmatmul.bf16.vlgmr.msrb.gmra.mxu3 %v5631_v61  ;;  %810 = vmatmul.bf16.vlgmr.msrb.gmra.mxu1 %v5709_v44  ;;  %v5731_v61 = vor.u32 %v4836_v57, %v4270_v58 }
  0x66   :  { %929 = vmatpush.bf16.msra.mxu1 %v5635_v8 }
  0x67   :  { %816 = vmatpush.bf16.msra.mxu2 %v5702_v38  ;;  %7947 = vst [vmem:[#allocation48_spill] sm:$0xff] %v5731_v61 }
  0x68   :  { %829 = vmatpush.bf16.msra.mxu3 %v5711_v45  ;;  %917 = vmatpush.bf16.msra.mxu0 %v5641_v12 }
  0x6a   :  { %930 = vmatpush.bf16.msra.mxu1 %v5645_v20 }
  0x6b   :  { %817 = vmatpush.bf16.msra.mxu2 %v5715_v48 }
  0x6c   :  { %830 = vmatpush.bf16.msra.mxu3 %v5722_v55  ;;  %918 = vmatpush.bf16.msra.mxu0 %v5648_v24 }
  0x6e   :  { %931 = vmatpush.bf16.msra.mxu1 %v5651_v32 }
  0x6f   :  { %818 = vmatpush.bf16.msra.mxu2 %v5727_v56 }
  0x70   :  { %831 = vmatpush.bf16.msra.mxu3 %v5731_v61  ;;  %919 = vmatpush.bf16.msra.mxu0 %v5654_v36 }
  0x72   :  { %932 = vmatpush.bf16.msra.mxu1 %v5662_v46  ;;  %545 = vmatmul.bf16.gmra.mxu2 %v5667_v47 }
  0x73   :  { %819 = vmatpush.bf16.msra.mxu2 %v5735_v63 }
  0x74   :  { %832 = vmatpush.bf16.msra.mxu3 %v5739_v6  ;;  %920 = vmatpush.bf16.msra.mxu0 %v5670_v50 }
  0x75   :  { %574 = vmatmul.bf16.gmra.mxu3 %v5667_v47  ;;  %v5762_v47 = vor.u32 %v4824_v21, %v4222_v22 }
  0x76   :  { %933 = vmatpush.bf16.msra.mxu1 %v5673_v59 }
  0x77   :  { %820 = vmatpush.bf16.msra.mxu2 %v5743_v7  ;;  %7954 = vst [vmem:[#allocation55_spill] sm:$0xff] %v5762_v47 }
  0x78   :  { %921 = vmatpush.bf16.msra.mxu0 %v5679_v1  ;;  %833 = vmatpush.bf16.msra.mxu3 %v5755_v19 }
  0x7a   :  { %934 = vmatpush.bf16.msra.mxu1 %v5683_v11 }
  0x7b   :  { %821 = vmatpush.bf16.msra.mxu2 %v5752_v14 }
  0x7c   :  { %922 = vmatpush.bf16.msra.mxu0 %v5686_v16  ;;  %834 = vmatpush.bf16.msra.mxu3 %v5762_v47 }
  0x7e   :  { %935 = vmatpush.bf16.msra.mxu1 %v5691_v29 }
  0x7f   :  { %822 = vmatpush.bf16.msra.mxu2 %v5758_v23 }
  0x80   :  { %923 = vmatpush.bf16.msra.mxu0 %v5696_v31  ;;  %835 = vmatpush.bf16.msra.mxu3 %v5768_v28 }
  0x82   :  { %936 = vmatpush.bf16.msra.mxu1 %v5706_v41  ;;  %550 = vmatmul.bf16.gmra.mxu2 %v5626_v52 }
  0x83   :  { %942 = vmatpush.bf16.msrb.mxu2 %v5688_v26 }
  0x84   :  { %955 = vmatpush.bf16.msrb.mxu3 %v5693_v30 }
  0x85   :  { %579 = vmatmul.bf16.gmra.mxu3 %v5626_v52  ;;  %v280_v52 = vld [vmem:[#allocation10] sm:$0xf] }
  0x86   :  { %v5796_v35 = vperm.slane %v280_v52, 0 }
  0x87   :  { %943 = vmatpush.bf16.msrb.mxu2 %v5702_v38 }
  0x88   :  { %956 = vmatpush.bf16.msrb.mxu3 %v5711_v45  ;;  %7956 = vst [vmem:[#allocation57_spill] sm:$0xff] %v5796_v35 }
  0x8b   :  { %944 = vmatpush.bf16.msrb.mxu2 %v5715_v48 }
  0x8c   :  { %957 = vmatpush.bf16.msrb.mxu3 %v5722_v55 }
  0x8f   :  { %945 = vmatpush.bf16.msrb.mxu2 %v5727_v56 }
  0x90   :  { %958 = vmatpush.bf16.msrb.mxu3 %v5731_v61 }
  0x92   :  { %555 = vmatmul.bf16.gmra.mxu2 %v5659_v37 }
  0x93   :  { %946 = vmatpush.bf16.msrb.mxu2 %v5735_v63 }
  0x94   :  { %959 = vmatpush.bf16.msrb.mxu3 %v5739_v6 }
  0x95   :  { %584 = vmatmul.bf16.gmra.mxu3 %v5659_v37  ;;  %v5798_v37 = vperm.slane %v280_v52, 1 }
  0x97   :  { %947 = vmatpush.bf16.msrb.mxu2 %v5743_v7  ;;  %7957 = vst [vmem:[#allocation58_spill] sm:$0xff] %v5798_v37 }
  0x98   :  { %960 = vmatpush.bf16.msrb.mxu3 %v5755_v19 }
  0x9b   :  { %948 = vmatpush.bf16.msrb.mxu2 %v5752_v14 }
  0x9c   :  { %961 = vmatpush.bf16.msrb.mxu3 %v5762_v47 }
  0x9f   :  { %949 = vmatpush.bf16.msrb.mxu2 %v5758_v23 }
  0xa0   :  { %962 = vmatpush.bf16.msrb.mxu3 %v5768_v28 }
  0xa2   :  { %823 = vmatmul.bf16.vlgmr.msra.gmra.mxu2 %v5709_v44 }
  0xa5   :  { %836 = vmatmul.bf16.vlgmr.msra.gmra.mxu3 %v5709_v44 }
  0xbf   :  { %v483_v33 = vpop.f32.mrf.mxu0 }
  0xc2   :  { %v512_v34 = vpop.f32.mrf.mxu1 }
  0xc5   :  { %v493_v39 = vpop.f32.mrf.mxu2 }
  0xc6   :  { %v5801_v40 = vadd.f32 %v493_v39, %v5796_v35  ;;  %v522_v42 = vpop.f32.mrf.mxu3 }
  0xc7   :  { %v5804_v43 = vadd.f32 %v522_v42, %v5798_v37  ;;  %v5806_v49 = vpop.f32.mrf.mxu0  ;;  %v5842_v42 = vperm.slane %v280_v52, 2 }
  0xc8   :  { %7958 = vst [vmem:[#allocation59_spill] sm:$0xff] %v5801_v40 }
  0xc9   :  { %7959 = vst [vmem:[#allocation60_spill] sm:$0xff] %v5804_v43 }
  0xca   :  { %7960 = vst [vmem:[#allocation61_spill] sm:$0xff] %v5806_v49  ;;  %v5808_v51 = vpop.f32.mrf.mxu1  ;;  %v4899_v49 = vld [vmem:[#allocation12 + $0x184] sm:$0xf] }
  0xcb   :  { %7961 = vst [vmem:[#allocation62_spill] sm:$0xff] %v5808_v51 }
  0xcc   :  { %7974 = vst [vmem:[#allocation75_spill] sm:$0xff] %v5842_v42 }
  0xcd   :  { %v5810_v44 = vpop.f32.mrf.mxu2 }
  0xce   :  { %7962 = vst [vmem:[#allocation63_spill] sm:$0xff] %v5810_v44  ;;  %v5812_v53 = vpop.f32.mrf.mxu3 }
  0xcf   :  { %7963 = vst [vmem:[#allocation64_spill] sm:$0xff] %v5812_v53 }
  0xd0   :  { %v488_v54 = vpop.f32.mrf.mxu0 }
  0xd1   :  { %v5815_v57 = vadd.f32 %v488_v54, %v5796_v35  ;;  %v5844_v54 = vperm.slane %v280_v52, 3 }
  0xd2   :  { %v517_v58 = vpop.f32.mrf.mxu1 }
  0xd3   :  { %7964 = vst [vmem:[#allocation65_spill] sm:$0xff] %v5815_v57  ;;  %v5818_v60 = vadd.f32 %v517_v58, %v5798_v37 }
  0xd4   :  { %7975 = vst [vmem:[#allocation76_spill] sm:$0xff] %v5844_v54 }
  0xd5   :  { %7965 = vst [vmem:[#allocation66_spill] sm:$0xff] %v5818_v60  ;;  %v498_v62 = vpop.f32.mrf.mxu2  ;;  %v4541_v60 = vld [vmem:[#allocation12 + $0x1b0] sm:$0xf0] }
  0xd6   :  { %v5821_v2 = vadd.f32 %v498_v62, %v5796_v35 }
  0xd8   :  { %7966 = vst [vmem:[#allocation67_spill] sm:$0xff] %v5821_v2  ;;  %v527_v3 = vpop.f32.mrf.mxu3  ;;  %v5826_v5 = vpop.f32.mrf.mxu0 }
  0xd9   :  { %v5824_v4 = vadd.f32 %v527_v3, %v5798_v37  ;;  %7968 = vst [vmem:[#allocation69_spill] sm:$0xff] %v5826_v5 }
  0xda   :  { %v5828_v9 = vpop.f32.mrf.mxu1 }
  0xdb   :  { %7967 = vst [vmem:[#allocation68_spill] sm:$0xff] %v5824_v4 }
  0xdc   :  { %7969 = vst [vmem:[#allocation70_spill] sm:$0xff] %v5828_v9 }
  0xdd   :  { %v5830_v10 = vpop.f32.mrf.mxu2 }
  0xde   :  { %7970 = vst [vmem:[#allocation71_spill] sm:$0xff] %v5830_v10 }
  0xe0   :  { %v5832_v13 = vpop.f32.mrf.mxu3  ;;  %v798_v15 = vpop.f32.mrf.mxu0 }
  0xe1   :  { %7971 = vst [vmem:[#allocation72_spill] sm:$0xff] %v5832_v13  ;;  %v513_v13 = vadd.f32 %v512_v34, %v5798_v37  ;;  %v4397_v37 = vld [vmem:[#allocation12 + $0x90] sm:$0xf0] }
  0xe2   :  { %v811_v17 = vpop.f32.mrf.mxu1 }
  0xe5   :  { %v5834_v18 = vpop.f32.mrf.mxu2 }
  0xe8   :  { %v5836_v21 = vpop.f32.mrf.mxu3  ;;  %v800_v22 = vpop.f32.mrf.mxu0 }
  0xe9   :  { %v484_v22 = vadd.f32 %v483_v33, %v5796_v35  ;;  %v4525_v35 = vld [vmem:[#allocation12 + $0x190] sm:$0xf0] }
  0xea   :  { %v813_v25 = vpop.f32.mrf.mxu1 }
  0xeb   :  { %v812_v25 = vadd.f32 %v811_v17, %v513_v13  ;;  %v799_v4 = vadd.f32 %v798_v15, %v484_v22  ;;  %v4443_v13 = vld [vmem:[#allocation12 + $0xe0] sm:$0xf]  ;;  %v4881_v15 = vld [vmem:[#allocation12 + $0xec] sm:$0xf0] }
  0xec   :  { %v4571_v17 = vld [vmem:[#allocation12 + $0x1e0] sm:$0xf]  ;;  %v5864_v22 = vor.u32 %v4881_v15, %v4443_v13 }
  0xed   :  { %v5838_v27 = vpop.f32.mrf.mxu2  ;;  %v4323_v52 = vmul.f32 -1.442695, %v812_v25  ;;  %v4322_v44 = vmul.f32 -1.442695, %v799_v4  ;;  %v4879_v25 = vld [vmem:[#allocation12 + $0xe4] sm:$0xf] }
  0xee   :  { %7972 = vst [vmem:[#allocation73_spill] sm:$0xff] %v5838_v27  ;;  %v4445_v4 = vld [vmem:[#allocation12 + $0xf0] sm:$0xf0]  ;;  %1361 = vmatpush.bf16.msrb.mxu0 %v5864_v22  ;;  %v4555_v15 = vld [vmem:[#allocation12 + $0x1c0] sm:$0xf] }
  0xef   :  { %5028 = vpow2.f32 %v4323_v52  ;;  %7982 = vst [vmem:[#allocation83_spill] sm:$0xff] %v5864_v22 }
  0xf0   :  { %v5840_v39 = vpop.f32.mrf.mxu3  ;;  %5030 = vpow2.f32 %v4322_v44 }
  0xf1   :  { %7973 = vst [vmem:[#allocation74_spill] sm:$0xff] %v5840_v39 }
  0xf5   :  { %v546_v58 = vpop.f32.mrf.mxu2  ;;  %v5029_v40 = vpop.eup %5028 }
  0xf6   :  { %v5847_v62 = vadd.f32 %v546_v58, %v5842_v42  ;;  %v5031_v33 = vpop.eup %5030  ;;  %v5866_v52 = vadd.f32 1.0, %v5029_v40  ;;  %v4427_v40 = vld [vmem:[#allocation12 + $0xc0] sm:$0xf] }
  0xf8   :  { %7976 = vst [vmem:[#allocation77_spill] sm:$0xff] %v5847_v62  ;;  %v575_v3 = vpop.f32.mrf.mxu3  ;;  %5032 = vrcp.f32 %v5866_v52  ;;  %vm873_vm0 = vweird.f32 %v5866_v52 }
  0xf9   :  { %v5851_v10 = vadd.f32 %v575_v3, %v5844_v54 }
  0xfb   :  { %7977 = vst [vmem:[#allocation78_spill] sm:$0xff] %v5851_v10  ;;  %v4539_v10 = vld [vmem:[#allocation12 + $0x1a0] sm:$0xf] }
  0xfd   :  { %v5854_v2 = vpop.f32.mrf.mxu2 }
  0xfe   :  { %7978 = vst [vmem:[#allocation79_spill] sm:$0xff] %v5854_v2  ;;  %v4573_v2 = vld [vmem:[#allocation12 + $0x1f0] sm:$0xf0]  ;;  %v5907_v27 = vpop.eup %5032 }
  0xff   :  { %vm874_vm1 = vweird.f32 %v5907_v27 }
 0x100   :  { %v5856_v53 = vpop.f32.mrf.mxu3  ;;  %vm5983_vm2 = vmor %vm873_vm0, %vm874_vm1 }
 0x101   :  { %7979 = vst [vmem:[#allocation80_spill] sm:$0xff] %v5856_v53  ;;  %v4913_v53 = vld [vmem:[#allocation12 + $0x1ec] sm:$0xf0] }
 0x102   :  { %v5868_v44 = vor.u32 %v4913_v53, %v4571_v17  ;;  %v4877_v53 = vld [vmem:[#allocation12 + $0xcc] sm:$0xf0] }
 0x103   :  { %v5884_v17 = vor.u32 %v4877_v53, %v4427_v40  ;;  %v4411_v40 = vld [vmem:[#allocation12 + $0xa0] sm:$0xf]  ;;  %v4873_v53 = vld [vmem:[#allocation12 + $0xac] sm:$0xf0] }
 0x104   :  { %7983 = vst [vmem:[#allocation84_spill] sm:$0xff] %v5868_v44  ;;  %1374 = vmatpush.bf16.msrb.mxu1 %v5868_v44 }
 0x105   :  { %v551_v58 = vpop.f32.mrf.mxu2  ;;  %7988 = vst [vmem:[#allocation89_spill] sm:$0xff] %v5884_v17  ;;  %1362 = vmatpush.bf16.msrb.mxu0 %v5884_v17  ;;  %v4459_v17 = vld [vmem:[#allocation12 + $0x100] sm:$0xf] }
 0x106   :  { %v5859_v43 = vadd.f32 %v551_v58, %v5842_v42  ;;  %v5870_v58 = vor.u32 %v4879_v25, %v4445_v4  ;;  %v4875_v25 = vld [vmem:[#allocation12 + $0xc4] sm:$0xf]  ;;  %v4429_v4 = vld [vmem:[#allocation12 + $0xd0] sm:$0xf0] }
 0x108   :  { %7980 = vst [vmem:[#allocation81_spill] sm:$0xff] %v5859_v43  ;;  %v580_v34 = vpop.f32.mrf.mxu3  ;;  %v4911_v43 = vld [vmem:[#allocation12 + $0x1e4] sm:$0xf]  ;;  %1387 = vmatpush.bf16.msra.mxu2 %v5870_v58 }
 0x109   :  { %v5862_v3 = vadd.f32 %v580_v34, %v5844_v54  ;;  %7984 = vst [vmem:[#allocation85_spill] sm:$0xff] %v5870_v58  ;;  %v5872_v34 = vadd.f32 1.0, %v5031_v33  ;;  %v5877_v9 = vor.u32 %v4911_v43, %v4573_v2  ;;  %v4909_v33 = vld [vmem:[#allocation12 + $0x1cc] sm:$0xf0]  ;;  %v5889_v2 = vor.u32 %v4875_v25, %v4429_v4  ;;  %v4871_v25 = vld [vmem:[#allocation12 + $0xa4] sm:$0xf] }
 0x10a   :  { %v5887_v43 = vor.u32 %v4909_v33, %v4555_v15  ;;  %v5898_v15 = vor.u32 %v4873_v53, %v4411_v40  ;;  %v4905_v33 = vld [vmem:[#allocation12 + $0x1ac] sm:$0xf0]  ;;  %v4413_v4 = vld [vmem:[#allocation12 + $0xb0] sm:$0xf0] }
 0x10b   :  { %7981 = vst [vmem:[#allocation82_spill] sm:$0xff] %v5862_v3  ;;  %1400 = vmatpush.bf16.msra.mxu3 %v5877_v9  ;;  %5034 = vrcp.f32 %v5872_v34  ;;  %v5900_v62 = vor.u32 %v4905_v33, %v4539_v10  ;;  %v4395_v10 = vld [vmem:[#allocation12 + $0x80] sm:$0xf]  ;;  %v4869_v53 = vld [vmem:[#allocation12 + $0x8c] sm:$0xf0]  ;;  %vm858_vm3 = vweird.f32 %v5872_v34 }
 0x10c   :  { %7986 = vst [vmem:[#allocation87_spill] sm:$0xff] %v5877_v9  ;;  %1375 = vmatpush.bf16.msrb.mxu1 %v5887_v43  ;;  %1388 = vmatpush.bf16.msra.mxu2 %v5889_v2  ;;  %v4523_v33 = vld [vmem:[#allocation12 + $0x180] sm:$0xf] }
 0x10d   :  { %v5874_v3 = vpop.f32.mrf.mxu2  ;;  %7989 = vst [vmem:[#allocation90_spill] sm:$0xff] %v5887_v43  ;;  %1363 = vmatpush.bf16.msrb.mxu0 %v5898_v15 }
 0x10e   :  { %7985 = vst [vmem:[#allocation86_spill] sm:$0xff] %v5874_v3  ;;  %v4557_v3 = vld [vmem:[#allocation12 + $0x1d0] sm:$0xf0] }
 0x10f   :  { %7990 = vst [vmem:[#allocation91_spill] sm:$0xff] %v5889_v2 }
 0x110   :  { %v5879_v13 = vpop.f32.mrf.mxu3  ;;  %7992 = vst [vmem:[#allocation93_spill] sm:$0xff] %v5898_v15  ;;  %1376 = vmatpush.bf16.msrb.mxu1 %v5900_v62  ;;  %v869_v15 = vmul.f32 %v5907_v27, %v5866_v52 }
 0x111   :  { %7987 = vst [vmem:[#allocation88_spill] sm:$0xff] %v5879_v13  ;;  %v4907_v13 = vld [vmem:[#allocation12 + $0x1c4] sm:$0xf] }
 0x112   :  { %v5892_v5 = vor.u32 %v4907_v13, %v4557_v3  ;;  %7993 = vst [vmem:[#allocation94_spill] sm:$0xff] %v5900_v62  ;;  %v5902_v3 = vor.u32 %v4871_v25, %v4413_v4  ;;  %v4903_v13 = vld [vmem:[#allocation12 + $0x1a4] sm:$0xf]  ;;  %v4901_v4 = vld [vmem:[#allocation12 + $0x18c] sm:$0xf0] }
 0x113   :  { %v5905_v39 = vor.u32 %v4903_v13, %v4541_v60  ;;  %v5918_v60 = vor.u32 %v4869_v53, %v4395_v10  ;;  %v4867_v13 = vld [vmem:[#allocation12 + $0x84] sm:$0xf]  ;;  %v4379_v10 = vld [vmem:[#allocation12 + $0x60] sm:$0xf]  ;;  %v4865_v53 = vld [vmem:[#allocation12 + $0x6c] sm:$0xf0] }
 0x114   :  { %7991 = vst [vmem:[#allocation92_spill] sm:$0xff] %v5892_v5  ;;  %1401 = vmatpush.bf16.msra.mxu3 %v5892_v5  ;;  %1389 = vmatpush.bf16.msra.mxu2 %v5902_v3 }
 0x115   :  { %7994 = vst [vmem:[#allocation95_spill] sm:$0xff] %v5902_v3  ;;  %v556_v57 = vpop.f32.mrf.mxu2  ;;  %v5924_v3 = vpop.eup %5034  ;;  %1364 = vmatpush.bf16.msrb.mxu0 %v5918_v60 }
 0x116   :  { %7995 = vst [vmem:[#allocation96_spill] sm:$0xff] %v5905_v39  ;;  %v5910_v51 = vadd.f32 %v556_v57, %v5842_v42  ;;  %v5920_v57 = vor.u32 %v4901_v4, %v4523_v33  ;;  %v4507_v33 = vld [vmem:[#allocation12 + $0x160] sm:$0xf]  ;;  %v4897_v4 = vld [vmem:[#allocation12 + $0x16c] sm:$0xf0]  ;;  %vm859_vm4 = vweird.f32 %v5924_v3 }
 0x117   :  { %7998 = vst [vmem:[#allocation99_spill] sm:$0xff] %v5918_v60  ;;  %v5938_v60 = vor.u32 %v4897_v4, %v4507_v33  ;;  %v4861_v33 = vld [vmem:[#allocation12 + $0x4c] sm:$0xf0]  ;;  %v4491_v4 = vld [vmem:[#allocation12 + $0x140] sm:$0xf]  ;;  %vm6010_vm5 = vmor %vm858_vm3, %vm859_vm4 }
 0x118   :  { %7996 = vst [vmem:[#allocation97_spill] sm:$0xff] %v5910_v51  ;;  %v585_v40 = vpop.f32.mrf.mxu3  ;;  %1402 = vmatpush.bf16.msra.mxu3 %v5905_v39  ;;  %v5922_v51 = vor.u32 %v4867_v13, %v4397_v37  ;;  %1377 = vmatpush.bf16.msrb.mxu1 %v5920_v57  ;;  %v5934_v37 = vor.u32 %v4865_v53, %v4379_v10  ;;  %v4863_v13 = vld [vmem:[#allocation12 + $0x64] sm:$0xf]  ;;  %v4363_v53 = vld [vmem:[#allocation12 + $0x40] sm:$0xf] }
 0x119   :  { %v5915_v25 = vadd.f32 %v585_v40, %v5844_v54  ;;  %7999 = vst [vmem:[#allocation100_spill] sm:$0xff] %v5920_v57  ;;  %v5929_v40 = vor.u32 %v4899_v49, %v4525_v35  ;;  %v854_v39 = vmul.f32 %v5924_v3, %v5872_v34  ;;  %v4895_v49 = vld [vmem:[#allocation12 + $0x164] sm:$0xf]  ;;  %v4509_v57 = vld [vmem:[#allocation12 + $0x170] sm:$0xf0] }
 0x11a   :  { %8000 = vst [vmem:[#allocation101_spill] sm:$0xff] %v5922_v51  ;;  %1390 = vmatpush.bf16.msra.mxu2 %v5922_v51  ;;  %v870_v51 = vsub.f32 1.0, %v869_v15  ;;  %1365 = vmatpush.bf16.msrb.mxu0 %v5934_v37  ;;  %v4893_v15 = vld [vmem:[#allocation12 + $0x14c] sm:$0xf0] }
 0x11b   :  { %7997 = vst [vmem:[#allocation98_spill] sm:$0xff] %v5915_v25  ;;  %v4381_v25 = vld [vmem:[#allocation12 + $0x70] sm:$0xf0]  ;;  %v855_v2 = vsub.f32 1.0, %v854_v39  ;;  %v4347_v39 = vld [vmem:[#allocation12 + $0x20] sm:$0xf] }
 0x11c   :  { %8001 = vst [vmem:[#allocation102_spill] sm:$0xff] %v5929_v40  ;;  %1403 = vmatpush.bf16.msra.mxu3 %v5929_v40  ;;  %v5940_v35 = vor.u32 %v4863_v13, %v4381_v25  ;;  %v5945_v40 = vor.u32 %v4895_v49, %v4509_v57  ;;  %1378 = vmatpush.bf16.msrb.mxu1 %v5938_v60  ;;  %v4859_v13 = vld [vmem:[#allocation12 + $0x44] sm:$0xf] }
 0x11d   :  { %8002 = vst [vmem:[#allocation103_spill] sm:$0xff] %v5934_v37  ;;  %v5942_v62 = vpop.f32.mrf.mxu2  ;;  %v5952_v25 = vor.u32 %v4861_v33, %v4363_v53  ;;  %v5954_v37 = vor.u32 %v4893_v15, %v4491_v4  ;;  %v4891_v49 = vld [vmem:[#allocation12 + $0x144] sm:$0xf]  ;;  %v4857_v53 = vld [vmem:[#allocation12 + $0x2c] sm:$0xf0]  ;;  %v542_v33 = vadd.f32 %v5834_v18, %v5842_v42 }
 0x11e   :  { %8003 = vst [vmem:[#allocation104_spill] sm:$0xff] %v5938_v60  ;;  %1391 = vmatpush.bf16.msra.mxu2 %v5940_v35  ;;  %v871_v60 = vmul.f32 %v5907_v27, %v870_v51  ;;  %v5971_v51 = vor.u32 %v4857_v53, %v4347_v39  ;;  %v4889_v4 = vld [vmem:[#allocation12 + $0x12c] sm:$0xf0]  ;;  %v4855_v15 = vld [vmem:[#allocation12 + $0x24] sm:$0xf]  ;;  %v879_v39 = vand.u32 2147483648, %v5866_v52 }
 0x11f   :  { %8004 = vst [vmem:[#allocation105_spill] sm:$0xff] %v5940_v35  ;;  %1366 = vmatpush.bf16.msrb.mxu0 %v5952_v25  ;;  %v4477_v18 = vld [vmem:[#allocation12 + $0x130] sm:$0xf0]  ;;  %v4331_v42 = vld [vmem:[#allocation12] sm:$0xf] }
 0x120   :  { %8005 = vst [vmem:[#allocation106_spill] sm:$0xff] %v5942_v62  ;;  %v5947_v10 = vpop.f32.mrf.mxu3  ;;  %1404 = vmatpush.bf16.msra.mxu3 %v5945_v40  ;;  %v4365_v62 = vld [vmem:[#allocation12 + $0x50] sm:$0xf0]  ;;  %1379 = vmatpush.bf16.msrb.mxu1 %v5954_v37  ;;  %v880_v58 = vor.u32 1.1754944e-38, %v879_v39 }
 0x121   :  { %8006 = vst [vmem:[#allocation107_spill] sm:$0xff] %v5945_v40  ;;  %v5956_v57 = vor.u32 %v4859_v13, %v4365_v62  ;;  %v4475_v62 = vld [vmem:[#allocation12 + $0x120] sm:$0xf]  ;;  %v4349_v13 = vld [vmem:[#allocation12 + $0x30] sm:$0xf0] }
 0x122   :  { %8007 = vst [vmem:[#allocation108_spill] sm:$0xff] %v5947_v10  ;;  %v4493_v10 = vld [vmem:[#allocation12 + $0x150] sm:$0xf0]  ;;  %v4887_v40 = vld [vmem:[#allocation12 + $0x124] sm:$0xf] }
 0x123   :  { %8008 = vst [vmem:[#allocation109_spill] sm:$0xff] %v5952_v25  ;;  %v5959_v35 = vor.u32 %v4891_v49, %v4493_v10  ;;  %1392 = vmatpush.bf16.msra.mxu2 %v5956_v57  ;;  %v571_v10 = vadd.f32 %v5836_v21, %v5844_v54  ;;  %v856_v49 = vmul.f32 %v5924_v3, %v855_v2  ;;  %v864_v2 = vand.u32 2147483648, %v5872_v34 }
 0x124   :  { %8009 = vst [vmem:[#allocation110_spill] sm:$0xff] %v5954_v37  ;;  %v5975_v25 = vor.u32 %v4889_v4, %v4475_v62  ;;  %v5977_v37 = vor.u32 %v4855_v15, %v4349_v13  ;;  %v877_v62 = vand.u32 2147483647, %v5866_v52  ;;  %1367 = vmatpush.bf16.msrb.mxu0 %v5971_v51  ;;  %v5991_v4 = vor.u32 %v4887_v40, %v4477_v18  ;;  %v4851_v18 = vld [vmem:[#allocation12 + $0x4] sm:$0xf] }
 0x125   :  { %8010 = vst [vmem:[#allocation111_spill] sm:$0xff] %v5956_v57  ;;  %1405 = vmatpush.bf16.msra.mxu3 %v5959_v35  ;;  %v862_v57 = vand.u32 2147483647, %v5872_v34  ;;  %v824_v53 = vpop.f32.mrf.mxu2  ;;  %v872_v54 = vadd.f32 %v5907_v27, %v871_v60  ;;  %v857_v5 = vadd.f32 %v5924_v3, %v856_v49  ;;  %v865_v34 = vor.u32 1.1754944e-38, %v864_v2 }
 0x126   :  { %8011 = vst [vmem:[#allocation112_spill] sm:$0xff] %v5959_v35  ;;  %v825_v15 = vadd.f32 %v824_v53, %v542_v33  ;;  %1380 = vmatpush.bf16.msrb.mxu1 %v5975_v25  ;;  %v4853_v35 = vld [vmem:[#allocation12 + $0xc] sm:$0xf0]  ;;  %v4333_v53 = vld [vmem:[#allocation12 + $0x10] sm:$0xf0]  ;;  %vm878_vm6 = vcmp.eq.f32.partialorder %v877_v62, 8.507059e+37 }
 0x127   :  { %8012 = vst [vmem:[#allocation113_spill] sm:$0xff] %v5971_v51  ;;  %1393 = vmatpush.bf16.msra.mxu2 %v5977_v37  ;;  %v5999_v40 = vor.u32 %v4853_v35, %v4331_v42  ;;  %v4885_v33 = vld [vmem:[#allocation12 + $0x10c] sm:$0xf0]  ;;  %v6004_v60 = vor.u32 %v4851_v18, %v4333_v53  ;;  %vm863_vm7 = vcmp.eq.f32.partialorder %v862_v57, 8.507059e+37  ;;  %v4451_v42 = vld [vmem:[#allocation12 + $0xe8] sm:$0xf] }
 0x128   :  { %8013 = vst [vmem:[#allocation114_spill] sm:$0xff] %v5975_v25  ;;  %v837_v13 = vpop.f32.mrf.mxu3  ;;  %v4324_v51 = vmul.f32 -1.442695, %v825_v15  ;;  %v6002_v43 = vor.u32 %v4885_v33, %v4459_v17  ;;  %v4883_v25 = vld [vmem:[#allocation12 + $0x104] sm:$0xf]  ;;  %v876_v17 = vsel %vm5983_vm2, %v5907_v27, %v872_v54 }
 0x129   :  { %8014 = vst [vmem:[#allocation115_spill] sm:$0xff] %v5977_v37  ;;  %v838_v52 = vadd.f32 %v837_v13, %v571_v10  ;;  %1406 = vmatpush.bf16.msra.mxu3 %v5991_v4  ;;  %v4461_v37 = vld [vmem:[#allocation12 + $0x110] sm:$0xf0]  ;;  %1368 = vmatpush.bf16.msrb.mxu0 %v5999_v40  ;;  %v861_v10 = vsel %vm6010_vm5, %v5924_v3, %v857_v5 }
 0x12a   :  { %8017 = vst [vmem:[#allocation116_spill] sm:$0xff] %v5991_v4  ;;  %v6015_v35 = vor.u32 %v4883_v25, %v4461_v37  ;;  %1381 = vmatpush.bf16.msrb.mxu1 %v6002_v43  ;;  %v623_v37 = vld [vmem:[#allocation4] sm:$0xff]  ;;  %v881_v25 = vsel %vm878_vm6, %v880_v58, %v876_v17  ;;  %v866_v21 = vsel %vm863_vm7, %v865_v34, %v861_v10  ;;  %v4882_v17 = vld [vmem:[#allocation12 + $0xf4] sm:$0xf0] }
 0x12b   :  { %8018 = vst [vmem:[#allocation117_spill] sm:$0xff] %v5999_v40  ;;  %5036 = vtanh.f32 %v838_v52  ;;  %1394 = vmatpush.bf16.msra.mxu2 %v6004_v60  ;;  %v899_v54 = vmul.f32 %v881_v25, %v623_v37  ;;  %v4579_v37 = vld [vmem:[#allocation12 + $0x1e8] sm:$0xf]  ;;  %v4914_v25 = vld [vmem:[#allocation12 + $0x1f4] sm:$0xf0] }
 0x12c   :  { %8019 = vst [vmem:[#allocation118_spill] sm:$0xff] %v6002_v43  ;;  %5038 = vpow2.f32 %v4324_v51 }
 0x12d   :  { %8020 = vst [vmem:[#allocation119_spill] sm:$0xff] %v6004_v60  ;;  %1407 = vmatpush.bf16.msra.mxu3 %v6015_v35  ;;  %v826_v51 = vpop.f32.mrf.mxu2 }
 0x12e   :  { %8023 = vst [vmem:[#allocation120_spill] sm:$0xff] %v6015_v35  ;;  %v4880_v51 = vld [vmem:[#allocation12 + $0xec] sm:$0xf] }
 0x130   :  { %v839_v49 = vpop.f32.mrf.mxu3 }
 0x131   :  { %v5037_v39 = vpop.eup %5036 }
 0x132   :  { %v5039_v27 = vpop.eup %5038  ;;  %v900_v62 = vmul.f32 %v5037_v39, %v866_v21  ;;  %v4453_v39 = vld [vmem:[#allocation12 + $0xf8] sm:$0xf0]  ;;  %v4912_v21 = vld [vmem:[#allocation12 + $0x1ec] sm:$0xf] }
 0x133   :  { %v852_v15 = vadd.f32 1.0, %v5039_v27  ;;  %v4581_v27 = vld [vmem:[#allocation12 + $0x1f8] sm:$0xf0] }
 0x134   :  { %v6026_v13 = vadd.f32 %v900_v62, %v899_v54  ;;  %v6031_v62 = vor.u32 %v4882_v17, %v4451_v42 }
 0x135   :  { %5040 = vrcp.f32 %v852_v15  ;;  %v894_v18 = vand.u32 2147483648, %v852_v15  ;;  %v892_v58 = vand.u32 2147483647, %v852_v15  ;;  %vm888_vm9 = vweird.f32 %v852_v15 }
 0x136   :  { %8024 = vst [vmem:[#allocation121_spill] sm:$0xff] %v6026_v13  ;;  %5042 = vtanh.f32 %v6026_v13  ;;  %v4888_v13 = vld [vmem:[#allocation12 + $0x12c] sm:$0xf] }
 0x137   :  { %v895_v57 = vor.u32 1.1754944e-38, %v894_v18  ;;  %vm893_vm11 = vcmp.eq.f32.partialorder %v892_v58, 8.507059e+37  ;;  %8025 = vst [vmem:[#allocation122_spill] sm:$0xff] %v6031_v62  ;;  %v6037_v18 = vor.u32 %v4912_v21, %v4581_v27  ;;  %v4910_v58 = vld [vmem:[#allocation12 + $0x1d4] sm:$0xf0] }
 0x138   :  { %v4872_v21 = vld [vmem:[#allocation12 + $0xac] sm:$0xf]  ;;  %v4421_v27 = vld [vmem:[#allocation12 + $0xb8] sm:$0xf0] }
 0x139   :  { %8028 = vst [vmem:[#allocation125_spill] sm:$0xff] %v6037_v18 }
 0x13b   :  { %v5041_v2 = vpop.eup %5040 }
 0x13c   :  { %v884_v52 = vmul.f32 %v5041_v2, %v852_v15  ;;  %vm889_vm8 = vweird.f32 %v5041_v2  ;;  %v5043_v34 = vpop.eup %5042  ;;  %v6033_v15 = vor.u32 %v4914_v25, %v4579_v37  ;;  %v4874_v37 = vld [vmem:[#allocation12 + $0xb4] sm:$0xf0] }
 0x13d   :  { %vm890_vm10 = vmor %vm888_vm9, %vm889_vm8 }
 0x13e   :  { %v885_v33 = vsub.f32 1.0, %v884_v52  ;;  %8026 = vst [vmem:[#allocation123_spill] sm:$0xff] %v6033_v15  ;;  %v4435_v52 = vld [vmem:[#allocation12 + $0xc8] sm:$0xf] }
 0x140   :  { %v886_v5 = vmul.f32 %v5041_v2, %v885_v33  ;;  %v6035_v33 = vor.u32 %v4880_v51, %v4453_v39  ;;  %v4906_v39 = vld [vmem:[#allocation12 + $0x1b4] sm:$0xf0] }
 0x142   :  { %v887_v3 = vadd.f32 %v5041_v2, %v886_v5  ;;  %8027 = vst [vmem:[#allocation124_spill] sm:$0xff] %v6035_v33  ;;  %v4563_v5 = vld [vmem:[#allocation12 + $0x1c8] sm:$0xf] }
 0x143   :  { %v6047_v17 = vor.u32 %v4910_v58, %v4563_v5  ;;  %v4403_v5 = vld [vmem:[#allocation12 + $0x88] sm:$0xf]  ;;  %v4870_v58 = vld [vmem:[#allocation12 + $0x94] sm:$0xf0] }
 0x144   :  { %v891_v53 = vsel %vm890_vm10, %v5041_v2, %v887_v3  ;;  %v4878_v2 = vld [vmem:[#allocation12 + $0xd4] sm:$0xf0]  ;;  %v4876_v3 = vld [vmem:[#allocation12 + $0xcc] sm:$0xf] }
 0x145   :  { %v896_v10 = vsel %vm893_vm11, %v895_v57, %v891_v53  ;;  %v4437_v57 = vld [vmem:[#allocation12 + $0xd8] sm:$0xf0]  ;;  %v4908_v53 = vld [vmem:[#allocation12 + $0x1cc] sm:$0xf]  ;;  %v6045_v42 = vor.u32 %v4878_v2, %v4435_v52  ;;  %8030 = vst [vmem:[#allocation127_spill] sm:$0xff] %v6047_v17 }
 0x146   :  { %v903_v49 = vmul.f32 %v5043_v34, %v896_v10  ;;  %v4565_v34 = vld [vmem:[#allocation12 + $0x1d8] sm:$0xf0]  ;;  %v4419_v10 = vld [vmem:[#allocation12 + $0xa8] sm:$0xf]  ;;  %v6051_v25 = vor.u32 %v4876_v3, %v4437_v57  ;;  %v6063_v3 = vor.u32 %v4872_v21, %v4421_v27 }
 0x147   :  { %8029 = vst [vmem:[#allocation126_spill] sm:$0xff] %v6045_v42  ;;  %v6053_v51 = vor.u32 %v4908_v53, %v4565_v34  ;;  %v6057_v52 = vor.u32 %v4874_v37, %v4419_v10  ;;  %v4531_v53 = vld [vmem:[#allocation12 + $0x188] sm:$0xf]  ;;  %v4902_v34 = vld [vmem:[#allocation12 + $0x194] sm:$0xf0]  ;;  %v6072_v37 = vor.u32 %v4870_v58, %v4403_v5 }
 0x148   :  { %v6029_v54 = vpack.c.bf16 %v903_v49, %v903_v49  ;;  %8031 = vst [vmem:[#allocation128_spill] sm:$0xff] %v6051_v25  ;;  %v4547_v49 = vld [vmem:[#allocation12 + $0x1a8] sm:$0xf]  ;;  %v4325_v10 = vld [vmem:[%s7715_s1 + $0x8] sm:$0xff]  ;;  %v4896_v5 = vld [vmem:[#allocation12 + $0x16c] sm:$0xf] }
 0x149   :  { %8032 = vst [vmem:[#allocation129_spill] sm:$0xff] %v6053_v51  ;;  %v6059_v2 = vor.u32 %v4906_v39, %v4547_v49  ;;  %v6074_v49 = vor.u32 %v4902_v34, %v4531_v53  ;;  %v4515_v27 = vld [vmem:[#allocation12 + $0x168] sm:$0xf]  ;;  %v4517_v58 = vld [vmem:[#allocation12 + $0x178] sm:$0xf0] }
 0x14a   :  { %924 = vmatmul.bf16.vlgmr.msra.gmra.mxu0 %v6029_v54  ;;  %937 = vmatmul.bf16.vlgmr.msra.gmra.mxu1 %v6029_v54  ;;  %8033 = vst [vmem:[#allocation130_spill] sm:$0xff] %v6057_v52 }
 0x14b   :  { %950 = vmatmul.bf16.vlgmr.msrb.gmra.mxu2 %v6029_v54  ;;  %963 = vmatmul.bf16.vlgmr.msrb.gmra.mxu3 %v6029_v54  ;;  %8034 = vst [vmem:[#allocation131_spill] sm:$0xff] %v6059_v2 }
 0x14c   :  { %1413 = vmatpush.bf16.msra.mxu0 %v6031_v62  ;;  %1426 = vmatpush.bf16.msra.mxu1 %v6033_v15  ;;  %v4904_v62 = vld [vmem:[#allocation12 + $0x1ac] sm:$0xf]  ;;  %v4549_v15 = vld [vmem:[#allocation12 + $0x1b8] sm:$0xf0]  ;;  %8035 = vst [vmem:[#allocation132_spill] sm:$0xff] %v6063_v3 }
 0x14d   :  { %1439 = vmatpush.bf16.msrb.mxu2 %v6035_v33  ;;  %1452 = vmatpush.bf16.msrb.mxu3 %v6037_v18  ;;  %v6065_v57 = vor.u32 %v4904_v62, %v4549_v15  ;;  %v4868_v33 = vld [vmem:[#allocation12 + $0x8c] sm:$0xf]  ;;  %8037 = vst [vmem:[#allocation134_spill] sm:$0xff] %v6072_v37  ;;  %v4387_v62 = vld [vmem:[#allocation12 + $0x68] sm:$0xf] }
 0x14e   :  { %v4900_v18 = vld [vmem:[#allocation12 + $0x18c] sm:$0xf]  ;;  %8038 = vst [vmem:[#allocation135_spill] sm:$0xff] %v6074_v49  ;;  %v4866_v15 = vld [vmem:[#allocation12 + $0x74] sm:$0xf0] }
 0x14f   :  { %8036 = vst [vmem:[#allocation133_spill] sm:$0xff] %v6065_v57  ;;  %v6086_v53 = vor.u32 %v4866_v15, %v4387_v62  ;;  %v4373_v62 = vld [vmem:[#allocation12 + $0x58] sm:$0xf0] }
 0x150   :  { %1414 = vmatpush.bf16.msra.mxu0 %v6045_v42  ;;  %1427 = vmatpush.bf16.msra.mxu1 %v6047_v17  ;;  %v4405_v42 = vld [vmem:[#allocation12 + $0x98] sm:$0xf0] }
 0x151   :  { %1440 = vmatpush.bf16.msrb.mxu2 %v6051_v25  ;;  %1453 = vmatpush.bf16.msrb.mxu3 %v6053_v51  ;;  %v4533_v17 = vld [vmem:[#allocation12 + $0x198] sm:$0xf0]  ;;  %v6078_v39 = vor.u32 %v4868_v33, %v4405_v42  ;;  %v4898_v25 = vld [vmem:[#allocation12 + $0x174] sm:$0xf0]  ;;  %v4864_v51 = vld [vmem:[#allocation12 + $0x6c] sm:$0xf] }
 0x152   :  { %v6080_v21 = vor.u32 %v4900_v18, %v4533_v17  ;;  %8041 = vst [vmem:[#allocation138_spill] sm:$0xff] %v6086_v53  ;;  %v6088_v34 = vor.u32 %v4898_v25, %v4515_v27  ;;  %v4371_v33 = vld [vmem:[#allocation12 + $0x48] sm:$0xf]  ;;  %v4862_v42 = vld [vmem:[#allocation12 + $0x54] sm:$0xf0]  ;;  %v6094_v17 = vor.u32 %v4896_v5, %v4517_v58 }
 0x153   :  { %8039 = vst [vmem:[#allocation136_spill] sm:$0xff] %v6078_v39  ;;  %v4892_v25 = vld [vmem:[#allocation12 + $0x14c] sm:$0xf]  ;;  %v4501_v15 = vld [vmem:[#allocation12 + $0x158] sm:$0xf0] }
 0x154   :  { %1415 = vmatpush.bf16.msra.mxu0 %v6057_v52  ;;  %1428 = vmatpush.bf16.msra.mxu1 %v6059_v2  ;;  %8040 = vst [vmem:[#allocation137_spill] sm:$0xff] %v6080_v21  ;;  %v6082_v52 = vpack.c.bf16 %v4325_v10, %v4325_v10  ;;  %v4389_v2 = vld [vmem:[#allocation12 + $0x78] sm:$0xf0]  ;;  %v4499_v10 = vld [vmem:[#allocation12 + $0x148] sm:$0xf] }
 0x155   :  { %1441 = vmatpush.bf16.msrb.mxu2 %v6063_v3  ;;  %1454 = vmatpush.bf16.msrb.mxu3 %v6065_v57  ;;  %8042 = vst [vmem:[#allocation139_spill] sm:$0xff] %v6088_v34  ;;  %v6092_v18 = vor.u32 %v4864_v51, %v4389_v2  ;;  %v4894_v3 = vld [vmem:[#allocation12 + $0x154] sm:$0xf0]  ;;  %v4860_v57 = vld [vmem:[#allocation12 + $0x4c] sm:$0xf]  ;;  %v6102_v51 = vor.u32 %v4862_v42, %v4371_v33 }
 0x156   :  { %8044 = vst [vmem:[#allocation141_spill] sm:$0xff] %v6094_v17  ;;  %v6104_v2 = vor.u32 %v4894_v3, %v4499_v10  ;;  %v4355_v27 = vld [vmem:[#allocation12 + $0x28] sm:$0xf]  ;;  %v4858_v5 = vld [vmem:[#allocation12 + $0x34] sm:$0xf0]  ;;  %v6108_v58 = vor.u32 %v4860_v57, %v4373_v62 }
 0x157   :  { %8043 = vst [vmem:[#allocation140_spill] sm:$0xff] %v6092_v18  ;;  %v6114_v3 = vor.u32 %v4858_v5, %v4355_v27  ;;  %v4339_v42 = vld [vmem:[#allocation12 + $0x8] sm:$0xf]  ;;  %v4854_v10 = vld [vmem:[#allocation12 + $0x14] sm:$0xf0] }
 0x158   :  { %1416 = vmatpush.bf16.msra.mxu0 %v6072_v37  ;;  %1429 = vmatpush.bf16.msra.mxu1 %v6074_v49  ;;  %8045 = vst [vmem:[#allocation142_spill] sm:$0xff] %v6102_v51  ;;  %v4483_v37 = vld [vmem:[#allocation12 + $0x128] sm:$0xf]  ;;  %v4856_v49 = vld [vmem:[#allocation12 + $0x2c] sm:$0xf]  ;;  %v8057_v27 = vld [vmem:[#allocation95_spill] sm:$0xff] }
 0x159   :  { %1442 = vmatpush.bf16.msrb.mxu2 %v6078_v39  ;;  %1455 = vmatpush.bf16.msrb.mxu3 %v6080_v21  ;;  %8046 = vst [vmem:[#allocation143_spill] sm:$0xff] %v6104_v2  ;;  %v6110_v39 = vor.u32 %v4892_v25, %v4501_v15  ;;  %v4890_v21 = vld [vmem:[#allocation12 + $0x134] sm:$0xf0]  ;;  %v4467_v25 = vld [vmem:[#allocation12 + $0x108] sm:$0xf] }
 0x15a   :  { %1369 = vmatmul.bf16.vlgmr.msrb.gmra.mxu0 %v6082_v52  ;;  %1382 = vmatmul.bf16.vlgmr.msrb.gmra.mxu1 %v6029_v54  ;;  %v6116_v33 = vor.u32 %v4890_v21, %v4483_v37  ;;  %v4886_v15 = vld [vmem:[#allocation12 + $0x114] sm:$0xf0]  ;;  %v6126_v37 = vor.u32 %v4854_v10, %v4339_v42  ;;  %v8058_v5 = vld [vmem:[#allocation100_spill] sm:$0xff] }
 0x15b   :  { %1395 = vmatmul.bf16.vlgmr.msra.gmra.mxu2 %v6082_v52  ;;  %1408 = vmatmul.bf16.vlgmr.msra.gmra.mxu3 %v6029_v54  ;;  %v6128_v21 = vor.u32 %v4886_v15, %v4467_v25  ;;  %v8059_v42 = vld [vmem:[#allocation102_spill] sm:$0xff]  ;;  %v8060_v10 = vld [vmem:[#allocation99_spill] sm:$0xff]  ;;  %v8061_v25 = vld [vmem:[#allocation101_spill] sm:$0xff] }
 0x15c   :  { %1417 = vmatpush.bf16.msra.mxu0 %v6086_v53  ;;  %1430 = vmatpush.bf16.msra.mxu1 %v6088_v34  ;;  %v4357_v53 = vld [vmem:[#allocation12 + $0x38] sm:$0xf0]  ;;  %8047 = vst [vmem:[#allocation144_spill] sm:$0xff] %v6126_v37  ;;  %v8062_v15 = vld [vmem:[#allocation104_spill] sm:$0xff] }
 0x15d   :  { %1443 = vmatpush.bf16.msrb.mxu2 %v6092_v18  ;;  %1456 = vmatpush.bf16.msrb.mxu3 %v6094_v17  ;;  %v4485_v34 = vld [vmem:[#allocation12 + $0x138] sm:$0xf0]  ;;  %v6120_v57 = vor.u32 %v4856_v49, %v4357_v53  ;;  %v4852_v18 = vld [vmem:[#allocation12 + $0xc] sm:$0xf]  ;;  %v8051_v53 = vld [vmem:[#allocation92_spill] sm:$0xff] }
 0x15e   :  { %v6122_v62 = vor.u32 %v4888_v13, %v4485_v34  ;;  %v4884_v17 = vld [vmem:[#allocation12 + $0x10c] sm:$0xf] }
 0x15f   :  { %v8052_v34 = vld [vmem:[#allocation89_spill] sm:$0xff] }
 0x160   :  { %1418 = vmatpush.bf16.msra.mxu0 %v6102_v51  ;;  %1431 = vmatpush.bf16.msra.mxu1 %v6104_v2  ;;  %v4341_v51 = vld [vmem:[#allocation12 + $0x18] sm:$0xf0] }
 0x161   :  { %1444 = vmatpush.bf16.msrb.mxu2 %v6108_v58  ;;  %1457 = vmatpush.bf16.msrb.mxu3 %v6110_v39  ;;  %v4469_v2 = vld [vmem:[#allocation12 + $0x118] sm:$0xf0]  ;;  %v6132_v13 = vor.u32 %v4852_v18, %v4341_v51  ;;  %v8055_v51 = vld [vmem:[#allocation96_spill] sm:$0xff] }
 0x162   :  { %v6134_v49 = vor.u32 %v4884_v17, %v4469_v2  ;;  %v8053_v18 = vld [vmem:[#allocation91_spill] sm:$0xff]  ;;  %v8054_v17 = vld [vmem:[#allocation94_spill] sm:$0xff]  ;;  %v8056_v2 = vld [vmem:[#allocation93_spill] sm:$0xff] }
 0x163   :  { %8048 = vst [vmem:[#allocation145_spill] sm:$0xff] %v6132_v13 }
 0x164   :  { %1419 = vmatpush.bf16.msra.mxu0 %v6114_v3  ;;  %1432 = vmatpush.bf16.msra.mxu1 %v6116_v33 }
 0x165   :  { %1445 = vmatpush.bf16.msrb.mxu2 %v6120_v57  ;;  %1458 = vmatpush.bf16.msrb.mxu3 %v6122_v62 }
 0x168   :  { %1420 = vmatpush.bf16.msra.mxu0 %v6126_v37  ;;  %1433 = vmatpush.bf16.msra.mxu1 %v6128_v21 }
 0x169   :  { %1446 = vmatpush.bf16.msrb.mxu2 %v6132_v13  ;;  %1459 = vmatpush.bf16.msrb.mxu3 %v6134_v49 }
 0x16b   :  { %1421 = vmatmul.bf16.vlgmr.msra.gmra.mxu0 %v6082_v52  ;;  %1434 = vmatmul.bf16.vlgmr.msra.gmra.mxu1 %v6029_v54 }
 0x16c   :  { %1550 = vmatpush.bf16.msrb.mxu1 %v5635_v8  ;;  %1447 = vmatmul.bf16.vlgmr.msrb.gmra.mxu2 %v6082_v52  ;;  %v8050_v52 = vld [vmem:[#allocation90_spill] sm:$0xff] }
 0x16d   :  { %1576 = vmatpush.bf16.msra.mxu3 %v5693_v30  ;;  %1537 = vmatpush.bf16.msrb.mxu0 %v5633_v0 }
 0x16e   :  { %1460 = vmatmul.bf16.vlgmr.msrb.gmra.mxu3 %v6029_v54  ;;  %1563 = vmatpush.bf16.msra.mxu2 %v5688_v26  ;;  %v8049_v54 = vld [vmem:[#allocation85_spill] sm:$0xff] }
 0x170   :  { %1551 = vmatpush.bf16.msrb.mxu1 %v5645_v20 }
 0x171   :  { %1577 = vmatpush.bf16.msra.mxu3 %v5711_v45  ;;  %1538 = vmatpush.bf16.msrb.mxu0 %v5641_v12 }
 0x172   :  { %1564 = vmatpush.bf16.msra.mxu2 %v5702_v38 }
 0x174   :  { %1552 = vmatpush.bf16.msrb.mxu1 %v5651_v32 }
 0x175   :  { %1578 = vmatpush.bf16.msra.mxu3 %v5722_v55  ;;  %1539 = vmatpush.bf16.msrb.mxu0 %v5648_v24 }
 0x176   :  { %1565 = vmatpush.bf16.msra.mxu2 %v5715_v48 }
 0x178   :  { %1553 = vmatpush.bf16.msrb.mxu1 %v5662_v46 }
 0x179   :  { %1579 = vmatpush.bf16.msra.mxu3 %v5731_v61  ;;  %1540 = vmatpush.bf16.msrb.mxu0 %v5654_v36 }
 0x17a   :  { %1566 = vmatpush.bf16.msra.mxu2 %v5727_v56 }
 0x17c   :  { %1554 = vmatpush.bf16.msrb.mxu1 %v5673_v59 }
 0x17d   :  { %1580 = vmatpush.bf16.msra.mxu3 %v5739_v6  ;;  %1541 = vmatpush.bf16.msrb.mxu0 %v5670_v50 }
 0x17e   :  { %1567 = vmatpush.bf16.msra.mxu2 %v5735_v63 }
 0x180   :  { %1555 = vmatpush.bf16.msrb.mxu1 %v5683_v11 }
 0x181   :  { %1581 = vmatpush.bf16.msra.mxu3 %v5755_v19  ;;  %1542 = vmatpush.bf16.msrb.mxu0 %v5679_v1 }
 0x182   :  { %1568 = vmatpush.bf16.msra.mxu2 %v5743_v7 }
 0x184   :  { %1556 = vmatpush.bf16.msrb.mxu1 %v5691_v29  ;;  %v8083_v29 = vld [vmem:[#allocation121_spill] sm:$0xff] }
 0x185   :  { %1582 = vmatpush.bf16.msra.mxu3 %v5762_v47  ;;  %1543 = vmatpush.bf16.msrb.mxu0 %v5686_v16 }
 0x186   :  { %1569 = vmatpush.bf16.msra.mxu2 %v5752_v14 }
 0x188   :  { %1557 = vmatpush.bf16.msrb.mxu1 %v5706_v41 }
 0x189   :  { %1583 = vmatpush.bf16.msra.mxu3 %v5768_v28  ;;  %1544 = vmatpush.bf16.msrb.mxu0 %v5696_v31 }
 0x18a   :  { %1570 = vmatpush.bf16.msra.mxu2 %v5758_v23 }
 0x18c   :  { %1666 = vmatpush.bf16.msra.mxu1 %v5868_v44 }
 0x18d   :  { %1692 = vmatpush.bf16.msrb.mxu3 %v5877_v9  ;;  %1653 = vmatpush.bf16.msra.mxu0 %v5864_v22 }
 0x18e   :  { %1679 = vmatpush.bf16.msrb.mxu2 %v8049_v54 }
 0x190   :  { %1667 = vmatpush.bf16.msra.mxu1 %v8050_v52 }
 0x191   :  { %1693 = vmatpush.bf16.msrb.mxu3 %v8051_v53  ;;  %1654 = vmatpush.bf16.msra.mxu0 %v8052_v34  ;;  %v8063_v34 = vld [vmem:[#allocation107_spill] sm:$0xff]  ;;  %v8078_v53 = vld [vmem:[#allocation73_spill] sm:$0xff] }
 0x192   :  { %1680 = vmatpush.bf16.msrb.mxu2 %v8053_v18  ;;  %v8064_v18 = vld [vmem:[#allocation103_spill] sm:$0xff] }
 0x194   :  { %1668 = vmatpush.bf16.msra.mxu1 %v8054_v17  ;;  %v8065_v17 = vld [vmem:[#allocation105_spill] sm:$0xff] }
 0x195   :  { %1694 = vmatpush.bf16.msrb.mxu3 %v8055_v51  ;;  %1655 = vmatpush.bf16.msra.mxu0 %v8056_v2  ;;  %v8066_v51 = vld [vmem:[#allocation110_spill] sm:$0xff]  ;;  %v8067_v2 = vld [vmem:[#allocation112_spill] sm:$0xff] }
 0x196   :  { %1681 = vmatpush.bf16.msrb.mxu2 %v8057_v27  ;;  %v8068_v27 = vld [vmem:[#allocation109_spill] sm:$0xff] }
 0x198   :  { %1669 = vmatpush.bf16.msra.mxu1 %v8058_v5  ;;  %v8069_v5 = vld [vmem:[#allocation111_spill] sm:$0xff] }
 0x199   :  { %1695 = vmatpush.bf16.msrb.mxu3 %v8059_v42  ;;  %1656 = vmatpush.bf16.msra.mxu0 %v8060_v10  ;;  %v8070_v42 = vld [vmem:[#allocation114_spill] sm:$0xff] }
 0x19a   :  { %1682 = vmatpush.bf16.msrb.mxu2 %v8061_v25  ;;  %v8071_v25 = vld [vmem:[#allocation113_spill] sm:$0xff] }
 0x19c   :  { %1670 = vmatpush.bf16.msra.mxu1 %v8062_v15  ;;  %v8072_v15 = vld [vmem:[#allocation115_spill] sm:$0xff] }
 0x19d   :  { %1696 = vmatpush.bf16.msrb.mxu3 %v8063_v34  ;;  %1657 = vmatpush.bf16.msra.mxu0 %v8064_v18 }
 0x19e   :  { %1683 = vmatpush.bf16.msrb.mxu2 %v8065_v17  ;;  %v8076_v17 = vld [vmem:[#allocation62_spill] sm:$0xff] }
 0x1a0   :  { %1671 = vmatpush.bf16.msra.mxu1 %v8066_v51 }
 0x1a1   :  { %1697 = vmatpush.bf16.msrb.mxu3 %v8067_v2  ;;  %1658 = vmatpush.bf16.msra.mxu0 %v8068_v27  ;;  %v8073_v2 = vld [vmem:[#allocation57_spill] sm:$0xff] }
 0x1a2   :  { %1684 = vmatpush.bf16.msrb.mxu2 %v8069_v5  ;;  %v8074_v27 = vld [vmem:[#allocation61_spill] sm:$0xff]  ;;  %v8075_v5 = vld [vmem:[#allocation58_spill] sm:$0xff] }
 0x1a3   :  { %v486_v51 = vadd.f32 %v8074_v27, %v8073_v2  ;;  %v6214_v2 = vld [vmem:[#allocation13] sm:$0xf] }
 0x1a4   :  { %1672 = vmatpush.bf16.msra.mxu1 %v8070_v42  ;;  %v515_v42 = vadd.f32 %v8076_v17, %v8075_v5 }
 0x1a5   :  { %1698 = vmatpush.bf16.msrb.mxu3 %v5991_v4  ;;  %1659 = vmatpush.bf16.msra.mxu0 %v8071_v25 }
 0x1a6   :  { %1685 = vmatpush.bf16.msrb.mxu2 %v8072_v15 }
 0x1a8   :  { %1673 = vmatpush.bf16.msra.mxu1 %v6002_v43  ;;  %v8077_v43 = vld [vmem:[#allocation75_spill] sm:$0xff] }
 0x1a9   :  { %1699 = vmatpush.bf16.msrb.mxu3 %v6015_v35  ;;  %1660 = vmatpush.bf16.msra.mxu0 %v5999_v40  ;;  %v544_v35 = vadd.f32 %v8078_v53, %v8077_v43 }
 0x1aa   :  { %1686 = vmatpush.bf16.msrb.mxu2 %v6004_v60 }
 0x1c7   :  { %v925_v18 = vpop.f32.mrf.mxu0  ;;  %v938_v4 = vpop.f32.mrf.mxu1 }
 0x1c8   :  { %v926_v34 = vadd.f32 %v925_v18, %v486_v51  ;;  %v939_v25 = vadd.f32 %v938_v4, %v515_v42 }
 0x1ca   :  { %v4326_v10 = vmul.f32 -1.442695, %v926_v34  ;;  %v4327_v15 = vmul.f32 -1.442695, %v939_v25  ;;  %v6217_v34 = vperm.slane %v6214_v2, 0 }
 0x1cc   :  { %5044 = vpow2.f32 %v4326_v10  ;;  %8079 = vst [vmem:[#allocation61_spill] sm:$0xff] %v6217_v34 }
 0x1cd   :  { %5046 = vpow2.f32 %v4327_v15 }
 0x1ce   :  { %v951_v40 = vpop.f32.mrf.mxu2  ;;  %v964_v52 = vpop.f32.mrf.mxu3 }
 0x1cf   :  { %v952_v60 = vadd.f32 %v951_v40, %v544_v35  ;;  %v927_v54 = vpop.f32.mrf.mxu0  ;;  %v940_v22 = vpop.f32.mrf.mxu1  ;;  %v8080_v40 = vld [vmem:[#allocation76_spill] sm:$0xff]  ;;  %v8081_v35 = vld [vmem:[#allocation74_spill] sm:$0xff] }
 0x1d0   :  { %v573_v22 = vadd.f32 %v8081_v35, %v8080_v40 }
 0x1d1   :  { %v4328_v27 = vmul.f32 -1.442695, %v952_v60 }
 0x1d2   :  { %v5045_v17 = vpop.eup %5044  ;;  %v965_v25 = vadd.f32 %v964_v52, %v573_v22 }
 0x1d3   :  { %v5047_v5 = vpop.eup %5046  ;;  %v977_v23 = vadd.f32 1.0, %v5045_v17  ;;  %5048 = vpow2.f32 %v4328_v27  ;;  %v6225_v27 = vperm.slane %v6214_v2, 1 }
 0x1d4   :  { %v978_v4 = vadd.f32 1.0, %v5047_v5 }
 0x1d5   :  { %5050 = vrcp.f32 %v977_v23  ;;  %8082 = vst [vmem:[#allocation62_spill] sm:$0xff] %v6225_v27  ;;  %v989_v31 = vand.u32 2147483647, %v977_v23  ;;  %v991_v9 = vand.u32 2147483648, %v977_v23  ;;  %vm985_vm15 = vweird.f32 %v977_v23 }
 0x1d6   :  { %5052 = vrcp.f32 %v978_v4  ;;  %v953_v53 = vpop.f32.mrf.mxu2  ;;  %v966_v18 = vpop.f32.mrf.mxu3  ;;  %v1004_v44 = vand.u32 2147483647, %v978_v4  ;;  %vm1000_vm14 = vweird.f32 %v978_v4 }
 0x1d7   :  { %v1370_v51 = vpop.f32.mrf.mxu0  ;;  %v1383_v42 = vpop.f32.mrf.mxu1  ;;  %vm990_vm2 = vcmp.eq.f32.partialorder %v989_v31, 8.507059e+37 }
 0x1d8   :  { %v1371_v60 = vadd.f32 %v1370_v51, %v6217_v34  ;;  %vm1005_vm3 = vcmp.eq.f32.partialorder %v1004_v44, 8.507059e+37 }
 0x1d9   :  { %v5049_v54 = vpop.eup %5048 }
 0x1da   :  { %v6222_v10 = vadd.f32 1.0, %v5049_v54  ;;  %v1384_v15 = vadd.f32 %v1383_v42, %v1371_v60  ;;  %v1006_v54 = vand.u32 2147483648, %v978_v4 }
 0x1db   :  { %v5051_v5 = vpop.eup %5050 }
 0x1dc   :  { %v5053_v17 = vpop.eup %5052  ;;  %v981_v43 = vmul.f32 %v5051_v5, %v977_v23  ;;  %5054 = vrcp.f32 %v6222_v10  ;;  %v4585_v35 = vmul.f32 -1.442695, %v1384_v15  ;;  %vm986_vm12 = vweird.f32 %v5051_v5 }
 0x1dd   :  { %v996_v53 = vmul.f32 %v5053_v17, %v978_v4  ;;  %5056 = vtanh.f32 %v965_v25  ;;  %vm1001_vm13 = vweird.f32 %v5053_v17  ;;  %v6230_v15 = vperm.slane %v6214_v2, 2  ;;  %vm987_vm0 = vmor %vm985_vm15, %vm986_vm12 }
 0x1de   :  { %v982_v18 = vsub.f32 1.0, %v981_v43  ;;  %v1396_v40 = vpop.f32.mrf.mxu2  ;;  %v1409_v51 = vpop.f32.mrf.mxu3  ;;  %5058 = vpow2.f32 %v4585_v35  ;;  %vm1002_vm1 = vmor %vm1000_vm14, %vm1001_vm13  ;;  %vm1015_vm5 = vweird.f32 %v6222_v10 }
 0x1df   :  { %v997_v34 = vsub.f32 1.0, %v996_v53  ;;  %v1397_v52 = vadd.f32 %v1396_v40, %v6225_v27  ;;  %v1372_v42 = vpop.f32.mrf.mxu0  ;;  %v1385_v22 = vpop.f32.mrf.mxu1  ;;  %v992_v40 = vor.u32 1.1754944e-38, %v991_v9  ;;  %v1007_v27 = vor.u32 1.1754944e-38, %v1006_v54 }
 0x1e0   :  { %v983_v60 = vmul.f32 %v5051_v5, %v982_v18 }
 0x1e1   :  { %v998_v28 = vmul.f32 %v5053_v17, %v997_v34  ;;  %v1410_v41 = vadd.f32 %v1409_v51, %v1397_v52 }
 0x1e2   :  { %v5055_v43 = vpop.eup %5054  ;;  %v984_v25 = vadd.f32 %v5051_v5, %v983_v60 }
 0x1e3   :  { %v1011_v53 = vmul.f32 %v5055_v43, %v6222_v10  ;;  %v999_v42 = vadd.f32 %v5053_v17, %v998_v28  ;;  %v4586_v22 = vmul.f32 -1.442695, %v1410_v41  ;;  %v5057_v18 = vpop.eup %5056  ;;  %vm1016_vm4 = vweird.f32 %v5055_v43 }
 0x1e4   :  { %v988_v35 = vsel %vm987_vm0, %v5051_v5, %v984_v25  ;;  %v5059_v23 = vpop.eup %5058  ;;  %vm6249_vm6 = vmor %vm1015_vm5, %vm1016_vm4 }
 0x1e5   :  { %v1012_v34 = vsub.f32 1.0, %v1011_v53  ;;  %v993_v51 = vsel %vm990_vm2, %v992_v40, %v988_v35  ;;  %v1003_v4 = vsel %vm1002_vm1, %v5053_v17, %v999_v42  ;;  %5060 = vpow2.f32 %v4586_v22 }
 0x1e6   :  { %v1008_v52 = vsel %vm1005_vm3, %v1007_v27, %v1003_v4  ;;  %v1027_v60 = vmul.f32 %v5057_v18, %v993_v51  ;;  %v1398_v14 = vpop.f32.mrf.mxu2  ;;  %v1411_v16 = vpop.f32.mrf.mxu3  ;;  %v6234_v28 = vadd.f32 1.0, %v5059_v23  ;;  %v1021_v27 = vand.u32 2147483648, %v6222_v10 }
 0x1e7   :  { %v1013_v47 = vmul.f32 %v5055_v43, %v1012_v34  ;;  %v1026_v9 = vmul.f32 %v1008_v52, %v8083_v29  ;;  %v1019_v29 = vand.u32 2147483647, %v6222_v10  ;;  %v6247_v17 = vperm.slane %v6214_v2, 3 }
 0x1e8   :  { %v1422_v41 = vpop.f32.mrf.mxu0  ;;  %v1435_v7 = vpop.f32.mrf.mxu1  ;;  %5062 = vrcp.f32 %v6234_v28  ;;  %v1022_v40 = vor.u32 1.1754944e-38, %v1021_v27  ;;  %v1488_v27 = vand.u32 2147483648, %v6234_v28  ;;  %vm1482_vm9 = vweird.f32 %v6234_v28 }
 0x1e9   :  { %v6236_v54 = vadd.f32 %v1027_v60, %v1026_v9  ;;  %v1423_v31 = vadd.f32 %v1422_v41, %v6230_v15  ;;  %v1014_v44 = vadd.f32 %v5055_v43, %v1013_v47  ;;  %vm1020_vm7 = vcmp.eq.f32.partialorder %v1019_v29, 8.507059e+37 }
 0x1ea   :  { %v1486_v29 = vand.u32 2147483647, %v6234_v28 }
 0x1eb   :  { %v5061_v5 = vpop.eup %5060  ;;  %5064 = vtanh.f32 %v6236_v54  ;;  %v1436_v16 = vadd.f32 %v1435_v7, %v1423_v31  ;;  %v1018_v53 = vsel %vm6249_vm6, %v5055_v43, %v1014_v44 }
 0x1ec   :  { %v6244_v14 = vadd.f32 1.0, %v5061_v5  ;;  %v1023_v51 = vsel %vm1020_vm7, %v1022_v40, %v1018_v53  ;;  %vm1487_vm13 = vcmp.eq.f32.partialorder %v1486_v29, 8.507059e+37  ;;  %v8096_v40 = vld [vmem:[#allocation131_spill] sm:$0xff] }
 0x1ed   :  { %v4587_v47 = vmul.f32 -1.442695, %v1436_v16 }
 0x1ee   :  { %5066 = vrcp.f32 %v6244_v14  ;;  %v5063_v7 = vpop.eup %5062  ;;  %v1503_v53 = vand.u32 2147483648, %v6244_v14  ;;  %vm1497_vm12 = vweird.f32 %v6244_v14 }
 0x1ef   :  { %5068 = vpow2.f32 %v4587_v47  ;;  %v1448_v42 = vpop.f32.mrf.mxu2  ;;  %v1478_v22 = vmul.f32 %v5063_v7, %v6234_v28  ;;  %vm1483_vm8 = vweird.f32 %v5063_v7 }
 0x1f0   :  { %v1449_v2 = vadd.f32 %v1448_v42, %v6247_v17  ;;  %v1424_v18 = vpop.f32.mrf.mxu0  ;;  %v1437_v35 = vpop.f32.mrf.mxu1  ;;  %vm6273_vm10 = vmor %vm1482_vm9, %vm1483_vm8  ;;  %v8088_v42 = vld [vmem:[#allocation123_spill] sm:$0xff] }
 0x1f1   :  { %v1461_v10 = vpop.f32.mrf.mxu3  ;;  %v5065_v34 = vpop.eup %5064  ;;  %v1479_v23 = vsub.f32 1.0, %v1478_v22  ;;  %v8090_v18 = vld [vmem:[#allocation122_spill] sm:$0xff]  ;;  %v8091_v35 = vld [vmem:[#allocation124_spill] sm:$0xff] }
 0x1f2   :  { %v1030_v4 = vmul.f32 %v5065_v34, %v1023_v51  ;;  %v1462_v52 = vadd.f32 %v1461_v10, %v1449_v2  ;;  %v8089_v10 = vld [vmem:[#allocation125_spill] sm:$0xff]  ;;  %v1501_v2 = vand.u32 2147483647, %v6244_v14  ;;  %v1489_v34 = vor.u32 1.1754944e-38, %v1488_v27 }
 0x1f3   :  { %v1480_v9 = vmul.f32 %v5063_v7, %v1479_v23  ;;  %v1504_v23 = vor.u32 1.1754944e-38, %v1503_v53  ;;  %v8097_v53 = vld [vmem:[#allocation133_spill] sm:$0xff] }
 0x1f4   :  { %v5067_v43 = vpop.eup %5066  ;;  %v6258_v60 = vpack.c.bf16 %v1030_v4, %v1030_v4  ;;  %5070 = vtanh.f32 %v1462_v52  ;;  %v907_v52 = vld [vmem:[#allocation4 + $0x8] sm:$0xff]  ;;  %vm1502_vm15 = vcmp.eq.f32.partialorder %v1501_v2, 8.507059e+37 }
 0x1f5   :  { %v5069_v41 = vpop.eup %5068  ;;  %v1493_v31 = vmul.f32 %v5067_v43, %v6244_v14  ;;  %v1481_v5 = vadd.f32 %v5063_v7, %v1480_v9  ;;  %vm1498_vm11 = vweird.f32 %v5067_v43 }
 0x1f6   :  { %v6261_v44 = vadd.f32 1.0, %v5069_v41  ;;  %1545 = vmatmul.bf16.vlgmr.msrb.gmra.mxu0 %v6258_v60  ;;  %1558 = vmatmul.bf16.vlgmr.msrb.gmra.mxu1 %v6258_v60  ;;  %vm1499_vm14 = vmor %vm1497_vm12, %vm1498_vm11  ;;  %v8092_v41 = vld [vmem:[#allocation127_spill] sm:$0xff] }
 0x1f7   :  { %v1494_v16 = vsub.f32 1.0, %v1493_v31  ;;  %v1450_v25 = vpop.f32.mrf.mxu2  ;;  %1571 = vmatmul.bf16.vlgmr.msra.gmra.mxu2 %v6258_v60  ;;  %1584 = vmatmul.bf16.vlgmr.msra.gmra.mxu3 %v6258_v60  ;;  %v1485_v22 = vsel %vm6273_vm10, %v5063_v7, %v1481_v5  ;;  %v8093_v31 = vld [vmem:[#allocation129_spill] sm:$0xff]  ;;  %v8094_v5 = vld [vmem:[#allocation126_spill] sm:$0xff] }
 0x1f8   :  { %5072 = vrcp.f32 %v6261_v44  ;;  %1718 = vmatpush.bf16.msrb.mxu1 %v8088_v42  ;;  %1744 = vmatpush.bf16.msra.mxu3 %v8089_v10  ;;  %v1490_v9 = vsel %vm1487_vm13, %v1489_v34, %v1485_v22  ;;  %v8099_v34 = vld [vmem:[#allocation130_spill] sm:$0xff]  ;;  %v1518_v2 = vand.u32 2147483648, %v6261_v44  ;;  %vm1512_vm1 = vweird.f32 %v6261_v44 }
 0x1f9   :  { %v1463_v47 = vpop.f32.mrf.mxu3  ;;  %v1495_v28 = vmul.f32 %v5067_v43, %v1494_v16  ;;  %1705 = vmatpush.bf16.msrb.mxu0 %v8090_v18  ;;  %1731 = vmatpush.bf16.msra.mxu2 %v8091_v35  ;;  %v8095_v16 = vld [vmem:[#allocation128_spill] sm:$0xff] }
 0x1fa   :  { %v5071_v4 = vpop.eup %5070 }
 0x1fb   :  { %v1496_v51 = vadd.f32 %v5067_v43, %v1495_v28  ;;  %v1524_v47 = vmul.f32 %v5071_v4, %v1490_v9  ;;  %v8101_v4 = vld [vmem:[#allocation135_spill] sm:$0xff]  ;;  %v8103_v9 = vld [vmem:[#allocation134_spill] sm:$0xff] }
 0x1fc   :  { %1719 = vmatpush.bf16.msrb.mxu1 %v8092_v41  ;;  %1745 = vmatpush.bf16.msra.mxu3 %v8093_v31 }
 0x1fd   :  { %v1500_v7 = vsel %vm1499_vm14, %v5067_v43, %v1496_v51  ;;  %1706 = vmatpush.bf16.msrb.mxu0 %v8094_v5  ;;  %1732 = vmatpush.bf16.msra.mxu2 %v8095_v16  ;;  %v8100_v43 = vld [vmem:[#allocation132_spill] sm:$0xff] }
 0x1fe   :  { %v5073_v27 = vpop.eup %5072  ;;  %v1505_v25 = vsel %vm1502_vm15, %v1504_v23, %v1500_v7  ;;  %v1516_v23 = vand.u32 2147483647, %v6261_v44  ;;  %v8104_v7 = vld [vmem:[#allocation136_spill] sm:$0xff] }
 0x1ff   :  { %v1508_v14 = vmul.f32 %v5073_v27, %v6261_v44  ;;  %v1523_v29 = vmul.f32 %v1505_v25, %v907_v52  ;;  %vm1513_vm0 = vweird.f32 %v5073_v27  ;;  %v8102_v52 = vld [vmem:[#allocation137_spill] sm:$0xff]  ;;  %v8107_v44 = vld [vmem:[#allocation138_spill] sm:$0xff] }
 0x200   :  { %1720 = vmatpush.bf16.msrb.mxu1 %v8096_v40  ;;  %1746 = vmatpush.bf16.msra.mxu3 %v8097_v53  ;;  %vm1514_vm2 = vmor %vm1512_vm1, %vm1513_vm0  ;;  %vm1517_vm3 = vcmp.eq.f32.partialorder %v1516_v23, 8.507059e+37  ;;  %v8114_v23 = vld [vmem:[#allocation55_spill] sm:$0xff] }
 0x201   :  { %v1509_v28 = vsub.f32 1.0, %v1508_v14  ;;  %v6292_v22 = vadd.f32 %v1524_v47, %v1523_v29  ;;  %1707 = vmatpush.bf16.msrb.mxu0 %v8099_v34  ;;  %1733 = vmatpush.bf16.msra.mxu2 %v8100_v43  ;;  %v1519_v14 = vor.u32 1.1754944e-38, %v1518_v2  ;;  %v8105_v47 = vld [vmem:[#allocation139_spill] sm:$0xff]  ;;  %v8111_v2 = vld [vmem:[#allocation142_spill] sm:$0xff] }
 0x203   :  { %8098 = vst [vmem:[#allocation73_spill] sm:$0xff] %v6292_v22  ;;  %v1510_v51 = vmul.f32 %v5073_v27, %v1509_v28  ;;  %5074 = vtanh.f32 %v6292_v22  ;;  %v8106_v28 = vld [vmem:[#allocation141_spill] sm:$0xff] }
 0x204   :  { %1721 = vmatpush.bf16.msrb.mxu1 %v8101_v4  ;;  %1747 = vmatpush.bf16.msra.mxu3 %v8102_v52 }
 0x205   :  { %1708 = vmatpush.bf16.msrb.mxu0 %v8103_v9  ;;  %1734 = vmatpush.bf16.msra.mxu2 %v8104_v7  ;;  %v1511_v25 = vadd.f32 %v5073_v27, %v1510_v51  ;;  %v8108_v9 = vld [vmem:[#allocation140_spill] sm:$0xff]  ;;  %v8110_v51 = vld [vmem:[#allocation143_spill] sm:$0xff] }
 0x206   :  { %1674 = vmatmul.bf16.vlgmr.msra.gmra.mxu1 %v6258_v60 }
 0x207   :  { %1700 = vmatmul.bf16.vlgmr.msrb.gmra.mxu3 %v6258_v60  ;;  %v1515_v29 = vsel %vm1514_vm2, %v5073_v27, %v1511_v25  ;;  %v8116_v25 = vld [vmem:[#allocation52_spill] sm:$0xff] }
 0x208   :  { %1722 = vmatpush.bf16.msrb.mxu1 %v8105_v47  ;;  %1748 = vmatpush.bf16.msra.mxu3 %v8106_v28  ;;  %v1520_v22 = vsel %vm1517_vm3, %v1519_v14, %v1515_v29  ;;  %v8117_v14 = vld [vmem:[#allocation43_spill] sm:$0xff]  ;;  %v8118_v29 = vld [vmem:[#allocation56_spill] sm:$0xff] }
 0x209   :  { %v5075_v52 = vpop.eup %5074  ;;  %1709 = vmatpush.bf16.msrb.mxu0 %v8107_v44  ;;  %1735 = vmatpush.bf16.msra.mxu2 %v8108_v9 }
 0x20a   :  { %v6310_v7 = vmul.f32 %v5075_v52, %v1520_v22  ;;  %v8113_v22 = vld [vmem:[#allocation39_spill] sm:$0xff]  ;;  %v8115_v52 = vld [vmem:[#allocation37_spill] sm:$0xff] }
 0x20c   :  { %8109 = vst [vmem:[#allocation74_spill] sm:$0xff] %v6310_v7  ;;  %1723 = vmatpush.bf16.msrb.mxu1 %v8110_v51  ;;  %1749 = vmatpush.bf16.msra.mxu3 %v6110_v39  ;;  %v1652_v27 = vpack.c.bf16 %v6310_v7, %v6310_v7  ;;  %v8120_v7 = vld [vmem:[#allocation87_spill] sm:$0xff] }
 0x20d   :  { %1710 = vmatpush.bf16.msrb.mxu0 %v8111_v2  ;;  %1736 = vmatpush.bf16.msra.mxu2 %v6108_v58 }
 0x20e   :  { %1661 = vmatmul.bf16.vlgmr.msra.gmra.mxu0 %v1652_v27  ;;  %1687 = vmatmul.bf16.vlgmr.msrb.gmra.mxu2 %v1652_v27 }
 0x210   :  { %1724 = vmatpush.bf16.msrb.mxu1 %v6116_v33  ;;  %1750 = vmatpush.bf16.msra.mxu3 %v6122_v62 }
 0x211   :  { %1711 = vmatpush.bf16.msrb.mxu0 %v6114_v3  ;;  %1737 = vmatpush.bf16.msra.mxu2 %v6120_v57 }
 0x214   :  { %1725 = vmatpush.bf16.msrb.mxu1 %v6128_v21  ;;  %1751 = vmatpush.bf16.msra.mxu3 %v6134_v49 }
 0x215   :  { %1712 = vmatpush.bf16.msrb.mxu0 %v6126_v37  ;;  %1738 = vmatpush.bf16.msra.mxu2 %v6132_v13 }
 0x217   :  { %1726 = vmatmul.bf16.vlgmr.msrb.gmra.mxu1 %v6258_v60  ;;  %1752 = vmatmul.bf16.vlgmr.msra.gmra.mxu3 %v6258_v60  ;;  %v8112_v60 = vld [vmem:[#allocation51_spill] sm:$0xff] }
 0x218   :  { %1843 = vmatpush.bf16.msra.mxu1 %v5635_v8  ;;  %1869 = vmatpush.bf16.msrb.mxu3 %v5693_v30 }
 0x219   :  { %1830 = vmatpush.bf16.msra.mxu0 %v5633_v0  ;;  %1856 = vmatpush.bf16.msrb.mxu2 %v5688_v26 }
 0x21c   :  { %1844 = vmatpush.bf16.msra.mxu1 %v5645_v20  ;;  %1870 = vmatpush.bf16.msrb.mxu3 %v5711_v45 }
 0x21d   :  { %1831 = vmatpush.bf16.msra.mxu0 %v5641_v12  ;;  %1857 = vmatpush.bf16.msrb.mxu2 %v5702_v38 }
 0x21e   :  { %1713 = vmatmul.bf16.vlgmr.msrb.gmra.mxu0 %v1652_v27  ;;  %1739 = vmatmul.bf16.vlgmr.msra.gmra.mxu2 %v1652_v27  ;;  %v8119_v27 = vld [vmem:[#allocation84_spill] sm:$0xff] }
 0x220   :  { %1845 = vmatpush.bf16.msra.mxu1 %v5651_v32  ;;  %1871 = vmatpush.bf16.msrb.mxu3 %v5722_v55 }
 0x221   :  { %1832 = vmatpush.bf16.msra.mxu0 %v5648_v24  ;;  %1858 = vmatpush.bf16.msrb.mxu2 %v5715_v48 }
 0x224   :  { %1846 = vmatpush.bf16.msra.mxu1 %v5662_v46  ;;  %1872 = vmatpush.bf16.msrb.mxu3 %v5731_v61 }
 0x225   :  { %1833 = vmatpush.bf16.msra.mxu0 %v5654_v36  ;;  %1859 = vmatpush.bf16.msrb.mxu2 %v5727_v56 }
 0x228   :  { %1847 = vmatpush.bf16.msra.mxu1 %v5673_v59  ;;  %1873 = vmatpush.bf16.msrb.mxu3 %v5739_v6  ;;  %v8155_v6 = vld [vmem:[#allocation77_spill] sm:$0xff] }
 0x229   :  { %1834 = vmatpush.bf16.msra.mxu0 %v5670_v50  ;;  %1860 = vmatpush.bf16.msrb.mxu2 %v5735_v63  ;;  %v8154_v63 = vld [vmem:[#allocation66_spill] sm:$0xff] }
 0x22c   :  { %1848 = vmatpush.bf16.msra.mxu1 %v5683_v11  ;;  %1874 = vmatpush.bf16.msrb.mxu3 %v5755_v19  ;;  %v8121_v19 = vld [vmem:[#allocation41_spill] sm:$0xff] }
 0x22d   :  { %1835 = vmatpush.bf16.msra.mxu0 %v5679_v1  ;;  %1861 = vmatpush.bf16.msrb.mxu2 %v8112_v60  ;;  %v8122_v1 = vld [vmem:[#allocation54_spill] sm:$0xff]  ;;  %v8123_v60 = vld [vmem:[#allocation83_spill] sm:$0xff]  ;;  %v8153_v11 = vld [vmem:[#allocation65_spill] sm:$0xff] }
 0x230   :  { %1849 = vmatpush.bf16.msra.mxu1 %v8113_v22  ;;  %1875 = vmatpush.bf16.msrb.mxu3 %v8114_v23  ;;  %v8124_v22 = vld [vmem:[#allocation85_spill] sm:$0xff]  ;;  %v8125_v23 = vld [vmem:[#allocation90_spill] sm:$0xff] }
 0x231   :  { %1836 = vmatpush.bf16.msra.mxu0 %v8115_v52  ;;  %1862 = vmatpush.bf16.msrb.mxu2 %v8116_v25  ;;  %v8126_v52 = vld [vmem:[#allocation92_spill] sm:$0xff]  ;;  %v8127_v25 = vld [vmem:[#allocation89_spill] sm:$0xff] }
 0x234   :  { %1850 = vmatpush.bf16.msra.mxu1 %v8117_v14  ;;  %1876 = vmatpush.bf16.msrb.mxu3 %v8118_v29  ;;  %v8128_v14 = vld [vmem:[#allocation91_spill] sm:$0xff]  ;;  %v8129_v29 = vld [vmem:[#allocation94_spill] sm:$0xff] }
 0x235   :  { %1837 = vmatpush.bf16.msra.mxu0 %v8121_v19  ;;  %1863 = vmatpush.bf16.msrb.mxu2 %v8122_v1  ;;  %v8132_v19 = vld [vmem:[#allocation95_spill] sm:$0xff]  ;;  %v8133_v1 = vld [vmem:[#allocation100_spill] sm:$0xff] }
 0x238   :  { %1959 = vmatpush.bf16.msrb.mxu1 %v8119_v27  ;;  %1985 = vmatpush.bf16.msra.mxu3 %v8120_v7  ;;  %v8130_v27 = vld [vmem:[#allocation96_spill] sm:$0xff]  ;;  %v8131_v7 = vld [vmem:[#allocation93_spill] sm:$0xff] }
 0x239   :  { %1946 = vmatpush.bf16.msrb.mxu0 %v8123_v60  ;;  %1972 = vmatpush.bf16.msra.mxu2 %v8124_v22  ;;  %v8134_v60 = vld [vmem:[#allocation102_spill] sm:$0xff]  ;;  %v8135_v22 = vld [vmem:[#allocation99_spill] sm:$0xff] }
 0x23c   :  { %1960 = vmatpush.bf16.msrb.mxu1 %v8125_v23  ;;  %1986 = vmatpush.bf16.msra.mxu3 %v8126_v52  ;;  %v8136_v23 = vld [vmem:[#allocation101_spill] sm:$0xff]  ;;  %v8137_v52 = vld [vmem:[#allocation104_spill] sm:$0xff] }
 0x23d   :  { %1947 = vmatpush.bf16.msrb.mxu0 %v8127_v25  ;;  %1973 = vmatpush.bf16.msra.mxu2 %v8128_v14  ;;  %v8138_v25 = vld [vmem:[#allocation107_spill] sm:$0xff] }
 0x23e   :  { %v8139_v14 = vld [vmem:[#allocation103_spill] sm:$0xff] }
 0x240   :  { %1961 = vmatpush.bf16.msrb.mxu1 %v8129_v29  ;;  %1987 = vmatpush.bf16.msra.mxu3 %v8130_v27  ;;  %v8140_v29 = vld [vmem:[#allocation105_spill] sm:$0xff]  ;;  %v8141_v27 = vld [vmem:[#allocation110_spill] sm:$0xff] }
 0x241   :  { %1948 = vmatpush.bf16.msrb.mxu0 %v8131_v7  ;;  %1974 = vmatpush.bf16.msra.mxu2 %v8132_v19  ;;  %v8142_v7 = vld [vmem:[#allocation112_spill] sm:$0xff]  ;;  %v8143_v19 = vld [vmem:[#allocation109_spill] sm:$0xff] }
 0x244   :  { %1962 = vmatpush.bf16.msrb.mxu1 %v8133_v1  ;;  %1988 = vmatpush.bf16.msra.mxu3 %v8134_v60  ;;  %v8144_v1 = vld [vmem:[#allocation111_spill] sm:$0xff]  ;;  %v8145_v60 = vld [vmem:[#allocation114_spill] sm:$0xff] }
 0x245   :  { %1949 = vmatpush.bf16.msrb.mxu0 %v8135_v22  ;;  %1975 = vmatpush.bf16.msra.mxu2 %v8136_v23  ;;  %v8146_v22 = vld [vmem:[#allocation116_spill] sm:$0xff]  ;;  %v8147_v23 = vld [vmem:[#allocation113_spill] sm:$0xff] }
 0x248   :  { %1963 = vmatpush.bf16.msrb.mxu1 %v8137_v52  ;;  %1989 = vmatpush.bf16.msra.mxu3 %v8138_v25  ;;  %v8148_v52 = vld [vmem:[#allocation115_spill] sm:$0xff]  ;;  %v8149_v25 = vld [vmem:[#allocation118_spill] sm:$0xff] }
 0x249   :  { %1950 = vmatpush.bf16.msrb.mxu0 %v8139_v14  ;;  %1976 = vmatpush.bf16.msra.mxu2 %v8140_v29  ;;  %v8150_v14 = vld [vmem:[#allocation120_spill] sm:$0xff]  ;;  %v8151_v29 = vld [vmem:[#allocation117_spill] sm:$0xff] }
 0x24c   :  { %1964 = vmatpush.bf16.msrb.mxu1 %v8141_v27  ;;  %1990 = vmatpush.bf16.msra.mxu3 %v8142_v7  ;;  %v8152_v27 = vld [vmem:[#allocation119_spill] sm:$0xff] }
 0x24d   :  { %1951 = vmatpush.bf16.msrb.mxu0 %v8143_v19  ;;  %1977 = vmatpush.bf16.msra.mxu2 %v8144_v1 }
 0x250   :  { %1965 = vmatpush.bf16.msrb.mxu1 %v8145_v60  ;;  %1991 = vmatpush.bf16.msra.mxu3 %v8146_v22 }
 0x251   :  { %1952 = vmatpush.bf16.msrb.mxu0 %v8147_v23  ;;  %1978 = vmatpush.bf16.msra.mxu2 %v8148_v52 }
 0x254   :  { %1966 = vmatpush.bf16.msrb.mxu1 %v8149_v25  ;;  %1992 = vmatpush.bf16.msra.mxu3 %v8150_v14 }
 0x255   :  { %1953 = vmatpush.bf16.msrb.mxu0 %v8151_v29  ;;  %1979 = vmatpush.bf16.msra.mxu2 %v8152_v27 }
 0x273   :  { %v1546_v7 = vpop.f32.mrf.mxu0  ;;  %v1559_v19 = vpop.f32.mrf.mxu1 }
 0x274   :  { %v1547_v1 = vadd.f32 %v1546_v7, %v8153_v11  ;;  %v1560_v60 = vadd.f32 %v1559_v19, %v8154_v63 }
 0x276   :  { %v4588_v50 = vmul.f32 -1.442695, %v1547_v1  ;;  %v4589_v22 = vmul.f32 -1.442695, %v1560_v60  ;;  %v8156_v60 = vld [vmem:[#allocation78_spill] sm:$0xff] }
 0x278   :  { %5076 = vpow2.f32 %v4588_v50 }
 0x279   :  { %5078 = vpow2.f32 %v4589_v22 }
 0x27a   :  { %v1572_v23 = vpop.f32.mrf.mxu2  ;;  %v1585_v52 = vpop.f32.mrf.mxu3 }
 0x27b   :  { %v1573_v25 = vadd.f32 %v1572_v23, %v8155_v6  ;;  %v1548_v59 = vpop.f32.mrf.mxu0  ;;  %v1561_v14 = vpop.f32.mrf.mxu1  ;;  %v1586_v22 = vadd.f32 %v1585_v52, %v8156_v60 }
 0x27d   :  { %v4590_v56 = vmul.f32 -1.442695, %v1573_v25 }
 0x27e   :  { %v5077_v29 = vpop.eup %5076 }
 0x27f   :  { %v5079_v36 = vpop.eup %5078  ;;  %v1598_v27 = vadd.f32 1.0, %v5077_v29  ;;  %5080 = vpow2.f32 %v4590_v56 }
 0x280   :  { %v1599_v61 = vadd.f32 1.0, %v5079_v36 }
 0x281   :  { %5082 = vrcp.f32 %v1598_v27  ;;  %v1610_v36 = vand.u32 2147483647, %v1598_v27  ;;  %v1612_v29 = vand.u32 2147483648, %v1598_v27  ;;  %vm1606_vm6 = vweird.f32 %v1598_v27 }
 0x282   :  { %5084 = vrcp.f32 %v1599_v61  ;;  %v1574_v11 = vpop.f32.mrf.mxu2  ;;  %v1587_v63 = vpop.f32.mrf.mxu3  ;;  %v1627_v46 = vand.u32 2147483648, %v1599_v61  ;;  %v1625_v52 = vand.u32 2147483647, %v1599_v61  ;;  %vm1621_vm7 = vweird.f32 %v1599_v61 }
 0x283   :  { %v1675_v1 = vpop.f32.mrf.mxu1  ;;  %vm1611_vm10 = vcmp.eq.f32.partialorder %v1610_v36, 8.507059e+37 }
 0x284   :  { %vm1626_vm11 = vcmp.eq.f32.partialorder %v1625_v52, 8.507059e+37 }
 0x285   :  { %v5081_v19 = vpop.eup %5080 }
 0x286   :  { %v6395_v50 = vadd.f32 1.0, %v5081_v19  ;;  %v8157_v19 = vld [vmem:[#allocation61_spill] sm:$0xff] }
 0x287   :  { %v5083_v7 = vpop.eup %5082 }
 0x288   :  { %v5085_v6 = vpop.eup %5084  ;;  %v1602_v59 = vmul.f32 %v5083_v7, %v1598_v27  ;;  %5086 = vrcp.f32 %v6395_v50  ;;  %vm1607_vm4 = vweird.f32 %v5083_v7  ;;  %vm1636_vm13 = vweird.f32 %v6395_v50 }
 0x289   :  { %v1617_v23 = vmul.f32 %v5085_v6, %v1599_v61  ;;  %5088 = vtanh.f32 %v1586_v22  ;;  %vm1622_vm5 = vweird.f32 %v5085_v6  ;;  %vm1608_vm8 = vmor %vm1606_vm6, %vm1607_vm4 }
 0x28a   :  { %v1603_v25 = vsub.f32 1.0, %v1602_v59  ;;  %v1701_v14 = vpop.f32.mrf.mxu3  ;;  %vm1623_vm9 = vmor %vm1621_vm7, %vm1622_vm5 }
 0x28b   :  { %v1618_v56 = vsub.f32 1.0, %v1617_v23  ;;  %v1662_v11 = vpop.f32.mrf.mxu0  ;;  %v1677_v63 = vpop.f32.mrf.mxu1  ;;  %v1613_v23 = vor.u32 1.1754944e-38, %v1612_v29 }
 0x28c   :  { %v1604_v48 = vmul.f32 %v5083_v7, %v1603_v25  ;;  %v1663_v24 = vadd.f32 %v1662_v11, %v8157_v19  ;;  %v1628_v63 = vor.u32 1.1754944e-38, %v1627_v46 }
 0x28d   :  { %v1619_v55 = vmul.f32 %v5085_v6, %v1618_v56 }
 0x28e   :  { %v5087_v60 = vpop.eup %5086  ;;  %v1605_v32 = vadd.f32 %v5083_v7, %v1604_v48  ;;  %v1676_v38 = vadd.f32 %v1675_v1, %v1663_v24  ;;  %v8158_v24 = vld [vmem:[#allocation62_spill] sm:$0xff] }
 0x28f   :  { %v1632_v59 = vmul.f32 %v5087_v60, %v6395_v50  ;;  %v1620_v22 = vadd.f32 %v5085_v6, %v1619_v55  ;;  %v5089_v45 = vpop.eup %5088  ;;  %vm1637_vm12 = vweird.f32 %v5087_v60 }
 0x290   :  { %v1609_v12 = vsel %vm1608_vm8, %v5083_v7, %v1605_v32  ;;  %v4591_v25 = vmul.f32 -1.442695, %v1676_v38  ;;  %vm1638_vm14 = vmor %vm1636_vm13, %vm1637_vm12 }
 0x291   :  { %v1633_v11 = vsub.f32 1.0, %v1632_v59  ;;  %v1614_v56 = vsel %vm1611_vm10, %v1613_v23, %v1609_v12  ;;  %v1624_v19 = vsel %vm1623_vm9, %v5085_v6, %v1620_v22  ;;  %v1688_v20 = vpop.f32.mrf.mxu2  ;;  %v1642_v6 = vand.u32 2147483648, %v6395_v50 }
 0x292   :  { %v1629_v48 = vsel %vm1626_vm11, %v1628_v63, %v1624_v19  ;;  %v1648_v27 = vmul.f32 %v5089_v45, %v1614_v56  ;;  %5090 = vpow2.f32 %v4591_v25  ;;  %v1689_v61 = vadd.f32 %v1688_v20, %v8158_v24  ;;  %v1703_v1 = vpop.f32.mrf.mxu3 }
 0x293   :  { %v1634_v26 = vmul.f32 %v5087_v60, %v1633_v11  ;;  %v1647_v55 = vmul.f32 %v1629_v48, %v6236_v54  ;;  %v1664_v29 = vpop.f32.mrf.mxu0  ;;  %v1640_v20 = vand.u32 2147483647, %v6395_v50  ;;  %v1643_v52 = vor.u32 1.1754944e-38, %v1642_v6 }
 0x294   :  { %v1702_v46 = vadd.f32 %v1701_v14, %v1689_v61  ;;  %v1727_v32 = vpop.f32.mrf.mxu1 }
 0x295   :  { %v6403_v7 = vadd.f32 %v1648_v27, %v1647_v55  ;;  %v1635_v38 = vadd.f32 %v5087_v60, %v1634_v26  ;;  %vm1641_vm15 = vcmp.eq.f32.partialorder %v1640_v20, 8.507059e+37 }
 0x296   :  { %v4592_v12 = vmul.f32 -1.442695, %v1702_v46 }
 0x297   :  { %5092 = vtanh.f32 %v6403_v7  ;;  %v1639_v36 = vsel %vm1638_vm14, %v5087_v60, %v1635_v38 }
 0x298   :  { %v5091_v45 = vpop.eup %5090  ;;  %5094 = vpow2.f32 %v4592_v12  ;;  %v1644_v63 = vsel %vm1641_vm15, %v1643_v52, %v1639_v36 }
 0x299   :  { %v6409_v54 = vadd.f32 1.0, %v5091_v45  ;;  %v1690_v14 = vpop.f32.mrf.mxu2 }
 0x29a   :  { %v1753_v19 = vpop.f32.mrf.mxu3 }
 0x29b   :  { %5096 = vrcp.f32 %v6409_v54  ;;  %v1714_v26 = vpop.f32.mrf.mxu0  ;;  %v1780_v52 = vand.u32 2147483648, %v6409_v54  ;;  %vm1774_vm1 = vweird.f32 %v6409_v54 }
 0x29c   :  { %v1715_v59 = vadd.f32 %v1714_v26, %v6230_v15  ;;  %v1729_v23 = vpop.f32.mrf.mxu1 }
 0x29d   :  { %v5093_v22 = vpop.eup %5092 }
 0x29e   :  { %v5095_v25 = vpop.eup %5094  ;;  %v1651_v11 = vmul.f32 %v5093_v22, %v1644_v63  ;;  %v1728_v50 = vadd.f32 %v1727_v32, %v1715_v59  ;;  %v1778_v59 = vand.u32 2147483647, %v6409_v54 }
 0x29f   :  { %v1767_v56 = vadd.f32 1.0, %v5095_v25 }
 0x2a0   :  { %v6413_v48 = vpack.c.bf16 %v1651_v11, %v1651_v11  ;;  %v4593_v27 = vmul.f32 -1.442695, %v1728_v50  ;;  %v1781_v50 = vor.u32 1.1754944e-38, %v1780_v52  ;;  %vm1779_vm5 = vcmp.eq.f32.partialorder %v1778_v59, 8.507059e+37 }
 0x2a1   :  { %v5097_v61 = vpop.eup %5096  ;;  %5098 = vrcp.f32 %v1767_v56  ;;  %v1740_v60 = vpop.f32.mrf.mxu2  ;;  %v1795_v23 = vand.u32 2147483648, %v1767_v56  ;;  %v1793_v11 = vand.u32 2147483647, %v1767_v56  ;;  %vm1789_vm4 = vweird.f32 %v1767_v56 }
 0x2a2   :  { %v1770_v1 = vmul.f32 %v5097_v61, %v6409_v54  ;;  %5100 = vpow2.f32 %v4593_v27  ;;  %v1741_v55 = vadd.f32 %v1740_v60, %v6247_v17  ;;  %v1755_v29 = vpop.f32.mrf.mxu3  ;;  %1838 = vmatmul.bf16.vlgmr.msra.gmra.mxu0 %v6413_v48  ;;  %1851 = vmatmul.bf16.vlgmr.msra.gmra.mxu1 %v6413_v48  ;;  %vm1775_vm0 = vweird.f32 %v5097_v61 }
 0x2a3   :  { %1864 = vmatmul.bf16.vlgmr.msrb.gmra.mxu2 %v6413_v48  ;;  %1877 = vmatmul.bf16.vlgmr.msrb.gmra.mxu3 %v6413_v48  ;;  %v1716_v46 = vpop.f32.mrf.mxu0  ;;  %vm6432_vm2 = vmor %vm1774_vm1, %vm1775_vm0  ;;  %v1796_v60 = vor.u32 1.1754944e-38, %v1795_v23  ;;  %vm1794_vm7 = vcmp.eq.f32.partialorder %v1793_v11, 8.507059e+37 }
 0x2a4   :  { %v1771_v32 = vsub.f32 1.0, %v1770_v1  ;;  %2011 = vmatpush.bf16.msra.mxu1 %v8088_v42  ;;  %2037 = vmatpush.bf16.msrb.mxu3 %v8089_v10  ;;  %v1754_v38 = vadd.f32 %v1753_v19, %v1741_v55 }
 0x2a5   :  { %1998 = vmatpush.bf16.msra.mxu0 %v8090_v18  ;;  %2024 = vmatpush.bf16.msrb.mxu2 %v8091_v35 }
 0x2a6   :  { %v1772_v12 = vmul.f32 %v5097_v61, %v1771_v32  ;;  %5102 = vtanh.f32 %v1754_v38  ;;  %v8162_v32 = vld [vmem:[#allocation134_spill] sm:$0xff]  ;;  %v8163_v38 = vld [vmem:[#allocation136_spill] sm:$0xff] }
 0x2a7   :  { %v5099_v6 = vpop.eup %5098 }
 0x2a8   :  { %v5101_v45 = vpop.eup %5100  ;;  %v1785_v20 = vmul.f32 %v5099_v6, %v1767_v56  ;;  %v1773_v14 = vadd.f32 %v5097_v61, %v1772_v12  ;;  %2012 = vmatpush.bf16.msra.mxu1 %v8092_v41  ;;  %2038 = vmatpush.bf16.msrb.mxu3 %v8093_v31  ;;  %vm1790_vm3 = vweird.f32 %v5099_v6  ;;  %v8164_v56 = vld [vmem:[#allocation73_spill] sm:$0xff] }
 0x2a9   :  { %v1768_v36 = vadd.f32 1.0, %v5101_v45  ;;  %v1742_v26 = vpop.f32.mrf.mxu2  ;;  %1999 = vmatpush.bf16.msra.mxu0 %v8094_v5  ;;  %2025 = vmatpush.bf16.msrb.mxu2 %v8095_v16  ;;  %vm1791_vm6 = vmor %vm1789_vm4, %vm1790_vm3 }
 0x2aa   :  { %v1786_v19 = vsub.f32 1.0, %v1785_v20  ;;  %v1777_v25 = vsel %vm6432_vm2, %v5097_v61, %v1773_v14  ;;  %v8161_v61 = vld [vmem:[#allocation137_spill] sm:$0xff] }
 0x2ab   :  { %5104 = vrcp.f32 %v1768_v36  ;;  %v1782_v1 = vsel %vm1779_vm5, %v1781_v50, %v1777_v25  ;;  %v1810_v52 = vand.u32 2147483648, %v1768_v36  ;;  %vm1804_vm9 = vweird.f32 %v1768_v36  ;;  %v8166_v50 = vld [vmem:[#allocation38_spill] sm:$0xff] }
 0x2ac   :  { %v1787_v63 = vmul.f32 %v5099_v6, %v1786_v19  ;;  %2013 = vmatpush.bf16.msra.mxu1 %v8096_v40  ;;  %2039 = vmatpush.bf16.msrb.mxu3 %v8097_v53  ;;  %v5103_v27 = vpop.eup %5102  ;;  %v1808_v19 = vand.u32 2147483647, %v1768_v36 }
 0x2ad   :  { %2000 = vmatpush.bf16.msra.mxu0 %v8099_v34  ;;  %2026 = vmatpush.bf16.msrb.mxu2 %v8100_v43  ;;  %v1816_v20 = vmul.f32 %v5103_v27, %v1782_v1  ;;  %v1811_v23 = vor.u32 1.1754944e-38, %v1810_v52  ;;  %v8168_v27 = vld [vmem:[#allocation44_spill] sm:$0xff]  ;;  %v8170_v1 = vld [vmem:[#allocation42_spill] sm:$0xff] }
 0x2ae   :  { %v1788_v54 = vadd.f32 %v5099_v6, %v1787_v63  ;;  %vm1809_vm11 = vcmp.eq.f32.partialorder %v1808_v19, 8.507059e+37  ;;  %v8180_v52 = vld [vmem:[#allocation50_spill] sm:$0xff]  ;;  %v8182_v19 = vld [vmem:[#allocation49_spill] sm:$0xff] }
 0x2b0   :  { %v1792_v55 = vsel %vm1791_vm6, %v5099_v6, %v1788_v54  ;;  %2014 = vmatpush.bf16.msra.mxu1 %v8101_v4  ;;  %2040 = vmatpush.bf16.msrb.mxu3 %v8161_v61  ;;  %v8167_v54 = vld [vmem:[#allocation28_spill] sm:$0xff] }
 0x2b1   :  { %v5105_v29 = vpop.eup %5104  ;;  %v1797_v46 = vsel %vm1794_vm7, %v1796_v60, %v1792_v55  ;;  %2001 = vmatpush.bf16.msra.mxu0 %v8162_v32  ;;  %2027 = vmatpush.bf16.msrb.mxu2 %v8163_v38  ;;  %v8169_v60 = vld [vmem:[#allocation27_spill] sm:$0xff]  ;;  %v8171_v55 = vld [vmem:[#allocation30_spill] sm:$0xff] }
 0x2b2   :  { %v1800_v12 = vmul.f32 %v5105_v29, %v1768_v36  ;;  %v1815_v45 = vmul.f32 %v1797_v46, %v8164_v56  ;;  %1967 = vmatmul.bf16.vlgmr.msrb.gmra.mxu1 %v6413_v48  ;;  %vm1805_vm8 = vweird.f32 %v5105_v29  ;;  %v8174_v46 = vld [vmem:[#allocation45_spill] sm:$0xff]  ;;  %v8176_v56 = vld [vmem:[#allocation48_spill] sm:$0xff] }
 0x2b3   :  { %1993 = vmatmul.bf16.vlgmr.msra.gmra.mxu3 %v6413_v48  ;;  %vm1806_vm10 = vmor %vm1804_vm9, %vm1805_vm8 }
 0x2b4   :  { %v1801_v6 = vsub.f32 1.0, %v1800_v12  ;;  %v6449_v14 = vadd.f32 %v1816_v20, %v1815_v45  ;;  %2015 = vmatpush.bf16.msra.mxu1 %v8105_v47  ;;  %2041 = vmatpush.bf16.msrb.mxu3 %v8106_v28  ;;  %v8175_v12 = vld [vmem:[#allocation32_spill] sm:$0xff]  ;;  %v8177_v45 = vld [vmem:[#allocation31_spill] sm:$0xff] }
 0x2b5   :  { %2002 = vmatpush.bf16.msra.mxu0 %v8107_v44  ;;  %2028 = vmatpush.bf16.msrb.mxu2 %v8108_v9  ;;  %v8178_v20 = vld [vmem:[#allocation47_spill] sm:$0xff] }
 0x2b6   :  { %5106 = vtanh.f32 %v6449_v14  ;;  %v1802_v26 = vmul.f32 %v5105_v29, %v1801_v6  ;;  %v8179_v6 = vld [vmem:[#allocation34_spill] sm:$0xff] }
 0x2b8   :  { %2016 = vmatpush.bf16.msra.mxu1 %v8110_v51  ;;  %2042 = vmatpush.bf16.msrb.mxu3 %v6110_v39  ;;  %v1803_v59 = vadd.f32 %v5105_v29, %v1802_v26  ;;  %v8181_v26 = vld [vmem:[#allocation33_spill] sm:$0xff] }
 0x2b9   :  { %2003 = vmatpush.bf16.msra.mxu0 %v8111_v2  ;;  %2029 = vmatpush.bf16.msrb.mxu2 %v6108_v58 }
 0x2ba   :  { %v1807_v22 = vsel %vm1806_vm10, %v5105_v29, %v1803_v59  ;;  %v8172_v29 = vld [vmem:[#allocation46_spill] sm:$0xff]  ;;  %v8183_v59 = vld [vmem:[#allocation36_spill] sm:$0xff] }
 0x2bb   :  { %v1812_v63 = vsel %vm1809_vm11, %v1811_v23, %v1807_v22  ;;  %v8184_v23 = vld [vmem:[#allocation53_spill] sm:$0xff]  ;;  %v8185_v22 = vld [vmem:[#allocation35_spill] sm:$0xff] }
 0x2bc   :  { %v5107_v25 = vpop.eup %5106  ;;  %2017 = vmatpush.bf16.msra.mxu1 %v6116_v33  ;;  %2043 = vmatpush.bf16.msrb.mxu3 %v6122_v62 }
 0x2bd   :  { %v6462_v11 = vmul.f32 %v5107_v25, %v1812_v63  ;;  %2004 = vmatpush.bf16.msra.mxu0 %v6114_v3  ;;  %2030 = vmatpush.bf16.msrb.mxu2 %v6120_v57  ;;  %v8186_v63 = vld [vmem:[#allocation51_spill] sm:$0xff] }
 0x2be   :  { %v8187_v25 = vld [vmem:[#allocation39_spill] sm:$0xff] }
 0x2bf   :  { %8165 = vst [vmem:[#allocation121_spill] sm:$0xff] %v6462_v11  ;;  %v1945_v36 = vpack.c.bf16 %v6462_v11, %v6462_v11  ;;  %v8189_v11 = vld [vmem:[#allocation37_spill] sm:$0xff] }
 0x2c0   :  { %2018 = vmatpush.bf16.msra.mxu1 %v6128_v21  ;;  %2044 = vmatpush.bf16.msrb.mxu3 %v6134_v49 }
 0x2c1   :  { %1954 = vmatmul.bf16.vlgmr.msrb.gmra.mxu0 %v1945_v36  ;;  %1980 = vmatmul.bf16.vlgmr.msra.gmra.mxu2 %v1945_v36 }
 0x2c2   :  { %2005 = vmatpush.bf16.msra.mxu0 %v6126_v37  ;;  %2031 = vmatpush.bf16.msrb.mxu2 %v6132_v13  ;;  %v8235_v13 = vld [vmem:[#allocation61_spill] sm:$0xff] }
 0x2c3   :  { %2019 = vmatmul.bf16.vlgmr.msra.gmra.mxu1 %v6413_v48  ;;  %2045 = vmatmul.bf16.vlgmr.msrb.gmra.mxu3 %v6413_v48  ;;  %v8173_v48 = vld [vmem:[#allocation29_spill] sm:$0xff] }
 0x2c4   :  { %2136 = vmatpush.bf16.msrb.mxu1 %v5635_v8  ;;  %2162 = vmatpush.bf16.msra.mxu3 %v5693_v30 }
 0x2c6   :  { %2123 = vmatpush.bf16.msrb.mxu0 %v5633_v0  ;;  %2149 = vmatpush.bf16.msra.mxu2 %v8166_v50 }
 0x2c8   :  { %2137 = vmatpush.bf16.msrb.mxu1 %v8167_v54  ;;  %2163 = vmatpush.bf16.msra.mxu3 %v8168_v27 }
 0x2ca   :  { %2124 = vmatpush.bf16.msrb.mxu0 %v8169_v60  ;;  %2150 = vmatpush.bf16.msra.mxu2 %v8170_v1 }
 0x2cc   :  { %2138 = vmatpush.bf16.msrb.mxu1 %v8171_v55  ;;  %2164 = vmatpush.bf16.msra.mxu3 %v8172_v29 }
 0x2ce   :  { %2125 = vmatpush.bf16.msrb.mxu0 %v8173_v48  ;;  %2151 = vmatpush.bf16.msra.mxu2 %v8174_v46 }
 0x2d0   :  { %2139 = vmatpush.bf16.msrb.mxu1 %v8175_v12  ;;  %2165 = vmatpush.bf16.msra.mxu3 %v8176_v56  ;;  %v8232_v12 = vld [vmem:[#allocation79_spill] sm:$0xff] }
 0x2d1   :  { %2006 = vmatmul.bf16.vlgmr.msra.gmra.mxu0 %v1945_v36  ;;  %2032 = vmatmul.bf16.vlgmr.msrb.gmra.mxu2 %v1945_v36  ;;  %v8188_v36 = vld [vmem:[#allocation55_spill] sm:$0xff] }
 0x2d2   :  { %2126 = vmatpush.bf16.msrb.mxu0 %v8177_v45  ;;  %2152 = vmatpush.bf16.msra.mxu2 %v8178_v20  ;;  %v8190_v20 = vld [vmem:[#allocation52_spill] sm:$0xff]  ;;  %v8191_v45 = vld [vmem:[#allocation43_spill] sm:$0xff] }
 0x2d4   :  { %2140 = vmatpush.bf16.msrb.mxu1 %v8179_v6  ;;  %2166 = vmatpush.bf16.msra.mxu3 %v8180_v52  ;;  %v8230_v6 = vld [vmem:[#allocation70_spill] sm:$0xff] }
 0x2d6   :  { %2127 = vmatpush.bf16.msrb.mxu0 %v8181_v26  ;;  %2153 = vmatpush.bf16.msra.mxu2 %v8182_v19  ;;  %v8192_v26 = vld [vmem:[#allocation56_spill] sm:$0xff] }
 0x2d7   :  { %v8193_v19 = vld [vmem:[#allocation84_spill] sm:$0xff] }
 0x2d8   :  { %2141 = vmatpush.bf16.msrb.mxu1 %v8183_v59  ;;  %2167 = vmatpush.bf16.msra.mxu3 %v8184_v23  ;;  %v8194_v59 = vld [vmem:[#allocation87_spill] sm:$0xff]  ;;  %v8195_v23 = vld [vmem:[#allocation41_spill] sm:$0xff] }
 0x2da   :  { %2128 = vmatpush.bf16.msrb.mxu0 %v8185_v22  ;;  %2154 = vmatpush.bf16.msra.mxu2 %v8186_v63  ;;  %v8196_v22 = vld [vmem:[#allocation54_spill] sm:$0xff]  ;;  %v8197_v63 = vld [vmem:[#allocation83_spill] sm:$0xff] }
 0x2dc   :  { %2142 = vmatpush.bf16.msrb.mxu1 %v8187_v25  ;;  %2168 = vmatpush.bf16.msra.mxu3 %v8188_v36  ;;  %v8198_v25 = vld [vmem:[#allocation85_spill] sm:$0xff]  ;;  %v8199_v36 = vld [vmem:[#allocation90_spill] sm:$0xff] }
 0x2de   :  { %2129 = vmatpush.bf16.msrb.mxu0 %v8189_v11  ;;  %2155 = vmatpush.bf16.msra.mxu2 %v8190_v20  ;;  %v8200_v11 = vld [vmem:[#allocation92_spill] sm:$0xff]  ;;  %v8201_v20 = vld [vmem:[#allocation89_spill] sm:$0xff] }
 0x2e0   :  { %2143 = vmatpush.bf16.msrb.mxu1 %v8191_v45  ;;  %2169 = vmatpush.bf16.msra.mxu3 %v8192_v26  ;;  %v8202_v45 = vld [vmem:[#allocation91_spill] sm:$0xff]  ;;  %v8203_v26 = vld [vmem:[#allocation94_spill] sm:$0xff] }
 0x2e2   :  { %2130 = vmatpush.bf16.msrb.mxu0 %v8195_v23  ;;  %2156 = vmatpush.bf16.msra.mxu2 %v8196_v22  ;;  %v8206_v23 = vld [vmem:[#allocation95_spill] sm:$0xff]  ;;  %v8207_v22 = vld [vmem:[#allocation100_spill] sm:$0xff] }
 0x2e4   :  { %2252 = vmatpush.bf16.msra.mxu1 %v8193_v19  ;;  %2278 = vmatpush.bf16.msrb.mxu3 %v8194_v59  ;;  %v8204_v19 = vld [vmem:[#allocation96_spill] sm:$0xff]  ;;  %v8205_v59 = vld [vmem:[#allocation93_spill] sm:$0xff] }
 0x2e6   :  { %2239 = vmatpush.bf16.msra.mxu0 %v8197_v63  ;;  %2265 = vmatpush.bf16.msrb.mxu2 %v8198_v25  ;;  %v8208_v63 = vld [vmem:[#allocation102_spill] sm:$0xff]  ;;  %v8209_v25 = vld [vmem:[#allocation99_spill] sm:$0xff] }
 0x2e8   :  { %2253 = vmatpush.bf16.msra.mxu1 %v8199_v36  ;;  %2279 = vmatpush.bf16.msrb.mxu3 %v8200_v11  ;;  %v8210_v36 = vld [vmem:[#allocation101_spill] sm:$0xff]  ;;  %v8211_v11 = vld [vmem:[#allocation104_spill] sm:$0xff] }
 0x2ea   :  { %2240 = vmatpush.bf16.msra.mxu0 %v8201_v20  ;;  %2266 = vmatpush.bf16.msrb.mxu2 %v8202_v45  ;;  %v8212_v20 = vld [vmem:[#allocation107_spill] sm:$0xff] }
 0x2eb   :  { %v8213_v45 = vld [vmem:[#allocation103_spill] sm:$0xff] }
 0x2ec   :  { %2254 = vmatpush.bf16.msra.mxu1 %v8203_v26  ;;  %2280 = vmatpush.bf16.msrb.mxu3 %v8204_v19  ;;  %v8214_v26 = vld [vmem:[#allocation105_spill] sm:$0xff]  ;;  %v8215_v19 = vld [vmem:[#allocation110_spill] sm:$0xff] }
 0x2ee   :  { %2241 = vmatpush.bf16.msra.mxu0 %v8205_v59  ;;  %2267 = vmatpush.bf16.msrb.mxu2 %v8206_v23  ;;  %v8216_v59 = vld [vmem:[#allocation112_spill] sm:$0xff]  ;;  %v8217_v23 = vld [vmem:[#allocation109_spill] sm:$0xff] }
 0x2f0   :  { %2255 = vmatpush.bf16.msra.mxu1 %v8207_v22  ;;  %2281 = vmatpush.bf16.msrb.mxu3 %v8208_v63  ;;  %v8218_v22 = vld [vmem:[#allocation111_spill] sm:$0xff]  ;;  %v8219_v63 = vld [vmem:[#allocation114_spill] sm:$0xff] }
 0x2f2   :  { %2242 = vmatpush.bf16.msra.mxu0 %v8209_v25  ;;  %2268 = vmatpush.bf16.msrb.mxu2 %v8210_v36  ;;  %v8220_v25 = vld [vmem:[#allocation116_spill] sm:$0xff]  ;;  %v8221_v36 = vld [vmem:[#allocation113_spill] sm:$0xff] }
 0x2f4   :  { %2256 = vmatpush.bf16.msra.mxu1 %v8211_v11  ;;  %2282 = vmatpush.bf16.msrb.mxu3 %v8212_v20  ;;  %v8222_v11 = vld [vmem:[#allocation115_spill] sm:$0xff]  ;;  %v8223_v20 = vld [vmem:[#allocation118_spill] sm:$0xff] }
 0x2f6   :  { %2243 = vmatpush.bf16.msra.mxu0 %v8213_v45  ;;  %2269 = vmatpush.bf16.msrb.mxu2 %v8214_v26  ;;  %v8224_v45 = vld [vmem:[#allocation120_spill] sm:$0xff]  ;;  %v8225_v26 = vld [vmem:[#allocation117_spill] sm:$0xff] }
 0x2f8   :  { %2257 = vmatpush.bf16.msra.mxu1 %v8215_v19  ;;  %2283 = vmatpush.bf16.msrb.mxu3 %v8216_v59  ;;  %v8226_v19 = vld [vmem:[#allocation119_spill] sm:$0xff]  ;;  %v8227_v59 = vld [vmem:[#allocation57_spill] sm:$0xff] }
 0x2fa   :  { %2244 = vmatpush.bf16.msra.mxu0 %v8217_v23  ;;  %2270 = vmatpush.bf16.msrb.mxu2 %v8218_v22  ;;  %v8228_v23 = vld [vmem:[#allocation69_spill] sm:$0xff]  ;;  %v8229_v22 = vld [vmem:[#allocation58_spill] sm:$0xff] }
 0x2fb   :  { %v491_v52 = vadd.f32 %v8228_v23, %v8227_v59 }
 0x2fc   :  { %2258 = vmatpush.bf16.msra.mxu1 %v8219_v63  ;;  %2284 = vmatpush.bf16.msrb.mxu3 %v8220_v25  ;;  %v520_v63 = vadd.f32 %v8230_v6, %v8229_v22 }
 0x2fe   :  { %2245 = vmatpush.bf16.msra.mxu0 %v8221_v36  ;;  %2271 = vmatpush.bf16.msrb.mxu2 %v8222_v11 }
 0x300   :  { %2259 = vmatpush.bf16.msra.mxu1 %v8223_v20  ;;  %2285 = vmatpush.bf16.msrb.mxu3 %v8224_v45  ;;  %v8231_v20 = vld [vmem:[#allocation75_spill] sm:$0xff] }
 0x301   :  { %v549_v45 = vadd.f32 %v8232_v12, %v8231_v20  ;;  %v8234_v12 = vld [vmem:[#allocation80_spill] sm:$0xff] }
 0x302   :  { %2246 = vmatpush.bf16.msra.mxu0 %v8225_v26  ;;  %2272 = vmatpush.bf16.msrb.mxu2 %v8226_v19 }
 0x31f   :  { %v1839_v46 = vpop.f32.mrf.mxu0  ;;  %v1852_v25 = vpop.f32.mrf.mxu1 }
 0x320   :  { %v1840_v48 = vadd.f32 %v1839_v46, %v491_v52  ;;  %v1853_v36 = vadd.f32 %v1852_v25, %v520_v63  ;;  %v8233_v63 = vld [vmem:[#allocation76_spill] sm:$0xff] }
 0x322   :  { %v4594_v56 = vmul.f32 -1.442695, %v1840_v48  ;;  %v4595_v11 = vmul.f32 -1.442695, %v1853_v36 }
 0x324   :  { %5108 = vpow2.f32 %v4594_v56 }
 0x325   :  { %5110 = vpow2.f32 %v4595_v11  ;;  %v578_v11 = vadd.f32 %v8234_v12, %v8233_v63 }
 0x326   :  { %v1865_v26 = vpop.f32.mrf.mxu2  ;;  %v1878_v1 = vpop.f32.mrf.mxu3 }
 0x327   :  { %v1866_v19 = vadd.f32 %v1865_v26, %v549_v45  ;;  %v1841_v60 = vpop.f32.mrf.mxu0  ;;  %v1854_v29 = vpop.f32.mrf.mxu1 }
 0x328   :  { %v1879_v60 = vadd.f32 %v1878_v1, %v578_v11 }
 0x329   :  { %v4596_v23 = vmul.f32 -1.442695, %v1866_v19 }
 0x32a   :  { %v5109_v59 = vpop.eup %5108 }
 0x32b   :  { %v5111_v55 = vpop.eup %5110  ;;  %v1891_v6 = vadd.f32 1.0, %v5109_v59  ;;  %5112 = vpow2.f32 %v4596_v23 }
 0x32c   :  { %v1892_v22 = vadd.f32 1.0, %v5111_v55 }
 0x32d   :  { %5114 = vrcp.f32 %v1891_v6  ;;  %v1905_v23 = vand.u32 2147483648, %v1891_v6  ;;  %v1903_v50 = vand.u32 2147483647, %v1891_v6  ;;  %vm1899_vm14 = vweird.f32 %v1891_v6 }
 0x32e   :  { %5116 = vrcp.f32 %v1892_v22  ;;  %v1867_v48 = vpop.f32.mrf.mxu2  ;;  %v1880_v46 = vpop.f32.mrf.mxu3  ;;  %vm1914_vm15 = vweird.f32 %v1892_v22 }
 0x32f   :  { %v1968_v56 = vpop.f32.mrf.mxu1  ;;  %v1920_v46 = vand.u32 2147483648, %v1892_v22  ;;  %vm1904_vm2 = vcmp.eq.f32.partialorder %v1903_v50, 8.507059e+37 }
 0x331   :  { %v5113_v52 = vpop.eup %5112 }
 0x332   :  { %v6546_v25 = vadd.f32 1.0, %v5113_v52  ;;  %v1918_v52 = vand.u32 2147483647, %v1892_v22 }
 0x333   :  { %v5115_v45 = vpop.eup %5114 }
 0x334   :  { %v5117_v29 = vpop.eup %5116  ;;  %v1895_v26 = vmul.f32 %v5115_v45, %v1891_v6  ;;  %5118 = vrcp.f32 %v6546_v25  ;;  %vm1900_vm12 = vweird.f32 %v5115_v45  ;;  %vm1919_vm3 = vcmp.eq.f32.partialorder %v1918_v52, 8.507059e+37 }
 0x335   :  { %v1910_v19 = vmul.f32 %v5117_v29, %v1892_v22  ;;  %5120 = vtanh.f32 %v1879_v60  ;;  %vm1915_vm13 = vweird.f32 %v5117_v29  ;;  %vm1901_vm0 = vmor %vm1899_vm14, %vm1900_vm12  ;;  %v1935_v50 = vand.u32 2147483648, %v6546_v25 }
 0x336   :  { %v1896_v59 = vsub.f32 1.0, %v1895_v26  ;;  %v1994_v55 = vpop.f32.mrf.mxu3  ;;  %v1906_v26 = vor.u32 1.1754944e-38, %v1905_v23  ;;  %vm1916_vm1 = vmor %vm1914_vm15, %vm1915_vm13  ;;  %vm1929_vm5 = vweird.f32 %v6546_v25 }
 0x337   :  { %v1911_v36 = vsub.f32 1.0, %v1910_v19  ;;  %v1970_v48 = vpop.f32.mrf.mxu1  ;;  %v1921_v19 = vor.u32 1.1754944e-38, %v1920_v46 }
 0x338   :  { %v1897_v20 = vmul.f32 %v5115_v45, %v1896_v59 }
 0x339   :  { %v1912_v12 = vmul.f32 %v5117_v29, %v1911_v36 }
 0x33a   :  { %v5119_v63 = vpop.eup %5118  ;;  %v1898_v1 = vadd.f32 %v5115_v45, %v1897_v20 }
 0x33b   :  { %v1925_v11 = vmul.f32 %v5119_v63, %v6546_v25  ;;  %v1913_v0 = vadd.f32 %v5117_v29, %v1912_v12  ;;  %v5121_v48 = vpop.eup %5120  ;;  %vm1930_vm4 = vweird.f32 %v5119_v63 }
 0x33c   :  { %v1902_v60 = vsel %vm1901_vm0, %v5115_v45, %v1898_v1  ;;  %vm1931_vm6 = vmor %vm1929_vm5, %vm1930_vm4 }
 0x33d   :  { %v1926_v59 = vsub.f32 1.0, %v1925_v11  ;;  %v1907_v27 = vsel %vm1904_vm2, %v1906_v26, %v1902_v60  ;;  %v1917_v54 = vsel %vm1916_vm1, %v5117_v29, %v1913_v0 }
 0x33e   :  { %v1922_v36 = vsel %vm1919_vm3, %v1921_v19, %v1917_v54  ;;  %v1941_v30 = vmul.f32 %v5121_v48, %v1907_v27  ;;  %v1996_v8 = vpop.f32.mrf.mxu3  ;;  %v1955_v20 = vpop.f32.mrf.mxu0 }
 0x33f   :  { %v1927_v6 = vmul.f32 %v5119_v63, %v1926_v59  ;;  %v1940_v22 = vmul.f32 %v1922_v36, %v6403_v7  ;;  %v1956_v37 = vadd.f32 %v1955_v20, %v8235_v13  ;;  %v1933_v8 = vand.u32 2147483647, %v6546_v25 }
 0x340   :  { %v2020_v23 = vpop.f32.mrf.mxu1 }
 0x341   :  { %v6552_v12 = vadd.f32 %v1941_v30, %v1940_v22  ;;  %v1969_v46 = vadd.f32 %v1968_v56, %v1956_v37  ;;  %v1928_v45 = vadd.f32 %v5119_v63, %v1927_v6  ;;  %v1936_v37 = vor.u32 1.1754944e-38, %v1935_v50 }
 0x342   :  { %vm1934_vm7 = vcmp.eq.f32.partialorder %v1933_v8, 8.507059e+37 }
 0x343   :  { %5122 = vtanh.f32 %v6552_v12  ;;  %v4597_v0 = vmul.f32 -1.442695, %v1969_v46  ;;  %v1932_v27 = vsel %vm1931_vm6, %v5119_v63, %v1928_v45 }
 0x344   :  { %v1981_v54 = vpop.f32.mrf.mxu2  ;;  %v1937_v11 = vsel %vm1934_vm7, %v1936_v37, %v1932_v27 }
 0x345   :  { %5124 = vpow2.f32 %v4597_v0  ;;  %v1982_v7 = vadd.f32 %v1981_v54, %v8158_v24 }
 0x346   :  { %v2046_v30 = vpop.f32.mrf.mxu3  ;;  %v1957_v29 = vpop.f32.mrf.mxu0 }
 0x347   :  { %v1995_v56 = vadd.f32 %v1994_v55, %v1982_v7 }
 0x348   :  { %v2022_v52 = vpop.f32.mrf.mxu1 }
 0x349   :  { %v5123_v1 = vpop.eup %5122  ;;  %v4598_v26 = vmul.f32 -1.442695, %v1995_v56 }
 0x34a   :  { %v1944_v19 = vmul.f32 %v5123_v1, %v1937_v11 }
 0x34b   :  { %v5125_v60 = vpop.eup %5124  ;;  %5126 = vpow2.f32 %v4598_v26 }
 0x34c   :  { %v6559_v48 = vpack.c.bf16 %v1944_v19, %v1944_v19  ;;  %v6561_v25 = vadd.f32 1.0, %v5125_v60  ;;  %v1983_v59 = vpop.f32.mrf.mxu2 }
 0x34d   :  { %v8241_v59 = vld [vmem:[#allocation40_spill] sm:$0xff] }
 0x34e   :  { %5128 = vrcp.f32 %v6561_v25  ;;  %v2048_v63 = vpop.f32.mrf.mxu3  ;;  %2131 = vmatmul.bf16.vlgmr.msrb.gmra.mxu0 %v6559_v48  ;;  %2144 = vmatmul.bf16.vlgmr.msrb.gmra.mxu1 %v6559_v48  ;;  %v2007_v55 = vpop.f32.mrf.mxu0  ;;  %v2073_v11 = vand.u32 2147483648, %v6561_v25  ;;  %vm2067_vm9 = vweird.f32 %v6561_v25  ;;  %v2071_v19 = vand.u32 2147483647, %v6561_v25 }
 0x34f   :  { %2157 = vmatmul.bf16.vlgmr.msra.gmra.mxu2 %v6559_v48  ;;  %2170 = vmatmul.bf16.vlgmr.msra.gmra.mxu3 %v6559_v48  ;;  %v2008_v36 = vadd.f32 %v2007_v55, %v6230_v15 }
 0x350   :  { %2304 = vmatpush.bf16.msrb.mxu1 %v8088_v42  ;;  %2330 = vmatpush.bf16.msra.mxu3 %v8089_v10  ;;  %vm2072_vm13 = vcmp.eq.f32.partialorder %v2071_v19, 8.507059e+37 }
 0x351   :  { %v5127_v20 = vpop.eup %5126  ;;  %v2021_v6 = vadd.f32 %v2020_v23, %v2008_v36  ;;  %2291 = vmatpush.bf16.msrb.mxu0 %v8090_v18  ;;  %2317 = vmatpush.bf16.msra.mxu2 %v8091_v35 }
 0x352   :  { %v2060_v22 = vadd.f32 1.0, %v5127_v20 }
 0x353   :  { %v4599_v46 = vmul.f32 -1.442695, %v2021_v6 }
 0x354   :  { %v5129_v45 = vpop.eup %5128  ;;  %5130 = vrcp.f32 %v2060_v22  ;;  %2305 = vmatpush.bf16.msrb.mxu1 %v8092_v41  ;;  %2331 = vmatpush.bf16.msra.mxu3 %v8093_v31  ;;  %v2033_v50 = vpop.f32.mrf.mxu2  ;;  %v2088_v60 = vand.u32 2147483648, %v2060_v22  ;;  %v2086_v36 = vand.u32 2147483647, %v2060_v22  ;;  %vm2082_vm12 = vweird.f32 %v2060_v22 }
 0x355   :  { %v2063_v0 = vmul.f32 %v5129_v45, %v6561_v25  ;;  %5132 = vpow2.f32 %v4599_v46  ;;  %v2034_v8 = vadd.f32 %v2033_v50, %v6247_v17  ;;  %2292 = vmatpush.bf16.msrb.mxu0 %v8094_v5  ;;  %2318 = vmatpush.bf16.msra.mxu2 %v8095_v16  ;;  %vm2068_vm8 = vweird.f32 %v5129_v45 }
 0x356   :  { %v2009_v23 = vpop.f32.mrf.mxu0  ;;  %vm6590_vm10 = vmor %vm2067_vm9, %vm2068_vm8  ;;  %v2074_v25 = vor.u32 1.1754944e-38, %v2073_v11  ;;  %v2089_v46 = vor.u32 1.1754944e-38, %v2088_v60  ;;  %vm2087_vm15 = vcmp.eq.f32.partialorder %v2086_v36, 8.507059e+37  ;;  %v8240_v60 = vld [vmem:[#allocation26_spill] sm:$0xff]  ;;  %v8243_v36 = vld [vmem:[#allocation28_spill] sm:$0xff] }
 0x357   :  { %v2064_v54 = vsub.f32 1.0, %v2063_v0  ;;  %v2047_v7 = vadd.f32 %v2046_v30, %v2034_v8 }
 0x358   :  { %2306 = vmatpush.bf16.msrb.mxu1 %v8096_v40  ;;  %2332 = vmatpush.bf16.msra.mxu3 %v8097_v53 }
 0x359   :  { %v2065_v27 = vmul.f32 %v5129_v45, %v2064_v54  ;;  %2293 = vmatpush.bf16.msrb.mxu0 %v8099_v34  ;;  %2319 = vmatpush.bf16.msra.mxu2 %v8100_v43  ;;  %5134 = vtanh.f32 %v2047_v7 }
 0x35a   :  { %v5131_v29 = vpop.eup %5130 }
 0x35b   :  { %v5133_v37 = vpop.eup %5132  ;;  %v2078_v56 = vmul.f32 %v5131_v29, %v2060_v22  ;;  %v2066_v52 = vadd.f32 %v5129_v45, %v2065_v27  ;;  %vm2083_vm11 = vweird.f32 %v5131_v29 }
 0x35c   :  { %v2061_v1 = vadd.f32 1.0, %v5133_v37  ;;  %2307 = vmatpush.bf16.msrb.mxu1 %v8101_v4  ;;  %2333 = vmatpush.bf16.msra.mxu3 %v8161_v61  ;;  %v2035_v30 = vpop.f32.mrf.mxu2  ;;  %vm2084_vm14 = vmor %vm2082_vm12, %vm2083_vm11 }
 0x35d   :  { %v2079_v26 = vsub.f32 1.0, %v2078_v56  ;;  %2294 = vmatpush.bf16.msrb.mxu0 %v8162_v32  ;;  %2320 = vmatpush.bf16.msra.mxu2 %v8163_v38  ;;  %v2070_v55 = vsel %vm6590_vm10, %v5129_v45, %v2066_v52  ;;  %v8238_v30 = vld [vmem:[#allocation144_spill] sm:$0xff] }
 0x35e   :  { %5136 = vrcp.f32 %v2061_v1  ;;  %2260 = vmatmul.bf16.vlgmr.msra.gmra.mxu1 %v6559_v48  ;;  %v2075_v50 = vsel %vm2072_vm13, %v2074_v25, %v2070_v55  ;;  %v2103_v37 = vand.u32 2147483648, %v2061_v1  ;;  %v2101_v56 = vand.u32 2147483647, %v2061_v1  ;;  %v8244_v25 = vld [vmem:[#allocation44_spill] sm:$0xff] }
 0x35f   :  { %v2080_v63 = vmul.f32 %v5131_v29, %v2079_v26  ;;  %2286 = vmatmul.bf16.vlgmr.msrb.gmra.mxu3 %v6559_v48  ;;  %v5135_v6 = vpop.eup %5134  ;;  %vm2097_vm1 = vweird.f32 %v2061_v1  ;;  %v8239_v26 = vld [vmem:[#allocation145_spill] sm:$0xff] }
 0x360   :  { %2308 = vmatpush.bf16.msrb.mxu1 %v8105_v47  ;;  %2334 = vmatpush.bf16.msra.mxu3 %v8106_v28  ;;  %v2109_v54 = vmul.f32 %v5135_v6, %v2075_v50  ;;  %v2104_v52 = vor.u32 1.1754944e-38, %v2103_v37  ;;  %vm2102_vm3 = vcmp.eq.f32.partialorder %v2101_v56, 8.507059e+37  ;;  %v8246_v6 = vld [vmem:[#allocation38_spill] sm:$0xff]  ;;  %v8257_v37 = vld [vmem:[#allocation31_spill] sm:$0xff]  ;;  %v8259_v56 = vld [vmem:[#allocation36_spill] sm:$0xff] }
 0x361   :  { %v2081_v20 = vadd.f32 %v5131_v29, %v2080_v63  ;;  %2295 = vmatpush.bf16.msrb.mxu0 %v8107_v44  ;;  %2321 = vmatpush.bf16.msra.mxu2 %v8108_v9  ;;  %v8248_v50 = vld [vmem:[#allocation46_spill] sm:$0xff] }
 0x363   :  { %v2085_v45 = vsel %vm2084_vm14, %v5131_v29, %v2081_v20  ;;  %v8245_v20 = vld [vmem:[#allocation25_spill] sm:$0xff] }
 0x364   :  { %v5137_v0 = vpop.eup %5136  ;;  %v2090_v8 = vsel %vm2087_vm15, %v2089_v46, %v2085_v45  ;;  %2309 = vmatpush.bf16.msrb.mxu1 %v8110_v51  ;;  %2335 = vmatpush.bf16.msra.mxu3 %v6110_v39  ;;  %v8247_v46 = vld [vmem:[#allocation30_spill] sm:$0xff] }
 0x365   :  { %v2093_v23 = vmul.f32 %v5137_v0, %v2061_v1  ;;  %v2108_v22 = vmul.f32 %v2090_v8, %v6449_v14  ;;  %2296 = vmatpush.bf16.msrb.mxu0 %v8111_v2  ;;  %2322 = vmatpush.bf16.msra.mxu2 %v6108_v58  ;;  %vm2098_vm0 = vweird.f32 %v5137_v0  ;;  %v8250_v45 = vld [vmem:[#allocation42_spill] sm:$0xff]  ;;  %v8252_v8 = vld [vmem:[#allocation48_spill] sm:$0xff] }
 0x366   :  { %vm2099_vm2 = vmor %vm2097_vm1, %vm2098_vm0 }
 0x367   :  { %v2094_v7 = vsub.f32 1.0, %v2093_v23  ;;  %v6607_v27 = vadd.f32 %v2109_v54, %v2108_v22  ;;  %v8253_v23 = vld [vmem:[#allocation29_spill] sm:$0xff]  ;;  %v8255_v54 = vld [vmem:[#allocation34_spill] sm:$0xff] }
 0x368   :  { %2310 = vmatpush.bf16.msrb.mxu1 %v6116_v33  ;;  %2336 = vmatpush.bf16.msra.mxu3 %v6122_v62  ;;  %v8254_v22 = vld [vmem:[#allocation45_spill] sm:$0xff] }
 0x369   :  { %v2095_v29 = vmul.f32 %v5137_v0, %v2094_v7  ;;  %5138 = vtanh.f32 %v6607_v27  ;;  %2297 = vmatpush.bf16.msrb.mxu0 %v6114_v3  ;;  %2323 = vmatpush.bf16.msra.mxu2 %v6120_v57  ;;  %v8256_v7 = vld [vmem:[#allocation50_spill] sm:$0xff] }
 0x36b   :  { %v2096_v14 = vadd.f32 %v5137_v0, %v2095_v29  ;;  %v8258_v29 = vld [vmem:[#allocation47_spill] sm:$0xff] }
 0x36c   :  { %2311 = vmatpush.bf16.msrb.mxu1 %v6128_v21  ;;  %2337 = vmatpush.bf16.msra.mxu3 %v6134_v49 }
 0x36d   :  { %v2100_v11 = vsel %vm2099_vm2, %v5137_v0, %v2096_v14  ;;  %2298 = vmatpush.bf16.msrb.mxu0 %v8238_v30  ;;  %2324 = vmatpush.bf16.msra.mxu2 %v8239_v26  ;;  %v8251_v0 = vld [vmem:[#allocation32_spill] sm:$0xff]  ;;  %v8260_v14 = vld [vmem:[#allocation53_spill] sm:$0xff] }
 0x36e   :  { %v2105_v19 = vsel %vm2102_vm3, %v2104_v52, %v2100_v11  ;;  %v8261_v52 = vld [vmem:[#allocation33_spill] sm:$0xff] }
 0x36f   :  { %v5139_v63 = vpop.eup %5138  ;;  %2312 = vmatmul.bf16.vlgmr.msrb.gmra.mxu1 %v6559_v48  ;;  %2338 = vmatmul.bf16.vlgmr.msra.gmra.mxu3 %v6559_v48  ;;  %v8249_v48 = vld [vmem:[#allocation27_spill] sm:$0xff]  ;;  %v8262_v11 = vld [vmem:[#allocation49_spill] sm:$0xff] }
 0x370   :  { %2429 = vmatpush.bf16.msra.mxu1 %v8240_v60  ;;  %2455 = vmatpush.bf16.msrb.mxu3 %v8241_v59  ;;  %v6622_v1 = vmul.f32 %v5139_v63, %v2105_v19  ;;  %v8263_v19 = vld [vmem:[#allocation39_spill] sm:$0xff] }
 0x371   :  { %v8264_v63 = vld [vmem:[#allocation55_spill] sm:$0xff] }
 0x372   :  { %8242 = vst [vmem:[#allocation123_spill] sm:$0xff] %v6622_v1  ;;  %v2238_v55 = vpack.c.bf16 %v6622_v1, %v6622_v1  ;;  %v8265_v1 = vld [vmem:[#allocation35_spill] sm:$0xff] }
 0x374   :  { %2430 = vmatpush.bf16.msra.mxu1 %v8243_v36  ;;  %2456 = vmatpush.bf16.msrb.mxu3 %v8244_v25 }
 0x375   :  { %2247 = vmatmul.bf16.vlgmr.msra.gmra.mxu0 %v2238_v55  ;;  %2273 = vmatmul.bf16.vlgmr.msrb.gmra.mxu2 %v2238_v55 }
 0x376   :  { %2416 = vmatpush.bf16.msra.mxu0 %v8245_v20  ;;  %2442 = vmatpush.bf16.msrb.mxu2 %v8246_v6 }
 0x378   :  { %2431 = vmatpush.bf16.msra.mxu1 %v8247_v46  ;;  %2457 = vmatpush.bf16.msrb.mxu3 %v8248_v50 }
 0x37a   :  { %2417 = vmatpush.bf16.msra.mxu0 %v8249_v48  ;;  %2443 = vmatpush.bf16.msrb.mxu2 %v8250_v45  ;;  %v8306_v45 = vld [vmem:[#allocation60_spill] sm:$0xff] }
 0x37c   :  { %2432 = vmatpush.bf16.msra.mxu1 %v8251_v0  ;;  %2458 = vmatpush.bf16.msrb.mxu3 %v8252_v8 }
 0x37e   :  { %2418 = vmatpush.bf16.msra.mxu0 %v8253_v23  ;;  %2444 = vmatpush.bf16.msrb.mxu2 %v8254_v22  ;;  %v8266_v22 = vld [vmem:[#allocation51_spill] sm:$0xff]  ;;  %v8269_v23 = vld [vmem:[#allocation84_spill] sm:$0xff] }
 0x380   :  { %2433 = vmatpush.bf16.msra.mxu1 %v8255_v54  ;;  %2459 = vmatpush.bf16.msrb.mxu3 %v8256_v7  ;;  %v8307_v7 = vld [vmem:[#allocation81_spill] sm:$0xff] }
 0x382   :  { %2419 = vmatpush.bf16.msra.mxu0 %v8257_v37  ;;  %2445 = vmatpush.bf16.msrb.mxu2 %v8258_v29  ;;  %v8267_v37 = vld [vmem:[#allocation43_spill] sm:$0xff]  ;;  %v8268_v29 = vld [vmem:[#allocation56_spill] sm:$0xff] }
 0x384   :  { %2434 = vmatpush.bf16.msra.mxu1 %v8259_v56  ;;  %2460 = vmatpush.bf16.msrb.mxu3 %v8260_v14  ;;  %v8270_v14 = vld [vmem:[#allocation87_spill] sm:$0xff] }
 0x385   :  { %2299 = vmatmul.bf16.vlgmr.msrb.gmra.mxu0 %v2238_v55  ;;  %2325 = vmatmul.bf16.vlgmr.msra.gmra.mxu2 %v2238_v55  ;;  %v8271_v55 = vld [vmem:[#allocation37_spill] sm:$0xff]  ;;  %v8305_v56 = vld [vmem:[#allocation59_spill] sm:$0xff] }
 0x386   :  { %2420 = vmatpush.bf16.msra.mxu0 %v8261_v52  ;;  %2446 = vmatpush.bf16.msrb.mxu2 %v8262_v11  ;;  %v8272_v52 = vld [vmem:[#allocation52_spill] sm:$0xff]  ;;  %v8273_v11 = vld [vmem:[#allocation90_spill] sm:$0xff] }
 0x388   :  { %2435 = vmatpush.bf16.msra.mxu1 %v8263_v19  ;;  %2461 = vmatpush.bf16.msrb.mxu3 %v8264_v63  ;;  %v8274_v19 = vld [vmem:[#allocation92_spill] sm:$0xff]  ;;  %v8275_v63 = vld [vmem:[#allocation41_spill] sm:$0xff] }
 0x38a   :  { %2421 = vmatpush.bf16.msra.mxu0 %v8265_v1  ;;  %2447 = vmatpush.bf16.msrb.mxu2 %v8266_v22  ;;  %v8276_v1 = vld [vmem:[#allocation54_spill] sm:$0xff]  ;;  %v8277_v22 = vld [vmem:[#allocation83_spill] sm:$0xff] }
 0x38c   :  { %2436 = vmatpush.bf16.msra.mxu1 %v8267_v37  ;;  %2462 = vmatpush.bf16.msrb.mxu3 %v8268_v29  ;;  %v8278_v37 = vld [vmem:[#allocation85_spill] sm:$0xff]  ;;  %v8279_v29 = vld [vmem:[#allocation94_spill] sm:$0xff] }
 0x38e   :  { %2422 = vmatpush.bf16.msra.mxu0 %v8271_v55  ;;  %2448 = vmatpush.bf16.msrb.mxu2 %v8272_v52  ;;  %v8282_v55 = vld [vmem:[#allocation91_spill] sm:$0xff]  ;;  %v8283_v52 = vld [vmem:[#allocation100_spill] sm:$0xff] }
 0x390   :  { %2545 = vmatpush.bf16.msrb.mxu1 %v8269_v23  ;;  %2571 = vmatpush.bf16.msra.mxu3 %v8270_v14  ;;  %v8280_v23 = vld [vmem:[#allocation96_spill] sm:$0xff]  ;;  %v8281_v14 = vld [vmem:[#allocation89_spill] sm:$0xff] }
 0x392   :  { %2423 = vmatpush.bf16.msra.mxu0 %v8275_v63  ;;  %2449 = vmatpush.bf16.msrb.mxu2 %v8276_v1  ;;  %v8286_v63 = vld [vmem:[#allocation95_spill] sm:$0xff]  ;;  %v8287_v1 = vld [vmem:[#allocation104_spill] sm:$0xff] }
 0x394   :  { %2546 = vmatpush.bf16.msrb.mxu1 %v8273_v11  ;;  %2572 = vmatpush.bf16.msra.mxu3 %v8274_v19  ;;  %v8284_v11 = vld [vmem:[#allocation102_spill] sm:$0xff]  ;;  %v8285_v19 = vld [vmem:[#allocation93_spill] sm:$0xff] }
 0x396   :  { %2532 = vmatpush.bf16.msrb.mxu0 %v8277_v22  ;;  %2558 = vmatpush.bf16.msra.mxu2 %v8278_v37  ;;  %v8288_v22 = vld [vmem:[#allocation107_spill] sm:$0xff] }
 0x397   :  { %v8289_v37 = vld [vmem:[#allocation99_spill] sm:$0xff] }
 0x398   :  { %2547 = vmatpush.bf16.msrb.mxu1 %v8279_v29  ;;  %2573 = vmatpush.bf16.msra.mxu3 %v8280_v23  ;;  %v8290_v29 = vld [vmem:[#allocation101_spill] sm:$0xff]  ;;  %v8291_v23 = vld [vmem:[#allocation110_spill] sm:$0xff] }
 0x39a   :  { %2533 = vmatpush.bf16.msrb.mxu0 %v8281_v14  ;;  %2559 = vmatpush.bf16.msra.mxu2 %v8282_v55  ;;  %v8292_v14 = vld [vmem:[#allocation112_spill] sm:$0xff]  ;;  %v8293_v55 = vld [vmem:[#allocation103_spill] sm:$0xff] }
 0x39c   :  { %2548 = vmatpush.bf16.msrb.mxu1 %v8283_v52  ;;  %2574 = vmatpush.bf16.msra.mxu3 %v8284_v11  ;;  %v8294_v52 = vld [vmem:[#allocation105_spill] sm:$0xff]  ;;  %v8295_v11 = vld [vmem:[#allocation114_spill] sm:$0xff] }
 0x39e   :  { %2534 = vmatpush.bf16.msrb.mxu0 %v8285_v19  ;;  %2560 = vmatpush.bf16.msra.mxu2 %v8286_v63  ;;  %v8296_v19 = vld [vmem:[#allocation116_spill] sm:$0xff]  ;;  %v8297_v63 = vld [vmem:[#allocation109_spill] sm:$0xff] }
 0x3a0   :  { %2549 = vmatpush.bf16.msrb.mxu1 %v8287_v1  ;;  %2575 = vmatpush.bf16.msra.mxu3 %v8288_v22  ;;  %v8298_v1 = vld [vmem:[#allocation111_spill] sm:$0xff]  ;;  %v8299_v22 = vld [vmem:[#allocation118_spill] sm:$0xff] }
 0x3a2   :  { %2535 = vmatpush.bf16.msrb.mxu0 %v8289_v37  ;;  %2561 = vmatpush.bf16.msra.mxu2 %v8290_v29  ;;  %v8300_v37 = vld [vmem:[#allocation120_spill] sm:$0xff]  ;;  %v8301_v29 = vld [vmem:[#allocation113_spill] sm:$0xff] }
 0x3a4   :  { %2550 = vmatpush.bf16.msrb.mxu1 %v8291_v23  ;;  %2576 = vmatpush.bf16.msra.mxu3 %v8292_v14  ;;  %v8302_v23 = vld [vmem:[#allocation115_spill] sm:$0xff]  ;;  %v8303_v14 = vld [vmem:[#allocation117_spill] sm:$0xff] }
 0x3a6   :  { %2536 = vmatpush.bf16.msrb.mxu0 %v8293_v55  ;;  %2562 = vmatpush.bf16.msra.mxu2 %v8294_v52  ;;  %v8304_v55 = vld [vmem:[#allocation119_spill] sm:$0xff] }
 0x3a8   :  { %2551 = vmatpush.bf16.msrb.mxu1 %v8295_v11  ;;  %2577 = vmatpush.bf16.msra.mxu3 %v8296_v19 }
 0x3aa   :  { %2537 = vmatpush.bf16.msrb.mxu0 %v8297_v63  ;;  %2563 = vmatpush.bf16.msra.mxu2 %v8298_v1 }
 0x3ac   :  { %2552 = vmatpush.bf16.msrb.mxu1 %v8299_v22  ;;  %2578 = vmatpush.bf16.msra.mxu3 %v8300_v37 }
 0x3ae   :  { %2538 = vmatpush.bf16.msrb.mxu0 %v8301_v29  ;;  %2564 = vmatpush.bf16.msra.mxu2 %v8302_v23 }
 0x3b2   :  { %2539 = vmatpush.bf16.msrb.mxu0 %v8303_v14  ;;  %2565 = vmatpush.bf16.msra.mxu2 %v8304_v55 }
 0x3cb   :  { %v2132_v52 = vpop.f32.mrf.mxu0  ;;  %v2145_v11 = vpop.f32.mrf.mxu1 }
 0x3cc   :  { %v2133_v19 = vadd.f32 %v2132_v52, %v8305_v56  ;;  %v2146_v63 = vadd.f32 %v2145_v11, %v8306_v45 }
 0x3ce   :  { %v4600_v48 = vmul.f32 -1.442695, %v2133_v19  ;;  %v4601_v1 = vmul.f32 -1.442695, %v2146_v63  ;;  %v8308_v19 = vld [vmem:[#allocation82_spill] sm:$0xff] }
 0x3d0   :  { %5140 = vpow2.f32 %v4600_v48 }
 0x3d1   :  { %5142 = vpow2.f32 %v4601_v1 }
 0x3d2   :  { %v2158_v22 = vpop.f32.mrf.mxu2  ;;  %v2171_v37 = vpop.f32.mrf.mxu3 }
 0x3d3   :  { %v2159_v29 = vadd.f32 %v2158_v22, %v8307_v7  ;;  %v2134_v54 = vpop.f32.mrf.mxu0  ;;  %v2147_v23 = vpop.f32.mrf.mxu1  ;;  %v2172_v63 = vadd.f32 %v2171_v37, %v8308_v19 }
 0x3d5   :  { %v4602_v6 = vmul.f32 -1.442695, %v2159_v29 }
 0x3d6   :  { %v5141_v14 = vpop.eup %5140 }
 0x3d7   :  { %v5143_v20 = vpop.eup %5142  ;;  %v2184_v55 = vadd.f32 1.0, %v5141_v14  ;;  %5144 = vpow2.f32 %v4602_v6 }
 0x3d8   :  { %v2185_v8 = vadd.f32 1.0, %v5143_v20 }
 0x3d9   :  { %5146 = vrcp.f32 %v2184_v55  ;;  %v2198_v14 = vand.u32 2147483648, %v2184_v55  ;;  %vm2192_vm6 = vweird.f32 %v2184_v55 }
 0x3da   :  { %5148 = vrcp.f32 %v2185_v8  ;;  %v2160_v56 = vpop.f32.mrf.mxu2  ;;  %v2173_v45 = vpop.f32.mrf.mxu3  ;;  %v2213_v6 = vand.u32 2147483648, %v2185_v8  ;;  %vm2207_vm7 = vweird.f32 %v2185_v8 }
 0x3db   :  { %v2261_v52 = vpop.f32.mrf.mxu1  ;;  %v2196_v56 = vand.u32 2147483647, %v2184_v55  ;;  %v2199_v19 = vor.u32 1.1754944e-38, %v2198_v14 }
 0x3dd   :  { %v5145_v11 = vpop.eup %5144  ;;  %vm2197_vm10 = vcmp.eq.f32.partialorder %v2196_v56, 8.507059e+37 }
 0x3de   :  { %v2186_v48 = vadd.f32 1.0, %v5145_v11  ;;  %v2211_v11 = vand.u32 2147483647, %v2185_v8 }
 0x3df   :  { %v5147_v1 = vpop.eup %5146 }
 0x3e0   :  { %v5149_v0 = vpop.eup %5148  ;;  %v2188_v22 = vmul.f32 %v5147_v1, %v2184_v55  ;;  %5150 = vrcp.f32 %v2186_v48  ;;  %vm2193_vm4 = vweird.f32 %v5147_v1  ;;  %vm2212_vm11 = vcmp.eq.f32.partialorder %v2211_v11, 8.507059e+37 }
 0x3e1   :  { %v2203_v23 = vmul.f32 %v5149_v0, %v2185_v8  ;;  %5152 = vtanh.f32 %v2172_v63  ;;  %vm2208_vm5 = vweird.f32 %v5149_v0  ;;  %vm2194_vm8 = vmor %vm2192_vm6, %vm2193_vm4  ;;  %vm2222_vm13 = vweird.f32 %v2186_v48 }
 0x3e2   :  { %v2189_v54 = vsub.f32 1.0, %v2188_v22  ;;  %v2287_v7 = vpop.f32.mrf.mxu3  ;;  %vm2209_vm9 = vmor %vm2207_vm7, %vm2208_vm5 }
 0x3e3   :  { %v2204_v29 = vsub.f32 1.0, %v2203_v23  ;;  %v2263_v20 = vpop.f32.mrf.mxu1  ;;  %v2214_v23 = vor.u32 1.1754944e-38, %v2213_v6 }
 0x3e4   :  { %v2190_v50 = vmul.f32 %v5147_v1, %v2189_v54 }
 0x3e5   :  { %v2205_v45 = vmul.f32 %v5149_v0, %v2204_v29 }
 0x3e6   :  { %v5151_v46 = vpop.eup %5150  ;;  %v2191_v25 = vadd.f32 %v5147_v1, %v2190_v50 }
 0x3e7   :  { %v2218_v37 = vmul.f32 %v5151_v46, %v2186_v48  ;;  %v2206_v22 = vadd.f32 %v5149_v0, %v2205_v45  ;;  %v5153_v63 = vpop.eup %5152  ;;  %vm2223_vm12 = vweird.f32 %v5151_v46  ;;  %v2228_v45 = vand.u32 2147483648, %v2186_v48 }
 0x3e8   :  { %v2195_v36 = vsel %vm2194_vm8, %v5147_v1, %v2191_v25  ;;  %v2226_v25 = vand.u32 2147483647, %v2186_v48  ;;  %vm2224_vm14 = vmor %vm2222_vm13, %vm2223_vm12 }
 0x3e9   :  { %v2219_v20 = vsub.f32 1.0, %v2218_v37  ;;  %v2200_v54 = vsel %vm2197_vm10, %v2199_v19, %v2195_v36  ;;  %v2210_v59 = vsel %vm2209_vm9, %v5149_v0, %v2206_v22 }
 0x3ea   :  { %v2215_v29 = vsel %vm2212_vm11, %v2214_v23, %v2210_v59  ;;  %v2234_v60 = vmul.f32 %v5153_v63, %v2200_v54  ;;  %v2289_v26 = vpop.f32.mrf.mxu3  ;;  %vm2227_vm15 = vcmp.eq.f32.partialorder %v2226_v25, 8.507059e+37 }
 0x3eb   :  { %v2220_v30 = vmul.f32 %v5151_v46, %v2219_v20  ;;  %v2233_v50 = vmul.f32 %v2215_v29, %v6552_v12  ;;  %v2229_v26 = vor.u32 1.1754944e-38, %v2228_v45 }
 0x3ec   :  { %v2313_v8 = vpop.f32.mrf.mxu1 }
 0x3ed   :  { %v6693_v55 = vadd.f32 %v2234_v60, %v2233_v50  ;;  %v2221_v14 = vadd.f32 %v5151_v46, %v2220_v30 }
 0x3ef   :  { %5154 = vtanh.f32 %v6693_v55  ;;  %v2225_v0 = vsel %vm2224_vm14, %v5151_v46, %v2221_v14 }
 0x3f0   :  { %v2230_v60 = vsel %vm2227_vm15, %v2229_v26, %v2225_v0 }
 0x3f2   :  { %v2248_v36 = vpop.f32.mrf.mxu0  ;;  %v2339_v1 = vpop.f32.mrf.mxu3 }
 0x3f3   :  { %v2249_v59 = vadd.f32 %v2248_v36, %v8235_v13 }
 0x3f4   :  { %v2315_v12 = vpop.f32.mrf.mxu1 }
 0x3f5   :  { %v2262_v6 = vadd.f32 %v2261_v52, %v2249_v59  ;;  %v5155_v56 = vpop.eup %5154 }
 0x3f6   :  { %v2237_v11 = vmul.f32 %v5155_v56, %v2230_v60 }
 0x3f7   :  { %v4603_v30 = vmul.f32 -1.442695, %v2262_v6 }
 0x3f8   :  { %v2274_v37 = vpop.f32.mrf.mxu2  ;;  %v6697_v19 = vpack.c.bf16 %v2237_v11, %v2237_v11 }
 0x3f9   :  { %5156 = vpow2.f32 %v4603_v30  ;;  %v2275_v48 = vadd.f32 %v2274_v37, %v8158_v24 }
 0x3fa   :  { %v2250_v22 = vpop.f32.mrf.mxu0  ;;  %v2341_v46 = vpop.f32.mrf.mxu3  ;;  %2424 = vmatmul.bf16.vlgmr.msra.gmra.mxu0 %v6697_v19  ;;  %2437 = vmatmul.bf16.vlgmr.msra.gmra.mxu1 %v6697_v19 }
 0x3fb   :  { %v2288_v23 = vadd.f32 %v2287_v7, %v2275_v48  ;;  %2450 = vmatmul.bf16.vlgmr.msrb.gmra.mxu2 %v6697_v19  ;;  %2463 = vmatmul.bf16.vlgmr.msrb.gmra.mxu3 %v6697_v19 }
 0x3fc   :  { %2597 = vmatpush.bf16.msra.mxu1 %v8088_v42  ;;  %2623 = vmatpush.bf16.msrb.mxu3 %v8089_v10 }
 0x3fd   :  { %v4604_v52 = vmul.f32 -1.442695, %v2288_v23  ;;  %2584 = vmatpush.bf16.msra.mxu0 %v8090_v18  ;;  %2610 = vmatpush.bf16.msrb.mxu2 %v8091_v35 }
 0x3ff   :  { %v5157_v63 = vpop.eup %5156  ;;  %5158 = vpow2.f32 %v4604_v52 }
 0x400   :  { %v2352_v7 = vadd.f32 1.0, %v5157_v63  ;;  %v2276_v20 = vpop.f32.mrf.mxu2  ;;  %2598 = vmatpush.bf16.msra.mxu1 %v8092_v41  ;;  %2624 = vmatpush.bf16.msrb.mxu3 %v8093_v31 }
 0x401   :  { %2585 = vmatpush.bf16.msra.mxu0 %v8094_v5  ;;  %2611 = vmatpush.bf16.msrb.mxu2 %v8095_v16 }
 0x402   :  { %5160 = vrcp.f32 %v2352_v7  ;;  %v2300_v54 = vpop.f32.mrf.mxu0  ;;  %v2366_v22 = vand.u32 2147483648, %v2352_v7  ;;  %vm2360_vm1 = vweird.f32 %v2352_v7  ;;  %v2364_v46 = vand.u32 2147483647, %v2352_v7 }
 0x403   :  { %v2301_v29 = vadd.f32 %v2300_v54, %v6230_v15 }
 0x404   :  { %2599 = vmatpush.bf16.msra.mxu1 %v8096_v40  ;;  %2625 = vmatpush.bf16.msrb.mxu3 %v8097_v53  ;;  %vm2365_vm5 = vcmp.eq.f32.partialorder %v2364_v46, 8.507059e+37  ;;  %v8316_v46 = vld [vmem:[#allocation28_spill] sm:$0xff] }
 0x405   :  { %v5159_v50 = vpop.eup %5158  ;;  %v2314_v14 = vadd.f32 %v2313_v8, %v2301_v29  ;;  %2586 = vmatpush.bf16.msra.mxu0 %v8099_v34  ;;  %2612 = vmatpush.bf16.msrb.mxu2 %v8100_v43  ;;  %v2367_v29 = vor.u32 1.1754944e-38, %v2366_v22 }
 0x406   :  { %v2353_v45 = vadd.f32 1.0, %v5159_v50 }
 0x407   :  { %v4605_v25 = vmul.f32 -1.442695, %v2314_v14 }
 0x408   :  { %v5161_v36 = vpop.eup %5160  ;;  %5162 = vrcp.f32 %v2353_v45  ;;  %v2326_v0 = vpop.f32.mrf.mxu2  ;;  %2600 = vmatpush.bf16.msra.mxu1 %v8101_v4  ;;  %2626 = vmatpush.bf16.msrb.mxu3 %v8161_v61  ;;  %v2381_v52 = vand.u32 2147483648, %v2353_v45  ;;  %vm2375_vm4 = vweird.f32 %v2353_v45 }
 0x409   :  { %v2356_v59 = vmul.f32 %v5161_v36, %v2352_v7  ;;  %5164 = vpow2.f32 %v4605_v25  ;;  %v2327_v26 = vadd.f32 %v2326_v0, %v6247_v17  ;;  %2587 = vmatpush.bf16.msra.mxu0 %v8162_v32  ;;  %2613 = vmatpush.bf16.msrb.mxu2 %v8163_v38  ;;  %vm2361_vm0 = vweird.f32 %v5161_v36 }
 0x40a   :  { %v2302_v6 = vpop.f32.mrf.mxu0  ;;  %2553 = vmatmul.bf16.vlgmr.msrb.gmra.mxu1 %v6697_v19  ;;  %vm6730_vm2 = vmor %vm2360_vm1, %vm2361_vm0  ;;  %v2379_v7 = vand.u32 2147483647, %v2353_v45  ;;  %v2382_v25 = vor.u32 1.1754944e-38, %v2381_v52  ;;  %v8317_v52 = vld [vmem:[#allocation44_spill] sm:$0xff] }
 0x40b   :  { %v2357_v8 = vsub.f32 1.0, %v2356_v59  ;;  %v2340_v12 = vadd.f32 %v2339_v1, %v2327_v26  ;;  %2579 = vmatmul.bf16.vlgmr.msra.gmra.mxu3 %v6697_v19 }
 0x40c   :  { %2601 = vmatpush.bf16.msra.mxu1 %v8105_v47  ;;  %2627 = vmatpush.bf16.msrb.mxu3 %v8106_v28  ;;  %vm2380_vm7 = vcmp.eq.f32.partialorder %v2379_v7, 8.507059e+37 }
 0x40d   :  { %v2358_v56 = vmul.f32 %v5161_v36, %v2357_v8  ;;  %2588 = vmatpush.bf16.msra.mxu0 %v8107_v44  ;;  %2614 = vmatpush.bf16.msrb.mxu2 %v8108_v9  ;;  %5166 = vtanh.f32 %v2340_v12  ;;  %v8311_v12 = vld [vmem:[#allocation144_spill] sm:$0xff] }
 0x40e   :  { %v5163_v60 = vpop.eup %5162 }
 0x40f   :  { %v5165_v11 = vpop.eup %5164  ;;  %v2371_v30 = vmul.f32 %v5163_v60, %v2353_v45  ;;  %v2359_v37 = vadd.f32 %v5161_v36, %v2358_v56  ;;  %vm2376_vm3 = vweird.f32 %v5163_v60  ;;  %v8312_v56 = vld [vmem:[#allocation145_spill] sm:$0xff] }
 0x410   :  { %v2354_v48 = vadd.f32 1.0, %v5165_v11  ;;  %v2328_v1 = vpop.f32.mrf.mxu2  ;;  %2602 = vmatpush.bf16.msra.mxu1 %v8110_v51  ;;  %2628 = vmatpush.bf16.msrb.mxu3 %v6110_v39  ;;  %vm2377_vm6 = vmor %vm2375_vm4, %vm2376_vm3 }
 0x411   :  { %v2372_v23 = vsub.f32 1.0, %v2371_v30  ;;  %2589 = vmatpush.bf16.msra.mxu0 %v8111_v2  ;;  %2615 = vmatpush.bf16.msrb.mxu2 %v6108_v58  ;;  %v2363_v54 = vsel %vm6730_vm2, %v5161_v36, %v2359_v37  ;;  %v8314_v37 = vld [vmem:[#allocation26_spill] sm:$0xff] }
 0x412   :  { %5168 = vrcp.f32 %v2354_v48  ;;  %v2368_v0 = vsel %vm2365_vm5, %v2367_v29, %v2363_v54  ;;  %v2396_v22 = vand.u32 2147483648, %v2354_v48  ;;  %v2394_v1 = vand.u32 2147483647, %v2354_v48  ;;  %v8318_v29 = vld [vmem:[#allocation30_spill] sm:$0xff] }
 0x413   :  { %v2373_v20 = vmul.f32 %v5163_v60, %v2372_v23  ;;  %v5167_v14 = vpop.eup %5166  ;;  %vm2390_vm9 = vweird.f32 %v2354_v48 }
 0x414   :  { %2603 = vmatpush.bf16.msra.mxu1 %v6116_v33  ;;  %2629 = vmatpush.bf16.msrb.mxu3 %v6122_v62  ;;  %v2402_v8 = vmul.f32 %v5167_v14, %v2368_v0  ;;  %v2397_v63 = vor.u32 1.1754944e-38, %v2396_v22  ;;  %vm2395_vm11 = vcmp.eq.f32.partialorder %v2394_v1, 8.507059e+37  ;;  %v8321_v14 = vld [vmem:[#allocation32_spill] sm:$0xff]  ;;  %v8323_v0 = vld [vmem:[#allocation25_spill] sm:$0xff]  ;;  %v8333_v1 = vld [vmem:[#allocation39_spill] sm:$0xff] }
 0x415   :  { %v2374_v50 = vadd.f32 %v5163_v60, %v2373_v20  ;;  %2590 = vmatpush.bf16.msra.mxu0 %v6114_v3  ;;  %2616 = vmatpush.bf16.msrb.mxu2 %v6120_v57  ;;  %v8331_v22 = vld [vmem:[#allocation29_spill] sm:$0xff] }
 0x417   :  { %v2378_v59 = vsel %vm2377_vm6, %v5163_v60, %v2374_v50  ;;  %v8315_v60 = vld [vmem:[#allocation40_spill] sm:$0xff] }
 0x418   :  { %v5169_v36 = vpop.eup %5168  ;;  %v2383_v26 = vsel %vm2380_vm7, %v2382_v25, %v2378_v59  ;;  %2604 = vmatpush.bf16.msra.mxu1 %v6128_v21  ;;  %2630 = vmatpush.bf16.msrb.mxu3 %v6134_v49  ;;  %v8322_v25 = vld [vmem:[#allocation48_spill] sm:$0xff]  ;;  %v8324_v59 = vld [vmem:[#allocation38_spill] sm:$0xff] }
 0x419   :  { %v2386_v6 = vmul.f32 %v5169_v36, %v2354_v48  ;;  %v2401_v45 = vmul.f32 %v2383_v26, %v6607_v27  ;;  %2591 = vmatpush.bf16.msra.mxu0 %v8311_v12  ;;  %2617 = vmatpush.bf16.msrb.mxu2 %v8312_v56  ;;  %vm2391_vm8 = vweird.f32 %v5169_v36  ;;  %v8326_v26 = vld [vmem:[#allocation50_spill] sm:$0xff] }
 0x41a   :  { %vm2392_vm10 = vmor %vm2390_vm9, %vm2391_vm8 }
 0x41b   :  { %v2387_v11 = vsub.f32 1.0, %v2386_v6  ;;  %v6747_v30 = vadd.f32 %v2402_v8, %v2401_v45  ;;  %2605 = vmatmul.bf16.vlgmr.msra.gmra.mxu1 %v6697_v19  ;;  %2631 = vmatmul.bf16.vlgmr.msrb.gmra.mxu3 %v6697_v19  ;;  %v8319_v19 = vld [vmem:[#allocation46_spill] sm:$0xff]  ;;  %v8327_v6 = vld [vmem:[#allocation27_spill] sm:$0xff]  ;;  %v8329_v8 = vld [vmem:[#allocation36_spill] sm:$0xff] }
 0x41c   :  { %2722 = vmatpush.bf16.msrb.mxu1 %v8314_v37  ;;  %2748 = vmatpush.bf16.msra.mxu3 %v8315_v60  ;;  %v8328_v45 = vld [vmem:[#allocation42_spill] sm:$0xff] }
 0x41d   :  { %8313 = vst [vmem:[#allocation125_spill] sm:$0xff] %v6747_v30  ;;  %v2388_v27 = vmul.f32 %v5169_v36, %v2387_v11  ;;  %5170 = vtanh.f32 %v6747_v30  ;;  %v8330_v11 = vld [vmem:[#allocation53_spill] sm:$0xff] }
 0x41f   :  { %v2389_v23 = vadd.f32 %v5169_v36, %v2388_v27  ;;  %v8332_v27 = vld [vmem:[#allocation45_spill] sm:$0xff] }
 0x420   :  { %2723 = vmatpush.bf16.msrb.mxu1 %v8316_v46  ;;  %2749 = vmatpush.bf16.msra.mxu3 %v8317_v52 }
 0x421   :  { %v2393_v20 = vsel %vm2392_vm10, %v5169_v36, %v2389_v23  ;;  %v8325_v36 = vld [vmem:[#allocation34_spill] sm:$0xff]  ;;  %v8334_v23 = vld [vmem:[#allocation55_spill] sm:$0xff] }
 0x422   :  { %v2398_v54 = vsel %vm2395_vm11, %v2397_v63, %v2393_v20  ;;  %v8335_v63 = vld [vmem:[#allocation31_spill] sm:$0xff] }
 0x423   :  { %v5171_v7 = vpop.eup %5170  ;;  %v8336_v20 = vld [vmem:[#allocation47_spill] sm:$0xff] }
 0x424   :  { %2724 = vmatpush.bf16.msrb.mxu1 %v8318_v29  ;;  %2750 = vmatpush.bf16.msra.mxu3 %v8319_v19  ;;  %v6758_v50 = vmul.f32 %v5171_v7, %v2398_v54  ;;  %v8337_v54 = vld [vmem:[#allocation43_spill] sm:$0xff]  ;;  %v8338_v7 = vld [vmem:[#allocation56_spill] sm:$0xff] }
 0x426   :  { %8320 = vst [vmem:[#allocation122_spill] sm:$0xff] %v6758_v50  ;;  %v2531_v48 = vpack.c.bf16 %v6758_v50, %v6758_v50  ;;  %v8339_v50 = vld [vmem:[#allocation84_spill] sm:$0xff] }
 0x428   :  { %2725 = vmatpush.bf16.msrb.mxu1 %v8321_v14  ;;  %2751 = vmatpush.bf16.msra.mxu3 %v8322_v25 }
 0x429   :  { %2540 = vmatmul.bf16.vlgmr.msrb.gmra.mxu0 %v2531_v48  ;;  %2566 = vmatmul.bf16.vlgmr.msra.gmra.mxu2 %v2531_v48 }
 0x42a   :  { %2709 = vmatpush.bf16.msrb.mxu0 %v8323_v0  ;;  %2735 = vmatpush.bf16.msra.mxu2 %v8324_v59  ;;  %v8382_v59 = vld [vmem:[#allocation64_spill] sm:$0xff] }
 0x42c   :  { %2726 = vmatpush.bf16.msrb.mxu1 %v8325_v36  ;;  %2752 = vmatpush.bf16.msra.mxu3 %v8326_v26  ;;  %v8384_v26 = vld [vmem:[#allocation86_spill] sm:$0xff] }
 0x42e   :  { %2710 = vmatpush.bf16.msrb.mxu0 %v8327_v6  ;;  %2736 = vmatpush.bf16.msra.mxu2 %v8328_v45  ;;  %v8340_v45 = vld [vmem:[#allocation87_spill] sm:$0xff]  ;;  %v8343_v6 = vld [vmem:[#allocation90_spill] sm:$0xff] }
 0x430   :  { %2727 = vmatpush.bf16.msrb.mxu1 %v8329_v8  ;;  %2753 = vmatpush.bf16.msra.mxu3 %v8330_v11 }
 0x432   :  { %2711 = vmatpush.bf16.msrb.mxu0 %v8331_v22  ;;  %2737 = vmatpush.bf16.msra.mxu2 %v8332_v27  ;;  %v8341_v22 = vld [vmem:[#allocation33_spill] sm:$0xff] }
 0x433   :  { %v8342_v27 = vld [vmem:[#allocation49_spill] sm:$0xff] }
 0x434   :  { %2728 = vmatpush.bf16.msrb.mxu1 %v8333_v1  ;;  %2754 = vmatpush.bf16.msra.mxu3 %v8334_v23  ;;  %v8344_v23 = vld [vmem:[#allocation92_spill] sm:$0xff] }
 0x436   :  { %2712 = vmatpush.bf16.msrb.mxu0 %v8335_v63  ;;  %2738 = vmatpush.bf16.msra.mxu2 %v8336_v20  ;;  %v8345_v63 = vld [vmem:[#allocation35_spill] sm:$0xff] }
 0x437   :  { %v8346_v20 = vld [vmem:[#allocation51_spill] sm:$0xff] }
 0x438   :  { %2729 = vmatpush.bf16.msrb.mxu1 %v8337_v54  ;;  %2755 = vmatpush.bf16.msra.mxu3 %v8338_v7  ;;  %v8347_v54 = vld [vmem:[#allocation94_spill] sm:$0xff]  ;;  %v8348_v7 = vld [vmem:[#allocation96_spill] sm:$0xff] }
 0x439   :  { %2592 = vmatmul.bf16.vlgmr.msra.gmra.mxu0 %v2531_v48  ;;  %2618 = vmatmul.bf16.vlgmr.msrb.gmra.mxu2 %v2531_v48  ;;  %v8349_v48 = vld [vmem:[#allocation37_spill] sm:$0xff] }
 0x43a   :  { %2713 = vmatpush.bf16.msrb.mxu0 %v8341_v22  ;;  %2739 = vmatpush.bf16.msra.mxu2 %v8342_v27  ;;  %v8352_v22 = vld [vmem:[#allocation102_spill] sm:$0xff]  ;;  %v8353_v27 = vld [vmem:[#allocation41_spill] sm:$0xff] }
 0x43c   :  { %2838 = vmatpush.bf16.msra.mxu1 %v8339_v50  ;;  %2864 = vmatpush.bf16.msrb.mxu3 %v8340_v45  ;;  %v8350_v50 = vld [vmem:[#allocation52_spill] sm:$0xff] }
 0x43d   :  { %v8351_v45 = vld [vmem:[#allocation100_spill] sm:$0xff] }
 0x43e   :  { %2714 = vmatpush.bf16.msrb.mxu0 %v8345_v63  ;;  %2740 = vmatpush.bf16.msra.mxu2 %v8346_v20  ;;  %v8356_v63 = vld [vmem:[#allocation85_spill] sm:$0xff]  ;;  %v8357_v20 = vld [vmem:[#allocation104_spill] sm:$0xff] }
 0x440   :  { %2839 = vmatpush.bf16.msra.mxu1 %v8343_v6  ;;  %2865 = vmatpush.bf16.msrb.mxu3 %v8344_v23  ;;  %v8354_v6 = vld [vmem:[#allocation54_spill] sm:$0xff]  ;;  %v8355_v23 = vld [vmem:[#allocation83_spill] sm:$0xff] }
 0x442   :  { %2715 = vmatpush.bf16.msrb.mxu0 %v8349_v48  ;;  %2741 = vmatpush.bf16.msra.mxu2 %v8350_v50  ;;  %v8360_v48 = vld [vmem:[#allocation91_spill] sm:$0xff]  ;;  %v8361_v50 = vld [vmem:[#allocation110_spill] sm:$0xff] }
 0x444   :  { %2840 = vmatpush.bf16.msra.mxu1 %v8347_v54  ;;  %2866 = vmatpush.bf16.msrb.mxu3 %v8348_v7  ;;  %v8358_v54 = vld [vmem:[#allocation107_spill] sm:$0xff]  ;;  %v8359_v7 = vld [vmem:[#allocation89_spill] sm:$0xff] }
 0x446   :  { %2716 = vmatpush.bf16.msrb.mxu0 %v8353_v27  ;;  %2742 = vmatpush.bf16.msra.mxu2 %v8354_v6  ;;  %v8364_v27 = vld [vmem:[#allocation95_spill] sm:$0xff]  ;;  %v8365_v6 = vld [vmem:[#allocation114_spill] sm:$0xff] }
 0x448   :  { %2841 = vmatpush.bf16.msra.mxu1 %v8351_v45  ;;  %2867 = vmatpush.bf16.msrb.mxu3 %v8352_v22  ;;  %v8362_v45 = vld [vmem:[#allocation112_spill] sm:$0xff]  ;;  %v8363_v22 = vld [vmem:[#allocation93_spill] sm:$0xff] }
 0x44a   :  { %2825 = vmatpush.bf16.msra.mxu0 %v8355_v23  ;;  %2851 = vmatpush.bf16.msrb.mxu2 %v8356_v63  ;;  %v8366_v23 = vld [vmem:[#allocation116_spill] sm:$0xff]  ;;  %v8367_v63 = vld [vmem:[#allocation99_spill] sm:$0xff] }
 0x44c   :  { %2842 = vmatpush.bf16.msra.mxu1 %v8357_v20  ;;  %2868 = vmatpush.bf16.msrb.mxu3 %v8358_v54  ;;  %v8368_v20 = vld [vmem:[#allocation101_spill] sm:$0xff]  ;;  %v8369_v54 = vld [vmem:[#allocation118_spill] sm:$0xff] }
 0x44e   :  { %2826 = vmatpush.bf16.msra.mxu0 %v8359_v7  ;;  %2852 = vmatpush.bf16.msrb.mxu2 %v8360_v48  ;;  %v8370_v7 = vld [vmem:[#allocation120_spill] sm:$0xff]  ;;  %v8371_v48 = vld [vmem:[#allocation103_spill] sm:$0xff] }
 0x450   :  { %2843 = vmatpush.bf16.msra.mxu1 %v8361_v50  ;;  %2869 = vmatpush.bf16.msrb.mxu3 %v8362_v45  ;;  %v8372_v50 = vld [vmem:[#allocation105_spill] sm:$0xff] }
 0x451   :  { %v8373_v45 = vld [vmem:[#allocation109_spill] sm:$0xff] }
 0x452   :  { %2827 = vmatpush.bf16.msra.mxu0 %v8363_v22  ;;  %2853 = vmatpush.bf16.msrb.mxu2 %v8364_v27  ;;  %v8374_v22 = vld [vmem:[#allocation111_spill] sm:$0xff]  ;;  %v8375_v27 = vld [vmem:[#allocation113_spill] sm:$0xff] }
 0x454   :  { %2844 = vmatpush.bf16.msra.mxu1 %v8365_v6  ;;  %2870 = vmatpush.bf16.msrb.mxu3 %v8366_v23  ;;  %v8376_v6 = vld [vmem:[#allocation115_spill] sm:$0xff]  ;;  %v8377_v23 = vld [vmem:[#allocation117_spill] sm:$0xff] }
 0x456   :  { %2828 = vmatpush.bf16.msra.mxu0 %v8367_v63  ;;  %2854 = vmatpush.bf16.msrb.mxu2 %v8368_v20  ;;  %v8378_v63 = vld [vmem:[#allocation119_spill] sm:$0xff]  ;;  %v8379_v20 = vld [vmem:[#allocation57_spill] sm:$0xff] }
 0x458   :  { %2845 = vmatpush.bf16.msra.mxu1 %v8369_v54  ;;  %2871 = vmatpush.bf16.msrb.mxu3 %v8370_v7  ;;  %v8380_v54 = vld [vmem:[#allocation63_spill] sm:$0xff]  ;;  %v8381_v7 = vld [vmem:[#allocation58_spill] sm:$0xff] }
 0x459   :  { %v496_v1 = vadd.f32 %v8380_v54, %v8379_v20 }
 0x45a   :  { %2829 = vmatpush.bf16.msra.mxu0 %v8371_v48  ;;  %2855 = vmatpush.bf16.msrb.mxu2 %v8372_v50  ;;  %v525_v48 = vadd.f32 %v8382_v59, %v8381_v7 }
 0x45e   :  { %2830 = vmatpush.bf16.msra.mxu0 %v8373_v45  ;;  %2856 = vmatpush.bf16.msrb.mxu2 %v8374_v22 }
 0x462   :  { %2831 = vmatpush.bf16.msra.mxu0 %v8375_v27  ;;  %2857 = vmatpush.bf16.msrb.mxu2 %v8376_v6  ;;  %v8383_v27 = vld [vmem:[#allocation75_spill] sm:$0xff] }
 0x463   :  { %v554_v6 = vadd.f32 %v8384_v26, %v8383_v27  ;;  %v8385_v26 = vld [vmem:[#allocation76_spill] sm:$0xff] }
 0x466   :  { %2832 = vmatpush.bf16.msra.mxu0 %v8377_v23  ;;  %2858 = vmatpush.bf16.msrb.mxu2 %v8378_v63 }
 0x477   :  { %v2425_v0 = vpop.f32.mrf.mxu0  ;;  %v2438_v50 = vpop.f32.mrf.mxu1 }
 0x478   :  { %v2426_v11 = vadd.f32 %v2425_v0, %v496_v1  ;;  %v2439_v45 = vadd.f32 %v2438_v50, %v525_v48 }
 0x47a   :  { %v4606_v8 = vmul.f32 -1.442695, %v2426_v11  ;;  %v4607_v22 = vmul.f32 -1.442695, %v2439_v45  ;;  %v8386_v11 = vld [vmem:[#allocation88_spill] sm:$0xff] }
 0x47c   :  { %5172 = vpow2.f32 %v4606_v8 }
 0x47d   :  { %5174 = vpow2.f32 %v4607_v22  ;;  %v583_v22 = vadd.f32 %v8386_v11, %v8385_v26 }
 0x47e   :  { %v2451_v23 = vpop.f32.mrf.mxu2  ;;  %v2464_v36 = vpop.f32.mrf.mxu3 }
 0x47f   :  { %v2452_v63 = vadd.f32 %v2451_v23, %v554_v6  ;;  %v2427_v25 = vpop.f32.mrf.mxu0  ;;  %v2440_v14 = vpop.f32.mrf.mxu1 }
 0x480   :  { %v2465_v25 = vadd.f32 %v2464_v36, %v583_v22 }
 0x481   :  { %v4608_v54 = vmul.f32 -1.442695, %v2452_v63 }
 0x482   :  { %v5173_v20 = vpop.eup %5172 }
 0x483   :  { %v5175_v19 = vpop.eup %5174  ;;  %v2477_v59 = vadd.f32 1.0, %v5173_v20  ;;  %5176 = vpow2.f32 %v4608_v54 }
 0x484   :  { %v2478_v7 = vadd.f32 1.0, %v5175_v19 }
 0x485   :  { %5178 = vrcp.f32 %v2477_v59  ;;  %v2491_v54 = vand.u32 2147483648, %v2477_v59  ;;  %v2489_v29 = vand.u32 2147483647, %v2477_v59  ;;  %vm2485_vm14 = vweird.f32 %v2477_v59 }
 0x486   :  { %5180 = vrcp.f32 %v2478_v7  ;;  %v2453_v50 = vpop.f32.mrf.mxu2  ;;  %v2466_v0 = vpop.f32.mrf.mxu3  ;;  %vm2500_vm15 = vweird.f32 %v2478_v7 }
 0x487   :  { %v6826_v45 = vpop.f32.mrf.mxu1  ;;  %v2506_v0 = vand.u32 2147483648, %v2478_v7  ;;  %vm2490_vm2 = vcmp.eq.f32.partialorder %v2489_v29, 8.507059e+37 }
 0x489   :  { %v5177_v8 = vpop.eup %5176 }
 0x48a   :  { %v2479_v1 = vadd.f32 1.0, %v5177_v8  ;;  %v2504_v8 = vand.u32 2147483647, %v2478_v7 }
 0x48b   :  { %v5179_v6 = vpop.eup %5178 }
 0x48c   :  { %v5181_v14 = vpop.eup %5180  ;;  %v2481_v23 = vmul.f32 %v5179_v6, %v2477_v59  ;;  %5182 = vrcp.f32 %v2479_v1  ;;  %vm2486_vm12 = vweird.f32 %v5179_v6  ;;  %vm2505_vm3 = vcmp.eq.f32.partialorder %v2504_v8, 8.507059e+37 }
 0x48d   :  { %v2496_v63 = vmul.f32 %v5181_v14, %v2478_v7  ;;  %5184 = vtanh.f32 %v2465_v25  ;;  %vm2501_vm13 = vweird.f32 %v5181_v14  ;;  %vm2487_vm0 = vmor %vm2485_vm14, %vm2486_vm12  ;;  %vm2515_vm5 = vweird.f32 %v2479_v1 }
 0x48e   :  { %v2482_v20 = vsub.f32 1.0, %v2481_v23  ;;  %v6830_v48 = vpop.f32.mrf.mxu3  ;;  %v2492_v23 = vor.u32 1.1754944e-38, %v2491_v54  ;;  %vm2502_vm1 = vmor %vm2500_vm15, %vm2501_vm13  ;;  %v2519_v29 = vand.u32 2147483647, %v2479_v1 }
 0x48f   :  { %v2497_v19 = vsub.f32 1.0, %v2496_v63  ;;  %v2556_v50 = vpop.f32.mrf.mxu1  ;;  %v2507_v63 = vor.u32 1.1754944e-38, %v2506_v0 }
 0x490   :  { %v2483_v27 = vmul.f32 %v5179_v6, %v2482_v20  ;;  %vm2520_vm7 = vcmp.eq.f32.partialorder %v2519_v29, 8.507059e+37 }
 0x491   :  { %v2498_v30 = vmul.f32 %v5181_v14, %v2497_v19 }
 0x492   :  { %v5183_v11 = vpop.eup %5182  ;;  %v2484_v36 = vadd.f32 %v5179_v6, %v2483_v27 }
 0x493   :  { %v2511_v22 = vmul.f32 %v5183_v11, %v2479_v1  ;;  %v2499_v26 = vadd.f32 %v5181_v14, %v2498_v30  ;;  %v5185_v25 = vpop.eup %5184  ;;  %vm2516_vm4 = vweird.f32 %v5183_v11  ;;  %v2521_v30 = vand.u32 2147483648, %v2479_v1 }
 0x494   :  { %v2488_v52 = vsel %vm2487_vm0, %v5179_v6, %v2484_v36  ;;  %vm2517_vm6 = vmor %vm2515_vm5, %vm2516_vm4 }
 0x495   :  { %v2512_v50 = vsub.f32 1.0, %v2511_v22  ;;  %v2493_v20 = vsel %vm2490_vm2, %v2492_v23, %v2488_v52  ;;  %v2503_v46 = vsel %vm2502_vm1, %v5181_v14, %v2499_v26 }
 0x496   :  { %v2508_v19 = vsel %vm2505_vm3, %v2507_v63, %v2503_v46  ;;  %v2527_v60 = vmul.f32 %v5185_v25, %v2493_v20  ;;  %v2582_v37 = vpop.f32.mrf.mxu3  ;;  %v2522_v46 = vor.u32 1.1754944e-38, %v2521_v30 }
 0x497   :  { %v2513_v56 = vmul.f32 %v5183_v11, %v2512_v50  ;;  %v2526_v27 = vmul.f32 %v2508_v19, %v6693_v55 }
 0x498   :  { %v2606_v7 = vpop.f32.mrf.mxu1 }
 0x499   :  { %v6833_v59 = vadd.f32 %v2527_v60, %v2526_v27  ;;  %v2514_v54 = vadd.f32 %v5183_v11, %v2513_v56 }
 0x49b   :  { %5186 = vtanh.f32 %v6833_v59  ;;  %v2518_v52 = vsel %vm2517_vm6, %v5183_v11, %v2514_v54 }
 0x49c   :  { %v2523_v14 = vsel %vm2520_vm7, %v2522_v46, %v2518_v52 }
 0x49e   :  { %v6836_v26 = vpop.f32.mrf.mxu3 }
 0x4a0   :  { %v2608_v37 = vpop.f32.mrf.mxu1 }
 0x4a1   :  { %v5187_v6 = vpop.eup %5186 }
 0x4a2   :  { %v2530_v55 = vmul.f32 %v5187_v6, %v2523_v14 }
 0x4a4   :  { %v6838_v0 = vpack.c.bf16 %v2530_v55, %v2530_v55 }
 0x4a6   :  { %v2541_v60 = vpop.f32.mrf.mxu0  ;;  %v2634_v8 = vpop.f32.mrf.mxu3  ;;  %2717 = vmatmul.bf16.vlgmr.msrb.gmra.mxu0 %v6838_v0  ;;  %2730 = vmatmul.bf16.vlgmr.msrb.gmra.mxu1 %v6838_v0 }
 0x4a7   :  { %v2542_v56 = vadd.f32 %v2541_v60, %v8235_v13  ;;  %2743 = vmatmul.bf16.vlgmr.msra.gmra.mxu2 %v6838_v0  ;;  %2756 = vmatmul.bf16.vlgmr.msra.gmra.mxu3 %v6838_v0 }
 0x4a8   :  { %2890 = vmatpush.bf16.msrb.mxu1 %v8088_v42  ;;  %2916 = vmatpush.bf16.msra.mxu3 %v8089_v10 }
 0x4a9   :  { %v2555_v1 = vadd.f32 %v6826_v45, %v2542_v56  ;;  %2877 = vmatpush.bf16.msrb.mxu0 %v8090_v18  ;;  %2903 = vmatpush.bf16.msra.mxu2 %v8091_v35 }
 0x4ab   :  { %v4609_v11 = vmul.f32 -1.442695, %v2555_v1 }
 0x4ac   :  { %v2567_v36 = vpop.f32.mrf.mxu2  ;;  %2891 = vmatpush.bf16.msrb.mxu1 %v8092_v41  ;;  %2917 = vmatpush.bf16.msra.mxu3 %v8093_v31 }
 0x4ad   :  { %5188 = vpow2.f32 %v4609_v11  ;;  %v2568_v22 = vadd.f32 %v2567_v36, %v8158_v24  ;;  %2878 = vmatpush.bf16.msrb.mxu0 %v8094_v5  ;;  %2904 = vmatpush.bf16.msra.mxu2 %v8095_v16 }
 0x4ae   :  { %v2543_v23 = vpop.f32.mrf.mxu0 }
 0x4af   :  { %v2581_v45 = vadd.f32 %v6830_v48, %v2568_v22 }
 0x4b0   :  { %2892 = vmatpush.bf16.msrb.mxu1 %v8096_v40  ;;  %2918 = vmatpush.bf16.msra.mxu3 %v8097_v53 }
 0x4b1   :  { %v4610_v63 = vmul.f32 -1.442695, %v2581_v45  ;;  %2879 = vmatpush.bf16.msrb.mxu0 %v8099_v34  ;;  %2905 = vmatpush.bf16.msra.mxu2 %v8100_v43 }
 0x4b3   :  { %v5189_v25 = vpop.eup %5188  ;;  %5190 = vpow2.f32 %v4610_v63 }
 0x4b4   :  { %v6860_v50 = vadd.f32 1.0, %v5189_v25  ;;  %v2569_v20 = vpop.f32.mrf.mxu2  ;;  %2893 = vmatpush.bf16.msrb.mxu1 %v8101_v4  ;;  %2919 = vmatpush.bf16.msra.mxu3 %v8161_v61 }
 0x4b5   :  { %2880 = vmatpush.bf16.msrb.mxu0 %v8162_v32  ;;  %2906 = vmatpush.bf16.msra.mxu2 %v8163_v38 }
 0x4b6   :  { %5192 = vrcp.f32 %v6860_v50  ;;  %v2593_v48 = vpop.f32.mrf.mxu0  ;;  %2846 = vmatmul.bf16.vlgmr.msra.gmra.mxu1 %v6838_v0  ;;  %v2659_v22 = vand.u32 2147483648, %v6860_v50  ;;  %vm2653_vm9 = vweird.f32 %v6860_v50  ;;  %v2657_v45 = vand.u32 2147483647, %v6860_v50 }
 0x4b7   :  { %v2594_v19 = vadd.f32 %v2593_v48, %v6230_v15  ;;  %2872 = vmatmul.bf16.vlgmr.msrb.gmra.mxu3 %v6838_v0 }
 0x4b8   :  { %2894 = vmatpush.bf16.msrb.mxu1 %v8105_v47  ;;  %2920 = vmatpush.bf16.msra.mxu3 %v8106_v28  ;;  %vm2658_vm13 = vcmp.eq.f32.partialorder %v2657_v45, 8.507059e+37  ;;  %v8396_v45 = vld [vmem:[#allocation30_spill] sm:$0xff] }
 0x4b9   :  { %v5191_v27 = vpop.eup %5190  ;;  %v2607_v54 = vadd.f32 %v2606_v7, %v2594_v19  ;;  %2881 = vmatpush.bf16.msrb.mxu0 %v8107_v44  ;;  %2907 = vmatpush.bf16.msra.mxu2 %v8108_v9 }
 0x4ba   :  { %v2646_v30 = vadd.f32 1.0, %v5191_v27  ;;  %v8389_v27 = vld [vmem:[#allocation145_spill] sm:$0xff] }
 0x4bb   :  { %v4611_v29 = vmul.f32 -1.442695, %v2607_v54  ;;  %v8390_v54 = vld [vmem:[#allocation26_spill] sm:$0xff] }
 0x4bc   :  { %v5193_v52 = vpop.eup %5192  ;;  %5194 = vrcp.f32 %v2646_v30  ;;  %v2619_v46 = vpop.f32.mrf.mxu2  ;;  %2895 = vmatpush.bf16.msrb.mxu1 %v8110_v51  ;;  %2921 = vmatpush.bf16.msra.mxu3 %v6110_v39  ;;  %v2674_v63 = vand.u32 2147483648, %v2646_v30  ;;  %v2672_v19 = vand.u32 2147483647, %v2646_v30  ;;  %vm2668_vm12 = vweird.f32 %v2646_v30 }
 0x4bd   :  { %v2649_v37 = vmul.f32 %v5193_v52, %v6860_v50  ;;  %5196 = vpow2.f32 %v4611_v29  ;;  %v2620_v6 = vadd.f32 %v2619_v46, %v6247_v17  ;;  %2882 = vmatpush.bf16.msrb.mxu0 %v8111_v2  ;;  %2908 = vmatpush.bf16.msra.mxu2 %v6108_v58  ;;  %vm2654_vm8 = vweird.f32 %v5193_v52  ;;  %v8391_v29 = vld [vmem:[#allocation40_spill] sm:$0xff] }
 0x4be   :  { %v2595_v7 = vpop.f32.mrf.mxu0  ;;  %vm6888_vm10 = vmor %vm2653_vm9, %vm2654_vm8  ;;  %v2660_v50 = vor.u32 1.1754944e-38, %v2659_v22  ;;  %vm2673_vm15 = vcmp.eq.f32.partialorder %v2672_v19, 8.507059e+37  ;;  %v8398_v19 = vld [vmem:[#allocation32_spill] sm:$0xff] }
 0x4bf   :  { %v2650_v14 = vsub.f32 1.0, %v2649_v37  ;;  %v2633_v55 = vadd.f32 %v6836_v26, %v2620_v6 }
 0x4c0   :  { %2896 = vmatpush.bf16.msrb.mxu1 %v6116_v33  ;;  %2922 = vmatpush.bf16.msra.mxu3 %v6122_v62 }
 0x4c1   :  { %v2651_v60 = vmul.f32 %v5193_v52, %v2650_v14  ;;  %2883 = vmatpush.bf16.msrb.mxu0 %v6114_v3  ;;  %2909 = vmatpush.bf16.msra.mxu2 %v6120_v57  ;;  %5198 = vtanh.f32 %v2633_v55 }
 0x4c2   :  { %v5195_v56 = vpop.eup %5194 }
 0x4c3   :  { %v5197_v8 = vpop.eup %5196  ;;  %v2664_v1 = vmul.f32 %v5195_v56, %v2646_v30  ;;  %v2652_v11 = vadd.f32 %v5193_v52, %v2651_v60  ;;  %vm2669_vm11 = vweird.f32 %v5195_v56  ;;  %v8392_v60 = vld [vmem:[#allocation28_spill] sm:$0xff]  ;;  %v8394_v30 = vld [vmem:[#allocation125_spill] sm:$0xff] }
 0x4c4   :  { %v2647_v36 = vadd.f32 1.0, %v5197_v8  ;;  %v2621_v23 = vpop.f32.mrf.mxu2  ;;  %2897 = vmatpush.bf16.msrb.mxu1 %v6128_v21  ;;  %2923 = vmatpush.bf16.msra.mxu3 %v6134_v49  ;;  %vm2670_vm14 = vmor %vm2668_vm12, %vm2669_vm11  ;;  %v8393_v8 = vld [vmem:[#allocation44_spill] sm:$0xff] }
 0x4c5   :  { %v2665_v26 = vsub.f32 1.0, %v2664_v1  ;;  %v2656_v48 = vsel %vm6888_vm10, %v5193_v52, %v2652_v11  ;;  %2884 = vmatpush.bf16.msrb.mxu0 %v8311_v12  ;;  %2910 = vmatpush.bf16.msra.mxu2 %v8389_v27  ;;  %v2675_v52 = vor.u32 1.1754944e-38, %v2674_v63  ;;  %v8397_v63 = vld [vmem:[#allocation46_spill] sm:$0xff] }
 0x4c6   :  { %5200 = vrcp.f32 %v2647_v36  ;;  %v2661_v6 = vsel %vm2658_vm13, %v2660_v50, %v2656_v48  ;;  %v2687_v25 = vand.u32 2147483647, %v2647_v36  ;;  %vm2683_vm1 = vweird.f32 %v2647_v36  ;;  %v8399_v50 = vld [vmem:[#allocation48_spill] sm:$0xff] }
 0x4c7   :  { %v2666_v20 = vmul.f32 %v5195_v56, %v2665_v26  ;;  %2898 = vmatmul.bf16.vlgmr.msrb.gmra.mxu1 %v6838_v0  ;;  %2924 = vmatmul.bf16.vlgmr.msra.gmra.mxu3 %v6838_v0  ;;  %v5199_v37 = vpop.eup %5198  ;;  %v2689_v0 = vand.u32 2147483648, %v2647_v36 }
 0x4c8   :  { %3015 = vmatpush.bf16.msra.mxu1 %v8390_v54  ;;  %3041 = vmatpush.bf16.msrb.mxu3 %v8391_v29  ;;  %v2695_v22 = vmul.f32 %v5199_v37, %v2661_v6  ;;  %vm2688_vm3 = vcmp.eq.f32.partialorder %v2687_v25, 8.507059e+37  ;;  %v8402_v6 = vld [vmem:[#allocation50_spill] sm:$0xff] }
 0x4c9   :  { %v2667_v46 = vadd.f32 %v5195_v56, %v2666_v20  ;;  %v2690_v48 = vor.u32 1.1754944e-38, %v2689_v0  ;;  %v8413_v0 = vld [vmem:[#allocation84_spill] sm:$0xff]  ;;  %v8417_v25 = vld [vmem:[#allocation90_spill] sm:$0xff] }
 0x4cb   :  { %v2671_v7 = vsel %vm2670_vm14, %v5195_v56, %v2667_v46 }
 0x4cc   :  { %v5201_v14 = vpop.eup %5200  ;;  %v2676_v55 = vsel %vm2673_vm15, %v2675_v52, %v2671_v7  ;;  %3016 = vmatpush.bf16.msra.mxu1 %v8392_v60  ;;  %3042 = vmatpush.bf16.msrb.mxu3 %v8393_v8  ;;  %v8401_v52 = vld [vmem:[#allocation34_spill] sm:$0xff]  ;;  %v8403_v7 = vld [vmem:[#allocation36_spill] sm:$0xff]  ;;  %v8405_v60 = vld [vmem:[#allocation25_spill] sm:$0xff] }
 0x4cd   :  { %v2679_v1 = vmul.f32 %v5201_v14, %v2647_v36  ;;  %v2694_v11 = vmul.f32 %v2676_v55, %v8394_v30  ;;  %vm2684_vm0 = vweird.f32 %v5201_v14  ;;  %v8404_v55 = vld [vmem:[#allocation53_spill] sm:$0xff]  ;;  %v8407_v8 = vld [vmem:[#allocation39_spill] sm:$0xff] }
 0x4ce   :  { %vm2685_vm2 = vmor %vm2683_vm1, %vm2684_vm0  ;;  %v8409_v30 = vld [vmem:[#allocation27_spill] sm:$0xff] }
 0x4cf   :  { %v2680_v23 = vsub.f32 1.0, %v2679_v1  ;;  %v6905_v26 = vadd.f32 %v2695_v22, %v2694_v11  ;;  %v8408_v1 = vld [vmem:[#allocation55_spill] sm:$0xff]  ;;  %v8410_v11 = vld [vmem:[#allocation42_spill] sm:$0xff] }
 0x4d0   :  { %3017 = vmatpush.bf16.msra.mxu1 %v8396_v45  ;;  %3043 = vmatpush.bf16.msrb.mxu3 %v8397_v63  ;;  %v8411_v22 = vld [vmem:[#allocation43_spill] sm:$0xff]  ;;  %v8415_v63 = vld [vmem:[#allocation29_spill] sm:$0xff] }
 0x4d1   :  { %8395 = vst [vmem:[#allocation124_spill] sm:$0xff] %v6905_v26  ;;  %v2681_v56 = vmul.f32 %v5201_v14, %v2680_v23  ;;  %5202 = vtanh.f32 %v6905_v26  ;;  %v8412_v23 = vld [vmem:[#allocation56_spill] sm:$0xff]  ;;  %v8414_v45 = vld [vmem:[#allocation87_spill] sm:$0xff] }
 0x4d3   :  { %v2682_v20 = vadd.f32 %v5201_v14, %v2681_v56  ;;  %v8416_v56 = vld [vmem:[#allocation45_spill] sm:$0xff] }
 0x4d4   :  { %3018 = vmatpush.bf16.msra.mxu1 %v8398_v19  ;;  %3044 = vmatpush.bf16.msrb.mxu3 %v8399_v50  ;;  %v8420_v19 = vld [vmem:[#allocation47_spill] sm:$0xff]  ;;  %v8421_v50 = vld [vmem:[#allocation94_spill] sm:$0xff] }
 0x4d5   :  { %v2686_v54 = vsel %vm2685_vm2, %v5201_v14, %v2682_v20  ;;  %v8406_v14 = vld [vmem:[#allocation38_spill] sm:$0xff]  ;;  %v8418_v20 = vld [vmem:[#allocation92_spill] sm:$0xff] }
 0x4d6   :  { %v2691_v29 = vsel %vm2688_vm3, %v2690_v48, %v2686_v54  ;;  %v8419_v48 = vld [vmem:[#allocation31_spill] sm:$0xff]  ;;  %v8422_v54 = vld [vmem:[#allocation96_spill] sm:$0xff] }
 0x4d7   :  { %v5203_v46 = vpop.eup %5202 }
 0x4d8   :  { %v6912_v37 = vmul.f32 %v5203_v46, %v2691_v29  ;;  %3019 = vmatpush.bf16.msra.mxu1 %v8401_v52  ;;  %3045 = vmatpush.bf16.msrb.mxu3 %v8402_v6  ;;  %v8423_v29 = vld [vmem:[#allocation33_spill] sm:$0xff]  ;;  %v8425_v52 = vld [vmem:[#allocation100_spill] sm:$0xff]  ;;  %v8426_v6 = vld [vmem:[#allocation102_spill] sm:$0xff] }
 0x4d9   :  { %v8424_v46 = vld [vmem:[#allocation49_spill] sm:$0xff] }
 0x4da   :  { %8400 = vst [vmem:[#allocation127_spill] sm:$0xff] %v6912_v37  ;;  %v2824_v36 = vpack.c.bf16 %v6912_v37, %v6912_v37  ;;  %v8450_v37 = vld [vmem:[#allocation105_spill] sm:$0xff] }
 0x4dc   :  { %2833 = vmatmul.bf16.vlgmr.msra.gmra.mxu0 %v2824_v36  ;;  %2859 = vmatmul.bf16.vlgmr.msrb.gmra.mxu2 %v2824_v36 }
 0x4dd   :  { %3020 = vmatpush.bf16.msra.mxu1 %v8403_v7  ;;  %3046 = vmatpush.bf16.msrb.mxu3 %v8404_v55  ;;  %v8427_v7 = vld [vmem:[#allocation35_spill] sm:$0xff] }
 0x4de   :  { %3002 = vmatpush.bf16.msra.mxu0 %v8405_v60  ;;  %3028 = vmatpush.bf16.msrb.mxu2 %v8406_v14  ;;  %v8428_v55 = vld [vmem:[#allocation51_spill] sm:$0xff]  ;;  %v8429_v60 = vld [vmem:[#allocation104_spill] sm:$0xff] }
 0x4df   :  { %v8430_v14 = vld [vmem:[#allocation107_spill] sm:$0xff] }
 0x4e1   :  { %3021 = vmatpush.bf16.msra.mxu1 %v8407_v8  ;;  %3047 = vmatpush.bf16.msrb.mxu3 %v8408_v1  ;;  %v8432_v8 = vld [vmem:[#allocation52_spill] sm:$0xff]  ;;  %v8433_v1 = vld [vmem:[#allocation110_spill] sm:$0xff] }
 0x4e2   :  { %3003 = vmatpush.bf16.msra.mxu0 %v8409_v30  ;;  %3029 = vmatpush.bf16.msrb.mxu2 %v8410_v11  ;;  %v8434_v30 = vld [vmem:[#allocation112_spill] sm:$0xff]  ;;  %v8435_v11 = vld [vmem:[#allocation41_spill] sm:$0xff] }
 0x4e5   :  { %3022 = vmatpush.bf16.msra.mxu1 %v8411_v22  ;;  %3048 = vmatpush.bf16.msrb.mxu3 %v8412_v23  ;;  %v8436_v22 = vld [vmem:[#allocation54_spill] sm:$0xff]  ;;  %v8437_v23 = vld [vmem:[#allocation83_spill] sm:$0xff] }
 0x4e6   :  { %3004 = vmatpush.bf16.msra.mxu0 %v8415_v63  ;;  %3030 = vmatpush.bf16.msrb.mxu2 %v8416_v56  ;;  %v8438_v63 = vld [vmem:[#allocation85_spill] sm:$0xff]  ;;  %v8439_v56 = vld [vmem:[#allocation114_spill] sm:$0xff] }
 0x4e9   :  { %3131 = vmatpush.bf16.msrb.mxu1 %v8413_v0  ;;  %3157 = vmatpush.bf16.msra.mxu3 %v8414_v45 }
 0x4ea   :  { %3005 = vmatpush.bf16.msra.mxu0 %v8419_v48  ;;  %3031 = vmatpush.bf16.msrb.mxu2 %v8420_v19  ;;  %v8440_v48 = vld [vmem:[#allocation116_spill] sm:$0xff]  ;;  %v8441_v19 = vld [vmem:[#allocation89_spill] sm:$0xff] }
 0x4ec   :  { %2885 = vmatmul.bf16.vlgmr.msrb.gmra.mxu0 %v2824_v36  ;;  %2911 = vmatmul.bf16.vlgmr.msra.gmra.mxu2 %v2824_v36  ;;  %v8431_v36 = vld [vmem:[#allocation37_spill] sm:$0xff] }
 0x4ed   :  { %3132 = vmatpush.bf16.msrb.mxu1 %v8417_v25  ;;  %3158 = vmatpush.bf16.msra.mxu3 %v8418_v20 }
 0x4ee   :  { %3006 = vmatpush.bf16.msra.mxu0 %v8423_v29  ;;  %3032 = vmatpush.bf16.msrb.mxu2 %v8424_v46  ;;  %v8442_v29 = vld [vmem:[#allocation91_spill] sm:$0xff]  ;;  %v8443_v46 = vld [vmem:[#allocation118_spill] sm:$0xff] }
 0x4f1   :  { %3133 = vmatpush.bf16.msrb.mxu1 %v8421_v50  ;;  %3159 = vmatpush.bf16.msra.mxu3 %v8422_v54 }
 0x4f2   :  { %3007 = vmatpush.bf16.msra.mxu0 %v8427_v7  ;;  %3033 = vmatpush.bf16.msrb.mxu2 %v8428_v55  ;;  %v8444_v7 = vld [vmem:[#allocation120_spill] sm:$0xff]  ;;  %v8445_v55 = vld [vmem:[#allocation93_spill] sm:$0xff] }
 0x4f5   :  { %3134 = vmatpush.bf16.msrb.mxu1 %v8425_v52  ;;  %3160 = vmatpush.bf16.msra.mxu3 %v8426_v6 }
 0x4f6   :  { %3008 = vmatpush.bf16.msra.mxu0 %v8431_v36  ;;  %3034 = vmatpush.bf16.msrb.mxu2 %v8432_v8  ;;  %v8446_v36 = vld [vmem:[#allocation95_spill] sm:$0xff] }
 0x4f7   :  { %v8447_v8 = vld [vmem:[#allocation99_spill] sm:$0xff] }
 0x4f9   :  { %3135 = vmatpush.bf16.msrb.mxu1 %v8429_v60  ;;  %3161 = vmatpush.bf16.msra.mxu3 %v8430_v14 }
 0x4fa   :  { %3009 = vmatpush.bf16.msra.mxu0 %v8435_v11  ;;  %3035 = vmatpush.bf16.msrb.mxu2 %v8436_v22  ;;  %v8448_v11 = vld [vmem:[#allocation101_spill] sm:$0xff]  ;;  %v8449_v22 = vld [vmem:[#allocation103_spill] sm:$0xff] }
 0x4fd   :  { %3136 = vmatpush.bf16.msrb.mxu1 %v8433_v1  ;;  %3162 = vmatpush.bf16.msra.mxu3 %v8434_v30  ;;  %v8459_v30 = vld [vmem:[#allocation97_spill] sm:$0xff] }
 0x4fe   :  { %3118 = vmatpush.bf16.msrb.mxu0 %v8437_v23  ;;  %3144 = vmatpush.bf16.msra.mxu2 %v8438_v63  ;;  %v8451_v63 = vld [vmem:[#allocation109_spill] sm:$0xff]  ;;  %v8454_v23 = vld [vmem:[#allocation115_spill] sm:$0xff] }
 0x501   :  { %3137 = vmatpush.bf16.msrb.mxu1 %v8439_v56  ;;  %3163 = vmatpush.bf16.msra.mxu3 %v8440_v48  ;;  %v8458_v48 = vld [vmem:[#allocation68_spill] sm:$0xff] }
 0x502   :  { %3119 = vmatpush.bf16.msrb.mxu0 %v8441_v19  ;;  %3145 = vmatpush.bf16.msra.mxu2 %v8442_v29  ;;  %v8452_v19 = vld [vmem:[#allocation111_spill] sm:$0xff]  ;;  %v8453_v29 = vld [vmem:[#allocation113_spill] sm:$0xff] }
 0x505   :  { %3138 = vmatpush.bf16.msrb.mxu1 %v8443_v46  ;;  %3164 = vmatpush.bf16.msra.mxu3 %v8444_v7  ;;  %v8455_v7 = vld [vmem:[#allocation117_spill] sm:$0xff]  ;;  %v8457_v46 = vld [vmem:[#allocation67_spill] sm:$0xff] }
 0x506   :  { %3120 = vmatpush.bf16.msrb.mxu0 %v8445_v55  ;;  %3146 = vmatpush.bf16.msra.mxu2 %v8446_v36  ;;  %v8456_v55 = vld [vmem:[#allocation119_spill] sm:$0xff] }
 0x50a   :  { %3121 = vmatpush.bf16.msrb.mxu0 %v8447_v8  ;;  %3147 = vmatpush.bf16.msra.mxu2 %v8448_v11 }
 0x50e   :  { %3122 = vmatpush.bf16.msrb.mxu0 %v8449_v22  ;;  %3148 = vmatpush.bf16.msra.mxu2 %v8450_v37 }
 0x512   :  { %3123 = vmatpush.bf16.msrb.mxu0 %v8451_v63  ;;  %3149 = vmatpush.bf16.msra.mxu2 %v8452_v19 }
 0x516   :  { %3124 = vmatpush.bf16.msrb.mxu0 %v8453_v29  ;;  %3150 = vmatpush.bf16.msra.mxu2 %v8454_v23 }
 0x51a   :  { %3125 = vmatpush.bf16.msrb.mxu0 %v8455_v7  ;;  %3151 = vmatpush.bf16.msra.mxu2 %v8456_v55 }
 0x523   :  { %v2718_v36 = vpop.f32.mrf.mxu0  ;;  %v2731_v8 = vpop.f32.mrf.mxu1 }
 0x524   :  { %v2719_v11 = vadd.f32 %v2718_v36, %v8457_v46  ;;  %v2732_v22 = vadd.f32 %v2731_v8, %v8458_v48 }
 0x526   :  { %v4612_v56 = vmul.f32 -1.442695, %v2719_v11  ;;  %v4613_v37 = vmul.f32 -1.442695, %v2732_v22  ;;  %v8460_v11 = vld [vmem:[#allocation98_spill] sm:$0xff] }
 0x528   :  { %5204 = vpow2.f32 %v4612_v56 }
 0x529   :  { %5206 = vpow2.f32 %v4613_v37 }
 0x52a   :  { %v2744_v63 = vpop.f32.mrf.mxu2  ;;  %v2757_v19 = vpop.f32.mrf.mxu3 }
 0x52b   :  { %v2745_v29 = vadd.f32 %v2744_v63, %v8459_v30  ;;  %v2720_v1 = vpop.f32.mrf.mxu0  ;;  %v2733_v23 = vpop.f32.mrf.mxu1  ;;  %v2758_v22 = vadd.f32 %v2757_v19, %v8460_v11 }
 0x52d   :  { %v4614_v14 = vmul.f32 -1.442695, %v2745_v29 }
 0x52e   :  { %v5205_v7 = vpop.eup %5204 }
 0x52f   :  { %v5207_v60 = vpop.eup %5206  ;;  %v2770_v55 = vadd.f32 1.0, %v5205_v7  ;;  %5208 = vpow2.f32 %v4614_v14 }
 0x530   :  { %v2771_v6 = vadd.f32 1.0, %v5207_v60 }
 0x531   :  { %5210 = vrcp.f32 %v2770_v55  ;;  %v2784_v60 = vand.u32 2147483648, %v2770_v55  ;;  %v2782_v52 = vand.u32 2147483647, %v2770_v55  ;;  %vm2778_vm6 = vweird.f32 %v2770_v55 }
 0x532   :  { %5212 = vrcp.f32 %v2771_v6  ;;  %v2746_v46 = vpop.f32.mrf.mxu2  ;;  %v2759_v48 = vpop.f32.mrf.mxu3  ;;  %vm2793_vm7 = vweird.f32 %v2771_v6 }
 0x533   :  { %v6975_v36 = vpop.f32.mrf.mxu1  ;;  %v2799_v46 = vand.u32 2147483648, %v2771_v6  ;;  %vm2783_vm10 = vcmp.eq.f32.partialorder %v2782_v52, 8.507059e+37 }
 0x535   :  { %v5209_v56 = vpop.eup %5208 }
 0x536   :  { %v2772_v37 = vadd.f32 1.0, %v5209_v56  ;;  %v2797_v56 = vand.u32 2147483647, %v2771_v6 }
 0x537   :  { %v5211_v8 = vpop.eup %5210 }
 0x538   :  { %v5213_v30 = vpop.eup %5212  ;;  %v2774_v1 = vmul.f32 %v5211_v8, %v2770_v55  ;;  %5214 = vrcp.f32 %v2772_v37  ;;  %vm2779_vm4 = vweird.f32 %v5211_v8  ;;  %vm2798_vm11 = vcmp.eq.f32.partialorder %v2797_v56, 8.507059e+37 }
 0x539   :  { %v2789_v23 = vmul.f32 %v5213_v30, %v2771_v6  ;;  %5216 = vtanh.f32 %v2758_v22  ;;  %vm2794_vm5 = vweird.f32 %v5213_v30  ;;  %vm2780_vm8 = vmor %vm2778_vm6, %vm2779_vm4  ;;  %vm2808_vm13 = vweird.f32 %v2772_v37 }
 0x53a   :  { %v2775_v63 = vsub.f32 1.0, %v2774_v1  ;;  %v6978_v29 = vpop.f32.mrf.mxu3  ;;  %v2785_v1 = vor.u32 1.1754944e-38, %v2784_v60  ;;  %vm2795_vm9 = vmor %vm2793_vm7, %vm2794_vm5  ;;  %v2814_v60 = vand.u32 2147483648, %v2772_v37  ;;  %v2812_v52 = vand.u32 2147483647, %v2772_v37 }
 0x53b   :  { %v2790_v14 = vsub.f32 1.0, %v2789_v23  ;;  %v2849_v7 = vpop.f32.mrf.mxu1  ;;  %v2800_v23 = vor.u32 1.1754944e-38, %v2799_v46 }
 0x53c   :  { %v2776_v48 = vmul.f32 %v5211_v8, %v2775_v63  ;;  %vm2813_vm15 = vcmp.eq.f32.partialorder %v2812_v52, 8.507059e+37 }
 0x53d   :  { %v2791_v26 = vmul.f32 %v5213_v30, %v2790_v14 }
 0x53e   :  { %v5215_v54 = vpop.eup %5214  ;;  %v2777_v19 = vadd.f32 %v5211_v8, %v2776_v48 }
 0x53f   :  { %v2804_v11 = vmul.f32 %v5215_v54, %v2772_v37  ;;  %v2792_v50 = vadd.f32 %v5213_v30, %v2791_v26  ;;  %v5217_v22 = vpop.eup %5216  ;;  %vm2809_vm12 = vweird.f32 %v5215_v54 }
 0x540   :  { %v2781_v20 = vsel %vm2780_vm8, %v5211_v8, %v2777_v19  ;;  %vm2810_vm14 = vmor %vm2808_vm13, %vm2809_vm12 }
 0x541   :  { %v2805_v7 = vsub.f32 1.0, %v2804_v11  ;;  %v2786_v63 = vsel %vm2783_vm10, %v2785_v1, %v2781_v20  ;;  %v2796_v25 = vsel %vm2795_vm9, %v5213_v30, %v2792_v50 }
 0x542   :  { %v2801_v14 = vsel %vm2798_vm11, %v2800_v23, %v2796_v25  ;;  %v2820_v45 = vmul.f32 %v5217_v22, %v2786_v63  ;;  %v2875_v0 = vpop.f32.mrf.mxu3  ;;  %v2815_v25 = vor.u32 1.1754944e-38, %v2814_v60 }
 0x543   :  { %v2806_v27 = vmul.f32 %v5215_v54, %v2805_v7  ;;  %v2819_v55 = vmul.f32 %v2801_v14, %v6833_v59 }
 0x544   :  { %v6981_v6 = vpop.f32.mrf.mxu1 }
 0x545   :  { %v6983_v48 = vadd.f32 %v2820_v45, %v2819_v55  ;;  %v2807_v26 = vadd.f32 %v5215_v54, %v2806_v27 }
 0x547   :  { %5218 = vtanh.f32 %v6983_v48  ;;  %v2811_v20 = vsel %vm2810_vm14, %v5215_v54, %v2807_v26 }
 0x548   :  { %v2816_v59 = vsel %vm2813_vm15, %v2815_v25, %v2811_v20 }
 0x54a   :  { %v6986_v50 = vpop.f32.mrf.mxu3 }
 0x54c   :  { %v2901_v0 = vpop.f32.mrf.mxu1 }
 0x54d   :  { %v5219_v8 = vpop.eup %5218 }
 0x54e   :  { %v2823_v30 = vmul.f32 %v5219_v8, %v2816_v59 }
 0x550   :  { %v6988_v46 = vpack.c.bf16 %v2823_v30, %v2823_v30 }
 0x552   :  { %v2927_v45 = vpop.f32.mrf.mxu3  ;;  %3010 = vmatmul.bf16.vlgmr.msra.gmra.mxu0 %v6988_v46  ;;  %3023 = vmatmul.bf16.vlgmr.msra.gmra.mxu1 %v6988_v46 }
 0x553   :  { %3036 = vmatmul.bf16.vlgmr.msrb.gmra.mxu2 %v6988_v46  ;;  %3049 = vmatmul.bf16.vlgmr.msrb.gmra.mxu3 %v6988_v46  ;;  %v8461_v45 = vld [vmem:[#allocation145_spill] sm:$0xff] }
 0x554   :  { %3183 = vmatpush.bf16.msra.mxu1 %v8088_v42  ;;  %3209 = vmatpush.bf16.msrb.mxu3 %v8089_v10 }
 0x555   :  { %3170 = vmatpush.bf16.msra.mxu0 %v8090_v18  ;;  %3196 = vmatpush.bf16.msrb.mxu2 %v8091_v35 }
 0x558   :  { %3184 = vmatpush.bf16.msra.mxu1 %v8092_v41  ;;  %3210 = vmatpush.bf16.msrb.mxu3 %v8093_v31 }
 0x559   :  { %v2834_v27 = vpop.f32.mrf.mxu0  ;;  %3171 = vmatpush.bf16.msra.mxu0 %v8094_v5  ;;  %3197 = vmatpush.bf16.msrb.mxu2 %v8095_v16 }
 0x55a   :  { %v2835_v54 = vadd.f32 %v2834_v27, %v8235_v13 }
 0x55c   :  { %v2848_v37 = vadd.f32 %v6975_v36, %v2835_v54  ;;  %3185 = vmatpush.bf16.msra.mxu1 %v8096_v40  ;;  %3211 = vmatpush.bf16.msrb.mxu3 %v8097_v53  ;;  %v8462_v54 = vld [vmem:[#allocation84_spill] sm:$0xff] }
 0x55d   :  { %3172 = vmatpush.bf16.msra.mxu0 %v8099_v34  ;;  %3198 = vmatpush.bf16.msrb.mxu2 %v8100_v43 }
 0x55e   :  { %v4615_v56 = vmul.f32 -1.442695, %v2848_v37  ;;  %v8463_v37 = vld [vmem:[#allocation87_spill] sm:$0xff] }
 0x55f   :  { %v2860_v19 = vpop.f32.mrf.mxu2 }
 0x560   :  { %5220 = vpow2.f32 %v4615_v56  ;;  %v2861_v11 = vadd.f32 %v2860_v19, %v8158_v24  ;;  %3186 = vmatpush.bf16.msra.mxu1 %v8101_v4  ;;  %3212 = vmatpush.bf16.msrb.mxu3 %v8161_v61 }
 0x561   :  { %v2836_v1 = vpop.f32.mrf.mxu0  ;;  %3173 = vmatpush.bf16.msra.mxu0 %v8162_v32  ;;  %3199 = vmatpush.bf16.msrb.mxu2 %v8163_v38 }
 0x562   :  { %v2874_v36 = vadd.f32 %v6978_v29, %v2861_v11  ;;  %3139 = vmatmul.bf16.vlgmr.msrb.gmra.mxu1 %v6988_v46 }
 0x563   :  { %3165 = vmatmul.bf16.vlgmr.msra.gmra.mxu3 %v6988_v46 }
 0x564   :  { %v4616_v23 = vmul.f32 -1.442695, %v2874_v36  ;;  %3187 = vmatpush.bf16.msra.mxu1 %v8105_v47  ;;  %3213 = vmatpush.bf16.msrb.mxu3 %v8106_v28 }
 0x565   :  { %3174 = vmatpush.bf16.msra.mxu0 %v8107_v44  ;;  %3200 = vmatpush.bf16.msrb.mxu2 %v8108_v9 }
 0x566   :  { %v5221_v22 = vpop.eup %5220  ;;  %5222 = vpow2.f32 %v4616_v23 }
 0x567   :  { %v2938_v7 = vadd.f32 1.0, %v5221_v22  ;;  %v2862_v63 = vpop.f32.mrf.mxu2 }
 0x568   :  { %3188 = vmatpush.bf16.msra.mxu1 %v8110_v51  ;;  %3214 = vmatpush.bf16.msrb.mxu3 %v6110_v39 }
 0x569   :  { %5224 = vrcp.f32 %v2938_v7  ;;  %v2886_v29 = vpop.f32.mrf.mxu0  ;;  %3175 = vmatpush.bf16.msra.mxu0 %v8111_v2  ;;  %3201 = vmatpush.bf16.msrb.mxu2 %v6108_v58  ;;  %vm2946_vm1 = vweird.f32 %v2938_v7  ;;  %v2950_v63 = vand.u32 2147483647, %v2938_v7 }
 0x56a   :  { %v2887_v14 = vadd.f32 %v2886_v29, %v6230_v15  ;;  %v8464_v29 = vld [vmem:[#allocation90_spill] sm:$0xff] }
 0x56b   :  { %vm2951_vm5 = vcmp.eq.f32.partialorder %v2950_v63, 8.507059e+37 }
 0x56c   :  { %v5223_v55 = vpop.eup %5222  ;;  %v2900_v26 = vadd.f32 %v6981_v6, %v2887_v14  ;;  %3189 = vmatpush.bf16.msra.mxu1 %v6116_v33  ;;  %3215 = vmatpush.bf16.msrb.mxu3 %v6122_v62  ;;  %v8465_v14 = vld [vmem:[#allocation92_spill] sm:$0xff] }
 0x56d   :  { %v2939_v60 = vadd.f32 1.0, %v5223_v55  ;;  %3176 = vmatpush.bf16.msra.mxu0 %v6114_v3  ;;  %3202 = vmatpush.bf16.msrb.mxu2 %v6120_v57 }
 0x56e   :  { %v4617_v52 = vmul.f32 -1.442695, %v2900_v26 }
 0x56f   :  { %v5225_v20 = vpop.eup %5224  ;;  %5226 = vrcp.f32 %v2939_v60  ;;  %v2912_v25 = vpop.f32.mrf.mxu2  ;;  %v2967_v55 = vand.u32 2147483648, %v2939_v60  ;;  %vm2961_vm4 = vweird.f32 %v2939_v60 }
 0x570   :  { %v2942_v0 = vmul.f32 %v5225_v20, %v2938_v7  ;;  %5228 = vpow2.f32 %v4617_v52  ;;  %v2913_v8 = vadd.f32 %v2912_v25, %v6247_v17  ;;  %3190 = vmatpush.bf16.msra.mxu1 %v6128_v21  ;;  %3216 = vmatpush.bf16.msrb.mxu3 %v6134_v49  ;;  %vm2947_vm0 = vweird.f32 %v5225_v20 }
 0x571   :  { %v2888_v59 = vpop.f32.mrf.mxu0  ;;  %3177 = vmatpush.bf16.msra.mxu0 %v8311_v12  ;;  %3203 = vmatpush.bf16.msrb.mxu2 %v8461_v45  ;;  %vm2948_vm2 = vmor %vm2946_vm1, %vm2947_vm0  ;;  %v2965_v52 = vand.u32 2147483647, %v2939_v60 }
 0x572   :  { %v2943_v30 = vsub.f32 1.0, %v2942_v0  ;;  %v2926_v6 = vadd.f32 %v6986_v50, %v2913_v8  ;;  %v2952_v50 = vand.u32 2147483648, %v2938_v7  ;;  %v8466_v8 = vld [vmem:[#allocation94_spill] sm:$0xff]  ;;  %v8467_v59 = vld [vmem:[#allocation96_spill] sm:$0xff] }
 0x573   :  { %3191 = vmatmul.bf16.vlgmr.msra.gmra.mxu1 %v6988_v46  ;;  %3217 = vmatmul.bf16.vlgmr.msrb.gmra.mxu3 %v6988_v46  ;;  %vm2966_vm7 = vcmp.eq.f32.partialorder %v2965_v52, 8.507059e+37 }
 0x574   :  { %v2944_v27 = vmul.f32 %v5225_v20, %v2943_v30  ;;  %3302 = vmatpush.bf16.msrb.mxu1 %v8462_v54  ;;  %3328 = vmatpush.bf16.msra.mxu3 %v8463_v37  ;;  %5230 = vtanh.f32 %v2926_v6  ;;  %v2953_v25 = vor.u32 1.1754944e-38, %v2952_v50  ;;  %v2968_v30 = vor.u32 1.1754944e-38, %v2967_v55  ;;  %v8469_v50 = vld [vmem:[#allocation100_spill] sm:$0xff]  ;;  %v8472_v55 = vld [vmem:[#allocation107_spill] sm:$0xff] }
 0x575   :  { %v5227_v56 = vpop.eup %5226 }
 0x576   :  { %v5229_v19 = vpop.eup %5228  ;;  %v2957_v11 = vmul.f32 %v5227_v56, %v2939_v60  ;;  %v2945_v1 = vadd.f32 %v5225_v20, %v2944_v27  ;;  %vm2962_vm3 = vweird.f32 %v5227_v56  ;;  %v8470_v60 = vld [vmem:[#allocation102_spill] sm:$0xff] }
 0x577   :  { %v2940_v36 = vadd.f32 1.0, %v5229_v19  ;;  %v2914_v23 = vpop.f32.mrf.mxu2  ;;  %vm2963_vm6 = vmor %vm2961_vm4, %vm2962_vm3 }
 0x578   :  { %v2958_v22 = vsub.f32 1.0, %v2957_v11  ;;  %3303 = vmatpush.bf16.msrb.mxu1 %v8464_v29  ;;  %3329 = vmatpush.bf16.msra.mxu3 %v8465_v14  ;;  %v2949_v46 = vsel %vm2948_vm2, %v5225_v20, %v2945_v1  ;;  %v8468_v11 = vld [vmem:[#allocation124_spill] sm:$0xff] }
 0x579   :  { %5232 = vrcp.f32 %v2940_v36  ;;  %v2954_v6 = vsel %vm2951_vm5, %v2953_v25, %v2949_v46  ;;  %v2982_v63 = vand.u32 2147483648, %v2940_v36  ;;  %v8471_v14 = vld [vmem:[#allocation104_spill] sm:$0xff]  ;;  %vm2976_vm9 = vweird.f32 %v2940_v36  ;;  %v8473_v25 = vld [vmem:[#allocation110_spill] sm:$0xff] }
 0x57a   :  { %v2959_v26 = vmul.f32 %v5227_v56, %v2958_v22  ;;  %v5231_v7 = vpop.eup %5230 }
 0x57b   :  { %v2988_v1 = vmul.f32 %v5231_v7, %v2954_v6  ;;  %v2983_v46 = vor.u32 1.1754944e-38, %v2982_v63  ;;  %v8476_v6 = vld [vmem:[#allocation116_spill] sm:$0xff] }
 0x57c   :  { %v2960_v0 = vadd.f32 %v5227_v56, %v2959_v26  ;;  %3304 = vmatpush.bf16.msrb.mxu1 %v8466_v8  ;;  %3330 = vmatpush.bf16.msra.mxu3 %v8467_v59 }
 0x57e   :  { %v2964_v27 = vsel %vm2963_vm6, %v5227_v56, %v2960_v0  ;;  %v2980_v56 = vand.u32 2147483647, %v2940_v36  ;;  %v8474_v0 = vld [vmem:[#allocation112_spill] sm:$0xff] }
 0x57f   :  { %v5233_v54 = vpop.eup %5232  ;;  %v2969_v37 = vsel %vm2966_vm7, %v2968_v30, %v2964_v27  ;;  %v8475_v30 = vld [vmem:[#allocation114_spill] sm:$0xff] }
 0x580   :  { %v2972_v19 = vmul.f32 %v5233_v54, %v2940_v36  ;;  %v2987_v20 = vmul.f32 %v2969_v37, %v8468_v11  ;;  %3305 = vmatpush.bf16.msrb.mxu1 %v8469_v50  ;;  %3331 = vmatpush.bf16.msra.mxu3 %v8470_v60  ;;  %vm2977_vm8 = vweird.f32 %v5233_v54  ;;  %vm2981_vm11 = vcmp.eq.f32.partialorder %v2980_v56, 8.507059e+37  ;;  %v8477_v27 = vld [vmem:[#allocation118_spill] sm:$0xff]  ;;  %v8479_v37 = vld [vmem:[#allocation83_spill] sm:$0xff]  ;;  %v8481_v11 = vld [vmem:[#allocation89_spill] sm:$0xff] }
 0x581   :  { %vm2978_vm10 = vmor %vm2976_vm9, %vm2977_vm8 }
 0x582   :  { %v2973_v23 = vsub.f32 1.0, %v2972_v19  ;;  %v7047_v22 = vadd.f32 %v2988_v1, %v2987_v20  ;;  %v8480_v19 = vld [vmem:[#allocation85_spill] sm:$0xff]  ;;  %v8482_v20 = vld [vmem:[#allocation91_spill] sm:$0xff] }
 0x583   :  { %v8483_v1 = vld [vmem:[#allocation93_spill] sm:$0xff] }
 0x584   :  { %v2974_v29 = vmul.f32 %v5233_v54, %v2973_v23  ;;  %5234 = vtanh.f32 %v7047_v22  ;;  %3306 = vmatpush.bf16.msrb.mxu1 %v8471_v14  ;;  %3332 = vmatpush.bf16.msra.mxu3 %v8472_v55 }
 0x586   :  { %v2975_v26 = vadd.f32 %v5233_v54, %v2974_v29 }
 0x588   :  { %v2979_v52 = vsel %vm2978_vm10, %v5233_v54, %v2975_v26  ;;  %3307 = vmatpush.bf16.msrb.mxu1 %v8473_v25  ;;  %3333 = vmatpush.bf16.msra.mxu3 %v8474_v0  ;;  %v8478_v54 = vld [vmem:[#allocation120_spill] sm:$0xff] }
 0x589   :  { %v2984_v8 = vsel %vm2981_vm11, %v2983_v46, %v2979_v52  ;;  %v8501_v26 = vld [vmem:[#allocation76_spill] sm:$0xff] }
 0x58a   :  { %v5235_v59 = vpop.eup %5234  ;;  %v8502_v46 = vld [vmem:[#allocation108_spill] sm:$0xff] }
 0x58b   :  { %v7054_v7 = vmul.f32 %v5235_v59, %v2984_v8  ;;  %v588_v52 = vadd.f32 %v8502_v46, %v8501_v26  ;;  %v4783_v26 = vld [vmem:[%s7722_s8 + $0x140] sm:$0xf0] }
 0x58c   :  { %3308 = vmatpush.bf16.msrb.mxu1 %v8475_v30  ;;  %3334 = vmatpush.bf16.msra.mxu3 %v8476_v6 }
 0x58d   :  { %v3117_v36 = vpack.c.bf16 %v7054_v7, %v7054_v7 }
 0x58f   :  { %3126 = vmatmul.bf16.vlgmr.msrb.gmra.mxu0 %v3117_v36  ;;  %3152 = vmatmul.bf16.vlgmr.msra.gmra.mxu2 %v3117_v36 }
 0x590   :  { %3309 = vmatpush.bf16.msrb.mxu1 %v8477_v27  ;;  %3335 = vmatpush.bf16.msra.mxu3 %v8478_v54 }
 0x591   :  { %3289 = vmatpush.bf16.msrb.mxu0 %v8479_v37  ;;  %3315 = vmatpush.bf16.msra.mxu2 %v8480_v19 }
 0x594   :  { %3354 = vmatpush.bf16.msra.mxu1 %v8088_v42  ;;  %3380 = vmatpush.bf16.msrb.mxu3 %v8089_v10  ;;  %v8484_v42 = vld [vmem:[#allocation95_spill] sm:$0xff] }
 0x595   :  { %3290 = vmatpush.bf16.msrb.mxu0 %v8481_v11  ;;  %3316 = vmatpush.bf16.msra.mxu2 %v8482_v20  ;;  %v8485_v10 = vld [vmem:[#allocation99_spill] sm:$0xff] }
 0x598   :  { %3355 = vmatpush.bf16.msra.mxu1 %v8092_v41  ;;  %3381 = vmatpush.bf16.msrb.mxu3 %v8093_v31  ;;  %v8486_v41 = vld [vmem:[#allocation101_spill] sm:$0xff]  ;;  %v8487_v31 = vld [vmem:[#allocation103_spill] sm:$0xff] }
 0x599   :  { %3291 = vmatpush.bf16.msrb.mxu0 %v8483_v1  ;;  %3317 = vmatpush.bf16.msra.mxu2 %v8484_v42 }
 0x59c   :  { %3356 = vmatpush.bf16.msra.mxu1 %v8096_v40  ;;  %3382 = vmatpush.bf16.msrb.mxu3 %v8097_v53  ;;  %v8488_v40 = vld [vmem:[#allocation105_spill] sm:$0xff] }
 0x59d   :  { %3292 = vmatpush.bf16.msrb.mxu0 %v8485_v10  ;;  %3318 = vmatpush.bf16.msra.mxu2 %v8486_v41  ;;  %v8489_v53 = vld [vmem:[#allocation109_spill] sm:$0xff] }
 0x59f   :  { %3178 = vmatmul.bf16.vlgmr.msra.gmra.mxu0 %v3117_v36  ;;  %3204 = vmatmul.bf16.vlgmr.msrb.gmra.mxu2 %v3117_v36 }
 0x5a0   :  { %3357 = vmatpush.bf16.msra.mxu1 %v8101_v4  ;;  %3383 = vmatpush.bf16.msrb.mxu3 %v8161_v61  ;;  %v8490_v4 = vld [vmem:[#allocation111_spill] sm:$0xff]  ;;  %v8491_v61 = vld [vmem:[#allocation113_spill] sm:$0xff] }
 0x5a1   :  { %3293 = vmatpush.bf16.msrb.mxu0 %v8487_v31  ;;  %3319 = vmatpush.bf16.msra.mxu2 %v8488_v40 }
 0x5a4   :  { %3358 = vmatpush.bf16.msra.mxu1 %v8105_v47  ;;  %3384 = vmatpush.bf16.msrb.mxu3 %v8106_v28  ;;  %v8492_v47 = vld [vmem:[#allocation115_spill] sm:$0xff]  ;;  %v8493_v28 = vld [vmem:[#allocation117_spill] sm:$0xff] }
 0x5a5   :  { %3294 = vmatpush.bf16.msrb.mxu0 %v8489_v53  ;;  %3320 = vmatpush.bf16.msra.mxu2 %v8490_v4 }
 0x5a8   :  { %3359 = vmatpush.bf16.msra.mxu1 %v8110_v51  ;;  %3385 = vmatpush.bf16.msrb.mxu3 %v6110_v39  ;;  %v8494_v51 = vld [vmem:[#allocation119_spill] sm:$0xff]  ;;  %v8495_v39 = vld [vmem:[#allocation57_spill] sm:$0xff] }
 0x5a9   :  { %3295 = vmatpush.bf16.msrb.mxu0 %v8491_v61  ;;  %3321 = vmatpush.bf16.msra.mxu2 %v8492_v47 }
 0x5ac   :  { %3360 = vmatpush.bf16.msra.mxu1 %v6116_v33  ;;  %3386 = vmatpush.bf16.msrb.mxu3 %v6122_v62  ;;  %v8496_v33 = vld [vmem:[#allocation71_spill] sm:$0xff] }
 0x5ad   :  { %3296 = vmatpush.bf16.msrb.mxu0 %v8493_v28  ;;  %3322 = vmatpush.bf16.msra.mxu2 %v8494_v51  ;;  %v501_v62 = vadd.f32 %v8496_v33, %v8495_v39 }
 0x5b0   :  { %3361 = vmatpush.bf16.msra.mxu1 %v6128_v21  ;;  %3387 = vmatpush.bf16.msrb.mxu3 %v6134_v49  ;;  %v8497_v21 = vld [vmem:[#allocation58_spill] sm:$0xff]  ;;  %v8498_v49 = vld [vmem:[#allocation72_spill] sm:$0xff] }
 0x5b1   :  { %3341 = vmatpush.bf16.msra.mxu0 %v8090_v18  ;;  %3367 = vmatpush.bf16.msrb.mxu2 %v8091_v35  ;;  %v530_v18 = vadd.f32 %v8498_v49, %v8497_v21 }
 0x5b5   :  { %3342 = vmatpush.bf16.msra.mxu0 %v8094_v5  ;;  %3368 = vmatpush.bf16.msrb.mxu2 %v8095_v16 }
 0x5b9   :  { %3343 = vmatpush.bf16.msra.mxu0 %v8099_v34  ;;  %3369 = vmatpush.bf16.msrb.mxu2 %v8100_v43 }
 0x5bd   :  { %3344 = vmatpush.bf16.msra.mxu0 %v8162_v32  ;;  %3370 = vmatpush.bf16.msrb.mxu2 %v8163_v38 }
 0x5c1   :  { %3345 = vmatpush.bf16.msra.mxu0 %v8107_v44  ;;  %3371 = vmatpush.bf16.msrb.mxu2 %v8108_v9  ;;  %v8500_v9 = vld [vmem:[#allocation106_spill] sm:$0xff] }
 0x5c5   :  { %3346 = vmatpush.bf16.msra.mxu0 %v8111_v2  ;;  %3372 = vmatpush.bf16.msrb.mxu2 %v6108_v58 }
 0x5c9   :  { %3347 = vmatpush.bf16.msra.mxu0 %v6114_v3  ;;  %3373 = vmatpush.bf16.msrb.mxu2 %v6120_v57  ;;  %v8499_v3 = vld [vmem:[#allocation75_spill] sm:$0xff] }
 0x5ca   :  { %v559_v57 = vadd.f32 %v8500_v9, %v8499_v3 }
 0x5cd   :  { %3348 = vmatpush.bf16.msra.mxu0 %v8311_v12  ;;  %3374 = vmatpush.bf16.msrb.mxu2 %v8461_v45 }
 0x5cf   :  { %v3011_v35 = vpop.f32.mrf.mxu0  ;;  %v3024_v5 = vpop.f32.mrf.mxu1 }
 0x5d0   :  { %v3012_v16 = vadd.f32 %v3011_v35, %v501_v62  ;;  %v3025_v34 = vadd.f32 %v3024_v5, %v530_v18 }
 0x5d2   :  { %v4618_v43 = vmul.f32 -1.442695, %v3012_v16  ;;  %v4619_v58 = vmul.f32 -1.442695, %v3025_v34 }
 0x5d4   :  { %5236 = vpow2.f32 %v4618_v43 }
 0x5d5   :  { %5238 = vpow2.f32 %v4619_v58 }
 0x5d6   :  { %v3037_v44 = vpop.f32.mrf.mxu2  ;;  %v3050_v2 = vpop.f32.mrf.mxu3 }
 0x5d7   :  { %v3038_v32 = vadd.f32 %v3037_v44, %v559_v57  ;;  %v3013_v38 = vpop.f32.mrf.mxu0  ;;  %v3026_v12 = vpop.f32.mrf.mxu1  ;;  %v3051_v8 = vadd.f32 %v3050_v2, %v588_v52  ;;  %v4993_v44 = vld [vmem:[%s7722_s8 + $0x154] sm:$0xf] }
 0x5d8   :  { %v4807_v38 = vld [vmem:[%s7722_s8 + $0x170] sm:$0xf0] }
 0x5d9   :  { %v4620_v45 = vmul.f32 -1.442695, %v3038_v32  ;;  %v4994_v32 = vld [vmem:[%s7722_s8 + $0x15c] sm:$0xf] }
 0x5da   :  { %v5237_v50 = vpop.eup %5236 }
 0x5db   :  { %v5239_v60 = vpop.eup %5238  ;;  %v3063_v23 = vadd.f32 1.0, %v5237_v50  ;;  %5240 = vpow2.f32 %v4620_v45 }
 0x5dc   :  { %v3064_v63 = vadd.f32 1.0, %v5239_v60 }
 0x5dd   :  { %5242 = vrcp.f32 %v3063_v23  ;;  %v3077_v37 = vand.u32 2147483648, %v3063_v23  ;;  %v3075_v1 = vand.u32 2147483647, %v3063_v23  ;;  %vm3071_vm14 = vweird.f32 %v3063_v23 }
 0x5de   :  { %5244 = vrcp.f32 %v3064_v63  ;;  %v3039_v29 = vpop.f32.mrf.mxu2  ;;  %v3052_v56 = vpop.f32.mrf.mxu3  ;;  %v3092_v11 = vand.u32 2147483648, %v3064_v63  ;;  %v3090_v10 = vand.u32 2147483647, %v3064_v63  ;;  %vm3086_vm15 = vweird.f32 %v3064_v63 }
 0x5df   :  { %v7116_v14 = vpop.f32.mrf.mxu1  ;;  %v3078_v53 = vor.u32 1.1754944e-38, %v3077_v37  ;;  %vm3076_vm2 = vcmp.eq.f32.partialorder %v3075_v1, 8.507059e+37  ;;  %v4775_v29 = vld [vmem:[%s7722_s8 + $0x138] sm:$0xf0] }
 0x5e0   :  { %v3093_v61 = vor.u32 1.1754944e-38, %v3092_v11  ;;  %vm3091_vm3 = vcmp.eq.f32.partialorder %v3090_v10, 8.507059e+37  ;;  %v4727_v37 = vld [vmem:[%s7722_s8 + $0xd8] sm:$0xf0]  ;;  %v4735_v11 = vld [vmem:[%s7722_s8 + $0xe0] sm:$0xf0] }
 0x5e1   :  { %v5241_v55 = vpop.eup %5240  ;;  %v4703_v10 = vld [vmem:[%s7722_s8 + $0xa8] sm:$0xf0] }
 0x5e2   :  { %v3065_v25 = vadd.f32 1.0, %v5241_v55  ;;  %v4988_v55 = vld [vmem:[%s7722_s8 + $0x12c] sm:$0xf] }
 0x5e3   :  { %v5243_v0 = vpop.eup %5242 }
 0x5e4   :  { %v5245_v59 = vpop.eup %5244  ;;  %v3067_v30 = vmul.f32 %v5243_v0, %v3063_v23  ;;  %5246 = vrcp.f32 %v3065_v25  ;;  %vm3072_vm12 = vweird.f32 %v5243_v0  ;;  %v3107_v43 = vand.u32 2147483648, %v3065_v25 }
 0x5e5   :  { %v3082_v6 = vmul.f32 %v5245_v59, %v3064_v63  ;;  %5248 = vtanh.f32 %v3051_v8  ;;  %vm3087_vm13 = vweird.f32 %v5245_v59  ;;  %vm3073_vm0 = vmor %vm3071_vm14, %vm3072_vm12  ;;  %vm3101_vm5 = vweird.f32 %v3065_v25  ;;  %v4987_v63 = vld [vmem:[%s7722_s8 + $0x124] sm:$0xf]  ;;  %v4751_v8 = vld [vmem:[%s7722_s8 + $0x108] sm:$0xf0] }
 0x5e6   :  { %v3068_v36 = vsub.f32 1.0, %v3067_v30  ;;  %v7120_v27 = vpop.f32.mrf.mxu3  ;;  %vm3088_vm1 = vmor %vm3086_vm15, %vm3087_vm13  ;;  %v3105_v58 = vand.u32 2147483647, %v3065_v25  ;;  %v3108_v57 = vor.u32 1.1754944e-38, %v3107_v43  ;;  %v4810_v23 = vor.u32 %v4994_v32, %v4807_v38  ;;  %v4759_v30 = vld [vmem:[%s7722_s8 + $0x110] sm:$0xf0] }
 0x5e7   :  { %v3083_v54 = vsub.f32 1.0, %v3082_v6  ;;  %v3142_v19 = vpop.f32.mrf.mxu1  ;;  %v4778_v52 = vor.u32 %v4987_v63, %v4775_v29  ;;  %v4952_v32 = vld [vmem:[%s7722_s8 + $0xc] sm:$0xf]  ;;  %v4639_v38 = vld [vmem:[%s7722_s8 + $0x20] sm:$0xf0] }
 0x5e8   :  { %v3069_v20 = vmul.f32 %v5243_v0, %v3068_v36  ;;  %vm3106_vm7 = vcmp.eq.f32.partialorder %v3105_v58, 8.507059e+37  ;;  %v4976_v19 = vld [vmem:[%s7722_s8 + $0xcc] sm:$0xf] }
 0x5e9   :  { %v3084_v42 = vmul.f32 %v5245_v59, %v3083_v54  ;;  %v4975_v54 = vld [vmem:[%s7722_s8 + $0xc4] sm:$0xf]  ;;  %v4738_v1 = vor.u32 %v4976_v19, %v4735_v11 }
 0x5ea   :  { %v5247_v41 = vpop.eup %5246  ;;  %v3070_v31 = vadd.f32 %v5243_v0, %v3069_v20  ;;  %v4730_v20 = vor.u32 %v4975_v54, %v4727_v37 }
 0x5eb   :  { %v3097_v40 = vmul.f32 %v5247_v41, %v3065_v25  ;;  %v3085_v4 = vadd.f32 %v5245_v59, %v3084_v42  ;;  %v5249_v28 = vpop.eup %5248  ;;  %vm3102_vm4 = vweird.f32 %v5247_v41  ;;  %v4786_v25 = vor.u32 %v4988_v55, %v4783_v26  ;;  %v4969_v42 = vld [vmem:[%s7722_s8 + $0x94] sm:$0xf]  ;;  %v8504_v55 = vld [vmem:[#allocation121_spill] sm:$0xff] }
 0x5ec   :  { %v3074_v47 = vsel %vm3073_vm0, %v5243_v0, %v3070_v31  ;;  %vm3103_vm6 = vmor %vm3101_vm5, %vm3102_vm4  ;;  %v4981_v0 = vld [vmem:[%s7722_s8 + $0xf4] sm:$0xf] }
 0x5ed   :  { %v3098_v51 = vsub.f32 1.0, %v3097_v40  ;;  %v3079_v39 = vsel %vm3076_vm2, %v3078_v53, %v3074_v47  ;;  %v3089_v33 = vsel %vm3088_vm1, %v5245_v59, %v3085_v4  ;;  %v4982_v59 = vld [vmem:[%s7722_s8 + $0xfc] sm:$0xf]  ;;  %v4754_v6 = vor.u32 %v4981_v0, %v4751_v8  ;;  %v4711_v31 = vld [vmem:[%s7722_s8 + $0xb0] sm:$0xf0] }
 0x5ee   :  { %v3094_v62 = vsel %vm3091_vm3, %v3093_v61, %v3089_v33  ;;  %v3113_v21 = vmul.f32 %v5249_v28, %v3079_v39  ;;  %v3168_v49 = vpop.f32.mrf.mxu3  ;;  %v4762_v36 = vor.u32 %v4982_v59, %v4759_v30  ;;  %v4706_v53 = vor.u32 %v4969_v42, %v4703_v10  ;;  %v4963_v47 = vld [vmem:[%s7722_s8 + $0x64] sm:$0xf]  ;;  %v4679_v28 = vld [vmem:[%s7722_s8 + $0x78] sm:$0xf0] }
 0x5ef   :  { %v3099_v18 = vmul.f32 %v5247_v41, %v3098_v51  ;;  %v3112_v35 = vmul.f32 %v3094_v62, %v6983_v48  ;;  %v4799_v48 = vld [vmem:[%s7722_s8 + $0x168] sm:$0xf0]  ;;  %v4687_v39 = vld [vmem:[%s7722_s8 + $0x80] sm:$0xf0] }
 0x5f0   :  { %v7123_v5 = vpop.f32.mrf.mxu1  ;;  %v4802_v60 = vor.u32 %v4993_v44, %v4799_v48  ;;  %v4964_v51 = vld [vmem:[%s7722_s8 + $0x6c] sm:$0xf]  ;;  %v4951_v48 = vld [vmem:[%s7722_s8 + $0x4] sm:$0xf] }
 0x5f1   :  { %v3114_v16 = vadd.f32 %v3113_v21, %v3112_v35  ;;  %v3100_v34 = vadd.f32 %v5247_v41, %v3099_v18  ;;  %v4682_v21 = vor.u32 %v4963_v47, %v4679_v28  ;;  %v4690_v49 = vor.u32 %v4964_v51, %v4687_v39  ;;  %v4957_v18 = vld [vmem:[%s7722_s8 + $0x34] sm:$0xf]  ;;  %v8506_v28 = vld [vmem:[#allocation122_spill] sm:$0xff] }
 0x5f2   :  { %v8505_v47 = vld [vmem:[#allocation123_spill] sm:$0xff] }
 0x5f3   :  { %5250 = vtanh.f32 %v3114_v16  ;;  %3996 = vst [vmem:[#allocation17] sm:$0xff] %v3114_v16  ;;  %v3104_v9 = vsel %vm3103_vm6, %v5247_v41, %v3100_v34  ;;  %v4970_v41 = vld [vmem:[%s7722_s8 + $0x9c] sm:$0xf]  ;;  %v4655_v16 = vld [vmem:[%s7722_s8 + $0x48] sm:$0xf0]  ;;  %v7239_v51 = vpack.c.bf16 %v8506_v28, %v8505_v47 }
 0x5f4   :  { %v3109_v45 = vsel %vm3106_vm7, %v3108_v57, %v3104_v9  ;;  %v4714_v4 = vor.u32 %v4970_v41, %v4711_v31  ;;  %v4663_v34 = vld [vmem:[%s7722_s8 + $0x50] sm:$0xf0]  ;;  %v4658_v57 = vor.u32 %v4957_v18, %v4655_v16  ;;  %v4966_v47 = vld [vmem:[%s7722_s8 + $0x74] sm:$0xf0]  ;;  %v4685_v28 = vld [vmem:[%s7722_s8 + $0x68] sm:$0xf] }
 0x5f6   :  { %v7125_v3 = vpop.f32.mrf.mxu3 }
 0x5f8   :  { %v3194_v2 = vpop.f32.mrf.mxu1 }
 0x5f9   :  { %v5251_v12 = vpop.eup %5250  ;;  %v4631_v2 = vld [vmem:[%s7722_s8 + $0x18] sm:$0xf0] }
 0x5fa   :  { %v3116_v50 = vmul.f32 %v5251_v12, %v3109_v45  ;;  %v4634_v45 = vor.u32 %v4951_v48, %v4631_v2 }
 0x5fc   :  { %v3288_v56 = vpack.c.bf16 %v3116_v50, %v3116_v50  ;;  %3993 = vst [vmem:[#allocation16] sm:$0xff] %v3116_v50  ;;  %v4642_v50 = vor.u32 %v4952_v32, %v4639_v38 }
 0x5fe   :  { %v3220_v46 = vpop.f32.mrf.mxu3  ;;  %3310 = vmatmul.bf16.vlgmr.msrb.gmra.mxu1 %v3288_v56  ;;  %3336 = vmatmul.bf16.vlgmr.msra.gmra.mxu3 %v3288_v56 }
 0x5ff   :  { %3800 = vmatpush.bf16.msrb.mxu1 %v4802_v60  ;;  %3858 = vmatpush.bf16.msra.mxu3 %v4810_v23 }
 0x603   :  { %3801 = vmatpush.bf16.msrb.mxu1 %v4778_v52  ;;  %3859 = vmatpush.bf16.msra.mxu3 %v4786_v25 }
 0x607   :  { %3802 = vmatpush.bf16.msrb.mxu1 %v4754_v6  ;;  %3860 = vmatpush.bf16.msra.mxu3 %v4762_v36 }
 0x60b   :  { %3803 = vmatpush.bf16.msrb.mxu1 %v4730_v20  ;;  %3861 = vmatpush.bf16.msra.mxu3 %v4738_v1 }
 0x60c   :  { %v3127_v40 = vpop.f32.mrf.mxu0 }
 0x60d   :  { %v3128_v61 = vadd.f32 %v3127_v40, %v8235_v13 }
 0x60e   :  { %3362 = vmatmul.bf16.vlgmr.msra.gmra.mxu1 %v3288_v56  ;;  %3388 = vmatmul.bf16.vlgmr.msrb.gmra.mxu3 %v3288_v56  ;;  %v8503_v56 = vld [vmem:[#allocation74_spill] sm:$0xff] }
 0x60f   :  { %v3141_v33 = vadd.f32 %v7116_v14, %v3128_v61  ;;  %3804 = vmatpush.bf16.msrb.mxu1 %v4706_v53  ;;  %3862 = vmatpush.bf16.msra.mxu3 %v4714_v4  ;;  %v4958_v14 = vld [vmem:[%s7722_s8 + $0x3c] sm:$0xf]  ;;  %v7230_v26 = vpack.c.bf16 %v8504_v55, %v8503_v56 }
 0x610   :  { %v4666_v44 = vor.u32 %v4958_v14, %v4663_v34 }
 0x611   :  { %v4621_v62 = vmul.f32 -1.442695, %v3141_v33 }
 0x612   :  { %v3153_v35 = vpop.f32.mrf.mxu2 }
 0x613   :  { %5252 = vpow2.f32 %v4621_v62  ;;  %v3154_v43 = vadd.f32 %v3153_v35, %v8158_v24  ;;  %3805 = vmatpush.bf16.msrb.mxu1 %v4682_v21  ;;  %3863 = vmatpush.bf16.msra.mxu3 %v4690_v49 }
 0x614   :  { %v3129_v58 = vpop.f32.mrf.mxu0 }
 0x615   :  { %v3167_v9 = vadd.f32 %v7120_v27, %v3154_v43 }
 0x617   :  { %v4622_v12 = vmul.f32 -1.442695, %v3167_v9  ;;  %3806 = vmatpush.bf16.msrb.mxu1 %v4658_v57  ;;  %3864 = vmatpush.bf16.msra.mxu3 %v4666_v44 }
 0x619   :  { %v5253_v27 = vpop.eup %5252  ;;  %5254 = vpow2.f32 %v4622_v12 }
 0x61a   :  { %v3231_v60 = vadd.f32 1.0, %v5253_v27  ;;  %v3155_v23 = vpop.f32.mrf.mxu2  ;;  %v4996_v27 = vld [vmem:[%s7722_s8 + $0x164] sm:$0xf0] }
 0x61b   :  { %3807 = vmatpush.bf16.msrb.mxu1 %v4634_v45  ;;  %3865 = vmatpush.bf16.msra.mxu3 %v4642_v50  ;;  %v4805_v45 = vld [vmem:[%s7722_s8 + $0x158] sm:$0xf]  ;;  %v4997_v50 = vld [vmem:[%s7722_s8 + $0x16c] sm:$0xf0] }
 0x61c   :  { %5256 = vrcp.f32 %v3231_v60  ;;  %v3179_v63 = vpop.f32.mrf.mxu0  ;;  %v3245_v10 = vand.u32 2147483648, %v3231_v60  ;;  %vm3239_vm9 = vweird.f32 %v3231_v60  ;;  %v3243_v40 = vand.u32 2147483647, %v3231_v60  ;;  %v8507_v23 = vld [vmem:[#allocation127_spill] sm:$0xff] }
 0x61d   :  { %v3180_v29 = vadd.f32 %v3179_v63, %v6230_v15  ;;  %v7261_v63 = vpack.c.bf16 %v7054_v7, %v8507_v23  ;;  %v4806_v55 = vor.u32 %v4997_v50, %v4805_v45  ;;  %v4990_v7 = vld [vmem:[%s7722_s8 + $0x134] sm:$0xf0] }
 0x61e   :  { %3808 = vmatmul.bf16.vlgmr.msrb.gmra.mxu1 %v7230_v26  ;;  %3866 = vmatmul.bf16.vlgmr.msra.gmra.mxu3 %v7230_v26  ;;  %v3246_v39 = vor.u32 1.1754944e-38, %v3245_v10  ;;  %vm3244_vm13 = vcmp.eq.f32.partialorder %v3243_v40, 8.507059e+37  ;;  %v4709_v40 = vld [vmem:[%s7722_s8 + $0x98] sm:$0xf] }
 0x61f   :  { %v5255_v46 = vpop.eup %5254  ;;  %v3193_v52 = vadd.f32 %v7123_v5, %v3180_v29  ;;  %v7365_v50 = vld [vmem:[#allocation15] sm:$0x3f] }
 0x620   :  { %v3232_v25 = vadd.f32 1.0, %v5255_v46  ;;  %v4773_v46 = vld [vmem:[%s7722_s8 + $0x120] sm:$0xf] }
 0x621   :  { %v4623_v0 = vmul.f32 -1.442695, %v3193_v52 }
 0x622   :  { %v5257_v8 = vpop.eup %5256  ;;  %5258 = vrcp.f32 %v3232_v25  ;;  %v3205_v59 = vpop.f32.mrf.mxu2  ;;  %v3260_v53 = vand.u32 2147483648, %v3232_v25  ;;  %vm3254_vm12 = vweird.f32 %v3232_v25 }
 0x623   :  { %v3235_v30 = vmul.f32 %v5257_v8, %v3231_v60  ;;  %5260 = vpow2.f32 %v4623_v0  ;;  %v3206_v6 = vadd.f32 %v3205_v59, %v6247_v17  ;;  %vm3240_vm8 = vweird.f32 %v5257_v8  ;;  %v4991_v0 = vld [vmem:[%s7722_s8 + $0x13c] sm:$0xf0] }
 0x624   :  { %v3181_v36 = vpop.f32.mrf.mxu0  ;;  %vm3241_vm10 = vmor %vm3239_vm9, %vm3240_vm8  ;;  %v3261_v21 = vor.u32 1.1754944e-38, %v3260_v53  ;;  %v4973_v53 = vld [vmem:[%s7722_s8 + $0xac] sm:$0xf0] }
 0x625   :  { %v3236_v54 = vsub.f32 1.0, %v3235_v30  ;;  %v3219_v37 = vadd.f32 %v7125_v3, %v3206_v6  ;;  %v3258_v3 = vand.u32 2147483647, %v3232_v25  ;;  %v4749_v30 = vld [vmem:[%s7722_s8 + $0xf0] sm:$0xf] }
 0x626   :  { %v4984_v6 = vld [vmem:[%s7722_s8 + $0x104] sm:$0xf0]  ;;  %v4757_v36 = vld [vmem:[%s7722_s8 + $0xf8] sm:$0xf] }
 0x627   :  { %v3237_v19 = vmul.f32 %v5257_v8, %v3236_v54  ;;  %5262 = vtanh.f32 %v3219_v37  ;;  %vm3259_vm15 = vcmp.eq.f32.partialorder %v3258_v3, 8.507059e+37  ;;  %v4985_v54 = vld [vmem:[%s7722_s8 + $0x10c] sm:$0xf0]  ;;  %v4750_v37 = vor.u32 %v4984_v6, %v4749_v30  ;;  %v4677_v3 = vld [vmem:[%s7722_s8 + $0x60] sm:$0xf] }
 0x628   :  { %v5259_v11 = vpop.eup %5258 }
 0x629   :  { %v5261_v5 = vpop.eup %5260  ;;  %v3250_v20 = vmul.f32 %v5259_v11, %v3232_v25  ;;  %v3238_v1 = vadd.f32 %v5257_v8, %v3237_v19  ;;  %vm3255_vm11 = vweird.f32 %v5259_v11  ;;  %v4781_v25 = vld [vmem:[%s7722_s8 + $0x128] sm:$0xf]  ;;  %v4758_v19 = vor.u32 %v4985_v54, %v4757_v36 }
 0x62a   :  { %v3233_v42 = vadd.f32 1.0, %v5261_v5  ;;  %v3207_v41 = vpop.f32.mrf.mxu2  ;;  %vm3256_vm14 = vmor %vm3254_vm12, %vm3255_vm11  ;;  %v4782_v59 = vor.u32 %v4991_v0, %v4781_v25  ;;  %v4978_v5 = vld [vmem:[%s7722_s8 + $0xd4] sm:$0xf0] }
 0x62b   :  { %v3251_v31 = vsub.f32 1.0, %v3250_v20  ;;  %v3242_v61 = vsel %vm3241_vm10, %v5257_v8, %v3238_v1  ;;  %v4774_v8 = vor.u32 %v4990_v7, %v4773_v46  ;;  %v4733_v20 = vld [vmem:[%s7722_s8 + $0xc8] sm:$0xf]  ;;  %v4979_v1 = vld [vmem:[%s7722_s8 + $0xdc] sm:$0xf0]  ;;  %v7375_v46 = vperm.slane %v7365_v50, 3 }
 0x62c   :  { %5264 = vrcp.f32 %v3233_v42  ;;  %v3247_v49 = vsel %vm3244_vm13, %v3246_v39, %v3242_v61  ;;  %v3275_v57 = vand.u32 2147483648, %v3233_v42  ;;  %v3273_v48 = vand.u32 2147483647, %v3233_v42  ;;  %v4701_v41 = vld [vmem:[%s7722_s8 + $0x90] sm:$0xf] }
 0x62d   :  { %v3252_v4 = vmul.f32 %v5259_v11, %v3251_v31  ;;  %v5263_v62 = vpop.eup %5262  ;;  %vm3269_vm1 = vweird.f32 %v3233_v42  ;;  %v4734_v10 = vor.u32 %v4979_v1, %v4733_v20  ;;  %v4972_v31 = vld [vmem:[%s7722_s8 + $0xa4] sm:$0xf0]  ;;  %v4710_v61 = vor.u32 %v4973_v53, %v4709_v40  ;;  %v4967_v39 = vld [vmem:[%s7722_s8 + $0x7c] sm:$0xf0]  ;;  %v4995_v53 = vld [vmem:[%s7722_s8 + $0x164] sm:$0xf] }
 0x62e   :  { %3813 = vmatmul.bf16.gmra.mxu1 %v7239_v51  ;;  %3871 = vmatmul.bf16.gmra.mxu3 %v7239_v51  ;;  %v3281_v43 = vmul.f32 %v5263_v62, %v3247_v49  ;;  %v3276_v32 = vor.u32 1.1754944e-38, %v3275_v57  ;;  %vm3274_vm3 = vcmp.eq.f32.partialorder %v3273_v48, 8.507059e+37  ;;  %v4686_v62 = vor.u32 %v4967_v39, %v4685_v28  ;;  %v4960_v49 = vld [vmem:[%s7722_s8 + $0x44] sm:$0xf0]  ;;  %v4955_v57 = vld [vmem:[%s7722_s8 + $0x1c] sm:$0xf0] }
 0x62f   :  { %v3253_v33 = vadd.f32 %v5259_v11, %v3252_v4  ;;  %v4702_v4 = vor.u32 %v4972_v31, %v4701_v41  ;;  %v4813_v41 = vld [vmem:[%s7722_s8 + $0x160] sm:$0xf]  ;;  %v4998_v31 = vld [vmem:[%s7722_s8 + $0x174] sm:$0xf0]  ;;  %v4989_v28 = vld [vmem:[%s7722_s8 + $0x134] sm:$0xf] }
 0x630   :  { %v4814_v40 = vor.u32 %v4998_v31, %v4813_v41  ;;  %v4791_v39 = vld [vmem:[%s7722_s8 + $0x148] sm:$0xf0] }
 0x631   :  { %v3257_v18 = vsel %vm3256_vm14, %v5259_v11, %v3253_v33  ;;  %v4725_v11 = vld [vmem:[%s7722_s8 + $0xc0] sm:$0xf]  ;;  %v4678_v33 = vor.u32 %v4966_v47, %v4677_v3  ;;  %v4992_v47 = vld [vmem:[%s7722_s8 + $0x144] sm:$0xf0] }
 0x632   :  { %v5265_v35 = vpop.eup %5264  ;;  %v3262_v16 = vsel %vm3259_vm15, %v3261_v21, %v3257_v18  ;;  %v4653_v21 = vld [vmem:[%s7722_s8 + $0x30] sm:$0xf]  ;;  %v4661_v18 = vld [vmem:[%s7722_s8 + $0x38] sm:$0xf] }
 0x633   :  { %v3265_v14 = vmul.f32 %v5265_v35, %v3233_v42  ;;  %v3280_v34 = vmul.f32 %v3262_v16, %v7047_v22  ;;  %vm3270_vm0 = vweird.f32 %v5265_v35  ;;  %v4797_v22 = vld [vmem:[%s7722_s8 + $0x150] sm:$0xf]  ;;  %v4726_v42 = vor.u32 %v4978_v5, %v4725_v11 }
 0x634   :  { %vm3271_vm2 = vmor %vm3269_vm1, %vm3270_vm0  ;;  %v4798_v56 = vor.u32 %v4996_v27, %v4797_v22  ;;  %v4654_v16 = vor.u32 %v4960_v49, %v4653_v21 }
 0x635   :  { %v3266_v58 = vsub.f32 1.0, %v3265_v14  ;;  %v7244_v9 = vadd.f32 %v3281_v43, %v3280_v34  ;;  %v4629_v34 = vld [vmem:[%s7722_s8] sm:$0xf]  ;;  %v4954_v43 = vld [vmem:[%s7722_s8 + $0x14] sm:$0xf0] }
 0x637   :  { %v3267_v44 = vmul.f32 %v5265_v35, %v3266_v58  ;;  %5266 = vtanh.f32 %v7244_v9  ;;  %v4637_v58 = vld [vmem:[%s7722_s8 + $0x8] sm:$0xf] }
 0x638   :  { %v4638_v48 = vor.u32 %v4955_v57, %v4637_v58 }
 0x639   :  { %v3268_v2 = vadd.f32 %v5265_v35, %v3267_v44  ;;  %v4630_v44 = vor.u32 %v4954_v43, %v4629_v34 }
 0x63b   :  { %v3272_v38 = vsel %vm3271_vm2, %v5265_v35, %v3268_v2  ;;  %v4961_v35 = vld [vmem:[%s7722_s8 + $0x4c] sm:$0xf0] }
 0x63c   :  { %v3277_v12 = vsel %vm3274_vm3, %v3276_v32, %v3272_v38  ;;  %v4662_v14 = vor.u32 %v4961_v35, %v4661_v18  ;;  %v4794_v18 = vor.u32 %v4989_v28, %v4791_v39 }
 0x63d   :  { %v5267_v60 = vpop.eup %5266 }
 0x63e   :  { %v7263_v29 = vmul.f32 %v5267_v60, %v3277_v12  ;;  %3818 = vmatmul.bf16.gmra.mxu1 %v7261_v63  ;;  %3876 = vmatmul.bf16.gmra.mxu3 %v7261_v63  ;;  %v7368_v60 = vperm.slane %v7365_v50, 1 }
 0x640   :  { %v3287_v52 = vpack.c.bf16 %v7263_v29, %v7263_v29 }
 0x642   :  { %3297 = vmatmul.bf16.vlgmr.msrb.gmra.mxu0 %v3287_v52  ;;  %3323 = vmatmul.bf16.vlgmr.msra.gmra.mxu2 %v3287_v52 }
 0x643   :  { %3771 = vmatpush.bf16.msrb.mxu0 %v4798_v56  ;;  %3829 = vmatpush.bf16.msra.mxu2 %v4806_v55 }
 0x647   :  { %3772 = vmatpush.bf16.msrb.mxu0 %v4774_v8  ;;  %3830 = vmatpush.bf16.msra.mxu2 %v4782_v59 }
 0x64b   :  { %3773 = vmatpush.bf16.msrb.mxu0 %v4750_v37  ;;  %3831 = vmatpush.bf16.msra.mxu2 %v4758_v19 }
 0x64f   :  { %3774 = vmatpush.bf16.msrb.mxu0 %v4726_v42  ;;  %3832 = vmatpush.bf16.msra.mxu2 %v4734_v10 }
 0x652   :  { %3349 = vmatmul.bf16.vlgmr.msra.gmra.mxu0 %v3287_v52  ;;  %3375 = vmatmul.bf16.vlgmr.msrb.gmra.mxu2 %v3287_v52 }
 0x653   :  { %3775 = vmatpush.bf16.msrb.mxu0 %v4702_v4  ;;  %3833 = vmatpush.bf16.msra.mxu2 %v4710_v61  ;;  %v4815_v4 = vld [vmem:[%s7722_s8 + $0x178] sm:$0xf0] }
 0x654   :  { %v4818_v3 = vor.u32 %v4995_v53, %v4815_v4  ;;  %v4693_v53 = vld [vmem:[%s7722_s8 + $0x70] sm:$0xf]  ;;  %v4968_v4 = vld [vmem:[%s7722_s8 + $0x84] sm:$0xf0] }
 0x656   :  { %3916 = vmatpush.bf16.msra.mxu1 %v4818_v3  ;;  %v4695_v3 = vld [vmem:[%s7722_s8 + $0x88] sm:$0xf0] }
 0x657   :  { %3776 = vmatpush.bf16.msrb.mxu0 %v4678_v33  ;;  %3834 = vmatpush.bf16.msra.mxu2 %v4686_v62 }
 0x65a   :  { %3917 = vmatpush.bf16.msra.mxu1 %v4794_v18 }
 0x65b   :  { %3777 = vmatpush.bf16.msrb.mxu0 %v4654_v16  ;;  %3835 = vmatpush.bf16.msra.mxu2 %v4662_v14 }
 0x65f   :  { %3778 = vmatpush.bf16.msrb.mxu0 %v4630_v44  ;;  %3836 = vmatpush.bf16.msra.mxu2 %v4638_v48 }
 0x662   :  { %3779 = vmatmul.bf16.vlgmr.msrb.gmra.mxu0 %v7230_v26  ;;  %3837 = vmatmul.bf16.vlgmr.msra.gmra.mxu2 %v7230_v26 }
 0x663   :  { %3887 = vmatpush.bf16.msra.mxu0 %v4814_v40 }
 0x672   :  { %3784 = vmatmul.bf16.gmra.mxu0 %v7239_v51  ;;  %3842 = vmatmul.bf16.gmra.mxu2 %v7239_v51 }
 0x67b   :  { %v3311_v2 = vpop.f32.mrf.mxu1 }
 0x681   :  { %v7359_v32 = vpop.f32.mrf.mxu3 }
 0x682   :  { %3789 = vmatmul.bf16.gmra.mxu0 %v7261_v63  ;;  %3847 = vmatmul.bf16.gmra.mxu2 %v7261_v63 }
 0x683   :  { %v3313_v38 = vpop.f32.mrf.mxu1 }
 0x689   :  { %v3339_v22 = vpop.f32.mrf.mxu3 }
 0x68b   :  { %v7361_v12 = vpop.f32.mrf.mxu1 }
 0x691   :  { %v7363_v27 = vpop.f32.mrf.mxu3 }
 0x693   :  { %v3365_v45 = vpop.f32.mrf.mxu1 }
 0x699   :  { %v3391_v23 = vpop.f32.mrf.mxu3 }
 0x69a   :  { %v4983_v23 = vld [vmem:[%s7722_s8 + $0x104] sm:$0xf] }
 0x69b   :  { %v3809_v56 = vpop.f32.mrf.mxu1 }
 0x69c   :  { %v3810_v55 = vadd.f32 %v3809_v56, %v7368_v60 }
 0x69e   :  { %3946 = vst [vmem:[%s7724_s10 + $0x8] sm:$0xff] %v3810_v55 }
 0x6a1   :  { %v3867_v52 = vpop.f32.mrf.mxu3 }
 0x6a2   :  { %v3868_v7 = vadd.f32 %v3867_v52, %v7375_v46  ;;  %v4767_v52 = vld [vmem:[%s7722_s8 + $0x118] sm:$0xf0] }
 0x6a3   :  { %v3811_v25 = vpop.f32.mrf.mxu1 }
 0x6a4   :  { %3948 = vst [vmem:[%s7724_s10 + $0x18] sm:$0xff] %v3868_v7  ;;  %v3812_v0 = vadd.f32 %v3811_v25, %v7368_v60  ;;  %v4741_v7 = vld [vmem:[%s7722_s8 + $0xd0] sm:$0xf]  ;;  %v4980_v25 = vld [vmem:[%s7722_s8 + $0xe4] sm:$0xf0] }
 0x6a6   :  { %3952 = vst [vmem:[%s7724_s10 + $0x38] sm:$0xff] %v3812_v0  ;;  %v4770_v0 = vor.u32 %v4983_v23, %v4767_v52 }
 0x6a8   :  { %3918 = vmatpush.bf16.msra.mxu1 %v4770_v0  ;;  %v4645_v0 = vld [vmem:[%s7722_s8 + $0x10] sm:$0xf] }
 0x6a9   :  { %v3869_v8 = vpop.f32.mrf.mxu3 }
 0x6aa   :  { %v3870_v59 = vadd.f32 %v3869_v8, %v7375_v46  ;;  %v4977_v8 = vld [vmem:[%s7722_s8 + $0xd4] sm:$0xf] }
 0x6ab   :  { %v3814_v30 = vpop.f32.mrf.mxu1 }
 0x6ac   :  { %3954 = vst [vmem:[%s7724_s10 + $0x48] sm:$0xff] %v3870_v59  ;;  %v3815_v6 = vadd.f32 %v3814_v30, %v7368_v60 }
 0x6ae   :  { %3958 = vst [vmem:[%s7724_s10 + $0x68] sm:$0xff] %v3815_v6  ;;  %v4742_v6 = vor.u32 %v4980_v25, %v4741_v7 }
 0x6b1   :  { %v3872_v36 = vpop.f32.mrf.mxu3 }
 0x6b2   :  { %v3873_v54 = vadd.f32 %v3872_v36, %v7375_v46 }
 0x6b3   :  { %v3816_v37 = vpop.f32.mrf.mxu1 }
 0x6b4   :  { %3960 = vst [vmem:[%s7724_s10 + $0x78] sm:$0xff] %v3873_v54  ;;  %v3817_v19 = vadd.f32 %v3816_v37, %v7368_v60  ;;  %v4717_v37 = vld [vmem:[%s7722_s8 + $0xa0] sm:$0xf] }
 0x6b6   :  { %3964 = vst [vmem:[%s7724_s10 + $0x98] sm:$0xff] %v3817_v19  ;;  %v4974_v19 = vld [vmem:[%s7722_s8 + $0xb4] sm:$0xf0] }
 0x6b7   :  { %v4718_v41 = vor.u32 %v4974_v19, %v4717_v37 }
 0x6b9   :  { %v3874_v11 = vpop.f32.mrf.mxu3 }
 0x6ba   :  { %v3875_v5 = vadd.f32 %v3874_v11, %v7375_v46 }
 0x6bb   :  { %v3819_v20 = vpop.f32.mrf.mxu1 }
 0x6bc   :  { %3966 = vst [vmem:[%s7724_s10 + $0xa8] sm:$0xff] %v3875_v5  ;;  %v3820_v1 = vadd.f32 %v3819_v20, %v7368_v60  ;;  %v4971_v5 = vld [vmem:[%s7722_s8 + $0xa4] sm:$0xf] }
 0x6be   :  { %3970 = vst [vmem:[%s7724_s10 + $0xc8] sm:$0xff] %v3820_v1 }
 0x6bf   :  { %v3298_v42 = vpop.f32.mrf.mxu0 }
 0x6c0   :  { %v3299_v10 = vadd.f32 %v3298_v42, %v8235_v13  ;;  %v4789_v13 = vld [vmem:[%s7722_s8 + $0x130] sm:$0xf] }
 0x6c1   :  { %v3877_v33 = vpop.f32.mrf.mxu3  ;;  %v4790_v62 = vor.u32 %v4992_v47, %v4789_v13 }
 0x6c2   :  { %v3312_v61 = vadd.f32 %v3311_v2, %v3299_v10  ;;  %v3878_v21 = vadd.f32 %v3877_v33, %v7375_v46  ;;  %v4694_v33 = vor.u32 %v4968_v4, %v4693_v53 }
 0x6c3   :  { %v3821_v35 = vpop.f32.mrf.mxu1  ;;  %3888 = vmatpush.bf16.msra.mxu0 %v4790_v62 }
 0x6c4   :  { %v4624_v49 = vmul.f32 -1.442695, %v3312_v61  ;;  %3972 = vst [vmem:[%s7724_s10 + $0xd8] sm:$0xff] %v3878_v21  ;;  %v3822_v14 = vadd.f32 %v3821_v35, %v7368_v60  ;;  %v4669_v21 = vld [vmem:[%s7722_s8 + $0x40] sm:$0xf] }
 0x6c5   :  { %v3324_v16 = vpop.f32.mrf.mxu2 }
 0x6c6   :  { %5268 = vpow2.f32 %v4624_v49  ;;  %v3325_v34 = vadd.f32 %v3324_v16, %v8158_v24  ;;  %3976 = vst [vmem:[%s7724_s10 + $0xf8] sm:$0xff] %v3822_v14  ;;  %v4765_v24 = vld [vmem:[%s7722_s8 + $0x100] sm:$0xf]  ;;  %v4962_v49 = vld [vmem:[%s7722_s8 + $0x54] sm:$0xf0]  ;;  %v7518_v14 = vperm.slane %v7365_v50, 0 }
 0x6c7   :  { %v3300_v43 = vpop.f32.mrf.mxu0 }
 0x6c8   :  { %v3338_v58 = vadd.f32 %v7359_v32, %v3325_v34  ;;  %v4986_v32 = vld [vmem:[%s7722_s8 + $0x114] sm:$0xf0]  ;;  %v4959_v34 = vld [vmem:[%s7722_s8 + $0x44] sm:$0xf]  ;;  %v4671_v43 = vld [vmem:[%s7722_s8 + $0x58] sm:$0xf0] }
 0x6c9   :  { %v3879_v44 = vpop.f32.mrf.mxu3  ;;  %v4766_v55 = vor.u32 %v4986_v32, %v4765_v24  ;;  %v4670_v24 = vor.u32 %v4962_v49, %v4669_v21 }
 0x6ca   :  { %v4625_v57 = vmul.f32 -1.442695, %v3338_v58  ;;  %v3880_v2 = vadd.f32 %v3879_v44, %v7375_v46 }
 0x6cb   :  { %3889 = vmatpush.bf16.msra.mxu0 %v4766_v55 }
 0x6cc   :  { %v5269_v48 = vpop.eup %5268  ;;  %5270 = vpow2.f32 %v4625_v57  ;;  %3978 = vst [vmem:[%s7724_s10 + $0x108] sm:$0xff] %v3880_v2 }
 0x6cd   :  { %v7445_v38 = vadd.f32 1.0, %v5269_v48  ;;  %v3326_v22 = vpop.f32.mrf.mxu2 }
 0x6cf   :  { %5272 = vrcp.f32 %v7445_v38  ;;  %v3350_v45 = vpop.f32.mrf.mxu0  ;;  %3890 = vmatpush.bf16.msra.mxu0 %v4742_v6  ;;  %v3414_v47 = vand.u32 2147483647, %v7445_v38  ;;  %v3416_v28 = vand.u32 2147483648, %v7445_v38  ;;  %vm3410_vm5 = vweird.f32 %v7445_v38 }
 0x6d0   :  { %v3351_v56 = vadd.f32 %v3350_v45, %v6230_v15  ;;  %v4743_v15 = vld [vmem:[%s7722_s8 + $0xe8] sm:$0xf0] }
 0x6d1   :  { %v4746_v54 = vor.u32 %v4977_v8, %v4743_v15  ;;  %vm7533_vm7 = vcmp.eq.f32.partialorder %v3414_v47, 8.507059e+37  ;;  %v3417_v22 = vor.u32 1.1754944e-38, %v3416_v28  ;;  %v4956_v8 = vld [vmem:[%s7722_s8 + $0x24] sm:$0xf0]  ;;  %v4953_v15 = vld [vmem:[%s7722_s8 + $0x14] sm:$0xf] }
 0x6d2   :  { %v5271_v59 = vpop.eup %5270  ;;  %v3364_v30 = vadd.f32 %v7361_v12, %v3351_v56  ;;  %v4719_v12 = vld [vmem:[%s7722_s8 + $0xb8] sm:$0xf0]  ;;  %v4674_v56 = vor.u32 %v4959_v34, %v4671_v43  ;;  %v4646_v37 = vor.u32 %v4956_v8, %v4645_v0 }
 0x6d3   :  { %v7477_v36 = vadd.f32 1.0, %v5271_v59  ;;  %3919 = vmatpush.bf16.msra.mxu1 %v4746_v54  ;;  %v4722_v40 = vor.u32 %v4971_v5, %v4719_v12  ;;  %3891 = vmatpush.bf16.msra.mxu0 %v4718_v41  ;;  %v7562_v54 = vperm.slane %v7365_v50, 2 }
 0x6d4   :  { %v4626_v11 = vmul.f32 -1.442695, %v3364_v30  ;;  %v4647_v30 = vld [vmem:[%s7722_s8 + $0x28] sm:$0xf0] }
 0x6d5   :  { %v5273_v20 = vpop.eup %5272  ;;  %5274 = vrcp.f32 %v7477_v36  ;;  %v3376_v1 = vpop.f32.mrf.mxu2  ;;  %v3431_v32 = vand.u32 2147483648, %v7477_v36  ;;  %v3429_v45 = vand.u32 2147483647, %v7477_v36  ;;  %vm3425_vm9 = vweird.f32 %v7477_v36 }
 0x6d6   :  { %v3406_v42 = vmul.f32 %v5273_v20, %v7445_v38  ;;  %5276 = vpow2.f32 %v4626_v11  ;;  %v3377_v10 = vadd.f32 %v3376_v1, %v6247_v17  ;;  %v4965_v17 = vld [vmem:[%s7722_s8 + $0x74] sm:$0xf]  ;;  %vm3411_vm4 = vweird.f32 %v5273_v20  ;;  %s4005_s8 = sshll.u32 %s5523_s19, 4  ;;  %s4006_s8 = int_to_ptr.vmem [resolvable:$true] %s4005_s8 }
 0x6d7   :  { %v3352_v31 = vpop.f32.mrf.mxu0  ;;  %3920 = vmatpush.bf16.msra.mxu1 %v4722_v40  ;;  %vm7529_vm6 = vmor %vm3410_vm5, %vm3411_vm4  ;;  %3892 = vmatpush.bf16.msra.mxu0 %v4694_v33  ;;  %v3432_v19 = vor.u32 1.1754944e-38, %v3431_v32  ;;  %v4650_v11 = vor.u32 %v4953_v15, %v4647_v30  ;;  %vm3430_vm11 = vcmp.eq.f32.partialorder %v3429_v45, 8.507059e+37 }
 0x6d8   :  { %v3407_v13 = vsub.f32 1.0, %v3406_v42  ;;  %v3390_v61 = vadd.f32 %v7363_v27, %v3377_v10  ;;  %v4698_v27 = vor.u32 %v4965_v17, %v4695_v3 }
 0x6da   :  { %v3408_v39 = vmul.f32 %v5273_v20, %v3407_v13  ;;  %5278 = vtanh.f32 %v3390_v61 }
 0x6db   :  { %v5275_v62 = vpop.eup %5274  ;;  %3921 = vmatpush.bf16.msra.mxu1 %v4698_v27  ;;  %3893 = vmatpush.bf16.msra.mxu0 %v4670_v24 }
 0x6dc   :  { %v5277_v18 = vpop.eup %5276  ;;  %v3421_v35 = vmul.f32 %v5275_v62, %v7477_v36  ;;  %v3409_v16 = vadd.f32 %v5273_v20, %v3408_v39  ;;  %vm3426_vm8 = vweird.f32 %v5275_v62 }
 0x6dd   :  { %v7526_v58 = vadd.f32 1.0, %v5277_v18  ;;  %v3378_v48 = vpop.f32.mrf.mxu2  ;;  %vm3427_vm10 = vmor %vm3425_vm9, %vm3426_vm8 }
 0x6de   :  { %v3422_v2 = vsub.f32 1.0, %v3421_v35  ;;  %v3413_v38 = vsel %vm7529_vm6, %v5273_v20, %v3409_v16 }
 0x6df   :  { %5280 = vrcp.f32 %v7526_v58  ;;  %v3780_v23 = vpop.f32.mrf.mxu0  ;;  %v3418_v7 = vsel %vm7533_vm7, %v3417_v22, %v3413_v38  ;;  %3922 = vmatpush.bf16.msra.mxu1 %v4674_v56  ;;  %3894 = vmatpush.bf16.msra.mxu0 %v4646_v37  ;;  %v3446_v4 = vand.u32 2147483648, %v7526_v58  ;;  %v3444_v61 = vand.u32 2147483647, %v7526_v58 }
 0x6e0   :  { %v5279_v55 = vpop.eup %5278  ;;  %v3423_v52 = vmul.f32 %v5275_v62, %v3422_v2  ;;  %v3781_v25 = vadd.f32 %v3780_v23, %v7518_v14  ;;  %vm3440_vm13 = vweird.f32 %v7526_v58 }
 0x6e1   :  { %v3452_v59 = vmul.f32 %v5279_v55, %v3418_v7  ;;  %v3447_v17 = vor.u32 1.1754944e-38, %v3446_v4  ;;  %vm3445_vm15 = vcmp.eq.f32.partialorder %v3444_v61, 8.507059e+37 }
 0x6e2   :  { %v3424_v6 = vadd.f32 %v5275_v62, %v3423_v52  ;;  %3945 = vst [vmem:[%s7724_s10] sm:$0xff] %v3781_v25 }
 0x6e3   :  { %3923 = vmatpush.bf16.msra.mxu1 %v4650_v11 }
 0x6e4   :  { %v3428_v5 = vsel %vm3427_vm10, %v5275_v62, %v3424_v6 }
 0x6e5   :  { %v5281_v12 = vpop.eup %5280  ;;  %v3433_v20 = vsel %vm3430_vm11, %v3432_v19, %v3428_v5  ;;  %v3838_v1 = vpop.f32.mrf.mxu2 }
 0x6e6   :  { %v3436_v36 = vmul.f32 %v5281_v12, %v7526_v58  ;;  %v3451_v42 = vmul.f32 %v3433_v20, %v7244_v9  ;;  %v3839_v10 = vadd.f32 %v3838_v1, %v7562_v54  ;;  %vm3441_vm12 = vweird.f32 %v5281_v12 }
 0x6e7   :  { %v3782_v41 = vpop.f32.mrf.mxu0  ;;  %vm3442_vm14 = vmor %vm3440_vm13, %vm3441_vm12 }
 0x6e8   :  { %v3437_v31 = vsub.f32 1.0, %v3436_v36  ;;  %v3453_v40 = vadd.f32 %v3452_v59, %v3451_v42  ;;  %3947 = vst [vmem:[%s7724_s10 + $0x10] sm:$0xff] %v3839_v10  ;;  %v3783_v53 = vadd.f32 %v3782_v41, %v7518_v14 }
 0x6ea   :  { %v3438_v13 = vmul.f32 %v5281_v12, %v3437_v31  ;;  %5282 = vtanh.f32 %v3453_v40  ;;  %3998 = vst [vmem:[#allocation17 + $0x8] sm:$0xff] %v3453_v40 }
 0x6eb   :  { %3951 = vst [vmem:[%s7724_s10 + $0x30] sm:$0xff] %v3783_v53 }
 0x6ec   :  { %v3439_v9 = vadd.f32 %v5281_v12, %v3438_v13  ;;  %4026 = dma.vmem_to_hbm [thread:$0]  %s4019_s21, 256, %s4021_s7, [#allocation18], %s5518_s23, %s5518_s23, %s5519_s24  }
 0x6ed   :  { %v3840_v3 = vpop.f32.mrf.mxu2 }
 0x6ee   :  { %v3443_v47 = vsel %vm3442_vm14, %v5281_v12, %v3439_v9  ;;  %v3841_v28 = vadd.f32 %v3840_v3, %v7562_v54 }
 0x6ef   :  { %v3785_v39 = vpop.f32.mrf.mxu0  ;;  %v3448_v33 = vsel %vm3445_vm15, %v3447_v17, %v3443_v47 }
 0x6f0   :  { %v5283_v62 = vpop.eup %5282  ;;  %3953 = vst [vmem:[%s7724_s10 + $0x40] sm:$0xff] %v3841_v28  ;;  %v3786_v27 = vadd.f32 %v3785_v39, %v7518_v14 }
 0x6f1   :  { %v3455_v21 = vmul.f32 %v5283_v62, %v3448_v33 }
 0x6f2   :  { %3957 = vst [vmem:[%s7724_s10 + $0x60] sm:$0xff] %v3786_v27 }
 0x6f3   :  { %v3468_v49 = vpack.c.bf16 %v3455_v21, %v7263_v29  ;;  %3995 = vst [vmem:[#allocation16 + $0x8] sm:$0xff] %v3455_v21 }
 0x6f4   :  { %4013 = dma.vmem_to_hbm [thread:$0]  %s4006_s8, 256, %s4008_s30, [#allocation6], %s5518_s23, %s5518_s23, %s5519_s24  }
 0x6f5   :  { %3794 = vmatmul.bf16.gmra.mxu0 %v3468_v49  ;;  %3823 = vmatmul.bf16.gmra.mxu1 %v3468_v49  ;;  %v3843_v18 = vpop.f32.mrf.mxu2 }
 0x6f6   :  { %v3844_v35 = vadd.f32 %v3843_v18, %v7562_v54  ;;  %3852 = vmatmul.bf16.gmra.mxu2 %v3468_v49  ;;  %3881 = vmatmul.bf16.gmra.mxu3 %v3468_v49 }
 0x6f7   :  { %v3787_v16 = vpop.f32.mrf.mxu0 }
 0x6f8   :  { %3959 = vst [vmem:[%s7724_s10 + $0x70] sm:$0xff] %v3844_v35  ;;  %v3788_v34 = vadd.f32 %v3787_v16, %v7518_v14 }
 0x6fa   :  { %3963 = vst [vmem:[%s7724_s10 + $0x90] sm:$0xff] %v3788_v34 }
 0x6fd   :  { %v3845_v29 = vpop.f32.mrf.mxu2 }
 0x6fe   :  { %v3846_v43 = vadd.f32 %v3845_v29, %v7562_v54 }
 0x6ff   :  { %v3790_v58 = vpop.f32.mrf.mxu0 }
 0x700   :  { %3965 = vst [vmem:[%s7724_s10 + $0xa0] sm:$0xff] %v3846_v43  ;;  %v3791_v57 = vadd.f32 %v3790_v58, %v7518_v14 }
 0x702   :  { %3969 = vst [vmem:[%s7724_s10 + $0xc0] sm:$0xff] %v3791_v57 }
 0x705   :  { %v3848_v44 = vpop.f32.mrf.mxu2  ;;  %3895 = vmatmul.bf16.vlgmr.msra.gmra.mxu0 %v7230_v26  ;;  %3924 = vmatmul.bf16.vlgmr.msra.gmra.mxu1 %v7230_v26 }
 0x706   :  { %v3849_v48 = vadd.f32 %v3848_v44, %v7562_v54 }
 0x707   :  { %v3792_v2 = vpop.f32.mrf.mxu0 }
 0x708   :  { %3971 = vst [vmem:[%s7724_s10 + $0xd0] sm:$0xff] %v3849_v48  ;;  %v3793_v38 = vadd.f32 %v3792_v2, %v7518_v14 }
 0x70a   :  { %3975 = vst [vmem:[%s7724_s10 + $0xf0] sm:$0xff] %v3793_v38 }
 0x70d   :  { %v3850_v22 = vpop.f32.mrf.mxu2 }
 0x70e   :  { %v3851_v24 = vadd.f32 %v3850_v22, %v7562_v54 }
 0x710   :  { %3977 = vst [vmem:[%s7724_s10 + $0x100] sm:$0xff] %v3851_v24 }
 0x715   :  { %3900 = vmatmul.bf16.gmra.mxu0 %v7239_v51  ;;  %3929 = vmatmul.bf16.gmra.mxu1 %v7239_v51 }
 0x725   :  { %3905 = vmatmul.bf16.gmra.mxu0 %v7261_v63  ;;  %3934 = vmatmul.bf16.gmra.mxu1 %v7261_v63 }
 0x735   :  { %3910 = vmatmul.bf16.gmra.mxu0 %v3468_v49  ;;  %3939 = vmatmul.bf16.gmra.mxu1 %v3468_v49 }
 0x772   :  { %v3795_v26 = vpop.f32.mrf.mxu0  ;;  %v3824_v51 = vpop.f32.mrf.mxu1 }
 0x773   :  { %v3796_v63 = vadd.f32 %v3795_v26, %v7518_v14  ;;  %v3825_v32 = vadd.f32 %v3824_v51, %v7368_v60 }
 0x775   :  { %3981 = vst [vmem:[%s7724_s10 + $0x120] sm:$0xff] %v3796_v63 }
 0x776   :  { %3982 = vst [vmem:[%s7724_s10 + $0x128] sm:$0xff] %v3825_v32 }
 0x779   :  { %v3853_v45 = vpop.f32.mrf.mxu2  ;;  %v3882_v23 = vpop.f32.mrf.mxu3 }
 0x77a   :  { %v3854_v56 = vadd.f32 %v3853_v45, %v7562_v54  ;;  %v3883_v55 = vadd.f32 %v3882_v23, %v7375_v46  ;;  %v3797_v52 = vpop.f32.mrf.mxu0  ;;  %v3826_v7 = vpop.f32.mrf.mxu1 }
 0x77b   :  { %v3798_v25 = vadd.f32 %v3797_v52, %v7518_v14  ;;  %v3827_v0 = vadd.f32 %v3826_v7, %v7368_v60  ;;  %v3523_v14 = vperm.slane %v7365_v50, 4  ;;  %v3524_v60 = vperm.slane %v7365_v50, 5 }
 0x77c   :  { %3983 = vst [vmem:[%s7724_s10 + $0x130] sm:$0xff] %v3854_v56 }
 0x77d   :  { %3984 = vst [vmem:[%s7724_s10 + $0x138] sm:$0xff] %v3883_v55 }
 0x77e   :  { %3987 = vst [vmem:[%s7724_s10 + $0x150] sm:$0xff] %v3798_v25 }
 0x77f   :  { %3988 = vst [vmem:[%s7724_s10 + $0x158] sm:$0xff] %v3827_v0 }
 0x781   :  { %v3855_v8 = vpop.f32.mrf.mxu2  ;;  %v3884_v15 = vpop.f32.mrf.mxu3 }
 0x782   :  { %v3856_v59 = vadd.f32 %v3855_v8, %v7562_v54  ;;  %v3885_v30 = vadd.f32 %v3884_v15, %v7375_v46  ;;  %v3896_v6 = vpop.f32.mrf.mxu0  ;;  %v3925_v37 = vpop.f32.mrf.mxu1 }
 0x783   :  { %v3897_v19 = vadd.f32 %v3896_v6, %v3523_v14  ;;  %v3926_v11 = vadd.f32 %v3925_v37, %v3524_v60 }
 0x784   :  { %3989 = vst [vmem:[%s7724_s10 + $0x160] sm:$0xff] %v3856_v59 }
 0x785   :  { %3990 = vst [vmem:[%s7724_s10 + $0x168] sm:$0xff] %v3885_v30 }
 0x786   :  { %3949 = vst [vmem:[%s7724_s10 + $0x20] sm:$0xff] %v3897_v19 }
 0x787   :  { %3950 = vst [vmem:[%s7724_s10 + $0x28] sm:$0xff] %v3926_v11 }
 0x78a   :  { %v3898_v50 = vpop.f32.mrf.mxu0  ;;  %v3927_v46 = vpop.f32.mrf.mxu1 }
 0x78b   :  { %v3899_v54 = vadd.f32 %v3898_v50, %v3523_v14  ;;  %v3928_v5 = vadd.f32 %v3927_v46, %v3524_v60 }
 0x78d   :  { %3955 = vst [vmem:[%s7724_s10 + $0x50] sm:$0xff] %v3899_v54 }
 0x78e   :  { %3956 = vst [vmem:[%s7724_s10 + $0x58] sm:$0xff] %v3928_v5 }
 0x792   :  { %v3901_v12 = vpop.f32.mrf.mxu0  ;;  %v3930_v20 = vpop.f32.mrf.mxu1 }
 0x793   :  { %v3902_v1 = vadd.f32 %v3901_v12, %v3523_v14  ;;  %v3931_v36 = vadd.f32 %v3930_v20, %v3524_v60 }
 0x795   :  { %3961 = vst [vmem:[%s7724_s10 + $0x80] sm:$0xff] %v3902_v1 }
 0x796   :  { %3962 = vst [vmem:[%s7724_s10 + $0x88] sm:$0xff] %v3931_v36 }
 0x79a   :  { %v3903_v42 = vpop.f32.mrf.mxu0  ;;  %v3932_v10 = vpop.f32.mrf.mxu1 }
 0x79b   :  { %v3904_v41 = vadd.f32 %v3903_v42, %v3523_v14  ;;  %v3933_v31 = vadd.f32 %v3932_v10, %v3524_v60 }
 0x79d   :  { %3967 = vst [vmem:[%s7724_s10 + $0xb0] sm:$0xff] %v3904_v41 }
 0x79e   :  { %3968 = vst [vmem:[%s7724_s10 + $0xb8] sm:$0xff] %v3933_v31 }
 0x7a2   :  { %v3906_v40 = vpop.f32.mrf.mxu0  ;;  %v3935_v53 = vpop.f32.mrf.mxu1 }
 0x7a3   :  { %v3907_v4 = vadd.f32 %v3906_v40, %v3523_v14  ;;  %v3936_v13 = vadd.f32 %v3935_v53, %v3524_v60 }
 0x7a5   :  { %3973 = vst [vmem:[%s7724_s10 + $0xe0] sm:$0xff] %v3907_v4 }
 0x7a6   :  { %3974 = vst [vmem:[%s7724_s10 + $0xe8] sm:$0xff] %v3936_v13 }
 0x7aa   :  { %v3908_v61 = vpop.f32.mrf.mxu0  ;;  %v3937_v9 = vpop.f32.mrf.mxu1 }
 0x7ab   :  { %v3909_v17 = vadd.f32 %v3908_v61, %v3523_v14  ;;  %v3938_v3 = vadd.f32 %v3937_v9, %v3524_v60 }
 0x7ad   :  { %3979 = vst [vmem:[%s7724_s10 + $0x110] sm:$0xff] %v3909_v17 }
 0x7ae   :  { %3980 = vst [vmem:[%s7724_s10 + $0x118] sm:$0xff] %v3938_v3 }
 0x7b2   :  { %v3911_v47 = vpop.f32.mrf.mxu0  ;;  %v3940_v28 = vpop.f32.mrf.mxu1 }
 0x7b3   :  { %v3912_v39 = vadd.f32 %v3911_v47, %v3523_v14  ;;  %v3941_v33 = vadd.f32 %v3940_v28, %v3524_v60 }
 0x7b5   :  { %3985 = vst [vmem:[%s7724_s10 + $0x140] sm:$0xff] %v3912_v39 }
 0x7b6   :  { %3986 = vst [vmem:[%s7724_s10 + $0x148] sm:$0xff] %v3941_v33 }
 0x7ba   :  { %v3913_v62 = vpop.f32.mrf.mxu0  ;;  %v3942_v27 = vpop.f32.mrf.mxu1 }
 0x7bb   :  { %v3914_v21 = vadd.f32 %v3913_v62, %v3523_v14  ;;  %v3943_v49 = vadd.f32 %v3942_v27, %v3524_v60 }
 0x7bd   :  { %3991 = vst [vmem:[%s7724_s10 + $0x170] sm:$0xff] %v3914_v21 }
 0x7be   :  { %3992 = vst [vmem:[%s7724_s10 + $0x178] sm:$0xff] %v3943_v49 }
 0x7bf   :  { %5508 = dma.done.wait [#allocation6], 256  }
 0x7c0   :  { %5509 = vsyncadd [#allocation6], 4294967040 }
 0x7c1   :  { %5510 = dma.done.wait [#allocation18], 256  }
 0x7c2   :  { %5511 = vsyncadd [#allocation18], 4294967040 }
 0x7c3   :  { %4037 = vsyncpa [#allocation5], 1 }
 0x7c4   :  { %4038 = vsyncpa [#allocation8], 1 }
 0x7c5   :  { %4039 = vsyncpa [#allocation11], 1 }
 0x7c6   :  { %4040 = vsyncpa [#allocation14], 1 }
 0x7c7   :  { %4041 = vsyncpa [#allocation6], 1 }
 0x7c8   :  { %4042 = vsyncpa [#allocation18], 1 }

</bundles_post_ra>
